<compile_context>
chip_gen: v7x
topology: tpu7x:2x2x1
jax: 0.10.0
libtpu: 0.0.40
codegen_flags: <defaults>
</compile_context>

<pallas_src>
import functools

import jax
import jax.numpy as jnp
from jax.experimental import pallas as pl
from jax.experimental.pallas import tpu as pltpu

HIDDEN = 1000        # nn.Linear(num_channels, 1000)
NUM_CLASSES = 10     # nn.Linear(1000, 10)


def _round_up(x, m):
    return ((x + m - 1) // m) * m


def _cdiv(a, b):
    return (a + b - 1) // b


def _vmem_tile_bytes(shape, itemsize):
    """Rough VMEM footprint of one buffer of `shape` ((8,128)-padded on the last two dims)."""
    shape = tuple(shape)
    if len(shape) == 1:
        shape = (1,) + shape
    lead = 1
    for d in shape[:-2]:
        lead *= int(d)
    return lead * _round_up(int(shape[-2]), 8) * _round_up(int(shape[-1]), 128) * itemsize


def _backbone_head_kernel(x_ref, w1_ref, b1_ref, w2_ref, b2_ref, out_ref, *, pooling):
    """Per batch tile: global spatial pool + Linear(C,Hp) + ReLU + Linear(Hp,10) + sigmoid.

    x_ref  : (TB, C, HW)  f32/bf16 -- layer4 features, native NCHW with HW flattened (lanes)
    w1_ref : (C, Hp)      bfloat16 -- hidden dim zero-padded 1000 -> Hp (multiple of 128)
    b1_ref : (1, Hp)      float32  -- zero-padded
    w2_ref : (Hp, 10)     float32  -- padded rows are zero
    b2_ref : (1, 10)      float32
    out_ref: (TB, 10)     float32
    """
    x = x_ref[...]
    if pooling == "avg":
        # AdaptiveAvgPool2d((1,1)) + flatten(1): cross-lane (XLU) reduce over the full HW
        # axis with f32 accumulation.  (If a bundle dump ever shows the XLU binding, this
        # can be reformulated as an MXU ones-vector contraction.)
        pooled = jnp.mean(x, axis=-1, dtype=jnp.float32)            # (TB, C)
    else:  # "max"
        pooled = jnp.max(x, axis=-1)                                # (TB, C)

    # weak_label: Linear -> ReLU -> Linear.  First matmul is bf16 x bf16 on the MXU with
    # f32 accumulation (no per-step f32 copy of w1 in VMEM).
    h = jnp.dot(pooled.astype(jnp.bfloat16), w1_ref[...],
                preferred_element_type=jnp.float32) + b1_ref[...]
    h = jnp.maximum(h, 0.0)
    logits = jnp.dot(h, w2_ref[...], preferred_element_type=jnp.float32) + b2_ref[...]

    # sigmoid: exp + reciprocal both land on the otherwise-idle EUP slot.
    out_ref[...] = pl.reciprocal(1.0 + jnp.exp(-logits), approx=True)


def backbone_base_forward(x_feat, params, *, pooling="avg", tb=None, vmem_limit_bytes=None):
    """x_feat: (B, C, H, W) NCHW layer4 feature map (f32 or bf16). Returns (B, 10) f32 sigmoids.

    params = (w1 (C,1000), b1 (1,1000), w2 (1000,10), b2 (1,10)) in float32.
    """
    if pooling not in ("avg", "max"):
        raise ValueError(f"unsupported pooling: {pooling!r}")

    B, C, H, W = x_feat.shape
    HW = H * W
    if x_feat.dtype not in (jnp.dtype("float32"), jnp.dtype("bfloat16")):
        x_feat = x_feat.astype(jnp.float32)
    # Native NCHW ingestion: (B, C, H, W) -> (B, C, HW) is a free reshape (no HBM pass).
    x = x_feat.reshape(B, C, HW)
    x_itemsize = x.dtype.itemsize

    w1, b1, w2, b2 = params
    w1 = jnp.asarray(w1, jnp.float32).reshape(C, HIDDEN)
    b1 = jnp.asarray(b1, jnp.float32).reshape(1, HIDDEN)
    w2 = jnp.asarray(w2, jnp.float32).reshape(HIDDEN, NUM_CLASSES)
    b2 = jnp.asarray(b2, jnp.float32).reshape(1, NUM_CLASSES)

    # Pad hidden dim 1000 -> 1024 (lane-dense); zero padding preserves numerics exactly.
    hp = _round_up(HIDDEN, 128)
    w1p = jnp.pad(w1, ((0, 0), (0, hp - HIDDEN))).astype(jnp.bfloat16)
    b1p = jnp.pad(b1, ((0, 0), (0, hp - HIDDEN)))
    w2p = jnp.pad(w2, ((0, hp - HIDDEN), (0, 0)))

    # ---- generation-aware VMEM budgeting (v5e/v6e: 128 MiB physical, v7x: 64 MiB/TC) ----
    phys_vmem = 64 << 20                       # conservative fallback = v7x per-TC physical
    try:
        phys_vmem = int(pltpu.get_tpu_info().vmem_capacity_bytes)
    except Exception:
        pass
    if vmem_limit_bytes is None:
        vmem_limit_bytes = int(0.92 * phys_vmem)
    vmem_limit_bytes = int(vmem_limit_bytes)

    # Worst case the weights are double-buffered (if the Buffered(1) request is rejected).
    weight_vmem = 2 * (_vmem_tile_bytes((C, hp), 2) + _vmem_tile_bytes((1, hp), 4)
                       + _vmem_tile_bytes((hp, NUM_CLASSES), 4)
                       + _vmem_tile_bytes((1, NUM_CLASSES), 4))
    # Per batch-row VMEM: double-buffered x tile (HW lane-padded to 128) + temps + out rows.
    per_row = (2 * _round_up(C, 8) * _round_up(HW, 128) * x_itemsize
               + 6 * _round_up(C, 128) + 8 * hp + 2 * 128 * 4)

    user_tb = tb is not None
    if user_tb:
        tb = max(8, _round_up(int(tb), 8))
    else:
        budget = int(0.80 * vmem_limit_bytes) - weight_vmem - (2 << 20)
        tb = max(8, (max(budget, 0) // per_row) // 8 * 8)
    tb = min(tb, _round_up(B, 8))
    if not user_tb:
        # Prefer >= 2 (ideally an even number of) batch steps so the "parallel" axis can
        # split across v7x's two TensorCores without a straggler step.
        if B > 8:
            tb = min(tb, _round_up(_cdiv(B, 2), 8))
        nb = _cdiv(B, tb)
        if nb > 2 and nb % 2 == 1:
            tb_alt = max(8, _round_up(_cdiv(B, nb + 1), 8))
            if _cdiv(B, tb_alt) % 2 == 0:
                tb = tb_alt
    nb = _cdiv(B, tb)

    flops = B * HW * C + 2 * B * C * hp + 2 * B * hp * NUM_CLASSES
    bytes_accessed = (B * C * HW * x_itemsize + w1p.size * 2 + b1p.size * 4
                      + w2p.size * 4 + b2.size * 4 + B * NUM_CLASSES * 4)
    cost = pl.CostEstimate(flops=flops, transcendentals=B * NUM_CLASSES,
                           bytes_accessed=bytes_accessed)

    def _const_spec(shape, single_buffered):
        index_map = lambda i: (0,) * len(shape)
        if single_buffered:
            # Constant block index: keep one resident VMEM copy instead of double-buffering.
            return pl.BlockSpec(shape, index_map, pipeline_mode=pl.Buffered(1))
        return pl.BlockSpec(shape, index_map)

    def _call(single_buffered_weights):
        grid_spec = pltpu.PrefetchScalarGridSpec(
            num_scalar_prefetch=0,
            grid=(nb,),
            in_specs=[
                pl.BlockSpec((tb, C, HW), lambda i: (i, 0, 0)),     # streamed, double-buffered
                _const_spec((C, hp), single_buffered_weights),      # resident weights
                _const_spec((1, hp), single_buffered_weights),
                _const_spec((hp, NUM_CLASSES), single_buffered_weights),
                _const_spec((1, NUM_CLASSES), single_buffered_weights),
            ],
            out_specs=pl.BlockSpec((tb, NUM_CLASSES), lambda i: (i, 0)),
        )
        return pl.pallas_call(
            functools.partial(_backbone_head_kernel, pooling=pooling),
            out_shape=jax.ShapeDtypeStruct((B, NUM_CLASSES), jnp.float32),
            grid_spec=grid_spec,
            compiler_params=pltpu.CompilerParams(
                dimension_semantics=("parallel",),
                vmem_limit_bytes=vmem_limit_bytes),
            cost_estimate=cost,
        )(x, w1p, b1p, w2p, b2)

    try:
        return _call(True)
    except Exception:
        # Fallback if this jax build rejects pipeline_mode=pl.Buffered(1) on pallas_call.
        return _call(False)


def init_params(num_channels, key):
    """Deterministic init matching nn.Linear shapes: (C->1000), (1000->10)."""
    k1, k2, k3, k4 = jax.random.split(key, 4)
    lim1 = 1.0 / jnp.sqrt(float(num_channels))
    lim2 = 1.0 / jnp.sqrt(float(HIDDEN))
    w1 = jax.random.uniform(k1, (num_channels, HIDDEN), jnp.float32, -lim1, lim1)
    b1 = jax.random.uniform(k2, (1, HIDDEN), jnp.float32, -lim1, lim1)
    w2 = jax.random.uniform(k3, (HIDDEN, NUM_CLASSES), jnp.float32, -lim2, lim2)
    b2 = jax.random.uniform(k4, (1, NUM_CLASSES), jnp.float32, -lim2, lim2)
    return w1, b1, w2, b2


def reference_forward(x_feat, params, pooling="avg"):
    """Pure-JAX reference mirroring the kernel's mixed precision (bf16 first matmul)."""
    w1, b1, w2, b2 = params
    xf = x_feat.astype(jnp.float32)
    if pooling == "avg":
        pooled = jnp.mean(xf, axis=(2, 3))
    else:
        pooled = jnp.max(xf, axis=(2, 3))
    pooled = pooled.astype(jnp.bfloat16).astype(jnp.float32)
    w1b = w1.astype(jnp.bfloat16).astype(jnp.float32)
    h = jnp.maximum(pooled @ w1b + b1, 0.0)
    return jax.nn.sigmoid(h @ w2 + b2)


if __name__ == "__main__":
    key = jax.random.PRNGKey(0)
    kx, kp = jax.random.split(key)

    # Small stand-in for layer4 features (production: C=2048, H=W=7, larger B).
    # B=12 deliberately exercises the partial last batch tile (no jnp.pad of x).
    B, C, H, W = 12, 256, 7, 7
    x = jax.random.normal(kx, (B, C, H, W), jnp.float32)
    params = init_params(C, kp)

    for pooling in ("avg", "max"):
        out = jax.block_until_ready(backbone_base_forward(x, params, pooling=pooling))
        ref = reference_forward(x, params, pooling=pooling)
        assert out.shape == (B, NUM_CLASSES)
        max_err = float(jnp.max(jnp.abs(out - ref)))
        assert max_err < 1e-2, f"{pooling}: max abs err {max_err} vs reference"

    print("KERNEL_OK")
</pallas_src>

<mosaic_0001>
module attributes {stable_mosaic.version = 11 : i64} {
  func.func @_backbone_head_kernel(%arg0: i32, %arg1: memref<8x256x49xf32, #tpu.memory_space<vmem>>, %arg2: memref<256x1024xbf16, #tpu.memory_space<vmem>>, %arg3: memref<1x1024xf32, #tpu.memory_space<vmem>>, %arg4: memref<1024x10xf32, #tpu.memory_space<vmem>>, %arg5: memref<1x10xf32, #tpu.memory_space<vmem>>, %arg6: memref<8x10xf32, #tpu.memory_space<vmem>>) attributes {dimension_semantics = [#tpu.dimension_semantics<parallel>], iteration_bounds = array<i64: 2>, scalar_prefetch = 0 : i64, scratch_operands = 0 : i64, tpu.core_type = #tpu.core_type<tc>, window_params = [{transform_indices = @transform_0, window_bounds = array<i64: 8, 256, 49>}, {pipeline_mode = #tpu.pipeline_mode<synchronous>, transform_indices = @transform_1, window_bounds = array<i64: 256, 1024>}, {pipeline_mode = #tpu.pipeline_mode<synchronous>, transform_indices = @transform_2, window_bounds = array<i64: 1, 1024>}, {pipeline_mode = #tpu.pipeline_mode<synchronous>, transform_indices = @transform_3, window_bounds = array<i64: 1024, 10>}, {pipeline_mode = #tpu.pipeline_mode<synchronous>, transform_indices = @transform_4, window_bounds = array<i64: 1, 10>}, {transform_indices = @transform_5, window_bounds = array<i64: 8, 10>}]} {
    %c0 = arith.constant 0 : index
    %c0_0 = arith.constant 0 : index
    %c0_1 = arith.constant 0 : index
    %0 = vector.load %arg1[%c0, %c0_0, %c0_1] : memref<8x256x49xf32, #tpu.memory_space<vmem>>, vector<8x256x49xf32>
    %cst = arith.constant dense<0.000000e+00> : vector<8x256xf32>
    %1 = vector.multi_reduction <add>, %0, %cst [2] : vector<8x256x49xf32> to vector<8x256xf32>
    %cst_2 = arith.constant 4.900000e+01 : f32
    %2 = vector.broadcast %cst_2 : f32 to vector<8x256xf32>
    %3 = arith.divf %1, %2 : vector<8x256xf32>
    %4 = arith.truncf %3 : vector<8x256xf32> to vector<8x256xbf16>
    %c0_3 = arith.constant 0 : index
    %c0_4 = arith.constant 0 : index
    %5 = vector.load %arg2[%c0_3, %c0_4] : memref<256x1024xbf16, #tpu.memory_space<vmem>>, vector<256x1024xbf16>
    %cst_5 = arith.constant dense<0.000000e+00> : vector<8x1024xf32>
    %6 = tpu.matmul %4, %5, %cst_5 {dimension_numbers = #tpu.dot_dimension_numbers<[1], [0], [0], [1], [0, 0, 1, 1], [], []>} : vector<8x256xbf16>, vector<256x1024xbf16>, vector<8x1024xf32> -> vector<8x1024xf32>
    %c0_6 = arith.constant 0 : index
    %c0_7 = arith.constant 0 : index
    %7 = vector.load %arg3[%c0_6, %c0_7] : memref<1x1024xf32, #tpu.memory_space<vmem>>, vector<1x1024xf32>
    %8 = vector.broadcast %7 : vector<1x1024xf32> to vector<8x1024xf32>
    %9 = arith.addf %6, %8 : vector<8x1024xf32>
    %cst_8 = arith.constant 0.000000e+00 : f32
    %10 = vector.broadcast %cst_8 : f32 to vector<8x1024xf32>
    %11 = arith.maximumf %9, %10 : vector<8x1024xf32>
    %c0_9 = arith.constant 0 : index
    %c0_10 = arith.constant 0 : index
    %12 = vector.load %arg4[%c0_9, %c0_10] : memref<1024x10xf32, #tpu.memory_space<vmem>>, vector<1024x10xf32>
    %cst_11 = arith.constant dense<0.000000e+00> : vector<8x10xf32>
    %13 = tpu.matmul %11, %12, %cst_11 {dimension_numbers = #tpu.dot_dimension_numbers<[1], [0], [0], [1], [0, 0, 1, 1], [], []>} : vector<8x1024xf32>, vector<1024x10xf32>, vector<8x10xf32> -> vector<8x10xf32>
    %c0_12 = arith.constant 0 : index
    %c0_13 = arith.constant 0 : index
    %14 = vector.load %arg5[%c0_12, %c0_13] : memref<1x10xf32, #tpu.memory_space<vmem>>, vector<1x10xf32>
    %15 = vector.broadcast %14 : vector<1x10xf32> to vector<8x10xf32>
    %16 = arith.addf %13, %15 : vector<8x10xf32>
    %cst_14 = arith.constant 0.000000e+00 : f32
    %17 = vector.broadcast %cst_14 : f32 to vector<8x10xf32>
    %18 = arith.subf %17, %16 : vector<8x10xf32>
    %19 = math.exp %18 : vector<8x10xf32>
    %cst_15 = arith.constant 1.000000e+00 : f32
    %20 = vector.broadcast %cst_15 : f32 to vector<8x10xf32>
    %21 = arith.addf %20, %19 : vector<8x10xf32>
    %22 = tpu.reciprocal %21 {approx = true} : vector<8x10xf32> -> vector<8x10xf32>
    %c0_16 = arith.constant 0 : index
    %c0_17 = arith.constant 0 : index
    %23 = vector.load %arg6[%c0_16, %c0_17] : memref<8x10xf32, #tpu.memory_space<vmem>>, vector<8x10xf32>
    tpu.vector_store %arg6[%c0_16, %c0_17], %22 {strides = array<i32>} : memref<8x10xf32, #tpu.memory_space<vmem>>, vector<8x10xf32>,
    return
  }
  func.func @transform_0(%arg0: i32) -> (i32, i32, i32) {
    %c0_i32 = arith.constant 0 : i32
    %c0_i32_0 = arith.constant 0 : i32
    %c0_i32_1 = arith.constant 0 : i32
    return %arg0, %c0_i32, %c0_i32_0 : i32, i32, i32
  }
  func.func @transform_1(%arg0: i32) -> (i32, i32) {
    %c0_i32 = arith.constant 0 : i32
    %c0_i32_0 = arith.constant 0 : i32
    %c0_i32_1 = arith.constant 0 : i32
    return %c0_i32, %c0_i32_0 : i32, i32
  }
  func.func @transform_2(%arg0: i32) -> (i32, i32) {
    %c0_i32 = arith.constant 0 : i32
    %c0_i32_0 = arith.constant 0 : i32
    %c0_i32_1 = arith.constant 0 : i32
    return %c0_i32, %c0_i32_0 : i32, i32
  }
  func.func @transform_3(%arg0: i32) -> (i32, i32) {
    %c0_i32 = arith.constant 0 : i32
    %c0_i32_0 = arith.constant 0 : i32
    %c0_i32_1 = arith.constant 0 : i32
    return %c0_i32, %c0_i32_0 : i32, i32
  }
  func.func @transform_4(%arg0: i32) -> (i32, i32) {
    %c0_i32 = arith.constant 0 : i32
    %c0_i32_0 = arith.constant 0 : i32
    %c0_i32_1 = arith.constant 0 : i32
    return %c0_i32, %c0_i32_0 : i32, i32
  }
  func.func @transform_5(%arg0: i32) -> (i32, i32) {
    %c0_i32 = arith.constant 0 : i32
    %c0_i32_0 = arith.constant 0 : i32
    return %arg0, %c0_i32 : i32, i32
  }
}

module attributes {stable_mosaic.version = 11 : i64} {
  func.func @_backbone_head_kernel(%arg0: i32, %arg1: memref<8x256x49xf32, #tpu.memory_space<vmem>>, %arg2: memref<256x1024xbf16, #tpu.memory_space<vmem>>, %arg3: memref<1x1024xf32, #tpu.memory_space<vmem>>, %arg4: memref<1024x10xf32, #tpu.memory_space<vmem>>, %arg5: memref<1x10xf32, #tpu.memory_space<vmem>>, %arg6: memref<8x10xf32, #tpu.memory_space<vmem>>) attributes {dimension_semantics = [#tpu.dimension_semantics<parallel>], iteration_bounds = array<i64: 2>, scalar_prefetch = 0 : i64, scratch_operands = 0 : i64, tpu.core_type = #tpu.core_type<tc>, window_params = [{transform_indices = @transform_0, window_bounds = array<i64: 8, 256, 49>}, {pipeline_mode = #tpu.pipeline_mode<synchronous>, transform_indices = @transform_1, window_bounds = array<i64: 256, 1024>}, {pipeline_mode = #tpu.pipeline_mode<synchronous>, transform_indices = @transform_2, window_bounds = array<i64: 1, 1024>}, {pipeline_mode = #tpu.pipeline_mode<synchronous>, transform_indices = @transform_3, window_bounds = array<i64: 1024, 10>}, {pipeline_mode = #tpu.pipeline_mode<synchronous>, transform_indices = @transform_4, window_bounds = array<i64: 1, 10>}, {transform_indices = @transform_5, window_bounds = array<i64: 8, 10>}]} {
    %c0 = arith.constant 0 : index
    %c0_0 = arith.constant 0 : index
    %c0_1 = arith.constant 0 : index
    %0 = vector.load %arg1[%c0, %c0_0, %c0_1] : memref<8x256x49xf32, #tpu.memory_space<vmem>>, vector<8x256x49xf32>
    %cst = arith.constant dense<0.000000e+00> : vector<8x256xf32>
    %1 = vector.multi_reduction <add>, %0, %cst [2] : vector<8x256x49xf32> to vector<8x256xf32>
    %cst_2 = arith.constant 4.900000e+01 : f32
    %2 = vector.broadcast %cst_2 : f32 to vector<8x256xf32>
    %3 = arith.divf %1, %2 : vector<8x256xf32>
    %4 = arith.truncf %3 : vector<8x256xf32> to vector<8x256xbf16>
    %c0_3 = arith.constant 0 : index
    %c0_4 = arith.constant 0 : index
    %5 = vector.load %arg2[%c0_3, %c0_4] : memref<256x1024xbf16, #tpu.memory_space<vmem>>, vector<256x1024xbf16>
    %cst_5 = arith.constant dense<0.000000e+00> : vector<8x1024xf32>
    %6 = tpu.matmul %4, %5, %cst_5 {dimension_numbers = #tpu.dot_dimension_numbers<[1], [0], [0], [1], [0, 0, 1, 1], [], []>} : vector<8x256xbf16>, vector<256x1024xbf16>, vector<8x1024xf32> -> vector<8x1024xf32>
    %c0_6 = arith.constant 0 : index
    %c0_7 = arith.constant 0 : index
    %7 = vector.load %arg3[%c0_6, %c0_7] : memref<1x1024xf32, #tpu.memory_space<vmem>>, vector<1x1024xf32>
    %8 = vector.broadcast %7 : vector<1x1024xf32> to vector<8x1024xf32>
    %9 = arith.addf %6, %8 : vector<8x1024xf32>
    %cst_8 = arith.constant 0.000000e+00 : f32
    %10 = vector.broadcast %cst_8 : f32 to vector<8x1024xf32>
    %11 = arith.maximumf %9, %10 : vector<8x1024xf32>
    %c0_9 = arith.constant 0 : index
    %c0_10 = arith.constant 0 : index
    %12 = vector.load %arg4[%c0_9, %c0_10] : memref<1024x10xf32, #tpu.memory_space<vmem>>, vector<1024x10xf32>
    %cst_11 = arith.constant dense<0.000000e+00> : vector<8x10xf32>
    %13 = tpu.matmul %11, %12, %cst_11 {dimension_numbers = #tpu.dot_dimension_numbers<[1], [0], [0], [1], [0, 0, 1, 1], [], []>} : vector<8x1024xf32>, vector<1024x10xf32>, vector<8x10xf32> -> vector<8x10xf32>
    %c0_12 = arith.constant 0 : index
    %c0_13 = arith.constant 0 : index
    %14 = vector.load %arg5[%c0_12, %c0_13] : memref<1x10xf32, #tpu.memory_space<vmem>>, vector<1x10xf32>
    %15 = vector.broadcast %14 : vector<1x10xf32> to vector<8x10xf32>
    %16 = arith.addf %13, %15 : vector<8x10xf32>
    %cst_14 = arith.constant 0.000000e+00 : f32
    %17 = vector.broadcast %cst_14 : f32 to vector<8x10xf32>
    %18 = arith.subf %17, %16 : vector<8x10xf32>
    %19 = math.exp %18 : vector<8x10xf32>
    %cst_15 = arith.constant 1.000000e+00 : f32
    %20 = vector.broadcast %cst_15 : f32 to vector<8x10xf32>
    %21 = arith.addf %20, %19 : vector<8x10xf32>
    %22 = tpu.reciprocal %21 {approx = true} : vector<8x10xf32> -> vector<8x10xf32>
    %c0_16 = arith.constant 0 : index
    %c0_17 = arith.constant 0 : index
    %23 = vector.load %arg6[%c0_16, %c0_17] : memref<8x10xf32, #tpu.memory_space<vmem>>, vector<8x10xf32>
    tpu.vector_store %arg6[%c0_16, %c0_17], %22 {strides = array<i32>} : memref<8x10xf32, #tpu.memory_space<vmem>>, vector<8x10xf32>,
    return
  }
  func.func @transform_0(%arg0: i32) -> (i32, i32, i32) {
    %c0_i32 = arith.constant 0 : i32
    %c0_i32_0 = arith.constant 0 : i32
    %c0_i32_1 = arith.constant 0 : i32
    return %arg0, %c0_i32, %c0_i32_0 : i32, i32, i32
  }
  func.func @transform_1(%arg0: i32) -> (i32, i32) {
    %c0_i32 = arith.constant 0 : i32
    %c0_i32_0 = arith.constant 0 : i32
    %c0_i32_1 = arith.constant 0 : i32
    return %c0_i32, %c0_i32_0 : i32, i32
  }
  func.func @transform_2(%arg0: i32) -> (i32, i32) {
    %c0_i32 = arith.constant 0 : i32
    %c0_i32_0 = arith.constant 0 : i32
    %c0_i32_1 = arith.constant 0 : i32
    return %c0_i32, %c0_i32_0 : i32, i32
  }
  func.func @transform_3(%arg0: i32) -> (i32, i32) {
    %c0_i32 = arith.constant 0 : i32
    %c0_i32_0 = arith.constant 0 : i32
    %c0_i32_1 = arith.constant 0 : i32
    return %c0_i32, %c0_i32_0 : i32, i32
  }
  func.func @transform_4(%arg0: i32) -> (i32, i32) {
    %c0_i32 = arith.constant 0 : i32
    %c0_i32_0 = arith.constant 0 : i32
    %c0_i32_1 = arith.constant 0 : i32
    return %c0_i32, %c0_i32_0 : i32, i32
  }
  func.func @transform_5(%arg0: i32) -> (i32, i32) {
    %c0_i32 = arith.constant 0 : i32
    %c0_i32_0 = arith.constant 0 : i32
    return %arg0, %c0_i32 : i32, i32
  }
}

</mosaic_0001>

<bundles_post_ra>
// kernel: tpu_custom_call.1
= control target key start
LH: loop header
LB: loop body
LE: loop exit
PB: predicated region body
PF: predicated region fallthrough
CT: control target
= control target key end

     0   :  { %10 = vsyncpa [#allocation3], 0  ;;  %s7756_s0 = inlined_call_operand.vmem [shape: f32[12,256,49], index: 0, kind: input, shape index: {}]   ;;  %s7757_s1 = inlined_call_operand.vmem [shape: bf16[256,1024], index: 1, kind: input, shape index: {}]   ;;  %s7758_s2 = inlined_call_operand.vmem [shape: f32[1,1024], index: 2, kind: input, shape index: {}]   ;;  %s7759_s3 = inlined_call_operand.vmem [shape: f32[1024,10], index: 3, kind: input, shape index: {}]   ;;  %s7760_s4 = inlined_call_operand.vmem [shape: f32[1,10], index: 4, kind: input, shape index: {}]   ;;  %s7761_s5 = inlined_call_operand.hbm [shape: f32[12,10], index: 5, kind: output, shape index: {}]  }
   0x1   :  { %12 = vsyncpa [#allocation3 + $0x1], 0  ;;  %s5393_s18 = smov 0   ;;  %s5395_s19 = smov 0  }
   0x2   :  { %s5397_s20 = smov 0   ;;  %s5399_s21 = smov 0  }
   0x3 LB: > { %s5414_s22 = sadd.s32 4294967295, %s5360_s21   ;;  %s4845_s23 = sadd.s32 4294967294, %s5360_s21   ;;  %s5360_s21 = sphi %s5399_s21, %s7767_s21   ;;  %s5356_s20 = sphi %s5397_s20, %s7766_s20   ;;  %s5352_s19 = sphi %s5395_s19, %s7765_s19   ;;  %s5348_s18 = sphi %s5393_s18, %s7764_s18  }
   0x4   : > { %s5418_s24 = sadd.s32 1, %s5360_s21   ;;  %s135_s25 = sadd.s32 1, %s5356_s20 }
   0x5   : > { %s132_s26 = ssub.s32 %s5360_s21, %s5418_s24  ;;  %p145_p0 = scmp.ne.s32.totalorder %s5356_s20, %s5352_s19 }
   0x6   : > { %p133_p1 = scmp.eq.s32.totalorder %s132_s26, 0  ;;  %p146_p2 = scmp.eq.s32.totalorder %s5414_s22, 1 }
   0x7   : > { %p151_p3 = scmp.ne.s32.totalorder %s5352_s19, %s5348_s18  ;;  %p152_p4 = scmp.eq.s32.totalorder %s4845_s23, 1 }
   0x8   : > { %s5429_s27 = scalar_select %p133_p1, %s5356_s20, %s135_s25  }
   0x9   : > { %p5431_p5 = por %p146_p2, %p145_p0  ;;  %p5435_p6 = por %p152_p4, %p151_p3 }
   0xa   : > { %p4848_p7 = scmp.ge.s32.totalorder %s5360_s21, 1  ;;  %p202_p8 = scmp.lt.s32.totalorder %s5360_s21, 3 }
   0xc   : > { %p203_p9 = pnand %p4848_p7, %p202_p8 }
   0xd   : > { %s4850_s30 = sshll.u32 (!%p203_p9), %s5414_s22, 3  ;;  %vm509_vm0 = vcmask (!%p203_p9), 400384   ;;  %vm2228_vm1 = vcmask (!%p203_p9), 130112   ;;  %vm2235_vm2 = vcmask (!%p203_p9), 195712   ;;  %vm2242_vm3 = vcmask (!%p203_p9), 261312   ;;  %s233_s23 = sand.u32 (!%p203_p9), 1, %s5352_s19  }
   0xe   : > { %206 = sbr.rel (%p203_p9) target bundleno = 1233 (0x4d1), region = 40  ;;  %p242_p10 = scmp.lt.s32.totalorder (!%p203_p9), %s4850_s30, 11  ;;  %vm2249_vm4 = vcmask (!%p203_p9), 326912   ;;  %vm2256_vm5 = vcmask (!%p203_p9), 392512   ;;  %vm2263_vm6 = vcmask (!%p203_p9), 458112   ;;  %vm2270_vm7 = vcmask (!%p203_p9), 523712  }
   0xf   : > { %vm2277_vm8 = vcmask (!%p203_p9), 589312   ;;  %vm2284_vm9 = vcmask (!%p203_p9), 654912   ;;  %vm2291_vm10 = vcmask (!%p203_p9), 720512   ;;  %vm2298_vm11 = vcmask (!%p203_p9), 786112   ;;  %s4849_s25 = sshll.u32 (!%p203_p9), %s233_s23, 3  ;;  %s4983_s26 = sshll.u32 (!%p203_p9), %s5414_s22, 7 }
  0x10   : > { %vm2305_vm12 = vcmask (!%p203_p9), 851712   ;;  %vm2312_vm13 = vcmask (!%p203_p9), 917312   ;;  %vm2319_vm14 = vcmask (!%p203_p9), 982912   ;;  %vm2326_vm15 = vcmask (!%p203_p9), 1048512   ;;  %s7714_s8 = scalar_lea.hbm (!%p203_p9), %s7761_s5, %s4983_s26  ;;  %s4773_s10 = scalar_lea.sflag (!%p203_p9), [#allocation3], %s233_s23 }
  0x11   : > { %s5362_s22 = smov (!%p203_p9), [#allocation2]  }
  0x12   : > { %s5302_s12 = sshll.u32 (!%p203_p9), %s5362_s22, 4  ;;  %s5303_s12 = int_to_ptr.vmem [resolvable:$false] %s5302_s12 }
  0x13   : > { %s5304_s13 = scalar_lea.vmem (!%p203_p9), %s5303_s12, 256 }
  0x15   : > { %s7769_s30 = smov (!%p242_p10, %s4850_s30), 11 }
  0x16   : > { %s4986_s6 = sshll.u32 %s7769_s30, 8  ;;  %s235_s30 = scalar_lea.vmem [#allocation2], %s4849_s25 }
  0x17   : > { %s5445_s9 = scalar_lea.vmem %s7756_s0, %s4986_s6 }
  0x18   : > { %v301_v0 = vld [vmem:[%s5445_s9 + $0x180] sm:$0xff]  ;;  %v302_v2 = vld [vmem:[%s5445_s9 + $0x188] sm:$0xff]  ;;  %v272_v12 = vld [vmem:[%s5445_s9 + $0x98] sm:$0xff] }
  0x19   : > { %v269_v1 = vld [vmem:[%s5445_s9 + $0x80] sm:$0xff]  ;;  %v654_v3 = vsel %vm509_vm0, %v301_v0, 0.0  ;;  %v270_v5 = vld [vmem:[%s5445_s9 + $0x88] sm:$0xff]  ;;  %v657_v6 = vsel %vm509_vm0, %v302_v2, 0.0  ;;  %v271_v13 = vld [vmem:[%s5445_s9 + $0x90] sm:$0xff]  ;;  %v567_v14 = vsel %vm509_vm0, %v272_v12, 0.0 }
  0x1a   : > { %v558_v4 = vsel %vm509_vm0, %v269_v1, 0.0  ;;  %655 = vadd.xlane.f32.xlu1 %v654_v3  ;;  %v561_v7 = vsel %vm509_vm0, %v270_v5, 0.0  ;;  %v254_v8 = vld [vmem:[%s5445_s9 + $0x8] sm:$0xff]  ;;  %v253_v9 = vld [vmem:[%s5445_s9] sm:$0xff]  ;;  %v564_v15 = vsel %vm509_vm0, %v271_v13, 0.0  ;;  %v304_v20 = vld [vmem:[%s5445_s9 + $0x198] sm:$0xff] }
  0x1b   : > { %559 = vadd.xlane.f32.xlu0 %v558_v4  ;;  %v513_v10 = vsel %vm509_vm0, %v254_v8, 0.0  ;;  %v510_v11 = vsel %vm509_vm0, %v253_v9, 0.0  ;;  %v286_v16 = vld [vmem:[%s5445_s9 + $0x108] sm:$0xff]  ;;  %v285_v17 = vld [vmem:[%s5445_s9 + $0x100] sm:$0xff]  ;;  %v303_v21 = vld [vmem:[%s5445_s9 + $0x190] sm:$0xff]  ;;  %v663_v22 = vsel %vm509_vm0, %v304_v20, 0.0 }
  0x1c   : > { %v609_v18 = vsel %vm509_vm0, %v286_v16, 0.0  ;;  %v606_v19 = vsel %vm509_vm0, %v285_v17, 0.0  ;;  %v660_v23 = vsel %vm509_vm0, %v303_v21, 0.0  ;;  %v334_v24 = vld [vmem:[%s5445_s9 + $0x288] sm:$0xff]  ;;  %v333_v25 = vld [vmem:[%s5445_s9 + $0x280] sm:$0xff]  ;;  %v256_v28 = vld [vmem:[%s5445_s9 + $0x18] sm:$0xff] }
  0x1d   : > { %v753_v26 = vsel %vm509_vm0, %v334_v24, 0.0  ;;  %v750_v27 = vsel %vm509_vm0, %v333_v25, 0.0  ;;  %v255_v29 = vld [vmem:[%s5445_s9 + $0x10] sm:$0xff]  ;;  %v519_v30 = vsel %vm509_vm0, %v256_v28, 0.0  ;;  %v288_v32 = vld [vmem:[%s5445_s9 + $0x118] sm:$0xff]  ;;  %v318_v36 = vld [vmem:[%s5445_s9 + $0x208] sm:$0xff] }
  0x1e   : > { %658 = vadd.xlane.f32.xlu1 %v657_v6  ;;  %v516_v31 = vsel %vm509_vm0, %v255_v29, 0.0  ;;  %v287_v33 = vld [vmem:[%s5445_s9 + $0x110] sm:$0xff]  ;;  %v615_v34 = vsel %vm509_vm0, %v288_v32, 0.0  ;;  %v317_v37 = vld [vmem:[%s5445_s9 + $0x200] sm:$0xff]  ;;  %v705_v38 = vsel %vm509_vm0, %v318_v36, 0.0  ;;  %v336_v40 = vld [vmem:[%s5445_s9 + $0x298] sm:$0xff] }
  0x1f   : > { %562 = vadd.xlane.f32.xlu0 %v561_v7  ;;  %v612_v35 = vsel %vm509_vm0, %v287_v33, 0.0  ;;  %v702_v39 = vsel %vm509_vm0, %v317_v37, 0.0  ;;  %v335_v41 = vld [vmem:[%s5445_s9 + $0x290] sm:$0xff]  ;;  %v759_v42 = vsel %vm509_vm0, %v336_v40, 0.0  ;;  %v366_v44 = vld [vmem:[%s5445_s9 + $0x388] sm:$0xff]  ;;  %v365_v45 = vld [vmem:[%s5445_s9 + $0x380] sm:$0xff] }
  0x20   : > { %v756_v43 = vsel %vm509_vm0, %v335_v41, 0.0  ;;  %v849_v46 = vsel %vm509_vm0, %v366_v44, 0.0  ;;  %v846_v47 = vsel %vm509_vm0, %v365_v45, 0.0  ;;  %v274_v48 = vld [vmem:[%s5445_s9 + $0xa8] sm:$0xff]  ;;  %v273_v49 = vld [vmem:[%s5445_s9 + $0xa0] sm:$0xff]  ;;  %v320_v56 = vld [vmem:[%s5445_s9 + $0x218] sm:$0xff] }
  0x21   : > { %v573_v50 = vsel %vm509_vm0, %v274_v48, 0.0  ;;  %v570_v51 = vsel %vm509_vm0, %v273_v49, 0.0  ;;  %v306_v52 = vld [vmem:[%s5445_s9 + $0x1a8] sm:$0xff]  ;;  %v305_v53 = vld [vmem:[%s5445_s9 + $0x1a0] sm:$0xff]  ;;  %v319_v57 = vld [vmem:[%s5445_s9 + $0x210] sm:$0xff]  ;;  %v711_v58 = vsel %vm509_vm0, %v320_v56, 0.0 }
  0x22   : > { %514 = vadd.xlane.f32.xlu1 %v513_v10  ;;  %v669_v54 = vsel %vm509_vm0, %v306_v52, 0.0  ;;  %v666_v55 = vsel %vm509_vm0, %v305_v53, 0.0  ;;  %v708_v59 = vsel %vm509_vm0, %v319_v57, 0.0  ;;  %v350_v60 = vld [vmem:[%s5445_s9 + $0x308] sm:$0xff]  ;;  %v349_v61 = vld [vmem:[%s5445_s9 + $0x300] sm:$0xff]  ;;  %v368_v0 = vld [vmem:[%s5445_s9 + $0x398] sm:$0xff] }
  0x23   : > { %511 = vadd.xlane.f32.xlu0 %v510_v11  ;;  %v801_v62 = vsel %vm509_vm0, %v350_v60, 0.0  ;;  %v798_v63 = vsel %vm509_vm0, %v349_v61, 0.0  ;;  %v367_v1 = vld [vmem:[%s5445_s9 + $0x390] sm:$0xff]  ;;  %v855_v2 = vsel %vm509_vm0, %v368_v0, 0.0  ;;  %v398_v4 = vld [vmem:[%s5445_s9 + $0x488] sm:$0xff]  ;;  %v397_v5 = vld [vmem:[%s5445_s9 + $0x480] sm:$0xff] }
  0x24   : > { %v852_v3 = vsel %vm509_vm0, %v367_v1, 0.0  ;;  %v945_v6 = vsel %vm509_vm0, %v398_v4, 0.0  ;;  %v942_v7 = vsel %vm509_vm0, %v397_v5, 0.0  ;;  %v258_v8 = vld [vmem:[%s5445_s9 + $0x28] sm:$0xff]  ;;  %v257_v9 = vld [vmem:[%s5445_s9 + $0x20] sm:$0xff]  ;;  %v352_v20 = vld [vmem:[%s5445_s9 + $0x318] sm:$0xff] }
  0x25   : > { %v525_v10 = vsel %vm509_vm0, %v258_v8, 0.0  ;;  %v522_v11 = vsel %vm509_vm0, %v257_v9, 0.0  ;;  %v290_v12 = vld [vmem:[%s5445_s9 + $0x128] sm:$0xff]  ;;  %v289_v13 = vld [vmem:[%s5445_s9 + $0x120] sm:$0xff]  ;;  %v351_v21 = vld [vmem:[%s5445_s9 + $0x310] sm:$0xff] }
  0x26   : > { %568 = vadd.xlane.f32.xlu1 %v567_v14  ;;  %v621_v14 = vsel %vm509_vm0, %v290_v12, 0.0  ;;  %v338_v16 = vld [vmem:[%s5445_s9 + $0x2a8] sm:$0xff]  ;;  %v337_v17 = vld [vmem:[%s5445_s9 + $0x2a0] sm:$0xff]  ;;  %v400_v28 = vld [vmem:[%s5445_s9 + $0x498] sm:$0xff] }
  0x27   : > { %565 = vadd.xlane.f32.xlu0 %v564_v15  ;;  %v618_v15 = vsel %vm509_vm0, %v289_v13, 0.0  ;;  %v382_v24 = vld [vmem:[%s5445_s9 + $0x408] sm:$0xff]  ;;  %v381_v25 = vld [vmem:[%s5445_s9 + $0x400] sm:$0xff]  ;;  %v399_v29 = vld [vmem:[%s5445_s9 + $0x490] sm:$0xff] }
  0x28   : > { %v430_v32 = vld [vmem:[%s5445_s9 + $0x588] sm:$0xff]  ;;  %v429_v33 = vld [vmem:[%s5445_s9 + $0x580] sm:$0xff]  ;;  %v276_v36 = vld [vmem:[%s5445_s9 + $0xb8] sm:$0xff] }
  0x29   : > { %v275_v37 = vld [vmem:[%s5445_s9 + $0xb0] sm:$0xff]  ;;  %v308_v40 = vld [vmem:[%s5445_s9 + $0x1b8] sm:$0xff]  ;;  %v322_v44 = vld [vmem:[%s5445_s9 + $0x228] sm:$0xff] }
  0x2a   : > { %610 = vadd.xlane.f32.xlu1 %v609_v18  ;;  %v765_v18 = vsel %vm509_vm0, %v338_v16, 0.0  ;;  %v307_v41 = vld [vmem:[%s5445_s9 + $0x1b0] sm:$0xff]  ;;  %v321_v45 = vld [vmem:[%s5445_s9 + $0x220] sm:$0xff]  ;;  %v370_v48 = vld [vmem:[%s5445_s9 + $0x3a8] sm:$0xff] }
  0x2b   : > { %607 = vadd.xlane.f32.xlu0 %v606_v19  ;;  %v762_v19 = vsel %vm509_vm0, %v337_v17, 0.0  ;;  %v369_v49 = vld [vmem:[%s5445_s9 + $0x3a0] sm:$0xff]  ;;  %v384_v52 = vld [vmem:[%s5445_s9 + $0x418] sm:$0xff]  ;;  %v383_v53 = vld [vmem:[%s5445_s9 + $0x410] sm:$0xff] }
  0x2c   : > { %v414_v56 = vld [vmem:[%s5445_s9 + $0x508] sm:$0xff]  ;;  %v413_v57 = vld [vmem:[%s5445_s9 + $0x500] sm:$0xff]  ;;  %v432_v60 = vld [vmem:[%s5445_s9 + $0x598] sm:$0xff] }
  0x2d   : > { %v431_v61 = vld [vmem:[%s5445_s9 + $0x590] sm:$0xff]  ;;  %v462_v0 = vld [vmem:[%s5445_s9 + $0x688] sm:$0xff]  ;;  %v461_v1 = vld [vmem:[%s5445_s9 + $0x680] sm:$0xff] }
  0x2e   : > { %664 = vadd.xlane.f32.xlu1 %v663_v22  ;;  %v807_v22 = vsel %vm509_vm0, %v352_v20, 0.0  ;;  %v260_v4 = vld [vmem:[%s5445_s9 + $0x38] sm:$0xff]  ;;  %v259_v5 = vld [vmem:[%s5445_s9 + $0x30] sm:$0xff]  ;;  %v354_v16 = vld [vmem:[%s5445_s9 + $0x328] sm:$0xff] }
  0x2f   : > { %661 = vadd.xlane.f32.xlu0 %v660_v23  ;;  %v804_v23 = vsel %vm509_vm0, %v351_v21, 0.0  ;;  %v292_v8 = vld [vmem:[%s5445_s9 + $0x138] sm:$0xff]  ;;  %v291_v9 = vld [vmem:[%s5445_s9 + $0x130] sm:$0xff]  ;;  %v353_v17 = vld [vmem:[%s5445_s9 + $0x320] sm:$0xff]  ;;  %v813_v21 = vsel %vm509_vm0, %v354_v16, 0.0 }
  0x30   : > { %v340_v12 = vld [vmem:[%s5445_s9 + $0x2b8] sm:$0xff]  ;;  %v339_v13 = vld [vmem:[%s5445_s9 + $0x2b0] sm:$0xff] }
  0x32   : > { %754 = vadd.xlane.f32.xlu1 %v753_v26  ;;  %v897_v26 = vsel %vm509_vm0, %v382_v24, 0.0  ;;  %v401_v24 = vld [vmem:[%s5445_s9 + $0x4a0] sm:$0xff] }
  0x33   : > { %751 = vadd.xlane.f32.xlu0 %v750_v27  ;;  %v894_v27 = vsel %vm509_vm0, %v381_v25, 0.0 }
  0x36   : > { %520 = vadd.xlane.f32.xlu1 %v519_v30  ;;  %v951_v30 = vsel %vm509_vm0, %v400_v28, 0.0 }
  0x37   : > { %517 = vadd.xlane.f32.xlu0 %v516_v31  ;;  %v948_v31 = vsel %vm509_vm0, %v399_v29, 0.0 }
  0x3a   : > { %616 = vadd.xlane.f32.xlu1 %v615_v34  ;;  %v1041_v34 = vsel %vm509_vm0, %v430_v32, 0.0 }
  0x3b   : > { %613 = vadd.xlane.f32.xlu0 %v612_v35  ;;  %v1038_v35 = vsel %vm509_vm0, %v429_v33, 0.0 }
  0x3e   : > { %706 = vadd.xlane.f32.xlu1 %v705_v38  ;;  %v579_v38 = vsel %vm509_vm0, %v276_v36, 0.0  ;;  %v415_v36 = vld [vmem:[%s5445_s9 + $0x510] sm:$0xff] }
  0x3f   : > { %703 = vadd.xlane.f32.xlu0 %v702_v39  ;;  %v576_v39 = vsel %vm509_vm0, %v275_v37, 0.0 }
  0x42   : > { %760 = vadd.xlane.f32.xlu1 %v759_v42  ;;  %v675_v42 = vsel %vm509_vm0, %v308_v40, 0.0 }
  0x43   : > { %757 = vadd.xlane.f32.xlu0 %v756_v43  ;;  %v672_v43 = vsel %vm509_vm0, %v307_v41, 0.0 }
  0x46   : > { %850 = vadd.xlane.f32.xlu1 %v849_v46  ;;  %v717_v46 = vsel %vm509_vm0, %v322_v44, 0.0  ;;  %v996_v44 = vsel %vm509_vm0, %v415_v36, 0.0 }
  0x47   : > { %847 = vadd.xlane.f32.xlu0 %v846_v47  ;;  %v714_v47 = vsel %vm509_vm0, %v321_v45, 0.0  ;;  %v445_v45 = vld [vmem:[%s5445_s9 + $0x600] sm:$0xff] }
  0x4a   : > { %574 = vadd.xlane.f32.xlu1 %v573_v50  ;;  %v861_v50 = vsel %vm509_vm0, %v370_v48, 0.0 }
  0x4b   : > { %571 = vadd.xlane.f32.xlu0 %v570_v51  ;;  %v858_v51 = vsel %vm509_vm0, %v369_v49, 0.0 }
  0x4e   : > { %670 = vadd.xlane.f32.xlu1 %v669_v54  ;;  %v903_v54 = vsel %vm509_vm0, %v384_v52, 0.0 }
  0x4f   : > { %667 = vadd.xlane.f32.xlu0 %v666_v55  ;;  %v900_v55 = vsel %vm509_vm0, %v383_v53, 0.0 }
  0x52   : > { %712 = vadd.xlane.f32.xlu1 %v711_v58  ;;  %v993_v58 = vsel %vm509_vm0, %v414_v56, 0.0 }
  0x53   : > { %709 = vadd.xlane.f32.xlu0 %v708_v59  ;;  %v990_v59 = vsel %vm509_vm0, %v413_v57, 0.0 }
  0x56   : > { %802 = vadd.xlane.f32.xlu1 %v801_v62  ;;  %v1047_v62 = vsel %vm509_vm0, %v432_v60, 0.0 }
  0x57   : > { %799 = vadd.xlane.f32.xlu0 %v798_v63  ;;  %v1044_v63 = vsel %vm509_vm0, %v431_v61, 0.0  ;;  %v464_v61 = vld [vmem:[%s5445_s9 + $0x698] sm:$0xff] }
  0x5a   : > { %856 = vadd.xlane.f32.xlu1 %v855_v2  ;;  %v1137_v2 = vsel %vm509_vm0, %v462_v0, 0.0 }
  0x5b   : > { %853 = vadd.xlane.f32.xlu0 %v852_v3  ;;  %v1134_v3 = vsel %vm509_vm0, %v461_v1, 0.0 }
  0x5e   : > { %946 = vadd.xlane.f32.xlu1 %v945_v6  ;;  %v531_v6 = vsel %vm509_vm0, %v260_v4, 0.0 }
  0x5f   : > { %943 = vadd.xlane.f32.xlu0 %v942_v7  ;;  %v528_v7 = vsel %vm509_vm0, %v259_v5, 0.0 }
  0x62   : > { %526 = vadd.xlane.f32.xlu1 %v525_v10  ;;  %v627_v10 = vsel %vm509_vm0, %v292_v8, 0.0 }
  0x63   : > { %523 = vadd.xlane.f32.xlu0 %v522_v11  ;;  %v624_v11 = vsel %vm509_vm0, %v291_v9, 0.0 }
  0x66   : > { %622 = vadd.xlane.f32.xlu1 %v621_v14  ;;  %v771_v14 = vsel %vm509_vm0, %v340_v12, 0.0  ;;  %v494_v12 = vld [vmem:[%s5445_s9 + $0x788] sm:$0xff] }
  0x67   : > { %619 = vadd.xlane.f32.xlu0 %v618_v15  ;;  %v768_v15 = vsel %vm509_vm0, %v339_v13, 0.0  ;;  %v493_v13 = vld [vmem:[%s5445_s9 + $0x780] sm:$0xff] }
  0x6a   : > { %766 = vadd.xlane.f32.xlu1 %v765_v18  ;;  %v1793_v18 = vlaneseq }
  0x6b   : > { %763 = vadd.xlane.f32.xlu0 %v762_v19 }
  0x6c   : > { %v5597_v25 = vand.u32 127, %v1793_v18 }
  0x6e   : > { %808 = vadd.xlane.f32.xlu1 %v807_v22  ;;  %v810_v22 = vsel %vm509_vm0, %v353_v17, 0.0  ;;  %v2223_v37 = vadd.s32 4294967288, %v5597_v25 }
  0x6f   : > { %805 = vadd.xlane.f32.xlu0 %v804_v23  ;;  %v402_v23 = vld [vmem:[%s5445_s9 + $0x4a8] sm:$0xff] }
  0x70   : > { %v957_v29 = vsel %vm509_vm0, %v402_v23, 0.0 }
  0x72   : > { %898 = vadd.xlane.f32.xlu1 %v897_v26 }
  0x73   : > { %895 = vadd.xlane.f32.xlu0 %v894_v27 }
  0x76   : > { %952 = vadd.xlane.f32.xlu1 %v951_v30  ;;  %v954_v30 = vsel %vm509_vm0, %v401_v24, 0.0 }
  0x77   : > { %949 = vadd.xlane.f32.xlu0 %v948_v31  ;;  %v416_v31 = vld [vmem:[%s5445_s9 + $0x518] sm:$0xff] }
  0x7a   : > { %1042 = vadd.xlane.f32.xlu1 %v1041_v34 }
  0x7b   : > { %1039 = vadd.xlane.f32.xlu0 %v1038_v35  ;;  %v5602_v35 = vshrl.u32 %v1793_v18, 7 }
  0x7d   : > { %v5617_v49 = vsub.s32 %v2223_v37, %v5602_v35  ;;  %v310_v37 = vld [vmem:[%s5445_s9 + $0x1c8] sm:$0xff] }
  0x7e   : > { %580 = vadd.xlane.f32.xlu1 %v579_v38 }
  0x7f   : > { %577 = vadd.xlane.f32.xlu0 %v576_v39 }
  0x82   : > { %676 = vadd.xlane.f32.xlu1 %v675_v42  ;;  %v999_v42 = vsel %vm509_vm0, %v416_v31, 0.0 }
  0x83   : > { %673 = vadd.xlane.f32.xlu0 %v672_v43  ;;  %v446_v43 = vld [vmem:[%s5445_s9 + $0x608] sm:$0xff] }
  0x84   : > { %v1089_v52 = vsel %vm509_vm0, %v446_v43, 0.0 }
  0x86   : > { %718 = vadd.xlane.f32.xlu1 %v717_v46  ;;  %v5614_v46 = vsub.s32 %v5597_v25, %v5602_v35 }
  0x87   : > { %715 = vadd.xlane.f32.xlu0 %v714_v47 }
  0x8a   : > { %862 = vadd.xlane.f32.xlu1 %v861_v50  ;;  %v2230_v50 = vadd.s32 4294967280, %v5597_v25 }
  0x8b   : > { %859 = vadd.xlane.f32.xlu0 %v858_v51  ;;  %v2237_v51 = vadd.s32 4294967272, %v5597_v25 }
  0x8d   : > { %v5631_v0 = vsub.s32 %v2237_v51, %v5602_v35 }
  0x8e   : > { %904 = vadd.xlane.f32.xlu1 %v903_v54 }
  0x8f   : > { %901 = vadd.xlane.f32.xlu0 %v900_v55 }
  0x92   : > { %994 = vadd.xlane.f32.xlu1 %v993_v58  ;;  %v1086_v58 = vsel %vm509_vm0, %v445_v45, 0.0 }
  0x93   : > { %991 = vadd.xlane.f32.xlu0 %v990_v59 }
  0x96   : > { %1048 = vadd.xlane.f32.xlu1 %v1047_v62  ;;  %v463_v62 = vld [vmem:[%s5445_s9 + $0x690] sm:$0xff] }
  0x97   : > { %1045 = vadd.xlane.f32.xlu0 %v1044_v63  ;;  %v5628_v63 = vsub.s32 %v2230_v50, %v5602_v35 }
  0x9a   : > { %1138 = vadd.xlane.f32.xlu1 %v1137_v2 }
  0x9b   : > { %1135 = vadd.xlane.f32.xlu0 %v1134_v3 }
  0x9e   : > { %532 = vadd.xlane.f32.xlu1 %v531_v6  ;;  %v1143_v6 = vsel %vm509_vm0, %v464_v61, 0.0  ;;  %v323_v61 = vld [vmem:[%s5445_s9 + $0x230] sm:$0xff] }
  0x9f   : > { %529 = vadd.xlane.f32.xlu0 %v528_v7  ;;  %v1140_v7 = vsel %vm509_vm0, %v463_v62, 0.0 }
  0xa2   : > { %628 = vadd.xlane.f32.xlu1 %v627_v10 }
  0xa3   : > { %625 = vadd.xlane.f32.xlu0 %v624_v11 }
  0xa6   : > { %772 = vadd.xlane.f32.xlu1 %v771_v14 }
  0xa7   : > { %769 = vadd.xlane.f32.xlu0 %v768_v15  ;;  %v656_v19 = vpop.xlane.xlu1 %655 }
  0xa8   : > { %v560_v20 = vpop.xlane.xlu0 %559  ;;  %v1327_v26 = vmul.f32 0.020408163, %v656_v19 }
  0xa9   : > { %v1295_v32 = vmul.f32 0.020408163, %v560_v20  ;;  %v1233_v20 = vsel %vm509_vm0, %v494_v12, 0.0 }
  0xaa   : > { %814 = vadd.xlane.f32.xlu1 %v813_v21  ;;  %v1230_v21 = vsel %vm509_vm0, %v493_v13, 0.0 }
  0xab   : > { %811 = vadd.xlane.f32.xlu0 %v810_v22  ;;  %v659_v27 = vpop.xlane.xlu1 %658 }
  0xac   : > { %v563_v28 = vpop.xlane.xlu0 %562  ;;  %v1328_v33 = vmul.f32 0.020408163, %v659_v27  ;;  %v278_v27 = vld [vmem:[%s5445_s9 + $0xc8] sm:$0xff] }
  0xad   : > { %v1296_v34 = vmul.f32 0.020408163, %v563_v28  ;;  %v277_v28 = vld [vmem:[%s5445_s9 + $0xc0] sm:$0xff] }
  0xae   : > { %v5606_v38 = vpack.c.bf16 %v1328_v33, %v1327_v26  ;;  %958 = vadd.xlane.f32.xlu1 %v957_v29  ;;  %v582_v36 = vsel %vm509_vm0, %v277_v28, 0.0 }
  0xaf   : > { %v1543_v39 = vpack.c.bf16 %v1296_v34, %v1295_v32  ;;  %955 = vadd.xlane.f32.xlu0 %v954_v30  ;;  %v515_v40 = vpop.xlane.xlu1 %514  ;;  %v585_v34 = vsel %vm509_vm0, %v278_v27, 0.0 }
  0xb0   : > { %v512_v41 = vpop.xlane.xlu0 %511  ;;  %v1280_v47 = vmul.f32 0.020408163, %v515_v40  ;;  %v2009_v22 = vunpack.c.l.b16 %v5606_v38  ;;  %v2010_v23 = vunpack.c.h.b16 %v5606_v38 }
  0xb1   : > { %v1279_v48 = vmul.f32 0.020408163, %v512_v41  ;;  %v1977_v53 = vunpack.c.l.b16 %v1543_v39  ;;  %v1978_v54 = vunpack.c.h.b16 %v1543_v39 }
  0xb2   : > { %1000 = vadd.xlane.f32.xlu1 %v999_v42  ;;  %v2489_v38 = vrot.slane %v2009_v22, %v5614_v46  ;;  %v2493_v39 = vrot.slane %v2010_v23, %v5617_v49 }
  0xb3   : > { %v5622_v55 = vpack.c.bf16 %v1280_v47, %v1279_v48  ;;  %997 = vadd.xlane.f32.xlu0 %v996_v44  ;;  %v569_v56 = vpop.xlane.xlu1 %568  ;;  %v2331_v2 = vrot.slane %v1977_v53, %v5614_v46  ;;  %v2335_v3 = vrot.slane %v1978_v54, %v5617_v49  ;;  %v309_v44 = vld [vmem:[%s5445_s9 + $0x1c0] sm:$0xff]  ;;  %v681_v47 = vsel %vm509_vm0, %v310_v37, 0.0 }
  0xb4   : > { %v566_v57 = vpop.xlane.xlu0 %565  ;;  %v1298_v59 = vmul.f32 0.020408163, %v569_v56  ;;  %v324_v56 = vld [vmem:[%s5445_s9 + $0x238] sm:$0xff] }
  0xb5   : > { %v1297_v60 = vmul.f32 0.020408163, %v566_v57  ;;  %v2336_v17 = vsel %vm2228_vm1, %v2335_v3, %v2331_v2  ;;  %v1961_v48 = vunpack.c.l.b16 %v5622_v55  ;;  %v1962_v50 = vunpack.c.h.b16 %v5622_v55 }
  0xb6   : > { %1090 = vadd.xlane.f32.xlu1 %v1089_v52  ;;  %v2494_v57 = vsel %vm2228_vm1, %v2493_v39, %v2489_v38  ;;  %v723_v2 = vsel %vm509_vm0, %v324_v56, 0.0 }
  0xb7   : > { %v1544_v1 = vpack.c.bf16 %v1298_v59, %v1297_v60  ;;  %1087 = vadd.xlane.f32.xlu0 %v1086_v58  ;;  %v611_v4 = vpop.xlane.xlu1 %610  ;;  %v678_v60 = vsel %vm509_vm0, %v309_v44, 0.0  ;;  %v2222_v3 = vrot.slane %v1961_v48, %v5614_v46 }
  0xb8   : > { %v608_v5 = vpop.xlane.xlu0 %607  ;;  %v1312_v10 = vmul.f32 0.020408163, %v611_v4  ;;  %v2227_v4 = vrot.slane %v1962_v50, %v5617_v49 }
  0xb9   : > { %v1979_v8 = vunpack.c.l.b16 %v1544_v1  ;;  %v1980_v9 = vunpack.c.h.b16 %v1544_v1  ;;  %v1311_v11 = vmul.f32 0.020408163, %v608_v5 }
  0xba   : > { %1144 = vadd.xlane.f32.xlu1 %v1143_v6 }
  0xbb   : > { %v2340_v14 = vrot.slane %v1979_v8, %v5628_v63  ;;  %v2345_v15 = vrot.slane %v1980_v9, %v5631_v0  ;;  %v5641_v16 = vpack.c.bf16 %v1312_v10, %v1311_v11  ;;  %1141 = vadd.xlane.f32.xlu0 %v1140_v7  ;;  %v665_v18 = vpop.xlane.xlu1 %664  ;;  %v720_v8 = vsel %vm509_vm0, %v323_v61, 0.0  ;;  %v372_v9 = vld [vmem:[%s5445_s9 + $0x3b8] sm:$0xff] }
  0xbc   : > { %v662_v19 = vpop.xlane.xlu0 %661  ;;  %v1330_v26 = vmul.f32 0.020408163, %v665_v18 }
  0xbd   : > { %v2341_v24 = vsel %vm2235_vm2, %v2340_v14, %v2336_v17  ;;  %v1329_v30 = vmul.f32 0.020408163, %v662_v19  ;;  %v1993_v5 = vunpack.c.l.b16 %v5641_v16  ;;  %v1994_v10 = vunpack.c.h.b16 %v5641_v16  ;;  %v371_v14 = vld [vmem:[%s5445_s9 + $0x3b0] sm:$0xff] }
  0xbe   : > { %v5652_v29 = vsel %vm2242_vm3, %v2345_v15, %v2341_v24  ;;  %1234 = vadd.xlane.f32.xlu1 %v1233_v20  ;;  %v867_v19 = vsel %vm509_vm0, %v372_v9, 0.0  ;;  %v2229_v20 = vsel %vm2228_vm1, %v2227_v4, %v2222_v3  ;;  %v864_v24 = vsel %vm509_vm0, %v371_v14, 0.0  ;;  %v448_v4 = vld [vmem:[%s5445_s9 + $0x618] sm:$0xff] }
  0xbf   : > { %v1560_v31 = vpack.c.bf16 %v1330_v26, %v1329_v30  ;;  %1231 = vadd.xlane.f32.xlu0 %v1230_v21  ;;  %v755_v32 = vpop.xlane.xlu1 %754  ;;  %v2410_v21 = vrot.slane %v1993_v5, %v5614_v46  ;;  %v386_v26 = vld [vmem:[%s5445_s9 + $0x428] sm:$0xff]  ;;  %v2414_v27 = vrot.slane %v1994_v10, %v5617_v49  ;;  %v447_v5 = vld [vmem:[%s5445_s9 + $0x610] sm:$0xff]  ;;  %v2244_v9 = vadd.s32 4294967264, %v5597_v25 }
  0xc0   : > { %v752_v33 = vpop.xlane.xlu0 %751  ;;  %v1360_v40 = vmul.f32 0.020408163, %v755_v32  ;;  %v909_v38 = vsel %vm509_vm0, %v386_v26, 0.0  ;;  %v2251_v10 = vadd.s32 4294967256, %v5597_v25 }
  0xc1   : > { %v1359_v41 = vmul.f32 0.020408163, %v752_v33  ;;  %v2011_v42 = vunpack.c.l.b16 %v1560_v31  ;;  %v2012_v43 = vunpack.c.h.b16 %v1560_v31 }
  0xc2   : > { %586 = vadd.xlane.f32.xlu1 %v585_v34 }
  0xc3   : > { %v5660_v45 = vpack.c.bf16 %v1360_v40, %v1359_v41  ;;  %v2498_v51 = vrot.slane %v2011_v42, %v5628_v63  ;;  %v2503_v52 = vrot.slane %v2012_v43, %v5631_v0  ;;  %583 = vadd.xlane.f32.xlu0 %v582_v36  ;;  %v521_v53 = vpop.xlane.xlu1 %520  ;;  %v385_v36 = vld [vmem:[%s5445_s9 + $0x420] sm:$0xff] }
  0xc4   : > { %v518_v54 = vpop.xlane.xlu0 %517  ;;  %v1282_v58 = vmul.f32 0.020408163, %v521_v53 }
  0xc5   : > { %v1281_v59 = vmul.f32 0.020408163, %v518_v54  ;;  %v2499_v62 = vsel %vm2235_vm2, %v2498_v51, %v2494_v57  ;;  %v2041_v39 = vunpack.c.l.b16 %v5660_v45  ;;  %v2042_v40 = vunpack.c.h.b16 %v5660_v45  ;;  %v433_v54 = vld [vmem:[%s5445_s9 + $0x5a0] sm:$0xff] }
  0xc6   : > { %v5673_v55 = vsel %vm2242_vm3, %v2503_v52, %v2499_v62  ;;  %682 = vadd.xlane.f32.xlu1 %v681_v47  ;;  %v2415_v47 = vsel %vm2228_vm1, %v2414_v27, %v2410_v21  ;;  %v906_v51 = vsel %vm509_vm0, %v385_v36, 0.0  ;;  %v434_v52 = vld [vmem:[%s5445_s9 + $0x5a8] sm:$0xff]  ;;  %v1050_v3 = vsel %vm509_vm0, %v433_v54, 0.0 }
  0xc7   : > { %v1536_v1 = vpack.c.bf16 %v1282_v58, %v1281_v59  ;;  %679 = vadd.xlane.f32.xlu0 %v678_v60  ;;  %v617_v6 = vpop.xlane.xlu1 %616  ;;  %v2647_v57 = vrot.slane %v2041_v39, %v5614_v46  ;;  %v2651_v58 = vrot.slane %v2042_v40, %v5617_v49  ;;  %v1053_v61 = vsel %vm509_vm0, %v434_v52, 0.0  ;;  %v478_v21 = vld [vmem:[%s5445_s9 + $0x708] sm:$0xff]  ;;  %v496_v39 = vld [vmem:[%s5445_s9 + $0x798] sm:$0xff]  ;;  %v495_v40 = vld [vmem:[%s5445_s9 + $0x790] sm:$0xff] }
  0xc8   : > { %v614_v7 = vpop.xlane.xlu0 %613  ;;  %v1314_v13 = vmul.f32 0.020408163, %v617_v6  ;;  %v1236_v52 = vsel %vm509_vm0, %v495_v40, 0.0 }
  0xc9   : > { %v1963_v11 = vunpack.c.l.b16 %v1536_v1  ;;  %v1964_v12 = vunpack.c.h.b16 %v1536_v1  ;;  %v1313_v15 = vmul.f32 0.020408163, %v614_v7 }
  0xca   : > { %724 = vadd.xlane.f32.xlu1 %v723_v2 }
  0xcb   : > { %v2234_v17 = vrot.slane %v1963_v11, %v5628_v63  ;;  %v2241_v18 = vrot.slane %v1964_v12, %v5631_v0  ;;  %v1552_v22 = vpack.c.bf16 %v1314_v13, %v1313_v15  ;;  %721 = vadd.xlane.f32.xlu0 %v720_v8  ;;  %v707_v16 = vpop.xlane.xlu1 %706  ;;  %v2652_v11 = vsel %vm2228_vm1, %v2651_v58, %v2647_v57  ;;  %v262_v58 = vld [vmem:[%s5445_s9 + $0x48] sm:$0xff] }
  0xcc   : > { %v704_v23 = vpop.xlane.xlu0 %703  ;;  %v1344_v30 = vmul.f32 0.020408163, %v707_v16  ;;  %v1095_v15 = vsel %vm509_vm0, %v448_v4, 0.0  ;;  %v537_v4 = vsel %vm509_vm0, %v262_v58, 0.0 }
  0xcd   : > { %v2236_v28 = vsel %vm2235_vm2, %v2234_v17, %v2229_v20  ;;  %v1343_v31 = vmul.f32 0.020408163, %v704_v23  ;;  %v1995_v33 = vunpack.c.l.b16 %v1552_v22  ;;  %v1996_v34 = vunpack.c.h.b16 %v1552_v22  ;;  %v477_v22 = vld [vmem:[%s5445_s9 + $0x700] sm:$0xff] }
  0xce   : > { %v5693_v32 = vsel %vm2242_vm3, %v2241_v18, %v2236_v28  ;;  %868 = vadd.xlane.f32.xlu1 %v867_v19  ;;  %v1092_v17 = vsel %vm509_vm0, %v447_v5, 0.0  ;;  %v5733_v23 = vsub.s32 %v2244_v9, %v5602_v35 }
  0xcf   : > { %v5696_v37 = vpack.c.bf16 %v1344_v30, %v1343_v31  ;;  %v2419_v41 = vrot.slane %v1995_v33, %v5628_v63  ;;  %v2424_v42 = vrot.slane %v1996_v34, %v5631_v0  ;;  %865 = vadd.xlane.f32.xlu0 %v864_v24  ;;  %v761_v43 = vpop.xlane.xlu1 %760  ;;  %v5736_v24 = vsub.s32 %v2251_v10, %v5602_v35 }
  0xd0   : > { %v758_v44 = vpop.xlane.xlu0 %757  ;;  %v1362_v48 = vmul.f32 0.020408163, %v761_v43  ;;  %v1185_v30 = vsel %vm509_vm0, %v478_v21, 0.0  ;;  %v1182_v31 = vsel %vm509_vm0, %v477_v22, 0.0 }
  0xd1   : > { %v1361_v50 = vmul.f32 0.020408163, %v758_v44  ;;  %v2420_v53 = vsel %vm2235_vm2, %v2419_v41, %v2415_v47  ;;  %v2025_v44 = vunpack.c.l.b16 %v5696_v37  ;;  %v2026_v47 = vunpack.c.h.b16 %v5696_v37 }
  0xd2   : > { %v5709_v45 = vsel %vm2242_vm3, %v2424_v42, %v2420_v53  ;;  %910 = vadd.xlane.f32.xlu1 %v909_v38 }
  0xd3   : > { %v1576_v56 = vpack.c.bf16 %v1362_v48, %v1361_v50  ;;  %907 = vadd.xlane.f32.xlu0 %v906_v51  ;;  %v851_v59 = vpop.xlane.xlu1 %850  ;;  %v1239_v51 = vsel %vm509_vm0, %v496_v39, 0.0 }
  0xd4   : > { %v848_v60 = vpop.xlane.xlu0 %847  ;;  %v1392_v2 = vmul.f32 0.020408163, %v851_v59  ;;  %v261_v59 = vld [vmem:[%s5445_s9 + $0x40] sm:$0xff] }
  0xd5   : > { %v2043_v62 = vunpack.c.l.b16 %v1576_v56  ;;  %v2044_v1 = vunpack.c.h.b16 %v1576_v56  ;;  %v1391_v6 = vmul.f32 0.020408163, %v848_v60  ;;  %v534_v5 = vsel %vm509_vm0, %v261_v59, 0.0 }
  0xd6   : > { %1054 = vadd.xlane.f32.xlu1 %v1053_v61 }
  0xd7   : > { %v2656_v7 = vrot.slane %v2043_v62, %v5628_v63  ;;  %v2661_v8 = vrot.slane %v2044_v1, %v5631_v0  ;;  %v5722_v12 = vpack.c.bf16 %v1392_v2, %v1391_v6  ;;  %1051 = vadd.xlane.f32.xlu0 %v1050_v3  ;;  %v575_v13 = vpop.xlane.xlu1 %574  ;;  %v2568_v1 = vrot.slane %v2025_v44, %v5614_v46  ;;  %v294_v6 = vld [vmem:[%s5445_s9 + $0x148] sm:$0xff] }
  0xd8   : > { %v572_v14 = vpop.xlane.xlu0 %571  ;;  %v1300_v19 = vmul.f32 0.020408163, %v575_v13 }
  0xd9   : > { %v2657_v18 = vsel %vm2235_vm2, %v2656_v7, %v2652_v11  ;;  %v1299_v20 = vmul.f32 0.020408163, %v572_v14  ;;  %v2572_v7 = vrot.slane %v2026_v47, %v5617_v49 }
  0xda   : > { %v5730_v16 = vsel %vm2242_vm3, %v2661_v8, %v2657_v18  ;;  %1096 = vadd.xlane.f32.xlu1 %v1095_v15  ;;  %v293_v15 = vld [vmem:[%s5445_s9 + $0x140] sm:$0xff]  ;;  %v633_v18 = vsel %vm509_vm0, %v294_v6, 0.0 }
  0xdb   : > { %v1545_v26 = vpack.c.bf16 %v1300_v19, %v1299_v20  ;;  %1093 = vadd.xlane.f32.xlu0 %v1092_v17  ;;  %v671_v27 = vpop.xlane.xlu1 %670  ;;  %v2073_v19 = vunpack.c.l.b16 %v5722_v12  ;;  %v2074_v20 = vunpack.c.h.b16 %v5722_v12 }
  0xdc   : > { %v668_v28 = vpop.xlane.xlu0 %667  ;;  %v1332_v36 = vmul.f32 0.020408163, %v671_v27  ;;  %v2573_v27 = vsel %vm2228_vm1, %v2572_v7, %v2568_v1 }
  0xdd   : > { %v1981_v33 = vunpack.c.l.b16 %v1545_v26  ;;  %v1982_v34 = vunpack.c.h.b16 %v1545_v26  ;;  %v1331_v38 = vmul.f32 0.020408163, %v668_v28  ;;  %v2805_v39 = vrot.slane %v2073_v19, %v5614_v46  ;;  %v418_v19 = vld [vmem:[%s5445_s9 + $0x528] sm:$0xff] }
  0xde   : > { %1186 = vadd.xlane.f32.xlu1 %v1185_v30  ;;  %v2809_v40 = vrot.slane %v2074_v20, %v5617_v49  ;;  %v417_v20 = vld [vmem:[%s5445_s9 + $0x520] sm:$0xff] }
  0xdf   : > { %v2350_v41 = vrot.slane %v1981_v33, %v5733_v23  ;;  %v2355_v42 = vrot.slane %v1982_v34, %v5736_v24  ;;  %v1561_v43 = vpack.c.bf16 %v1332_v36, %v1331_v38  ;;  %1183 = vadd.xlane.f32.xlu0 %v1182_v31  ;;  %v713_v48 = vpop.xlane.xlu1 %712  ;;  %v630_v31 = vsel %vm509_vm0, %v293_v15, 0.0  ;;  %v342_v33 = vld [vmem:[%s5445_s9 + $0x2c8] sm:$0xff]  ;;  %v341_v36 = vld [vmem:[%s5445_s9 + $0x2c0] sm:$0xff] }
  0xe0   : > { %v710_v50 = vpop.xlane.xlu0 %709  ;;  %v1346_v57 = vmul.f32 0.020408163, %v713_v48 }
  0xe1   : > { %v2351_v53 = vsel %vm2249_vm4, %v2350_v41, %v5652_v29  ;;  %v2013_v54 = vunpack.c.l.b16 %v1561_v43  ;;  %v2014_v56 = vunpack.c.h.b16 %v1561_v43  ;;  %v1345_v37 = vmul.f32 0.020408163, %v710_v50 }
  0xe2   : > { %v5753_v60 = vsel %vm2256_vm5, %v2355_v42, %v2351_v53  ;;  %1240 = vadd.xlane.f32.xlu1 %v1239_v51  ;;  %v777_v43 = vsel %vm509_vm0, %v342_v33, 0.0  ;;  %v774_v50 = vsel %vm509_vm0, %v341_v36, 0.0  ;;  %v356_v51 = vld [vmem:[%s5445_s9 + $0x338] sm:$0xff] }
  0xe3   : > { %v2508_v61 = vrot.slane %v2013_v54, %v5733_v23  ;;  %v2513_v62 = vrot.slane %v2014_v56, %v5736_v24  ;;  %v1568_v2 = vpack.c.bf16 %v1346_v57, %v1345_v37  ;;  %1237 = vadd.xlane.f32.xlu0 %v1236_v52  ;;  %v803_v29 = vpop.xlane.xlu1 %802  ;;  %v355_v52 = vld [vmem:[%s5445_s9 + $0x330] sm:$0xff]  ;;  %v2810_v57 = vsel %vm2228_vm1, %v2809_v40, %v2805_v39 }
  0xe4   : > { %v800_v3 = vpop.xlane.xlu0 %799  ;;  %v1376_v9 = vmul.f32 0.020408163, %v803_v29 }
  0xe5   : > { %v2509_v8 = vsel %vm2249_vm4, %v2508_v61, %v5673_v55  ;;  %v1375_v10 = vmul.f32 0.020408163, %v800_v3  ;;  %v2027_v13 = vunpack.c.l.b16 %v1568_v2  ;;  %v2028_v14 = vunpack.c.h.b16 %v1568_v2  ;;  %v404_v3 = vld [vmem:[%s5445_s9 + $0x4b8] sm:$0xff] }
  0xe6   : > { %v5765_v11 = vsel %vm2256_vm5, %v2513_v62, %v2509_v8  ;;  %538 = vadd.xlane.f32.xlu1 %v537_v4  ;;  %v819_v61 = vsel %vm509_vm0, %v356_v51, 0.0  ;;  %v816_v62 = vsel %vm509_vm0, %v355_v52, 0.0  ;;  %v403_v4 = vld [vmem:[%s5445_s9 + $0x4b0] sm:$0xff]  ;;  %v480_v52 = vld [vmem:[%s5445_s9 + $0x718] sm:$0xff] }
  0xe7   : > { %v5768_v17 = vpack.c.bf16 %v1376_v9, %v1375_v10  ;;  %v2577_v55 = vrot.slane %v2027_v13, %v5628_v63  ;;  %v2582_v21 = vrot.slane %v2028_v14, %v5631_v0  ;;  %535 = vadd.xlane.f32.xlu0 %v534_v5  ;;  %v857_v22 = vpop.xlane.xlu1 %856  ;;  %v963_v9 = vsel %vm509_vm0, %v404_v3, 0.0 }
  0xe8   : > { %v854_v26 = vpop.xlane.xlu0 %853  ;;  %v1394_v28 = vmul.f32 0.020408163, %v857_v22  ;;  %v960_v10 = vsel %vm509_vm0, %v403_v4, 0.0 }
  0xe9   : > { %v1393_v30 = vmul.f32 0.020408163, %v854_v26  ;;  %v2578_v34 = vsel %vm2235_vm2, %v2577_v55, %v2573_v27 }
  0xea   : > { %v5781_v12 = vsel %vm2242_vm3, %v2582_v21, %v2578_v34  ;;  %634 = vadd.xlane.f32.xlu1 %v633_v18 }
  0xeb   : > { %v1592_v38 = vpack.c.bf16 %v1394_v28, %v1393_v30  ;;  %631 = vadd.xlane.f32.xlu0 %v630_v31  ;;  %v947_v41 = vpop.xlane.xlu1 %946  ;;  %v1005_v28 = vsel %vm509_vm0, %v418_v19, 0.0  ;;  %v1002_v30 = vsel %vm509_vm0, %v417_v20, 0.0 }
  0xec   : > { %v944_v42 = vpop.xlane.xlu0 %943  ;;  %v1424_v48 = vmul.f32 0.020408163, %v947_v41  ;;  %v465_v41 = vld [vmem:[%s5445_s9 + $0x6a0] sm:$0xff] }
  0xed   : > { %v2075_v44 = vunpack.c.l.b16 %v1592_v38  ;;  %v2076_v47 = vunpack.c.h.b16 %v1592_v38  ;;  %v1423_v53 = vmul.f32 0.020408163, %v944_v42  ;;  %v466_v38 = vld [vmem:[%s5445_s9 + $0x6a8] sm:$0xff] }
  0xee   : > { %778 = vadd.xlane.f32.xlu1 %v777_v43  ;;  %v1149_v51 = vsel %vm509_vm0, %v466_v38, 0.0  ;;  %v311_v38 = vld [vmem:[%s5445_s9 + $0x1d0] sm:$0xff] }
  0xef   : > { %v2814_v54 = vrot.slane %v2075_v44, %v5628_v63  ;;  %v2819_v56 = vrot.slane %v2076_v47, %v5631_v0  ;;  %v5792_v58 = vpack.c.bf16 %v1424_v48, %v1423_v53  ;;  %775 = vadd.xlane.f32.xlu0 %v774_v50  ;;  %v527_v59 = vpop.xlane.xlu1 %526  ;;  %v2057_v44 = vunpack.c.l.b16 %v5768_v17  ;;  %v479_v53 = vld [vmem:[%s5445_s9 + $0x710] sm:$0xff] }
  0xf0   : > { %v524_v37 = vpop.xlane.xlu0 %523  ;;  %v1284_v2 = vmul.f32 0.020408163, %v527_v59  ;;  %v1146_v59 = vsel %vm509_vm0, %v465_v41, 0.0 }
  0xf1   : > { %v2815_v1 = vsel %vm2235_vm2, %v2814_v54, %v2810_v57  ;;  %v1283_v29 = vmul.f32 0.020408163, %v524_v37 }
  0xf2   : > { %v5800_v5 = vsel %vm2242_vm3, %v2819_v56, %v2815_v1  ;;  %820 = vadd.xlane.f32.xlu1 %v819_v61  ;;  %v1191_v1 = vsel %vm509_vm0, %v480_v52, 0.0  ;;  %v326_v52 = vld [vmem:[%s5445_s9 + $0x248] sm:$0xff] }
  0xf3   : > { %v1537_v6 = vpack.c.bf16 %v1284_v2, %v1283_v29  ;;  %817 = vadd.xlane.f32.xlu0 %v816_v62  ;;  %v623_v7 = vpop.xlane.xlu1 %622  ;;  %v1188_v2 = vsel %vm509_vm0, %v479_v53, 0.0  ;;  %v2726_v29 = vrot.slane %v2057_v44, %v5614_v46 }
  0xf4   : > { %v620_v8 = vpop.xlane.xlu0 %619  ;;  %v1316_v15 = vmul.f32 0.020408163, %v623_v7 }
  0xf5   : > { %v1965_v13 = vunpack.c.l.b16 %v1537_v6  ;;  %v1966_v14 = vunpack.c.h.b16 %v1537_v6  ;;  %v1315_v18 = vmul.f32 0.020408163, %v620_v8 }
  0xf6   : > { %964 = vadd.xlane.f32.xlu1 %v963_v9 }
  0xf7   : > { %v2248_v55 = vrot.slane %v1965_v13, %v5733_v23  ;;  %v2255_v21 = vrot.slane %v1966_v14, %v5736_v24  ;;  %v1553_v22 = vpack.c.bf16 %v1316_v15, %v1315_v18  ;;  %961 = vadd.xlane.f32.xlu0 %v960_v10  ;;  %v767_v26 = vpop.xlane.xlu1 %766  ;;  %v280_v14 = vld [vmem:[%s5445_s9 + $0xd8] sm:$0xff]  ;;  %v279_v15 = vld [vmem:[%s5445_s9 + $0xd0] sm:$0xff] }
  0xf8   : > { %v764_v27 = vpop.xlane.xlu0 %763  ;;  %v1364_v36 = vmul.f32 0.020408163, %v767_v26 }
  0xf9   : > { %v2250_v31 = vsel %vm2249_vm4, %v2248_v55, %v5693_v32  ;;  %v1997_v33 = vunpack.c.l.b16 %v1553_v22  ;;  %v1998_v34 = vunpack.c.h.b16 %v1553_v22  ;;  %v1363_v40 = vmul.f32 0.020408163, %v764_v27 }
  0xfa   : > { %v5814_v39 = vsel %vm2256_vm5, %v2255_v21, %v2250_v31  ;;  %1006 = vadd.xlane.f32.xlu1 %v1005_v28  ;;  %v2058_v32 = vunpack.c.h.b16 %v5768_v17  ;;  %v591_v28 = vsel %vm509_vm0, %v280_v14, 0.0  ;;  %v2106_v31 = vunpack.c.h.b16 %v5792_v58 }
  0xfb   : > { %v2429_v42 = vrot.slane %v1997_v33, %v5733_v23  ;;  %v2434_v43 = vrot.slane %v1998_v34, %v5736_v24  ;;  %v1577_v47 = vpack.c.bf16 %v1364_v36, %v1363_v40  ;;  %1003 = vadd.xlane.f32.xlu0 %v1002_v30  ;;  %v809_v48 = vpop.xlane.xlu1 %808  ;;  %v2105_v30 = vunpack.c.l.b16 %v5792_v58  ;;  %v312_v36 = vld [vmem:[%s5445_s9 + $0x1d8] sm:$0xff] }
  0xfc   : > { %v806_v50 = vpop.xlane.xlu0 %805  ;;  %v1378_v56 = vmul.f32 0.020408163, %v809_v48  ;;  %v684_v58 = vsel %vm509_vm0, %v311_v38, 0.0  ;;  %v2967_v48 = vrot.slane %v2106_v31, %v5617_v49 }
  0xfd   : > { %v2430_v54 = vsel %vm2249_vm4, %v2429_v42, %v5709_v45  ;;  %v1377_v57 = vmul.f32 0.020408163, %v806_v50  ;;  %v2045_v61 = vunpack.c.l.b16 %v1577_v47  ;;  %v2046_v17 = vunpack.c.h.b16 %v1577_v47 }
  0xfe   : > { %v5828_v37 = vsel %vm2256_vm5, %v2434_v43, %v2430_v54  ;;  %1150 = vadd.xlane.f32.xlu1 %v1149_v51  ;;  %v2730_v45 = vrot.slane %v2058_v32, %v5617_v49  ;;  %v687_v32 = vsel %vm509_vm0, %v312_v36, 0.0  ;;  %v2963_v47 = vrot.slane %v2105_v30, %v5614_v46  ;;  %v387_v30 = vld [vmem:[%s5445_s9 + $0x430] sm:$0xff] }
  0xff   : > { %v1584_v62 = vpack.c.bf16 %v1378_v56, %v1377_v57  ;;  %v2666_v3 = vrot.slane %v2045_v61, %v5733_v23  ;;  %v2671_v4 = vrot.slane %v2046_v17, %v5736_v24  ;;  %1147 = vadd.xlane.f32.xlu0 %v1146_v59  ;;  %v899_v6 = vpop.xlane.xlu1 %898  ;;  %v325_v56 = vld [vmem:[%s5445_s9 + $0x240] sm:$0xff]  ;;  %v2258_v59 = vadd.s32 4294967248, %v5597_v25 }
 0x100   : > { %v896_v7 = vpop.xlane.xlu0 %895  ;;  %v1408_v10 = vmul.f32 0.020408163, %v899_v6  ;;  %v2731_v22 = vsel %vm2228_vm1, %v2730_v45, %v2726_v29  ;;  %v2265_v61 = vadd.s32 4294967240, %v5597_v25  ;;  %v729_v29 = vsel %vm509_vm0, %v326_v52, 0.0 }
 0x101   : > { %v2059_v8 = vunpack.c.l.b16 %v1584_v62  ;;  %v2060_v9 = vunpack.c.h.b16 %v1584_v62  ;;  %v1407_v13 = vmul.f32 0.020408163, %v896_v7  ;;  %v2667_v18 = vsel %vm2249_vm4, %v2666_v3, %v5730_v16  ;;  %v374_v7 = vld [vmem:[%s5445_s9 + $0x3c8] sm:$0xff] }
 0x102   : > { %v5841_v19 = vsel %vm2256_vm5, %v2671_v4, %v2667_v18  ;;  %1192 = vadd.xlane.f32.xlu1 %v1191_v1  ;;  %v588_v16 = vsel %vm509_vm0, %v279_v15, 0.0  ;;  %v2968_v45 = vsel %vm2228_vm1, %v2967_v48, %v2963_v47  ;;  %v726_v6 = vsel %vm509_vm0, %v325_v56, 0.0  ;;  %v436_v47 = vld [vmem:[%s5445_s9 + $0x5b8] sm:$0xff]  ;;  %v435_v48 = vld [vmem:[%s5445_s9 + $0x5b0] sm:$0xff] }
 0x103   : > { %v2735_v20 = vrot.slane %v2059_v8, %v5628_v63  ;;  %v2740_v55 = vrot.slane %v2060_v9, %v5631_v0  ;;  %v5845_v21 = vpack.c.bf16 %v1408_v10, %v1407_v13  ;;  %1189 = vadd.xlane.f32.xlu0 %v1188_v2  ;;  %v953_v26 = vpop.xlane.xlu1 %952  ;;  %v373_v9 = vld [vmem:[%s5445_s9 + $0x3c0] sm:$0xff]  ;;  %v5880_v13 = vsub.s32 %v2258_v59, %v5602_v35 }
 0x104   : > { %v950_v27 = vpop.xlane.xlu0 %949  ;;  %v1426_v34 = vmul.f32 0.020408163, %v953_v26  ;;  %v5883_v14 = vsub.s32 %v2265_v61, %v5602_v35  ;;  %v1059_v61 = vsel %vm509_vm0, %v436_v47, 0.0 }
 0x105   : > { %v2736_v33 = vsel %vm2235_vm2, %v2735_v20, %v2731_v22  ;;  %v1425_v41 = vmul.f32 0.020408163, %v950_v27 }
 0x106   : > { %v5856_v40 = vsel %vm2242_vm3, %v2740_v55, %v2736_v33  ;;  %592 = vadd.xlane.f32.xlu1 %v591_v28  ;;  %v873_v55 = vsel %vm509_vm0, %v374_v7, 0.0  ;;  %v870_v28 = vsel %vm509_vm0, %v373_v9, 0.0 }
 0x107   : > { %v1608_v42 = vpack.c.bf16 %v1426_v34, %v1425_v41  ;;  %589 = vadd.xlane.f32.xlu0 %v588_v16  ;;  %v1043_v43 = vpop.xlane.xlu1 %1042  ;;  %v388_v16 = vld [vmem:[%s5445_s9 + $0x438] sm:$0xff] }
 0x108   : > { %v1040_v44 = vpop.xlane.xlu0 %1039  ;;  %v1456_v50 = vmul.f32 0.020408163, %v1043_v43  ;;  %v912_v43 = vsel %vm509_vm0, %v387_v30, 0.0  ;;  %v498_v30 = vld [vmem:[%s5445_s9 + $0x7a8] sm:$0xff] }
 0x109   : > { %v1455_v51 = vmul.f32 0.020408163, %v1040_v44  ;;  %v2107_v53 = vunpack.c.l.b16 %v1608_v42  ;;  %v2108_v54 = vunpack.c.h.b16 %v1608_v42  ;;  %v915_v42 = vsel %vm509_vm0, %v388_v16, 0.0 }
 0x10a   : > { %688 = vadd.xlane.f32.xlu1 %v687_v32 }
 0x10b   : > { %v5864_v57 = vpack.c.bf16 %v1456_v50, %v1455_v51  ;;  %v2972_v17 = vrot.slane %v2107_v53, %v5628_v63  ;;  %v2977_v62 = vrot.slane %v2108_v54, %v5631_v0  ;;  %685 = vadd.xlane.f32.xlu0 %v684_v58  ;;  %v581_v1 = vpop.xlane.xlu1 %580 }
 0x10c   : > { %v578_v2 = vpop.xlane.xlu0 %577  ;;  %v1302_v3 = vmul.f32 0.020408163, %v581_v1 }
 0x10d   : > { %v1301_v4 = vmul.f32 0.020408163, %v578_v2  ;;  %v2973_v8 = vsel %vm2235_vm2, %v2972_v17, %v2968_v45  ;;  %v1056_v17 = vsel %vm509_vm0, %v435_v48, 0.0  ;;  %v450_v45 = vld [vmem:[%s5445_s9 + $0x628] sm:$0xff] }
 0x10e   : > { %v5877_v10 = vsel %vm2242_vm3, %v2977_v62, %v2973_v8  ;;  %730 = vadd.xlane.f32.xlu1 %v729_v29 }
 0x10f   : > { %v1546_v15 = vpack.c.bf16 %v1302_v3, %v1301_v4  ;;  %727 = vadd.xlane.f32.xlu0 %v726_v6  ;;  %v677_v18 = vpop.xlane.xlu1 %676  ;;  %v449_v3 = vld [vmem:[%s5445_s9 + $0x620] sm:$0xff] }
 0x110   : > { %v674_v20 = vpop.xlane.xlu0 %673  ;;  %v1334_v27 = vmul.f32 0.020408163, %v677_v18  ;;  %v2090_v18 = vunpack.c.h.b16 %v5845_v21 }
 0x111   : > { %v1983_v22 = vunpack.c.l.b16 %v1546_v15  ;;  %v1984_v26 = vunpack.c.h.b16 %v1546_v15  ;;  %v1333_v31 = vmul.f32 0.020408163, %v674_v20  ;;  %v2089_v15 = vunpack.c.l.b16 %v5845_v21 }
 0x112   : > { %874 = vadd.xlane.f32.xlu1 %v873_v55 }
 0x113   : > { %v2360_v33 = vrot.slane %v1983_v22, %v5880_v13  ;;  %v2365_v34 = vrot.slane %v1984_v26, %v5883_v14  ;;  %v1562_v36 = vpack.c.bf16 %v1334_v27, %v1333_v31  ;;  %871 = vadd.xlane.f32.xlu0 %v870_v28  ;;  %v719_v38 = vpop.xlane.xlu1 %718  ;;  %v1098_v22 = vsel %vm509_vm0, %v449_v3, 0.0  ;;  %v497_v31 = vld [vmem:[%s5445_s9 + $0x7a0] sm:$0xff] }
 0x114   : > { %v716_v41 = vpop.xlane.xlu0 %715  ;;  %v1348_v32 = vmul.f32 0.020408163, %v719_v38  ;;  %v2884_v38 = vrot.slane %v2089_v15, %v5614_v46 }
 0x115   : > { %v2361_v44 = vsel %vm2263_vm6, %v2360_v33, %v5753_v60  ;;  %v1347_v58 = vmul.f32 0.020408163, %v716_v41  ;;  %v2015_v51 = vunpack.c.l.b16 %v1562_v36  ;;  %v2016_v52 = vunpack.c.h.b16 %v1562_v36 }
 0x116   : > { %v5898_v50 = vsel %vm2270_vm7, %v2365_v34, %v2361_v44  ;;  %916 = vadd.xlane.f32.xlu1 %v915_v42  ;;  %v1242_v44 = vsel %vm509_vm0, %v497_v31, 0.0  ;;  %v343_v31 = vld [vmem:[%s5445_s9 + $0x2d0] sm:$0xff] }
 0x117   : > { %v1569_v53 = vpack.c.bf16 %v1348_v32, %v1347_v58  ;;  %v2518_v54 = vrot.slane %v2015_v51, %v5880_v13  ;;  %v2523_v56 = vrot.slane %v2016_v52, %v5883_v14  ;;  %913 = vadd.xlane.f32.xlu0 %v912_v43  ;;  %v863_v59 = vpop.xlane.xlu1 %862  ;;  %v1245_v43 = vsel %vm509_vm0, %v498_v30, 0.0  ;;  %v264_v32 = vld [vmem:[%s5445_s9 + $0x58] sm:$0xff] }
 0x118   : > { %v860_v60 = vpop.xlane.xlu0 %859  ;;  %v1396_v2 = vmul.f32 0.020408163, %v863_v59  ;;  %v2888_v58 = vrot.slane %v2090_v18, %v5617_v49  ;;  %v344_v30 = vld [vmem:[%s5445_s9 + $0x2d8] sm:$0xff] }
 0x119   : > { %v2029_v62 = vunpack.c.l.b16 %v1569_v53  ;;  %v2030_v1 = vunpack.c.h.b16 %v1569_v53  ;;  %v1395_v29 = vmul.f32 0.020408163, %v860_v60  ;;  %v2519_v4 = vsel %vm2263_vm6, %v2518_v54, %v5765_v11 }
 0x11a   : > { %v5909_v6 = vsel %vm2270_vm7, %v2523_v56, %v2519_v4  ;;  %1060 = vadd.xlane.f32.xlu1 %v1059_v61  ;;  %v1101_v11 = vsel %vm509_vm0, %v450_v45, 0.0  ;;  %v263_v56 = vld [vmem:[%s5445_s9 + $0x50] sm:$0xff]  ;;  %v543_v60 = vsel %vm509_vm0, %v264_v32, 0.0  ;;  %v2137_v61 = vunpack.c.l.b16 %v5864_v57 }
 0x11b   : > { %v2587_v7 = vrot.slane %v2029_v62, %v5733_v23  ;;  %v2592_v8 = vrot.slane %v2030_v1, %v5736_v24  ;;  %v1593_v9 = vpack.c.bf16 %v1396_v2, %v1395_v29  ;;  %1057 = vadd.xlane.f32.xlu0 %v1056_v17  ;;  %v905_v20 = vpop.xlane.xlu1 %904  ;;  %v2138_v17 = vunpack.c.h.b16 %v5864_v57 }
 0x11c   : > { %v902_v55 = vpop.xlane.xlu0 %901  ;;  %v1410_v16 = vmul.f32 0.020408163, %v905_v20  ;;  %v2889_v29 = vsel %vm2228_vm1, %v2888_v58, %v2884_v38  ;;  %v540_v4 = vsel %vm509_vm0, %v263_v56, 0.0  ;;  %v3121_v18 = vrot.slane %v2137_v61, %v5614_v46 }
 0x11d   : > { %v2588_v26 = vsel %vm2249_vm4, %v2587_v7, %v5781_v12  ;;  %v2077_v27 = vunpack.c.l.b16 %v1593_v9  ;;  %v2078_v28 = vunpack.c.h.b16 %v1593_v9  ;;  %v1409_v21 = vmul.f32 0.020408163, %v902_v55  ;;  %v296_v7 = vld [vmem:[%s5445_s9 + $0x158] sm:$0xff]  ;;  %v295_v9 = vld [vmem:[%s5445_s9 + $0x150] sm:$0xff] }
 0x11e   : > { %v5922_v33 = vsel %vm2256_vm5, %v2592_v8, %v2588_v26  ;;  %1102 = vadd.xlane.f32.xlu1 %v1101_v11  ;;  %v3125_v20 = vrot.slane %v2138_v17, %v5617_v49 }
 0x11f   : > { %v2824_v34 = vrot.slane %v2077_v27, %v5733_v23  ;;  %v2829_v36 = vrot.slane %v2078_v28, %v5736_v24  ;;  %v1600_v41 = vpack.c.bf16 %v1410_v16, %v1409_v21  ;;  %1099 = vadd.xlane.f32.xlu0 %v1098_v22  ;;  %v995_v12 = vpop.xlane.xlu1 %994  ;;  %v639_v22 = vsel %vm509_vm0, %v296_v7, 0.0 }
 0x120   : > { %v992_v42 = vpop.xlane.xlu0 %991  ;;  %v1440_v48 = vmul.f32 0.020408163, %v995_v12  ;;  %v636_v16 = vsel %vm509_vm0, %v295_v9, 0.0  ;;  %v3126_v38 = vsel %vm2228_vm1, %v3125_v20, %v3121_v18 }
 0x121   : > { %v2825_v47 = vsel %vm2249_vm4, %v2824_v34, %v5800_v5  ;;  %v1439_v51 = vmul.f32 0.020408163, %v992_v42  ;;  %v2091_v53 = vunpack.c.l.b16 %v1600_v41  ;;  %v2092_v54 = vunpack.c.h.b16 %v1600_v41 }
 0x122   : > { %v5934_v52 = vsel %vm2256_vm5, %v2829_v36, %v2825_v47  ;;  %1246 = vadd.xlane.f32.xlu1 %v1245_v43  ;;  %v783_v43 = vsel %vm509_vm0, %v344_v30, 0.0 }
 0x123   : > { %v5937_v59 = vpack.c.bf16 %v1440_v48, %v1439_v51  ;;  %v2893_v5 = vrot.slane %v2091_v53, %v5628_v63  ;;  %v2898_v62 = vrot.slane %v2092_v54, %v5631_v0  ;;  %1243 = vadd.xlane.f32.xlu0 %v1242_v44  ;;  %v1049_v1 = vpop.xlane.xlu1 %1048  ;;  %v780_v44 = vsel %vm509_vm0, %v343_v31, 0.0  ;;  %v358_v48 = vld [vmem:[%s5445_s9 + $0x348] sm:$0xff]  ;;  %v357_v51 = vld [vmem:[%s5445_s9 + $0x340] sm:$0xff] }
 0x124   : > { %v1046_v2 = vpop.xlane.xlu0 %1045  ;;  %v1458_v45 = vmul.f32 0.020408163, %v1049_v1  ;;  %v825_v61 = vsel %vm509_vm0, %v358_v48, 0.0  ;;  %v822_v17 = vsel %vm509_vm0, %v357_v51, 0.0 }
 0x125   : > { %v1457_v3 = vmul.f32 0.020408163, %v1046_v2  ;;  %v2894_v8 = vsel %vm2235_vm2, %v2893_v5, %v2889_v29  ;;  %v406_v29 = vld [vmem:[%s5445_s9 + $0x4c8] sm:$0xff] }
 0x126   : > { %v5950_v57 = vsel %vm2242_vm3, %v2898_v62, %v2894_v8  ;;  %544 = vadd.xlane.f32.xlu1 %v543_v60 }
 0x127   : > { %v1624_v15 = vpack.c.bf16 %v1458_v45, %v1457_v3  ;;  %541 = vadd.xlane.f32.xlu0 %v540_v4  ;;  %v1139_v55 = vpop.xlane.xlu1 %1138  ;;  %v405_v45 = vld [vmem:[%s5445_s9 + $0x4c0] sm:$0xff] }
 0x128   : > { %v1136_v11 = vpop.xlane.xlu0 %1135  ;;  %v1488_v28 = vmul.f32 0.020408163, %v1139_v55  ;;  %v966_v18 = vsel %vm509_vm0, %v405_v45, 0.0  ;;  %v481_v45 = vld [vmem:[%s5445_s9 + $0x720] sm:$0xff] }
 0x129   : > { %v2139_v26 = vunpack.c.l.b16 %v1624_v15  ;;  %v2140_v27 = vunpack.c.h.b16 %v1624_v15  ;;  %v1487_v21 = vmul.f32 0.020408163, %v1136_v11  ;;  %v969_v15 = vsel %vm509_vm0, %v406_v29, 0.0  ;;  %v482_v29 = vld [vmem:[%s5445_s9 + $0x728] sm:$0xff] }
 0x12a   : > { %640 = vadd.xlane.f32.xlu1 %v639_v22 }
 0x12b   : > { %v3130_v34 = vrot.slane %v2139_v26, %v5628_v63  ;;  %v3135_v36 = vrot.slane %v2140_v27, %v5631_v0  ;;  %v5961_v41 = vpack.c.bf16 %v1488_v28, %v1487_v21  ;;  %637 = vadd.xlane.f32.xlu0 %v636_v16  ;;  %v533_v12 = vpop.xlane.xlu1 %532  ;;  %v420_v26 = vld [vmem:[%s5445_s9 + $0x538] sm:$0xff]  ;;  %v419_v27 = vld [vmem:[%s5445_s9 + $0x530] sm:$0xff] }
 0x12c   : > { %v530_v42 = vpop.xlane.xlu0 %529  ;;  %v1286_v58 = vmul.f32 0.020408163, %v533_v12 }
 0x12d   : > { %v3131_v32 = vsel %vm2235_vm2, %v3130_v34, %v3126_v38  ;;  %v1285_v47 = vmul.f32 0.020408163, %v530_v42  ;;  %v1008_v38 = vsel %vm509_vm0, %v419_v27, 0.0 }
 0x12e   : > { %v5969_v53 = vsel %vm2242_vm3, %v3135_v36, %v3131_v32  ;;  %784 = vadd.xlane.f32.xlu1 %v783_v43  ;;  %v1011_v36 = vsel %vm509_vm0, %v420_v26, 0.0  ;;  %v467_v32 = vld [vmem:[%s5445_s9 + $0x6b0] sm:$0xff] }
 0x12f   : > { %v1538_v54 = vpack.c.bf16 %v1286_v58, %v1285_v47  ;;  %781 = vadd.xlane.f32.xlu0 %v780_v44  ;;  %v629_v56 = vpop.xlane.xlu1 %628  ;;  %v468_v44 = vld [vmem:[%s5445_s9 + $0x6b8] sm:$0xff] }
 0x130   : > { %v626_v60 = vpop.xlane.xlu0 %625  ;;  %v1318_v1 = vmul.f32 0.020408163, %v629_v56 }
 0x131   : > { %v1967_v5 = vunpack.c.l.b16 %v1538_v54  ;;  %v1968_v62 = vunpack.c.h.b16 %v1538_v54  ;;  %v1317_v2 = vmul.f32 0.020408163, %v626_v60 }
 0x132   : > { %826 = vadd.xlane.f32.xlu1 %v825_v61  ;;  %v1155_v61 = vsel %vm509_vm0, %v468_v44, 0.0 }
 0x133   : > { %v2262_v3 = vrot.slane %v1967_v5, %v5880_v13  ;;  %v2269_v4 = vrot.slane %v1968_v62, %v5883_v14  ;;  %v1554_v7 = vpack.c.bf16 %v1318_v1, %v1317_v2  ;;  %823 = vadd.xlane.f32.xlu0 %v822_v17  ;;  %v773_v8 = vpop.xlane.xlu1 %772  ;;  %v1152_v17 = vsel %vm509_vm0, %v467_v32, 0.0 }
 0x134   : > { %v770_v9 = vpop.xlane.xlu0 %769  ;;  %v1366_v22 = vmul.f32 0.020408163, %v773_v8 }
 0x135   : > { %v2264_v20 = vsel %vm2263_vm6, %v2262_v3, %v5814_v39  ;;  %v1999_v55 = vunpack.c.l.b16 %v1554_v7  ;;  %v2000_v11 = vunpack.c.h.b16 %v1554_v7  ;;  %v1365_v16 = vmul.f32 0.020408163, %v770_v9 }
 0x136   : > { %v5984_v28 = vsel %vm2270_vm7, %v2269_v4, %v2264_v20  ;;  %970 = vadd.xlane.f32.xlu1 %v969_v15  ;;  %v2121_v15 = vunpack.c.l.b16 %v5937_v59 }
 0x137   : > { %v2439_v30 = vrot.slane %v1999_v55, %v5880_v13  ;;  %v2444_v31 = vrot.slane %v2000_v11, %v5883_v14  ;;  %v1578_v21 = vpack.c.bf16 %v1366_v22, %v1365_v16  ;;  %967 = vadd.xlane.f32.xlu0 %v966_v18  ;;  %v815_v34 = vpop.xlane.xlu1 %814  ;;  %v2122_v18 = vunpack.c.h.b16 %v5937_v59 }
 0x138   : > { %v812_v39 = vpop.xlane.xlu0 %811  ;;  %v1380_v42 = vmul.f32 0.020408163, %v815_v34  ;;  %v1197_v55 = vsel %vm509_vm0, %v482_v29, 0.0  ;;  %v2169_v29 = vunpack.c.l.b16 %v5961_v41 }
 0x139   : > { %v2440_v12 = vsel %vm2263_vm6, %v2439_v30, %v5828_v37  ;;  %v1379_v43 = vmul.f32 0.020408163, %v812_v39  ;;  %v2047_v47 = vunpack.c.l.b16 %v1578_v21  ;;  %v2048_v48 = vunpack.c.h.b16 %v1578_v21  ;;  %v282_v30 = vld [vmem:[%s5445_s9 + $0xe8] sm:$0xff] }
 0x13a   : > { %v5995_v58 = vsel %vm2270_vm7, %v2444_v31, %v2440_v12  ;;  %1012 = vadd.xlane.f32.xlu1 %v1011_v36  ;;  %v281_v31 = vld [vmem:[%s5445_s9 + $0xe0] sm:$0xff]  ;;  %v3046_v44 = vrot.slane %v2122_v18, %v5617_v49  ;;  %v327_v18 = vld [vmem:[%s5445_s9 + $0x250] sm:$0xff] }
 0x13b   : > { %v1585_v51 = vpack.c.bf16 %v1380_v42, %v1379_v43  ;;  %v2676_v54 = vrot.slane %v2047_v47, %v5880_v13  ;;  %v2681_v56 = vrot.slane %v2048_v48, %v5883_v14  ;;  %1009 = vadd.xlane.f32.xlu0 %v1008_v38  ;;  %v959_v60 = vpop.xlane.xlu1 %958  ;;  %v597_v38 = vsel %vm509_vm0, %v282_v30, 0.0  ;;  %v314_v42 = vld [vmem:[%s5445_s9 + $0x1e8] sm:$0xff]  ;;  %v376_v30 = vld [vmem:[%s5445_s9 + $0x3d8] sm:$0xff] }
 0x13c   : > { %v956_v37 = vpop.xlane.xlu0 %955  ;;  %v1428_v1 = vmul.f32 0.020408163, %v959_v60  ;;  %v594_v12 = vsel %vm509_vm0, %v281_v31, 0.0  ;;  %v3042_v43 = vrot.slane %v2121_v15, %v5614_v46 }
 0x13d   : > { %v2061_v5 = vunpack.c.l.b16 %v1585_v51  ;;  %v2062_v62 = vunpack.c.h.b16 %v1585_v51  ;;  %v1427_v2 = vmul.f32 0.020408163, %v956_v37  ;;  %v2677_v3 = vsel %vm2263_vm6, %v2676_v54, %v5841_v19  ;;  %v313_v51 = vld [vmem:[%s5445_s9 + $0x1e0] sm:$0xff] }
 0x13e   : > { %v6006_v4 = vsel %vm2270_vm7, %v2681_v56, %v2677_v3  ;;  %1156 = vadd.xlane.f32.xlu1 %v1155_v61  ;;  %v1194_v19 = vsel %vm509_vm0, %v481_v45, 0.0  ;;  %v693_v61 = vsel %vm509_vm0, %v314_v42, 0.0  ;;  %v2170_v45 = vunpack.c.h.b16 %v5961_v41 }
 0x13f   : > { %v2745_v7 = vrot.slane %v2061_v5, %v5733_v23  ;;  %v2750_v8 = vrot.slane %v2062_v62, %v5736_v24  ;;  %v1609_v9 = vpack.c.bf16 %v1428_v1, %v1427_v2  ;;  %1153 = vadd.xlane.f32.xlu0 %v1152_v17  ;;  %v1001_v20 = vpop.xlane.xlu1 %1000  ;;  %v690_v1 = vsel %vm509_vm0, %v313_v51, 0.0 }
 0x140   : > { %v1442_v27 = vmul.f32 0.020408163, %v1001_v20  ;;  %v998_v16 = vpop.xlane.xlu0 %997  ;;  %v3047_v2 = vsel %vm2228_vm1, %v3046_v44, %v3042_v43  ;;  %v3279_v41 = vrot.slane %v2169_v29, %v5614_v46  ;;  %v879_v44 = vsel %vm509_vm0, %v376_v30, 0.0 }
 0x141   : > { %v2746_v11 = vsel %vm2249_vm4, %v2745_v7, %v5856_v40  ;;  %v2109_v22 = vunpack.c.l.b16 %v1609_v9  ;;  %v2110_v26 = vunpack.c.h.b16 %v1609_v9  ;;  %v1441_v59 = vmul.f32 0.020408163, %v998_v16 }
 0x142   : > { %v6019_v21 = vsel %vm2256_vm5, %v2750_v8, %v2746_v11  ;;  %1198 = vadd.xlane.f32.xlu1 %v1197_v55  ;;  %v328_v8 = vld [vmem:[%s5445_s9 + $0x258] sm:$0xff]  ;;  %v732_v16 = vsel %vm509_vm0, %v327_v18, 0.0 }
 0x143   : > { %v2982_v34 = vrot.slane %v2109_v22, %v5733_v23  ;;  %v2987_v39 = vrot.slane %v2110_v26, %v5736_v24  ;;  %v1616_v36 = vpack.c.bf16 %v1442_v27, %v1441_v59  ;;  %1195 = vadd.xlane.f32.xlu0 %v1194_v19  ;;  %v1091_v40 = vpop.xlane.xlu1 %1090  ;;  %v735_v11 = vsel %vm509_vm0, %v328_v8, 0.0  ;;  %v438_v8 = vld [vmem:[%s5445_s9 + $0x5c8] sm:$0xff] }
 0x144   : > { %v1472_v47 = vmul.f32 0.020408163, %v1091_v40  ;;  %v1088_v48 = vpop.xlane.xlu0 %1087  ;;  %v3283_v22 = vrot.slane %v2170_v45, %v5617_v49  ;;  %v2279_v40 = vadd.s32 4294967224, %v5597_v25 }
 0x145   : > { %v2983_v32 = vsel %vm2249_vm4, %v2982_v34, %v5877_v10  ;;  %v2123_v56 = vunpack.c.l.b16 %v1616_v36  ;;  %v2124_v60 = vunpack.c.h.b16 %v1616_v36  ;;  %v1471_v37 = vmul.f32 0.020408163, %v1088_v48 }
 0x146   : > { %v6032_v54 = vsel %vm2256_vm5, %v2987_v39, %v2983_v32  ;;  %598 = vadd.xlane.f32.xlu1 %v597_v38  ;;  %v375_v39 = vld [vmem:[%s5445_s9 + $0x3d0] sm:$0xff]  ;;  %v2272_v36 = vadd.s32 4294967232, %v5597_v25  ;;  %v3284_v32 = vsel %vm2228_vm1, %v3283_v22, %v3279_v41 }
 0x147   : > { %v3051_v17 = vrot.slane %v2123_v56, %v5628_v63  ;;  %v3056_v5 = vrot.slane %v2124_v60, %v5631_v0  ;;  %v6037_v62 = vpack.c.bf16 %v1472_v47, %v1471_v37  ;;  %595 = vadd.xlane.f32.xlu0 %v594_v12  ;;  %v1145_v10 = vpop.xlane.xlu1 %1144  ;;  %v876_v51 = vsel %vm509_vm0, %v375_v39, 0.0  ;;  %v390_v56 = vld [vmem:[%s5445_s9 + $0x448] sm:$0xff] }
 0x148   : > { %v1490_v3 = vmul.f32 0.020408163, %v1145_v10  ;;  %v1142_v7 = vpop.xlane.xlu0 %1141  ;;  %v6074_v10 = vsub.s32 %v2279_v40, %v5602_v35  ;;  %v921_v29 = vsel %vm509_vm0, %v390_v56, 0.0  ;;  %v451_v40 = vld [vmem:[%s5445_s9 + $0x630] sm:$0xff]  ;;  %v500_v56 = vld [vmem:[%s5445_s9 + $0x7b8] sm:$0xff] }
 0x149   : > { %v3052_v9 = vsel %vm2235_vm2, %v3051_v17, %v3047_v2  ;;  %v1489_v15 = vmul.f32 0.020408163, %v1142_v7 }
 0x14a   : > { %v6047_v20 = vsel %vm2242_vm3, %v3056_v5, %v3052_v9  ;;  %694 = vadd.xlane.f32.xlu1 %v693_v61  ;;  %v389_v61 = vld [vmem:[%s5445_s9 + $0x440] sm:$0xff]  ;;  %v6071_v5 = vsub.s32 %v2272_v36, %v5602_v35 }
 0x14b   : > { %v1640_v55 = vpack.c.bf16 %v1490_v3, %v1489_v15  ;;  %691 = vadd.xlane.f32.xlu0 %v690_v1  ;;  %v1235_v19 = vpop.xlane.xlu1 %1234  ;;  %v918_v7 = vsel %vm509_vm0, %v389_v61, 0.0 }
 0x14c   : > { %v1520_v26 = vmul.f32 0.020408163, %v1235_v19  ;;  %v1232_v27 = vpop.xlane.xlu0 %1231 }
 0x14d   : > { %v2171_v31 = vunpack.c.l.b16 %v1640_v55  ;;  %v2172_v59 = vunpack.c.h.b16 %v1640_v55  ;;  %v1519_v34 = vmul.f32 0.020408163, %v1232_v27  ;;  %v437_v55 = vld [vmem:[%s5445_s9 + $0x5c0] sm:$0xff] }
 0x14e   : > { %736 = vadd.xlane.f32.xlu1 %v735_v11  ;;  %v1062_v30 = vsel %vm509_vm0, %v437_v55, 0.0  ;;  %v266_v55 = vld [vmem:[%s5445_s9 + $0x68] sm:$0xff] }
 0x14f   : > { %v3288_v38 = vrot.slane %v2171_v31, %v5628_v63  ;;  %v3293_v12 = vrot.slane %v2172_v59, %v5631_v0  ;;  %v6059_v42 = vpack.c.bf16 %v1520_v26, %v1519_v34  ;;  %733 = vadd.xlane.f32.xlu0 %v732_v16  ;;  %v587_v43 = vpop.xlane.xlu1 %586  ;;  %v1065_v26 = vsel %vm509_vm0, %v438_v8, 0.0  ;;  %v452_v31 = vld [vmem:[%s5445_s9 + $0x638] sm:$0xff] }
 0x150   : > { %v1304_v47 = vmul.f32 0.020408163, %v587_v43  ;;  %v584_v48 = vpop.xlane.xlu0 %583 }
 0x151   : > { %v3289_v60 = vsel %vm2235_vm2, %v3288_v38, %v3284_v32  ;;  %v1303_v37 = vmul.f32 0.020408163, %v584_v48 }
 0x152   : > { %v6068_v17 = vsel %vm2242_vm3, %v3293_v12, %v3289_v60  ;;  %880 = vadd.xlane.f32.xlu1 %v879_v44 }
 0x153   : > { %v1547_v1 = vpack.c.bf16 %v1304_v47, %v1303_v37  ;;  %877 = vadd.xlane.f32.xlu0 %v876_v51  ;;  %v683_v2 = vpop.xlane.xlu1 %682  ;;  %v1107_v47 = vsel %vm509_vm0, %v452_v31, 0.0  ;;  %v1104_v51 = vsel %vm509_vm0, %v451_v40, 0.0  ;;  %v298_v40 = vld [vmem:[%s5445_s9 + $0x168] sm:$0xff] }
 0x154   : > { %v1336_v45 = vmul.f32 0.020408163, %v683_v2  ;;  %v680_v3 = vpop.xlane.xlu0 %679  ;;  %v499_v2 = vld [vmem:[%s5445_s9 + $0x7b0] sm:$0xff] }
 0x155   : > { %v1985_v9 = vunpack.c.l.b16 %v1547_v1  ;;  %v1986_v15 = vunpack.c.h.b16 %v1547_v1  ;;  %v1335_v18 = vmul.f32 0.020408163, %v680_v3 }
 0x156   : > { %922 = vadd.xlane.f32.xlu1 %v921_v29 }
 0x157   : > { %v2370_v19 = vrot.slane %v1985_v9, %v6071_v5  ;;  %v2375_v11 = vrot.slane %v1986_v15, %v6074_v10  ;;  %v1563_v41 = vpack.c.bf16 %v1336_v45, %v1335_v18  ;;  %919 = vadd.xlane.f32.xlu0 %v918_v7  ;;  %v725_v22 = vpop.xlane.xlu1 %724  ;;  %v1251_v9 = vsel %vm509_vm0, %v500_v56, 0.0 }
 0x158   : > { %v1350_v27 = vmul.f32 0.020408163, %v725_v22  ;;  %v722_v16 = vpop.xlane.xlu0 %721  ;;  %v1248_v18 = vsel %vm509_vm0, %v499_v2, 0.0 }
 0x159   : > { %v2371_v59 = vsel %vm2277_vm8, %v2370_v19, %v5898_v50  ;;  %v2017_v34 = vunpack.c.l.b16 %v1563_v41  ;;  %v2018_v39 = vunpack.c.h.b16 %v1563_v41  ;;  %v1349_v36 = vmul.f32 0.020408163, %v722_v16 }
 0x15a   : > { %v6089_v38 = vsel %vm2284_vm9, %v2375_v11, %v2371_v59  ;;  %1066 = vadd.xlane.f32.xlu1 %v1065_v26  ;;  %v265_v26 = vld [vmem:[%s5445_s9 + $0x60] sm:$0xff] }
 0x15b   : > { %v2528_v12 = vrot.slane %v2017_v34, %v6071_v5  ;;  %v2533_v43 = vrot.slane %v2018_v39, %v6074_v10  ;;  %v1570_v44 = vpack.c.bf16 %v1350_v27, %v1349_v36  ;;  %1063 = vadd.xlane.f32.xlu0 %v1062_v30  ;;  %v869_v32 = vpop.xlane.xlu1 %868  ;;  %v549_v34 = vsel %vm509_vm0, %v266_v55, 0.0 }
 0x15c   : > { %v1398_v50 = vmul.f32 0.020408163, %v869_v32  ;;  %v866_v48 = vpop.xlane.xlu0 %865  ;;  %v546_v36 = vsel %vm509_vm0, %v265_v26, 0.0 }
 0x15d   : > { %v2529_v60 = vsel %vm2277_vm8, %v2528_v12, %v5909_v6  ;;  %v2031_v37 = vunpack.c.l.b16 %v1570_v44  ;;  %v2032_v61 = vunpack.c.h.b16 %v1570_v44  ;;  %v1397_v1 = vmul.f32 0.020408163, %v866_v48 }
 0x15e   : > { %v6100_v29 = vsel %vm2284_vm9, %v2533_v43, %v2529_v60  ;;  %1108 = vadd.xlane.f32.xlu1 %v1107_v47  ;;  %v297_v47 = vld [vmem:[%s5445_s9 + $0x160] sm:$0xff] }
 0x15f   : > { %v2597_v45 = vrot.slane %v2031_v37, %v5880_v13  ;;  %v2602_v3 = vrot.slane %v2032_v61, %v5883_v14  ;;  %v1594_v7 = vpack.c.bf16 %v1398_v50, %v1397_v1  ;;  %1105 = vadd.xlane.f32.xlu0 %v1104_v51  ;;  %v911_v8 = vpop.xlane.xlu1 %910  ;;  %v645_v37 = vsel %vm509_vm0, %v298_v40, 0.0 }
 0x160   : > { %v1412_v6 = vmul.f32 0.020408163, %v911_v8  ;;  %v908_v15 = vpop.xlane.xlu0 %907  ;;  %v2154_v61 = vunpack.c.h.b16 %v6037_v62 }
 0x161   : > { %v2598_v19 = vsel %vm2263_vm6, %v2597_v45, %v5922_v33  ;;  %v2079_v11 = vunpack.c.l.b16 %v1594_v7  ;;  %v2080_v41 = vunpack.c.h.b16 %v1594_v7  ;;  %v1411_v22 = vmul.f32 0.020408163, %v908_v15  ;;  %v345_v15 = vld [vmem:[%s5445_s9 + $0x2e0] sm:$0xff] }
 0x162   : > { %v6111_v27 = vsel %vm2270_vm7, %v2602_v3, %v2598_v19  ;;  %1252 = vadd.xlane.f32.xlu1 %v1251_v9  ;;  %v642_v45 = vsel %vm509_vm0, %v297_v47, 0.0  ;;  %v346_v3 = vld [vmem:[%s5445_s9 + $0x2e8] sm:$0xff]  ;;  %v3204_v26 = vrot.slane %v2154_v61, %v5617_v49 }
 0x163   : > { %v2834_v16 = vrot.slane %v2079_v11, %v5880_v13  ;;  %v2839_v30 = vrot.slane %v2080_v41, %v5883_v14  ;;  %v1601_v31 = vpack.c.bf16 %v1412_v6, %v1411_v22  ;;  %1249 = vadd.xlane.f32.xlu0 %v1248_v18  ;;  %v1055_v59 = vpop.xlane.xlu1 %1054  ;;  %v789_v41 = vsel %vm509_vm0, %v346_v3, 0.0  ;;  %v360_v22 = vld [vmem:[%s5445_s9 + $0x358] sm:$0xff] }
 0x164   : > { %v1460_v33 = vmul.f32 0.020408163, %v1055_v59  ;;  %v1052_v39 = vpop.xlane.xlu0 %1051  ;;  %v359_v59 = vld [vmem:[%s5445_s9 + $0x350] sm:$0xff] }
 0x165   : > { %v2835_v12 = vsel %vm2263_vm6, %v2834_v16, %v5934_v52  ;;  %v2093_v43 = vunpack.c.l.b16 %v1601_v31  ;;  %v2094_v44 = vunpack.c.h.b16 %v1601_v31  ;;  %v1459_v32 = vmul.f32 0.020408163, %v1052_v39 }
 0x166   : > { %v6122_v50 = vsel %vm2270_vm7, %v2839_v30, %v2835_v12  ;;  %550 = vadd.xlane.f32.xlu1 %v549_v34  ;;  %v2153_v52 = vunpack.c.l.b16 %v6037_v62  ;;  %v786_v31 = vsel %vm509_vm0, %v345_v15, 0.0  ;;  %v831_v12 = vsel %vm509_vm0, %v360_v22, 0.0  ;;  %v421_v22 = vld [vmem:[%s5445_s9 + $0x540] sm:$0xff] }
 0x167   : > { %v2903_v48 = vrot.slane %v2093_v43, %v5733_v23  ;;  %v2908_v51 = vrot.slane %v2094_v44, %v5736_v24  ;;  %v1625_v56 = vpack.c.bf16 %v1460_v33, %v1459_v32  ;;  %547 = vadd.xlane.f32.xlu0 %v546_v36  ;;  %v1097_v60 = vpop.xlane.xlu1 %1096 }
 0x168   : > { %v1474_v1 = vmul.f32 0.020408163, %v1097_v60  ;;  %v1094_v2 = vpop.xlane.xlu0 %1093 }
 0x169   : > { %v2904_v7 = vsel %vm2249_vm4, %v2903_v48, %v5950_v57  ;;  %v2141_v8 = vunpack.c.l.b16 %v1625_v56  ;;  %v2142_v9 = vunpack.c.h.b16 %v1625_v56  ;;  %v1473_v6 = vmul.f32 0.020408163, %v1094_v2  ;;  %v407_v2 = vld [vmem:[%s5445_s9 + $0x4d0] sm:$0xff] }
 0x16a   : > { %v6135_v18 = vsel %vm2256_vm5, %v2908_v51, %v2904_v7  ;;  %646 = vadd.xlane.f32.xlu1 %v645_v37  ;;  %v3200_v57 = vrot.slane %v2153_v52, %v5614_v46  ;;  %v2201_v51 = vunpack.c.l.b16 %v6059_v42  ;;  %v2202_v56 = vunpack.c.h.b16 %v6059_v42  ;;  %v408_v52 = vld [vmem:[%s5445_s9 + $0x4d8] sm:$0xff] }
 0x16b   : > { %v3140_v62 = vrot.slane %v2141_v8, %v5733_v23  ;;  %v3145_v55 = vrot.slane %v2142_v9, %v5736_v24  ;;  %v1632_v19 = vpack.c.bf16 %v1474_v1, %v1473_v6  ;;  %643 = vadd.xlane.f32.xlu0 %v642_v45  ;;  %v1187_v11 = vpop.xlane.xlu1 %1186  ;;  %v975_v8 = vsel %vm509_vm0, %v408_v52, 0.0 }
 0x16c   : > { %v1504_v16 = vmul.f32 0.020408163, %v1187_v11  ;;  %v1184_v30 = vpop.xlane.xlu0 %1183  ;;  %v3205_v48 = vsel %vm2228_vm1, %v3204_v26, %v3200_v57  ;;  %v3437_v42 = vrot.slane %v2201_v51, %v5614_v46  ;;  %v3441_v9 = vrot.slane %v2202_v56, %v5617_v49 }
 0x16d   : > { %v3141_v34 = vsel %vm2249_vm4, %v3140_v62, %v5969_v53  ;;  %v2155_v33 = vunpack.c.l.b16 %v1632_v19  ;;  %v2156_v39 = vunpack.c.h.b16 %v1632_v19  ;;  %v1503_v36 = vmul.f32 0.020408163, %v1184_v30 }
 0x16e   : > { %v6148_v40 = vsel %vm2256_vm5, %v3145_v55, %v3141_v34  ;;  %790 = vadd.xlane.f32.xlu1 %v789_v41  ;;  %v828_v53 = vsel %vm509_vm0, %v359_v59, 0.0  ;;  %v972_v62 = vsel %vm509_vm0, %v407_v2, 0.0  ;;  %v422_v55 = vld [vmem:[%s5445_s9 + $0x548] sm:$0xff]  ;;  %v3442_v59 = vsel %vm2228_vm1, %v3441_v9, %v3437_v42 }
 0x16f   : > { %v3209_v43 = vrot.slane %v2155_v33, %v5628_v63  ;;  %v3214_v44 = vrot.slane %v2156_v39, %v5631_v0  ;;  %v6153_v32 = vpack.c.bf16 %v1504_v16, %v1503_v36  ;;  %787 = vadd.xlane.f32.xlu0 %v786_v31  ;;  %v1241_v47 = vpop.xlane.xlu1 %1240  ;;  %v1017_v31 = vsel %vm509_vm0, %v422_v55, 0.0  ;;  %v470_v36 = vld [vmem:[%s5445_s9 + $0x6c8] sm:$0xff] }
 0x170   : > { %v1522_v60 = vmul.f32 0.020408163, %v1241_v47  ;;  %v1238_v37 = vpop.xlane.xlu0 %1237  ;;  %v1014_v39 = vsel %vm509_vm0, %v421_v22, 0.0  ;;  %v1161_v52 = vsel %vm509_vm0, %v470_v36, 0.0 }
 0x171   : > { %v3210_v61 = vsel %vm2235_vm2, %v3209_v43, %v3205_v48  ;;  %v1521_v1 = vmul.f32 0.020408163, %v1238_v37 }
 0x172   : > { %v6163_v45 = vsel %vm2242_vm3, %v3214_v44, %v3210_v61  ;;  %832 = vadd.xlane.f32.xlu1 %v831_v12 }
 0x173   : > { %v1656_v3 = vpack.c.bf16 %v1522_v60, %v1521_v1  ;;  %829 = vadd.xlane.f32.xlu0 %v828_v53  ;;  %v539_v7 = vpop.xlane.xlu1 %538  ;;  %v469_v53 = vld [vmem:[%s5445_s9 + $0x6c0] sm:$0xff] }
 0x174   : > { %v1288_v6 = vmul.f32 0.020408163, %v539_v7  ;;  %v536_v15 = vpop.xlane.xlu0 %535  ;;  %v1158_v2 = vsel %vm509_vm0, %v469_v53, 0.0 }
 0x175   : > { %v2203_v19 = vunpack.c.l.b16 %v1656_v3  ;;  %v2204_v11 = vunpack.c.h.b16 %v1656_v3  ;;  %v1287_v41 = vmul.f32 0.020408163, %v536_v15  ;;  %v484_v3 = vld [vmem:[%s5445_s9 + $0x738] sm:$0xff] }
 0x176   : > { %976 = vadd.xlane.f32.xlu1 %v975_v8 }
 0x177   : > { %v3446_v57 = vrot.slane %v2203_v19, %v5628_v63  ;;  %v3451_v26 = vrot.slane %v2204_v11, %v5631_v0  ;;  %v1539_v16 = vpack.c.bf16 %v1288_v6, %v1287_v41  ;;  %973 = vadd.xlane.f32.xlu0 %v972_v62  ;;  %v635_v30 = vpop.xlane.xlu1 %634  ;;  %v483_v6 = vld [vmem:[%s5445_s9 + $0x730] sm:$0xff]  ;;  %v1203_v41 = vsel %vm509_vm0, %v484_v3, 0.0 }
 0x178   : > { %v1320_v34 = vmul.f32 0.020408163, %v635_v30  ;;  %v632_v33 = vpop.xlane.xlu0 %631 }
 0x179   : > { %v3447_v12 = vsel %vm2235_vm2, %v3446_v57, %v3442_v59  ;;  %v1969_v43 = vunpack.c.l.b16 %v1539_v16  ;;  %v1970_v44 = vunpack.c.h.b16 %v1539_v16  ;;  %v1319_v47 = vmul.f32 0.020408163, %v632_v33 }
 0x17a   : > { %v6180_v48 = vsel %vm2242_vm3, %v3451_v26, %v3447_v12  ;;  %1018 = vadd.xlane.f32.xlu1 %v1017_v31  ;;  %v1200_v57 = vsel %vm509_vm0, %v483_v6, 0.0  ;;  %v284_v26 = vld [vmem:[%s5445_s9 + $0xf8] sm:$0xff] }
 0x17b   : > { %v2276_v51 = vrot.slane %v1969_v43, %v6071_v5  ;;  %v2283_v56 = vrot.slane %v1970_v44, %v6074_v10  ;;  %v1555_v60 = vpack.c.bf16 %v1320_v34, %v1319_v47  ;;  %1015 = vadd.xlane.f32.xlu0 %v1014_v39  ;;  %v779_v37 = vpop.xlane.xlu1 %778  ;;  %v283_v34 = vld [vmem:[%s5445_s9 + $0xf0] sm:$0xff]  ;;  %v603_v44 = vsel %vm509_vm0, %v284_v26, 0.0 }
 0x17c   : > { %v1368_v61 = vmul.f32 0.020408163, %v779_v37  ;;  %v776_v1 = vpop.xlane.xlu0 %775  ;;  %v600_v53 = vsel %vm509_vm0, %v283_v34, 0.0 }
 0x17d   : > { %v2278_v7 = vsel %vm2277_vm8, %v2276_v51, %v5984_v28  ;;  %v2001_v8 = vunpack.c.l.b16 %v1555_v60  ;;  %v2002_v42 = vunpack.c.h.b16 %v1555_v60  ;;  %v1367_v9 = vmul.f32 0.020408163, %v776_v1  ;;  %v316_v51 = vld [vmem:[%s5445_s9 + $0x1f8] sm:$0xff] }
 0x17e   : > { %v6191_v15 = vsel %vm2284_vm9, %v2283_v56, %v2278_v7  ;;  %1162 = vadd.xlane.f32.xlu1 %v1161_v52 }
 0x17f   : > { %v2449_v62 = vrot.slane %v2001_v8, %v6071_v5  ;;  %v2454_v55 = vrot.slane %v2002_v42, %v6074_v10  ;;  %v1579_v19 = vpack.c.bf16 %v1368_v61, %v1367_v9  ;;  %1159 = vadd.xlane.f32.xlu0 %v1158_v2  ;;  %v821_v11 = vpop.xlane.xlu1 %820  ;;  %v315_v61 = vld [vmem:[%s5445_s9 + $0x1f0] sm:$0xff]  ;;  %v699_v42 = vsel %vm509_vm0, %v316_v51, 0.0 }
 0x180   : > { %v1382_v28 = vmul.f32 0.020408163, %v821_v11  ;;  %v818_v22 = vpop.xlane.xlu0 %817  ;;  %v696_v6 = vsel %vm509_vm0, %v315_v61, 0.0 }
 0x181   : > { %v2450_v16 = vsel %vm2277_vm8, %v2449_v62, %v5995_v58  ;;  %v2049_v30 = vunpack.c.l.b16 %v1579_v19  ;;  %v2050_v31 = vunpack.c.h.b16 %v1579_v19  ;;  %v1381_v59 = vmul.f32 0.020408163, %v818_v22  ;;  %v330_v62 = vld [vmem:[%s5445_s9 + $0x268] sm:$0xff] }
 0x182   : > { %v6202_v33 = vsel %vm2284_vm9, %v2454_v55, %v2450_v16  ;;  %1204 = vadd.xlane.f32.xlu1 %v1203_v41 }
 0x183   : > { %v2686_v39 = vrot.slane %v2049_v30, %v6071_v5  ;;  %v2691_v36 = vrot.slane %v2050_v31, %v6074_v10  ;;  %v1586_v12 = vpack.c.bf16 %v1382_v28, %v1381_v59  ;;  %1201 = vadd.xlane.f32.xlu0 %v1200_v57  ;;  %v965_v43 = vpop.xlane.xlu1 %964  ;;  %v329_v28 = vld [vmem:[%s5445_s9 + $0x260] sm:$0xff]  ;;  %v741_v31 = vsel %vm509_vm0, %v330_v62, 0.0 }
 0x184   : > { %v1430_v58 = vmul.f32 0.020408163, %v965_v43  ;;  %v962_v47 = vpop.xlane.xlu0 %961  ;;  %v738_v34 = vsel %vm509_vm0, %v329_v28, 0.0 }
 0x185   : > { %v2687_v56 = vsel %vm2277_vm8, %v2686_v39, %v6006_v4  ;;  %v2063_v60 = vunpack.c.l.b16 %v1586_v12  ;;  %v2064_v37 = vunpack.c.h.b16 %v1586_v12  ;;  %v1429_v52 = vmul.f32 0.020408163, %v962_v47  ;;  %v378_v39 = vld [vmem:[%s5445_s9 + $0x3e8] sm:$0xff] }
 0x186   : > { %v6213_v1 = vsel %vm2284_vm9, %v2691_v36, %v2687_v56  ;;  %604 = vadd.xlane.f32.xlu1 %v603_v44 }
 0x187   : > { %v2755_v2 = vrot.slane %v2063_v60, %v5880_v13  ;;  %v2760_v3 = vrot.slane %v2064_v37, %v5883_v14  ;;  %v1610_v7 = vpack.c.bf16 %v1430_v58, %v1429_v52  ;;  %601 = vadd.xlane.f32.xlu0 %v600_v53  ;;  %v1007_v8 = vpop.xlane.xlu1 %1006  ;;  %v377_v58 = vld [vmem:[%s5445_s9 + $0x3e0] sm:$0xff]  ;;  %v885_v37 = vsel %vm509_vm0, %v378_v39, 0.0 }
 0x188   : > { %v1444_v4 = vmul.f32 0.020408163, %v1007_v8  ;;  %v1004_v9 = vpop.xlane.xlu0 %1003  ;;  %v2186_v52 = vunpack.c.h.b16 %v6153_v32 }
 0x189   : > { %v2756_v55 = vsel %vm2263_vm6, %v2755_v2, %v6019_v21  ;;  %v2111_v19 = vunpack.c.l.b16 %v1610_v7  ;;  %v2112_v11 = vunpack.c.h.b16 %v1610_v7  ;;  %v1443_v41 = vmul.f32 0.020408163, %v1004_v9  ;;  %v392_v7 = vld [vmem:[%s5445_s9 + $0x458] sm:$0xff] }
 0x18a   : > { %v6224_v22 = vsel %vm2270_vm7, %v2760_v3, %v2756_v55  ;;  %700 = vadd.xlane.f32.xlu1 %v699_v42  ;;  %v882_v3 = vsel %vm509_vm0, %v377_v58, 0.0  ;;  %v2286_v55 = vadd.s32 4294967216, %v5597_v25  ;;  %v927_v28 = vsel %vm509_vm0, %v392_v7, 0.0  ;;  %v453_v7 = vld [vmem:[%s5445_s9 + $0x640] sm:$0xff] }
 0x18b   : > { %v2992_v57 = vrot.slane %v2111_v19, %v5880_v13  ;;  %v2997_v26 = vrot.slane %v2112_v11, %v5883_v14  ;;  %v1617_v16 = vpack.c.bf16 %v1444_v4, %v1443_v41  ;;  %697 = vadd.xlane.f32.xlu0 %v696_v6  ;;  %v1151_v30 = vpop.xlane.xlu1 %1150  ;;  %v391_v6 = vld [vmem:[%s5445_s9 + $0x450] sm:$0xff] }
 0x18c   : > { %v1492_v21 = vmul.f32 0.020408163, %v1151_v30  ;;  %v1148_v59 = vpop.xlane.xlu0 %1147 }
 0x18d   : > { %v2993_v36 = vsel %vm2263_vm6, %v2992_v57, %v6032_v54  ;;  %v2125_v12 = vunpack.c.l.b16 %v1617_v16  ;;  %v2126_v43 = vunpack.c.h.b16 %v1617_v16  ;;  %v1491_v44 = vmul.f32 0.020408163, %v1148_v59 }
 0x18e   : > { %v6235_v47 = vsel %vm2270_vm7, %v2997_v26, %v2993_v36  ;;  %742 = vadd.xlane.f32.xlu1 %v741_v31  ;;  %v2185_v54 = vunpack.c.l.b16 %v6153_v32  ;;  %v2293_v32 = vadd.s32 4294967208, %v5597_v25  ;;  %v3362_v26 = vrot.slane %v2186_v52, %v5617_v49  ;;  %v454_v52 = vld [vmem:[%s5445_s9 + $0x648] sm:$0xff] }
 0x18f   : > { %v3061_v53 = vrot.slane %v2125_v12, %v5733_v23  ;;  %v3066_v51 = vrot.slane %v2126_v43, %v5736_v24  ;;  %v1641_v56 = vpack.c.bf16 %v1492_v21, %v1491_v44  ;;  %739 = vadd.xlane.f32.xlu0 %v738_v34  ;;  %v1193_v60 = vpop.xlane.xlu1 %1192  ;;  %v924_v31 = vsel %vm509_vm0, %v391_v6, 0.0  ;;  %v440_v21 = vld [vmem:[%s5445_s9 + $0x5d8] sm:$0xff]  ;;  %v439_v12 = vld [vmem:[%s5445_s9 + $0x5d0] sm:$0xff] }
 0x190   : > { %v1506_v61 = vmul.f32 0.020408163, %v1193_v60  ;;  %v1190_v2 = vpop.xlane.xlu0 %1189  ;;  %v3358_v57 = vrot.slane %v2185_v54, %v5614_v46  ;;  %v6266_v46 = vsub.s32 %v2286_v55, %v5602_v35  ;;  %v6269_v49 = vsub.s32 %v2293_v32, %v5602_v35 }
 0x191   : > { %v3062_v8 = vsel %vm2249_vm4, %v3061_v53, %v6047_v20  ;;  %v2173_v42 = vunpack.c.l.b16 %v1641_v56  ;;  %v2174_v4 = vunpack.c.h.b16 %v1641_v56  ;;  %v1505_v9 = vmul.f32 0.020408163, %v1190_v2 }
 0x192   : > { %v6248_v62 = vsel %vm2256_vm5, %v3066_v51, %v3062_v8  ;;  %886 = vadd.xlane.f32.xlu1 %v885_v37  ;;  %v1071_v51 = vsel %vm509_vm0, %v440_v21, 0.0  ;;  %v3363_v56 = vsel %vm2228_vm1, %v3362_v26, %v3358_v57  ;;  %v1068_v54 = vsel %vm509_vm0, %v439_v12, 0.0  ;;  %v501_v26 = vld [vmem:[%s5445_s9 + $0x7c0] sm:$0xff]  ;;  %v268_v12 = vld [vmem:[%s5445_s9 + $0x78] sm:$0xff] }
 0x193   : > { %v3298_v19 = vrot.slane %v2173_v42, %v5733_v23  ;;  %v3303_v11 = vrot.slane %v2174_v4, %v5736_v24  ;;  %v1648_v41 = vpack.c.bf16 %v1506_v61, %v1505_v9  ;;  %883 = vadd.xlane.f32.xlu0 %v882_v3  ;;  %v593_v20 = vpop.xlane.xlu1 %592  ;;  %v1113_v6 = vsel %vm509_vm0, %v454_v52, 0.0 }
 0x194   : > { %v1306_v16 = vmul.f32 0.020408163, %v593_v20  ;;  %v590_v30 = vpop.xlane.xlu0 %589  ;;  %vm3515_vm1 = vcmask 1042434  }
 0x195   : > { %v3299_v59 = vsel %vm2249_vm4, %v3298_v19, %v6068_v17  ;;  %v2187_v34 = vunpack.c.l.b16 %v1648_v41  ;;  %v2188_v39 = vunpack.c.h.b16 %v1648_v41  ;;  %v1305_v36 = vmul.f32 0.020408163, %v590_v30 }
 0x196   : > { %v6263_v43 = vsel %vm2256_vm5, %v3303_v11, %v3299_v59  ;;  %928 = vadd.xlane.f32.xlu1 %v927_v28  ;;  %v1110_v19 = vsel %vm509_vm0, %v453_v7, 0.0  ;;  %v502_v11 = vld [vmem:[%s5445_s9 + $0x7c8] sm:$0xff] }
 0x197   : > { %v3367_v44 = vrot.slane %v2187_v34, %v5628_v63  ;;  %v3372_v17 = vrot.slane %v2188_v39, %v5631_v0  ;;  %v1548_v58 = vpack.c.bf16 %v1306_v16, %v1305_v36  ;;  %925 = vadd.xlane.f32.xlu0 %v924_v31  ;;  %v689_v53 = vpop.xlane.xlu1 %688  ;;  %v1257_v34 = vsel %vm509_vm0, %v502_v11, 0.0 }
 0x198   : > { %v1338_v60 = vmul.f32 0.020408163, %v689_v53  ;;  %v686_v37 = vpop.xlane.xlu0 %685  ;;  %v1254_v36 = vsel %vm509_vm0, %v501_v26, 0.0 }
 0x199   : > { %v3368_v61 = vsel %vm2235_vm2, %v3367_v44, %v3363_v56  ;;  %v1987_v2 = vunpack.c.l.b16 %v1548_v58  ;;  %v1988_v3 = vunpack.c.h.b16 %v1548_v58  ;;  %v1337_v63 = vmul.f32 0.020408163, %v686_v37 }
 0x19a   : > { %v6280_v0 = vsel %vm2242_vm3, %v3372_v17, %v3368_v61  ;;  %1072 = vadd.xlane.f32.xlu1 %v1071_v51  ;;  %v267_v51 = vld [vmem:[%s5445_s9 + $0x70] sm:$0xff]  ;;  %v555_v61 = vsel %vm509_vm0, %v268_v12, 0.0  ;;  %vm3517_vm2 = vcmask 1043459   ;;  %vm3519_vm3 = vcmask 1044484  }
 0x19b   : > { %v2380_v8 = vrot.slane %v1987_v2, %v6266_v46  ;;  %v2385_v42 = vrot.slane %v1988_v3, %v6269_v49  ;;  %v1564_v4 = vpack.c.bf16 %v1338_v60, %v1337_v63  ;;  %1069 = vadd.xlane.f32.xlu0 %v1068_v54  ;;  %v731_v9 = vpop.xlane.xlu1 %730  ;;  %v552_v3 = vsel %vm509_vm0, %v267_v51, 0.0  ;;  %v300_v63 = vld [vmem:[%s5445_s9 + $0x178] sm:$0xff] }
 0x19c   : > { %v1352_v55 = vmul.f32 0.020408163, %v731_v9  ;;  %v728_v32 = vpop.xlane.xlu0 %727  ;;  %v299_v9 = vld [vmem:[%s5445_s9 + $0x170] sm:$0xff] }
 0x19d   : > { %v2381_v41 = vsel %vm2291_vm10, %v2380_v8, %v6089_v38  ;;  %v2019_v20 = vunpack.c.l.b16 %v1564_v4  ;;  %v2020_v28 = vunpack.c.h.b16 %v1564_v4  ;;  %v1351_v57 = vmul.f32 0.020408163, %v728_v32 }
 0x19e   : > { %v6291_v16 = vsel %vm2298_vm11, %v2385_v42, %v2381_v41  ;;  %1114 = vadd.xlane.f32.xlu1 %v1113_v6  ;;  %v651_v41 = vsel %vm509_vm0, %v300_v63, 0.0 }
 0x19f   : > { %v2538_v30 = vrot.slane %v2019_v20, %v6266_v46  ;;  %v2543_v31 = vrot.slane %v2020_v28, %v6269_v49  ;;  %v1571_v21 = vpack.c.bf16 %v1352_v55, %v1351_v57  ;;  %1111 = vadd.xlane.f32.xlu0 %v1110_v19  ;;  %v875_v59 = vpop.xlane.xlu1 %874  ;;  %v648_v28 = vsel %vm509_vm0, %v299_v9, 0.0  ;;  %v348_v57 = vld [vmem:[%s5445_s9 + $0x2f8] sm:$0xff] }
 0x1a0   : > { %v1400_v38 = vmul.f32 0.020408163, %v875_v59  ;;  %v872_v39 = vpop.xlane.xlu0 %871  ;;  %v347_v59 = vld [vmem:[%s5445_s9 + $0x2f0] sm:$0xff] }
 0x1a1   : > { %v2539_v44 = vsel %vm2291_vm10, %v2538_v30, %v6100_v29  ;;  %v2033_v17 = vunpack.c.l.b16 %v1571_v21  ;;  %v2034_v58 = vunpack.c.h.b16 %v1571_v21  ;;  %v1399_v53 = vmul.f32 0.020408163, %v872_v39 }
 0x1a2   : > { %v6302_v56 = vsel %vm2298_vm11, %v2543_v31, %v2539_v44  ;;  %1258 = vadd.xlane.f32.xlu1 %v1257_v34  ;;  %v795_v44 = vsel %vm509_vm0, %v348_v57, 0.0 }
 0x1a3   : > { %v2607_v60 = vrot.slane %v2033_v17, %v6071_v5  ;;  %v2612_v37 = vrot.slane %v2034_v58, %v6074_v10  ;;  %v1595_v54 = vpack.c.bf16 %v1400_v38, %v1399_v53  ;;  %1255 = vadd.xlane.f32.xlu0 %v1254_v36  ;;  %v917_v52 = vpop.xlane.xlu1 %916  ;;  %v792_v58 = vsel %vm509_vm0, %v347_v59, 0.0  ;;  %v362_v53 = vld [vmem:[%s5445_s9 + $0x368] sm:$0xff] }
 0x1a4   : > { %v1414_v29 = vmul.f32 0.020408163, %v917_v52  ;;  %v914_v2 = vpop.xlane.xlu0 %913  ;;  %v361_v52 = vld [vmem:[%s5445_s9 + $0x360] sm:$0xff] }
 0x1a5   : > { %v2608_v7 = vsel %vm2277_vm8, %v2607_v60, %v6111_v27  ;;  %v2081_v8 = vunpack.c.l.b16 %v1595_v54  ;;  %v2082_v42 = vunpack.c.h.b16 %v1595_v54  ;;  %v1413_v4 = vmul.f32 0.020408163, %v914_v2 }
 0x1a6   : > { %v6313_v6 = vsel %vm2284_vm9, %v2612_v37, %v2608_v7  ;;  %556 = vadd.xlane.f32.xlu1 %v555_v61  ;;  %v837_v7 = vsel %vm509_vm0, %v362_v53, 0.0 }
 0x1a7   : > { %v2844_v55 = vrot.slane %v2081_v8, %v6071_v5  ;;  %v2849_v32 = vrot.slane %v2082_v42, %v6074_v10  ;;  %v1602_v19 = vpack.c.bf16 %v1414_v29, %v1413_v4  ;;  %553 = vadd.xlane.f32.xlu0 %v552_v3  ;;  %v1061_v11 = vpop.xlane.xlu1 %1060  ;;  %v834_v42 = vsel %vm509_vm0, %v361_v52, 0.0  ;;  %v410_v4 = vld [vmem:[%s5445_s9 + $0x4e8] sm:$0xff] }
 0x1a8   : > { %v1462_v27 = vmul.f32 0.020408163, %v1061_v11  ;;  %v1058_v20 = vpop.xlane.xlu0 %1057  ;;  %v409_v11 = vld [vmem:[%s5445_s9 + $0x4e0] sm:$0xff] }
 0x1a9   : > { %v2845_v26 = vsel %vm2277_vm8, %v2844_v55, %v6122_v50  ;;  %v2095_v30 = vunpack.c.l.b16 %v1602_v19  ;;  %v2096_v31 = vunpack.c.h.b16 %v1602_v19  ;;  %v1461_v21 = vmul.f32 0.020408163, %v1058_v20 }
 0x1aa   : > { %v6324_v34 = vsel %vm2284_vm9, %v2849_v32, %v2845_v26  ;;  %652 = vadd.xlane.f32.xlu1 %v651_v41  ;;  %v981_v26 = vsel %vm509_vm0, %v410_v4, 0.0 }
 0x1ab   : > { %v2913_v38 = vrot.slane %v2095_v30, %v5880_v13  ;;  %v2918_v39 = vrot.slane %v2096_v31, %v5883_v14  ;;  %v1626_v36 = vpack.c.bf16 %v1462_v27, %v1461_v21  ;;  %649 = vadd.xlane.f32.xlu0 %v648_v28  ;;  %v1103_v12 = vpop.xlane.xlu1 %1102  ;;  %v978_v31 = vsel %vm509_vm0, %v409_v11, 0.0  ;;  %v424_v21 = vld [vmem:[%s5445_s9 + $0x558] sm:$0xff] }
 0x1ac   : > { %v1476_v50 = vmul.f32 0.020408163, %v1103_v12  ;;  %v1100_v17 = vpop.xlane.xlu0 %1099  ;;  %v423_v12 = vld [vmem:[%s5445_s9 + $0x550] sm:$0xff] }
 0x1ad   : > { %v2914_v51 = vsel %vm2263_vm6, %v2913_v38, %v6135_v18  ;;  %v2143_v60 = vunpack.c.l.b16 %v1626_v36  ;;  %v2144_v37 = vunpack.c.h.b16 %v1626_v36  ;;  %v1475_v54 = vmul.f32 0.020408163, %v1100_v17 }
 0x1ae   : > { %v6335_v61 = vsel %vm2270_vm7, %v2918_v39, %v2914_v51  ;;  %796 = vadd.xlane.f32.xlu1 %v795_v44  ;;  %v1023_v51 = vsel %vm509_vm0, %v424_v21, 0.0 }
 0x1af   : > { %v3150_v29 = vrot.slane %v2143_v60, %v5880_v13  ;;  %v3155_v2 = vrot.slane %v2144_v37, %v5883_v14  ;;  %v1633_v3 = vpack.c.bf16 %v1476_v50, %v1475_v54  ;;  %793 = vadd.xlane.f32.xlu0 %v792_v58  ;;  %v1247_v63 = vpop.xlane.xlu1 %1246  ;;  %v1020_v37 = vsel %vm509_vm0, %v423_v12, 0.0  ;;  %v472_v54 = vld [vmem:[%s5445_s9 + $0x6d8] sm:$0xff] }
 0x1b0   : > { %v1524_v18 = vmul.f32 0.020408163, %v1247_v63  ;;  %v1244_v8 = vpop.xlane.xlu0 %1243  ;;  %v471_v63 = vld [vmem:[%s5445_s9 + $0x6d0] sm:$0xff] }
 0x1b1   : > { %v3151_v9 = vsel %vm2263_vm6, %v3150_v29, %v6148_v40  ;;  %v2157_v55 = vunpack.c.l.b16 %v1633_v3  ;;  %v2158_v32 = vunpack.c.h.b16 %v1633_v3  ;;  %v1523_v19 = vmul.f32 0.020408163, %v1244_v8 }
 0x1b2   : > { %v6346_v41 = vsel %vm2270_vm7, %v3155_v2, %v3151_v9  ;;  %838 = vadd.xlane.f32.xlu1 %v837_v7  ;;  %v1167_v9 = vsel %vm509_vm0, %v472_v54, 0.0 }
 0x1b3   : > { %v3219_v27 = vrot.slane %v2157_v55, %v5733_v23  ;;  %v3224_v20 = vrot.slane %v2158_v32, %v5736_v24  ;;  %v1657_v28 = vpack.c.bf16 %v1524_v18, %v1523_v19  ;;  %835 = vadd.xlane.f32.xlu0 %v834_v42  ;;  %v545_v57 = vpop.xlane.xlu1 %544  ;;  %v1164_v32 = vsel %vm509_vm0, %v471_v63, 0.0  ;;  %v486_v19 = vld [vmem:[%s5445_s9 + $0x748] sm:$0xff] }
 0x1b4   : > { %v1290_v40 = vmul.f32 0.020408163, %v545_v57  ;;  %v542_v30 = vpop.xlane.xlu0 %541  ;;  %v485_v57 = vld [vmem:[%s5445_s9 + $0x740] sm:$0xff] }
 0x1b5   : > { %v3220_v59 = vsel %vm2249_vm4, %v3219_v27, %v6163_v45  ;;  %v2205_v38 = vunpack.c.l.b16 %v1657_v28  ;;  %v2206_v39 = vunpack.c.h.b16 %v1657_v28  ;;  %v1289_v36 = vmul.f32 0.020408163, %v542_v30 }
 0x1b6   : > { %v6357_v44 = vsel %vm2256_vm5, %v3224_v20, %v3220_v59  ;;  %982 = vadd.xlane.f32.xlu1 %v981_v26  ;;  %v1209_v59 = vsel %vm509_vm0, %v486_v19, 0.0 }
 0x1b7   : > { %v3456_v50 = vrot.slane %v2205_v38, %v5733_v23  ;;  %v3461_v17 = vrot.slane %v2206_v39, %v5736_v24  ;;  %v1540_v58 = vpack.c.bf16 %v1290_v40, %v1289_v36  ;;  %979 = vadd.xlane.f32.xlu0 %v978_v31  ;;  %v641_v53 = vpop.xlane.xlu1 %640  ;;  %v1206_v39 = vsel %vm509_vm0, %v485_v57, 0.0  ;;  %v332_v36 = vld [vmem:[%s5445_s9 + $0x278] sm:$0xff] }
 0x1b8   : > { %v1322_v45 = vmul.f32 0.020408163, %v641_v53  ;;  %v638_v60 = vpop.xlane.xlu0 %637  ;;  %v331_v53 = vld [vmem:[%s5445_s9 + $0x270] sm:$0xff] }
 0x1b9   : > { %v3457_v52 = vsel %vm2249_vm4, %v3456_v50, %v6180_v48  ;;  %v1971_v29 = vunpack.c.l.b16 %v1540_v58  ;;  %v1972_v2 = vunpack.c.h.b16 %v1540_v58  ;;  %v1321_v3 = vmul.f32 0.020408163, %v638_v60 }
 0x1ba   : > { %v6368_v7 = vsel %vm2256_vm5, %v3461_v17, %v3457_v52  ;;  %1024 = vadd.xlane.f32.xlu1 %v1023_v51  ;;  %v747_v52 = vsel %vm509_vm0, %v332_v36, 0.0 }
 0x1bb   : > { %v2290_v18 = vrot.slane %v1971_v29, %v6266_v46  ;;  %v2297_v8 = vrot.slane %v1972_v2, %v6269_v49  ;;  %v1556_v42 = vpack.c.bf16 %v1322_v45, %v1321_v3  ;;  %1021 = vadd.xlane.f32.xlu0 %v1020_v37  ;;  %v785_v4 = vpop.xlane.xlu1 %784  ;;  %v744_v2 = vsel %vm509_vm0, %v331_v53, 0.0  ;;  %v380_v3 = vld [vmem:[%s5445_s9 + $0x3f8] sm:$0xff] }
 0x1bc   : > { %v1370_v48 = vmul.f32 0.020408163, %v785_v4  ;;  %v782_v55 = vpop.xlane.xlu0 %781  ;;  %v379_v4 = vld [vmem:[%s5445_s9 + $0x3f0] sm:$0xff] }
 0x1bd   : > { %v2292_v11 = vsel %vm2291_vm10, %v2290_v18, %v6191_v15  ;;  %v2003_v27 = vunpack.c.l.b16 %v1556_v42  ;;  %v2004_v20 = vunpack.c.h.b16 %v1556_v42  ;;  %v1369_v28 = vmul.f32 0.020408163, %v782_v55 }
 0x1be   : > { %v6379_v26 = vsel %vm2298_vm11, %v2297_v8, %v2292_v11  ;;  %1168 = vadd.xlane.f32.xlu1 %v1167_v9  ;;  %v891_v11 = vsel %vm509_vm0, %v380_v3, 0.0 }
 0x1bf   : > { %v2459_v40 = vrot.slane %v2003_v27, %v6266_v46  ;;  %v2464_v30 = vrot.slane %v2004_v20, %v6269_v49  ;;  %v1580_v31 = vpack.c.bf16 %v1370_v48, %v1369_v28  ;;  %1165 = vadd.xlane.f32.xlu0 %v1164_v32  ;;  %v827_v21 = vpop.xlane.xlu1 %826  ;;  %v888_v20 = vsel %vm509_vm0, %v379_v4, 0.0  ;;  %v394_v28 = vld [vmem:[%s5445_s9 + $0x468] sm:$0xff] }
 0x1c0   : > { %v1384_v15 = vmul.f32 0.020408163, %v827_v21  ;;  %v824_v38 = vpop.xlane.xlu0 %823  ;;  %v393_v21 = vld [vmem:[%s5445_s9 + $0x460] sm:$0xff] }
 0x1c1   : > { %v2460_v12 = vsel %vm2291_vm10, %v2459_v40, %v6202_v33  ;;  %v2051_v50 = vunpack.c.l.b16 %v1580_v31  ;;  %v2052_v17 = vunpack.c.h.b16 %v1580_v31  ;;  %v1383_v58 = vmul.f32 0.020408163, %v824_v38 }
 0x1c2   : > { %v6390_v51 = vsel %vm2298_vm11, %v2464_v30, %v2460_v12  ;;  %1210 = vadd.xlane.f32.xlu1 %v1209_v59  ;;  %v933_v12 = vsel %vm509_vm0, %v394_v28, 0.0 }
 0x1c3   : > { %v2696_v45 = vrot.slane %v2051_v50, %v6266_v46  ;;  %v2701_v60 = vrot.slane %v2052_v17, %v6269_v49  ;;  %v1587_v37 = vpack.c.bf16 %v1384_v15, %v1383_v58  ;;  %1207 = vadd.xlane.f32.xlu0 %v1206_v39  ;;  %v971_v54 = vpop.xlane.xlu1 %970  ;;  %v930_v17 = vsel %vm509_vm0, %v393_v21, 0.0  ;;  %v442_v58 = vld [vmem:[%s5445_s9 + $0x5e8] sm:$0xff] }
 0x1c4   : > { %v1432_v33 = vmul.f32 0.020408163, %v971_v54  ;;  %v968_v29 = vpop.xlane.xlu0 %967  ;;  %v441_v54 = vld [vmem:[%s5445_s9 + $0x5e0] sm:$0xff] }
 0x1c5   : > { %v2697_v63 = vsel %vm2291_vm10, %v2696_v45, %v6213_v1  ;;  %v2065_v18 = vunpack.c.l.b16 %v1587_v37  ;;  %v2066_v8 = vunpack.c.h.b16 %v1587_v37  ;;  %v1431_v42 = vmul.f32 0.020408163, %v968_v29 }
 0x1c6   : > { %v6401_v9 = vsel %vm2298_vm11, %v2701_v60, %v2697_v63  ;;  %748 = vadd.xlane.f32.xlu1 %v747_v52  ;;  %v1077_v63 = vsel %vm509_vm0, %v442_v58, 0.0 }
 0x1c7   : > { %v2765_v48 = vrot.slane %v2065_v18, %v6071_v5  ;;  %v2770_v55 = vrot.slane %v2066_v8, %v6074_v10  ;;  %v1611_v32 = vpack.c.bf16 %v1432_v33, %v1431_v42  ;;  %745 = vadd.xlane.f32.xlu0 %v744_v2  ;;  %v1013_v19 = vpop.xlane.xlu1 %1012  ;;  %v1074_v8 = vsel %vm509_vm0, %v441_v54, 0.0  ;;  %v456_v42 = vld [vmem:[%s5445_s9 + $0x658] sm:$0xff] }
 0x1c8   : > { %v1446_v1 = vmul.f32 0.020408163, %v1013_v19  ;;  %v1010_v27 = vpop.xlane.xlu0 %1009  ;;  %v455_v19 = vld [vmem:[%s5445_s9 + $0x650] sm:$0xff] }
 0x1c9   : > { %v2766_v57 = vsel %vm2277_vm8, %v2765_v48, %v6224_v22  ;;  %v2113_v40 = vunpack.c.l.b16 %v1611_v32  ;;  %v2114_v30 = vunpack.c.h.b16 %v1611_v32  ;;  %v1445_v31 = vmul.f32 0.020408163, %v1010_v27 }
 0x1ca   : > { %v6412_v59 = vsel %vm2284_vm9, %v2770_v55, %v2766_v57  ;;  %892 = vadd.xlane.f32.xlu1 %v891_v11  ;;  %v2307_v27 = vadd.s32 4294967192, %v5597_v25  ;;  %v1116_v21 = vsel %vm509_vm0, %v455_v19, 0.0 }
 0x1cb   : > { %v3002_v15 = vrot.slane %v2113_v40, %v6071_v5  ;;  %v3007_v38 = vrot.slane %v2114_v30, %v6074_v10  ;;  %v1618_v39 = vpack.c.bf16 %v1446_v1, %v1445_v31  ;;  %889 = vadd.xlane.f32.xlu0 %v888_v20  ;;  %v1157_v36 = vpop.xlane.xlu1 %1156  ;;  %v2300_v1 = vadd.s32 4294967200, %v5597_v25 }
 0x1cc   : > { %v1494_v22 = vmul.f32 0.020408163, %v1157_v36  ;;  %v1154_v50 = vpop.xlane.xlu0 %1153  ;;  %v1119_v40 = vsel %vm509_vm0, %v456_v42, 0.0  ;;  %v6453_v58 = vsub.s32 %v2307_v27, %v5602_v35 }
 0x1cd   : > { %v3003_v53 = vsel %vm2277_vm8, %v3002_v15, %v6235_v47  ;;  %v2127_v45 = vunpack.c.l.b16 %v1618_v39  ;;  %v2128_v60 = vunpack.c.h.b16 %v1618_v39  ;;  %v1493_v37 = vmul.f32 0.020408163, %v1154_v50  ;;  %v504_v15 = vld [vmem:[%s5445_s9 + $0x7d8] sm:$0xff] }
 0x1ce   : > { %v6423_v52 = vsel %vm2284_vm9, %v3007_v38, %v3003_v53  ;;  %934 = vadd.xlane.f32.xlu1 %v933_v12 }
 0x1cf   : > { %v3071_v33 = vrot.slane %v2127_v45, %v5880_v13  ;;  %v3076_v29 = vrot.slane %v2128_v60, %v5883_v14  ;;  %v1642_v2 = vpack.c.bf16 %v1494_v22, %v1493_v37  ;;  %931 = vadd.xlane.f32.xlu0 %v930_v17  ;;  %v1199_v3 = vpop.xlane.xlu1 %1198  ;;  %v503_v22 = vld [vmem:[%s5445_s9 + $0x7d0] sm:$0xff]  ;;  %v6450_v17 = vsub.s32 %v2300_v1, %v5602_v35  ;;  %v412_v1 = vld [vmem:[%s5445_s9 + $0x4f8] sm:$0xff] }
 0x1d0   : > { %v1508_v47 = vmul.f32 0.020408163, %v1199_v3  ;;  %v1196_v18 = vpop.xlane.xlu0 %1195  ;;  %v1263_v37 = vsel %vm509_vm0, %v504_v15, 0.0 }
 0x1d1   : > { %v3072_v4 = vsel %vm2263_vm6, %v3071_v33, %v6248_v62  ;;  %v2175_v48 = vunpack.c.l.b16 %v1642_v2  ;;  %v2176_v55 = vunpack.c.h.b16 %v1642_v2  ;;  %v1507_v32 = vmul.f32 0.020408163, %v1196_v18  ;;  %v364_v2 = vld [vmem:[%s5445_s9 + $0x378] sm:$0xff] }
 0x1d2   : > { %v6434_v11 = vsel %vm2270_vm7, %v3076_v29, %v3072_v4  ;;  %1078 = vadd.xlane.f32.xlu1 %v1077_v63  ;;  %v1260_v29 = vsel %vm509_vm0, %v503_v22, 0.0 }
 0x1d3   : > { %v3308_v20 = vrot.slane %v2175_v48, %v5880_v13  ;;  %v3313_v28 = vrot.slane %v2176_v55, %v5883_v14  ;;  %v1649_v57 = vpack.c.bf16 %v1508_v47, %v1507_v32  ;;  %1075 = vadd.xlane.f32.xlu0 %v1074_v8  ;;  %v599_v62 = vpop.xlane.xlu1 %598 }
 0x1d4   : > { %v1308_v30 = vmul.f32 0.020408163, %v599_v62  ;;  %v596_v31 = vpop.xlane.xlu0 %595  ;;  %v411_v62 = vld [vmem:[%s5445_s9 + $0x4f0] sm:$0xff] }
 0x1d5   : > { %v3309_v38 = vsel %vm2263_vm6, %v3308_v20, %v6263_v43  ;;  %v2189_v39 = vunpack.c.l.b16 %v1649_v57  ;;  %v2190_v36 = vunpack.c.h.b16 %v1649_v57  ;;  %v1307_v12 = vmul.f32 0.020408163, %v596_v31 }
 0x1d6   : > { %v6447_v50 = vsel %vm2270_vm7, %v3313_v28, %v3309_v38  ;;  %1120 = vadd.xlane.f32.xlu1 %v1119_v40  ;;  %v987_v38 = vsel %vm509_vm0, %v412_v1, 0.0 }
 0x1d7   : > { %v3377_v53 = vrot.slane %v2189_v39, %v5733_v23  ;;  %v3382_v43 = vrot.slane %v2190_v36, %v5736_v24  ;;  %v1549_v45 = vpack.c.bf16 %v1308_v30, %v1307_v12  ;;  %1117 = vadd.xlane.f32.xlu0 %v1116_v21  ;;  %v695_v60 = vpop.xlane.xlu1 %694  ;;  %v363_v23 = vld [vmem:[%s5445_s9 + $0x370] sm:$0xff]  ;;  %v984_v36 = vsel %vm509_vm0, %v411_v62, 0.0  ;;  %v426_v12 = vld [vmem:[%s5445_s9 + $0x568] sm:$0xff] }
 0x1d8   : > { %v1340_v54 = vmul.f32 0.020408163, %v695_v60  ;;  %v692_v33 = vpop.xlane.xlu0 %691  ;;  %v840_v19 = vsel %vm509_vm0, %v363_v23, 0.0  ;;  %v425_v60 = vld [vmem:[%s5445_s9 + $0x560] sm:$0xff] }
 0x1d9   : > { %v3378_v3 = vsel %vm2249_vm4, %v3377_v53, %v6280_v0  ;;  %v1989_v63 = vunpack.c.l.b16 %v1549_v45  ;;  %v1990_v47 = vunpack.c.h.b16 %v1549_v45  ;;  %v1339_v18 = vmul.f32 0.020408163, %v692_v33 }
 0x1da   : > { %v6464_v24 = vsel %vm2256_vm5, %v3382_v43, %v3378_v3  ;;  %1264 = vadd.xlane.f32.xlu1 %v1263_v37  ;;  %v843_v0 = vsel %vm509_vm0, %v364_v2, 0.0  ;;  %v1029_v3 = vsel %vm509_vm0, %v426_v12, 0.0  ;;  %vm3521_vm4 = vcmask 1045509  }
 0x1db   : > { %v2390_v8 = vrot.slane %v1989_v63, %v6450_v17  ;;  %v2395_v42 = vrot.slane %v1990_v47, %v6453_v58  ;;  %v1565_v4 = vpack.c.bf16 %v1340_v54, %v1339_v18  ;;  %1261 = vadd.xlane.f32.xlu0 %v1260_v29  ;;  %v737_v48 = vpop.xlane.xlu1 %736  ;;  %v1026_v47 = vsel %vm509_vm0, %v425_v60, 0.0  ;;  %v474_v18 = vld [vmem:[%s5445_s9 + $0x6e8] sm:$0xff] }
 0x1dc   : > { %v1354_v55 = vmul.f32 0.020408163, %v737_v48  ;;  %v734_v32 = vpop.xlane.xlu0 %733  ;;  %v473_v48 = vld [vmem:[%s5445_s9 + $0x6e0] sm:$0xff]  ;;  %vm3523_vm5 = vcmask 1046534  }
 0x1dd   : > { %v2391_v27 = vsel %vm2305_vm12, %v2390_v8, %v6291_v16  ;;  %v2021_v20 = vunpack.c.l.b16 %v1565_v4  ;;  %v2022_v28 = vunpack.c.h.b16 %v1565_v4  ;;  %v1353_v57 = vmul.f32 0.020408163, %v734_v32 }
 0x1de   : > { %v6475_v40 = vsel %vm2312_vm13, %v2395_v42, %v2391_v27  ;;  %844 = vadd.xlane.f32.xlu1 %v843_v0  ;;  %v1173_v27 = vsel %vm509_vm0, %v474_v18, 0.0  ;;  %v1664_v18 = vld [vmem:[%s7757_s1 + $0x8] sm:$0xff] }
 0x1df   : > { %v2548_v30 = vrot.slane %v2021_v20, %v6450_v17  ;;  %v2553_v31 = vrot.slane %v2022_v28, %v6453_v58  ;;  %v1572_v21 = vpack.c.bf16 %v1354_v55, %v1353_v57  ;;  %841 = vadd.xlane.f32.xlu0 %v840_v19  ;;  %v881_v15 = vpop.xlane.xlu1 %880  ;;  %v1170_v28 = vsel %vm509_vm0, %v473_v48, 0.0  ;;  %v488_v57 = vld [vmem:[%s5445_s9 + $0x758] sm:$0xff] }
 0x1e0   : > { %v1402_v16 = vmul.f32 0.020408163, %v881_v15  ;;  %v878_v39 = vpop.xlane.xlu0 %877  ;;  %v487_v15 = vld [vmem:[%s5445_s9 + $0x750] sm:$0xff]  ;;  %v444_v48 = vld [vmem:[%s5445_s9 + $0x5f8] sm:$0xff] }
 0x1e1   : > { %v2549_v22 = vsel %vm2305_vm12, %v2548_v30, %v6302_v56  ;;  %v2035_v53 = vunpack.c.l.b16 %v1572_v21  ;;  %v2036_v43 = vunpack.c.h.b16 %v1572_v21  ;;  %v1401_v45 = vmul.f32 0.020408163, %v878_v39 }
 0x1e2   : > { %v6486_v37 = vsel %vm2312_vm13, %v2553_v31, %v2549_v22  ;;  %988 = vadd.xlane.f32.xlu1 %v987_v38  ;;  %v1215_v22 = vsel %vm509_vm0, %v488_v57, 0.0  ;;  %v1212_v60 = vsel %vm509_vm0, %v487_v15, 0.0  ;;  %v1083_v15 = vsel %vm509_vm0, %v444_v48, 0.0  ;;  %v1680_v48 = vld [vmem:[%s7757_s1 + $0x88] sm:$0xff] }
 0x1e3   : > { %v2617_v54 = vrot.slane %v2035_v53, %v6266_v46  ;;  %v2622_v33 = vrot.slane %v2036_v43, %v6269_v49  ;;  %v1596_v29 = vpack.c.bf16 %v1402_v16, %v1401_v45  ;;  %985 = vadd.xlane.f32.xlu0 %v984_v36  ;;  %v923_v2 = vpop.xlane.xlu1 %922  ;;  %v396_v53 = vld [vmem:[%s5445_s9 + $0x478] sm:$0xff]  ;;  %v395_v43 = vld [vmem:[%s5445_s9 + $0x470] sm:$0xff] }
 0x1e4   : > { %v1416_v56 = vmul.f32 0.020408163, %v923_v2  ;;  %v920_v63 = vpop.xlane.xlu0 %919 }
 0x1e5   : > { %v2618_v23 = vsel %vm2291_vm10, %v2617_v54, %v6313_v6  ;;  %v2083_v8 = vunpack.c.l.b16 %v1596_v29  ;;  %v2084_v42 = vunpack.c.h.b16 %v1596_v29  ;;  %v1415_v4 = vmul.f32 0.020408163, %v920_v63 }
 0x1e6   : > { %v6497_v0 = vsel %vm2298_vm11, %v2622_v33, %v2618_v23  ;;  %1030 = vadd.xlane.f32.xlu1 %v1029_v3  ;;  %v936_v63 = vsel %vm509_vm0, %v395_v43, 0.0 }
 0x1e7   : > { %v2854_v55 = vrot.slane %v2083_v8, %v6266_v46  ;;  %v2859_v32 = vrot.slane %v2084_v42, %v6269_v49  ;;  %v1603_v19 = vpack.c.bf16 %v1416_v56, %v1415_v4  ;;  %1027 = vadd.xlane.f32.xlu0 %v1026_v47  ;;  %v1067_v1 = vpop.xlane.xlu1 %1066  ;;  %v939_v56 = vsel %vm509_vm0, %v396_v53, 0.0  ;;  %v1663_v47 = vld [vmem:[%s7757_s1] sm:$0xff] }
 0x1e8   : > { %v1464_v6 = vmul.f32 0.020408163, %v1067_v1  ;;  %v1064_v20 = vpop.xlane.xlu0 %1063 }
 0x1e9   : > { %v2855_v62 = vsel %vm2291_vm10, %v2854_v55, %v6324_v34  ;;  %v2097_v30 = vunpack.c.l.b16 %v1603_v19  ;;  %v2098_v31 = vunpack.c.h.b16 %v1603_v19  ;;  %v1463_v21 = vmul.f32 0.020408163, %v1064_v20 }
 0x1ea   : > { %v6508_v38 = vsel %vm2298_vm11, %v2859_v32, %v2855_v62  ;;  %1174 = vadd.xlane.f32.xlu1 %v1173_v27  ;;  %v1668_v32 = vld [vmem:[%s7757_s1 + $0x28] sm:$0xff]  ;;  %v443_v27 = vld [vmem:[%s5445_s9 + $0x5f0] sm:$0xff] }
 0x1eb   : > { %v2923_v16 = vrot.slane %v2097_v30, %v6071_v5  ;;  %v2928_v39 = vrot.slane %v2098_v31, %v6074_v10  ;;  %v1627_v36 = vpack.c.bf16 %v1464_v6, %v1463_v21  ;;  %1171 = vadd.xlane.f32.xlu0 %v1170_v28  ;;  %v1109_v12 = vpop.xlane.xlu1 %1108  ;;  %v4856_v6 = vcombine.high %v1664_v18, %v1668_v32 }
 0x1ec   : > { %v1478_v34 = vmul.f32 0.020408163, %v1109_v12  ;;  %v1106_v45 = vpop.xlane.xlu0 %1105  ;;  %v4855_v28 = vcombine.low %v1664_v18, %v1668_v32  ;;  %v1080_v43 = vsel %vm509_vm0, %v443_v27, 0.0 }
 0x1ed   : > { %v2924_v54 = vsel %vm2277_vm8, %v2923_v16, %v6335_v61  ;;  %v2145_v33 = vunpack.c.l.b16 %v1627_v36  ;;  %v2146_v29 = vunpack.c.h.b16 %v1627_v36  ;;  %v1477_v2 = vmul.f32 0.020408163, %v1106_v45  ;;  %v1667_v61 = vld [vmem:[%s7757_s1 + $0x20] sm:$0xff]  ;;  %4219 = vmatprep.subr.bf16.mxu1 %v4856_v6  ;;  %v1676_v45 = vld [vmem:[%s7757_s1 + $0x68] sm:$0xff] }
 0x1ee   : > { %v6519_v3 = vsel %vm2284_vm9, %v2928_v39, %v2924_v54  ;;  %1216 = vadd.xlane.f32.xlu1 %v1215_v22  ;;  %v4854_v55 = vcombine.high %v1663_v47, %v1667_v61  ;;  %v4853_v20 = vcombine.low %v1663_v47, %v1667_v61  ;;  %v1671_v16 = vld [vmem:[%s7757_s1 + $0x40] sm:$0xff]  ;;  %v1672_v39 = vld [vmem:[%s7757_s1 + $0x48] sm:$0xff]  ;;  %4220 = vmatpush1.bf16.msra.mxu1 %v4855_v28 }
 0x1ef   : > { %v3160_v23 = vrot.slane %v2145_v33, %v6071_v5  ;;  %v3165_v8 = vrot.slane %v2146_v29, %v6074_v10  ;;  %v1634_v42 = vpack.c.bf16 %v1478_v34, %v1477_v2  ;;  %1213 = vadd.xlane.f32.xlu0 %v1212_v60  ;;  %v1253_v4 = vpop.xlane.xlu1 %1252  ;;  %v458_v34 = vld [vmem:[%s5445_s9 + $0x668] sm:$0xff]  ;;  %v457_v33 = vld [vmem:[%s5445_s9 + $0x660] sm:$0xff]  ;;  %v4864_v2 = vcombine.high %v1672_v39, %v1676_v45 }
 0x1f0   : > { %v1526_v19 = vmul.f32 0.020408163, %v1253_v4  ;;  %v1250_v1 = vpop.xlane.xlu0 %1249  ;;  %4178 = vmatprep.subr.bf16.mxu0 %v4854_v55  ;;  %v1679_v4 = vld [vmem:[%s7757_s1 + $0x80] sm:$0xff]  ;;  %v1122_v27 = vsel %vm509_vm0, %v457_v33, 0.0  ;;  %v506_v6 = vld [vmem:[%s5445_s9 + $0x7e8] sm:$0xff] }
 0x1f1   : > { %v3161_v57 = vsel %vm2277_vm8, %v3160_v23, %v6346_v41  ;;  %v2159_v62 = vunpack.c.l.b16 %v1634_v42  ;;  %v2160_v30 = vunpack.c.h.b16 %v1634_v42  ;;  %v1525_v31 = vmul.f32 0.020408163, %v1250_v1  ;;  %v1675_v41 = vld [vmem:[%s7757_s1 + $0x60] sm:$0xff]  ;;  %4179 = vmatpush1.bf16.msra.mxu0 %v4853_v20  ;;  %4221 = vmatprep.subr.bf16.mxu1 %v4864_v2  ;;  %v1684_v20 = vld [vmem:[%s7757_s1 + $0xa8] sm:$0xff]  ;;  %v428_v2 = vld [vmem:[%s5445_s9 + $0x578] sm:$0xff] }
 0x1f2   : > { %v6542_v21 = vsel %vm2284_vm9, %v3165_v8, %v3161_v57  ;;  %940 = vadd.xlane.f32.xlu1 %v939_v56  ;;  %v4862_v29 = vcombine.high %v1671_v16, %v1675_v41  ;;  %v4861_v56 = vcombine.low %v1671_v16, %v1675_v41  ;;  %v1125_v8 = vsel %vm509_vm0, %v458_v34, 0.0  ;;  %v1688_v34 = vld [vmem:[%s7757_s1 + $0xc8] sm:$0xff] }
 0x1f3   : > { %v3229_v36 = vrot.slane %v2159_v62, %v5880_v13  ;;  %v3234_v12 = vrot.slane %v2160_v30, %v5883_v14  ;;  %v1658_v22 = vpack.c.bf16 %v1526_v19, %v1525_v31  ;;  %937 = vadd.xlane.f32.xlu0 %v936_v63  ;;  %v551_v53 = vpop.xlane.xlu1 %550  ;;  %v4863_v42 = vcombine.low %v1672_v39, %v1676_v45  ;;  %v505_v62 = vld [vmem:[%s5445_s9 + $0x7e0] sm:$0xff] }
 0x1f4   : > { %v1292_v60 = vmul.f32 0.020408163, %v551_v53  ;;  %v548_v54 = vpop.xlane.xlu0 %547  ;;  %4180 = vmatprep.subr.bf16.mxu0 %v4862_v29  ;;  %v4872_v31 = vcombine.high %v1680_v48, %v1684_v20  ;;  %v4871_v53 = vcombine.low %v1680_v48, %v1684_v20  ;;  %v1266_v29 = vsel %vm509_vm0, %v505_v62, 0.0 }
 0x1f5   : > { %v3230_v47 = vsel %vm2263_vm6, %v3229_v36, %v6357_v44  ;;  %v2207_v63 = vunpack.c.l.b16 %v1658_v22  ;;  %v2208_v61 = vunpack.c.h.b16 %v1658_v22  ;;  %v1291_v18 = vmul.f32 0.020408163, %v548_v54  ;;  %v1683_v44 = vld [vmem:[%s7757_s1 + $0xa0] sm:$0xff]  ;;  %4181 = vmatpush1.bf16.msra.mxu0 %v4861_v56  ;;  %4222 = vmatpush1.bf16.msra.mxu1 %v4863_v42  ;;  %v1692_v56 = vld [vmem:[%s7757_s1 + $0xe8] sm:$0xff] }
 0x1f6   : > { %v6565_v23 = vsel %vm2270_vm7, %v3234_v12, %v3230_v47  ;;  %1084 = vadd.xlane.f32.xlu1 %v1083_v15  ;;  %v4870_v30 = vcombine.high %v1679_v4, %v1683_v44  ;;  %v4869_v15 = vcombine.low %v1679_v4, %v1683_v44  ;;  %v1269_v22 = vsel %vm509_vm0, %v506_v6, 0.0  ;;  %4223 = vmatprep.subr.bf16.mxu1 %v4872_v31  ;;  %v1696_v6 = vld [vmem:[%s7757_s1 + $0x108] sm:$0xff]  ;;  %v476_v31 = vld [vmem:[%s5445_s9 + $0x6f8] sm:$0xff] }
 0x1f7   : > { %v3466_v55 = vrot.slane %v2207_v63, %v5880_v13  ;;  %v3471_v32 = vrot.slane %v2208_v61, %v5883_v14  ;;  %v1541_v19 = vpack.c.bf16 %v1292_v60, %v1291_v18  ;;  %1081 = vadd.xlane.f32.xlu0 %v1080_v43  ;;  %v647_v1 = vpop.xlane.xlu1 %646  ;;  %v1687_v43 = vld [vmem:[%s7757_s1 + $0xc0] sm:$0xff]  ;;  %v427_v61 = vld [vmem:[%s5445_s9 + $0x570] sm:$0xff] }
 0x1f8   : > { %v1324_v28 = vmul.f32 0.020408163, %v647_v1  ;;  %v644_v57 = vpop.xlane.xlu0 %643  ;;  %4182 = vmatprep.subr.bf16.mxu0 %v4870_v30  ;;  %v4879_v1 = vcombine.low %v1688_v34, %v1692_v56  ;;  %v1032_v30 = vsel %vm509_vm0, %v427_v61, 0.0 }
 0x1f9   : > { %v3467_v16 = vsel %vm2263_vm6, %v3466_v55, %v6368_v7  ;;  %v1973_v41 = vunpack.c.l.b16 %v1541_v19  ;;  %v1974_v39 = vunpack.c.h.b16 %v1541_v19  ;;  %v1323_v36 = vmul.f32 0.020408163, %v644_v57  ;;  %v1691_v7 = vld [vmem:[%s7757_s1 + $0xe0] sm:$0xff]  ;;  %4183 = vmatpush1.bf16.msra.mxu0 %v4869_v15  ;;  %4224 = vmatpush1.bf16.msra.mxu1 %v4871_v53  ;;  %v1700_v15 = vld [vmem:[%s7757_s1 + $0x128] sm:$0xff] }
 0x1fa   : > { %v6588_v12 = vsel %vm2270_vm7, %v3471_v32, %v3467_v16  ;;  %1126 = vadd.xlane.f32.xlu1 %v1125_v8  ;;  %v4878_v18 = vcombine.high %v1687_v43, %v1691_v7  ;;  %v4880_v8 = vcombine.high %v1688_v34, %v1692_v56  ;;  %v4877_v42 = vcombine.low %v1687_v43, %v1691_v7 }
 0x1fb   : > { %v2304_v45 = vrot.slane %v1973_v41, %v6450_v17  ;;  %v2311_v60 = vrot.slane %v1974_v39, %v6453_v58  ;;  %v1557_v54 = vpack.c.bf16 %v1324_v28, %v1323_v36  ;;  %1123 = vadd.xlane.f32.xlu0 %v1122_v27  ;;  %v791_v33 = vpop.xlane.xlu1 %790  ;;  %v1035_v19 = vsel %vm509_vm0, %v428_v2, 0.0  ;;  %v1695_v27 = vld [vmem:[%s7757_s1 + $0x100] sm:$0xff]  ;;  %v475_v39 = vld [vmem:[%s5445_s9 + $0x6f0] sm:$0xff]  ;;  %v1704_v2 = vld [vmem:[%s7757_s1 + $0x148] sm:$0xff] }
 0x1fc   : > { %v1372_v47 = vmul.f32 0.020408163, %v791_v33  ;;  %v788_v63 = vpop.xlane.xlu0 %787  ;;  %4184 = vmatprep.subr.bf16.mxu0 %v4878_v18  ;;  %4225 = vmatprep.subr.bf16.mxu1 %v4880_v8  ;;  %v4887_v33 = vcombine.low %v1696_v6, %v1700_v15  ;;  %v1176_v18 = vsel %vm509_vm0, %v475_v39, 0.0  ;;  %v490_v8 = vld [vmem:[%s5445_s9 + $0x768] sm:$0xff] }
 0x1fd   : > { %v2306_v4 = vsel %vm2305_vm12, %v2304_v45, %v6379_v26  ;;  %v2005_v44 = vunpack.c.l.b16 %v1557_v54  ;;  %v2006_v48 = vunpack.c.h.b16 %v1557_v54  ;;  %v1371_v55 = vmul.f32 0.020408163, %v788_v63  ;;  %v1699_v26 = vld [vmem:[%s7757_s1 + $0x120] sm:$0xff]  ;;  %4185 = vmatpush1.bf16.msra.mxu0 %v4877_v42  ;;  %4226 = vmatpush1.bf16.msra.mxu1 %v4879_v1  ;;  %v1708_v42 = vld [vmem:[%s7757_s1 + $0x168] sm:$0xff] }
 0x1fe   : > { %v6611_v32 = vsel %vm2312_vm13, %v2311_v60, %v2306_v4  ;;  %1270 = vadd.xlane.f32.xlu1 %v1269_v22  ;;  %v4886_v36 = vcombine.high %v1695_v27, %v1699_v26  ;;  %v4888_v22 = vcombine.high %v1696_v6, %v1700_v15  ;;  %v4885_v53 = vcombine.low %v1695_v27, %v1699_v26 }
 0x1ff   : > { %v2469_v20 = vrot.slane %v2005_v44, %v6450_v17  ;;  %v2474_v28 = vrot.slane %v2006_v48, %v6453_v58  ;;  %v1581_v57 = vpack.c.bf16 %v1372_v47, %v1371_v55  ;;  %1267 = vadd.xlane.f32.xlu0 %v1266_v29  ;;  %v833_v62 = vpop.xlane.xlu1 %832  ;;  %v1179_v54 = vsel %vm509_vm0, %v476_v31, 0.0  ;;  %v1703_v29 = vld [vmem:[%s7757_s1 + $0x140] sm:$0xff]  ;;  %v1712_v31 = vld [vmem:[%s7757_s1 + $0x188] sm:$0xff] }
 0x200   : > { %v1386_v16 = vmul.f32 0.020408163, %v833_v62  ;;  %v830_v41 = vpop.xlane.xlu0 %829  ;;  %4186 = vmatprep.subr.bf16.mxu0 %v4886_v36  ;;  %4227 = vmatprep.subr.bf16.mxu1 %v4888_v22  ;;  %v489_v48 = vld [vmem:[%s5445_s9 + $0x760] sm:$0xff]  ;;  %v4895_v62 = vcombine.low %v1704_v2, %v1708_v42  ;;  %v460_v22 = vld [vmem:[%s5445_s9 + $0x678] sm:$0xff] }
 0x201   : > { %v2470_v43 = vsel %vm2305_vm12, %v2469_v20, %v6390_v51  ;;  %v2053_v7 = vunpack.c.l.b16 %v1581_v57  ;;  %v2054_v34 = vunpack.c.h.b16 %v1581_v57  ;;  %v1385_v45 = vmul.f32 0.020408163, %v830_v41  ;;  %v1707_v51 = vld [vmem:[%s7757_s1 + $0x160] sm:$0xff]  ;;  %4187 = vmatpush1.bf16.msra.mxu0 %v4885_v53  ;;  %4228 = vmatpush1.bf16.msra.mxu1 %v4887_v33  ;;  %v459_v53 = vld [vmem:[%s5445_s9 + $0x670] sm:$0xff] }
 0x202   : > { %v6634_v60 = vsel %vm2312_vm13, %v2474_v28, %v2470_v43  ;;  %1036 = vadd.xlane.f32.xlu1 %v1035_v19  ;;  %v4894_v55 = vcombine.high %v1703_v29, %v1707_v51  ;;  %v4896_v19 = vcombine.high %v1704_v2, %v1708_v42  ;;  %v4893_v1 = vcombine.low %v1703_v29, %v1707_v51  ;;  %v1716_v43 = vld [vmem:[%s7757_s1 + $0x1a8] sm:$0xff]  ;;  %v1719_v42 = vld [vmem:[%s7757_s1 + $0x1c0] sm:$0xff] }
 0x203   : > { %v2706_v56 = vrot.slane %v2053_v7, %v6450_v17  ;;  %v2711_v47 = vrot.slane %v2054_v34, %v6453_v58  ;;  %v1588_v63 = vpack.c.bf16 %v1386_v16, %v1385_v45  ;;  %1033 = vadd.xlane.f32.xlu0 %v1032_v30  ;;  %v977_v61 = vpop.xlane.xlu1 %976  ;;  %v1221_v57 = vsel %vm509_vm0, %v490_v8, 0.0  ;;  %v1711_v30 = vld [vmem:[%s7757_s1 + $0x180] sm:$0xff]  ;;  %v508_v45 = vld [vmem:[%s5445_s9 + $0x7f8] sm:$0xff] }
 0x204   : > { %v1434_v4 = vmul.f32 0.020408163, %v977_v61  ;;  %v974_v44 = vpop.xlane.xlu0 %973  ;;  %4188 = vmatprep.subr.bf16.mxu0 %v4894_v55  ;;  %v1218_v36 = vsel %vm509_vm0, %v489_v48, 0.0  ;;  %4229 = vmatprep.subr.bf16.mxu1 %v4896_v19  ;;  %v4904_v33 = vcombine.high %v1712_v31, %v1716_v43  ;;  %v1131_v61 = vsel %vm509_vm0, %v460_v22, 0.0 }
 0x205   : > { %v2707_v27 = vsel %vm2305_vm12, %v2706_v56, %v6401_v9  ;;  %v2067_v26 = vunpack.c.l.b16 %v1588_v63  ;;  %v2068_v6 = vunpack.c.h.b16 %v1588_v63  ;;  %v1433_v20 = vmul.f32 0.020408163, %v974_v44  ;;  %v1715_v9 = vld [vmem:[%s7757_s1 + $0x1a0] sm:$0xff]  ;;  %4189 = vmatpush1.bf16.msra.mxu0 %v4893_v1  ;;  %4230 = vmatpush1.bf16.msra.mxu1 %v4895_v62 }
 0x206   : > { %v6657_v28 = vsel %vm2312_vm13, %v2711_v47, %v2707_v27  ;;  %1180 = vadd.xlane.f32.xlu1 %v1179_v54  ;;  %v4902_v54 = vcombine.high %v1711_v30, %v1715_v9  ;;  %v4901_v29 = vcombine.low %v1711_v30, %v1715_v9  ;;  %v4903_v8 = vcombine.low %v1712_v31, %v1716_v43  ;;  %v507_v27 = vld [vmem:[%s5445_s9 + $0x7f0] sm:$0xff]  ;;  %v1727_v43 = vld [vmem:[%s7757_s1 + $0x200] sm:$0xff] }
 0x207   : > { %v2775_v15 = vrot.slane %v2067_v26, %v6266_v46  ;;  %v2780_v16 = vrot.slane %v2068_v6, %v6269_v49  ;;  %v1612_v41 = vpack.c.bf16 %v1434_v4, %v1433_v20  ;;  %1177 = vadd.xlane.f32.xlu0 %v1176_v18  ;;  %v1019_v39 = vpop.xlane.xlu1 %1018  ;;  %v1128_v18 = vsel %vm509_vm0, %v459_v53, 0.0  ;;  %v1720_v4 = vld [vmem:[%s7757_s1 + $0x1c8] sm:$0xff]  ;;  %4231 = vmatprep.subr.bf16.mxu1 %v4904_v33 }
 0x208   : > { %v1448_v7 = vmul.f32 0.020408163, %v1019_v39  ;;  %v1016_v34 = vpop.xlane.xlu0 %1015  ;;  %4190 = vmatprep.subr.bf16.mxu0 %v4902_v54  ;;  %v1275_v1 = vsel %vm509_vm0, %v508_v45, 0.0  ;;  %v1724_v26 = vld [vmem:[%s7757_s1 + $0x1e8] sm:$0xff]  ;;  %v2314_v22 = vadd.s32 4294967184, %v5597_v25 }
 0x209   : > { %v2776_v51 = vsel %vm2291_vm10, %v2775_v15, %v6412_v59  ;;  %v2115_v2 = vunpack.c.l.b16 %v1612_v41  ;;  %v2116_v56 = vunpack.c.h.b16 %v1612_v41  ;;  %v1447_v47 = vmul.f32 0.020408163, %v1016_v34  ;;  %v1723_v59 = vld [vmem:[%s7757_s1 + $0x1e0] sm:$0xff]  ;;  %4191 = vmatpush1.bf16.msra.mxu0 %v4901_v29  ;;  %4232 = vmatpush1.bf16.msra.mxu1 %v4903_v8 }
 0x20a   : > { %v6681_v63 = vsel %vm2298_vm11, %v2780_v16, %v2776_v51  ;;  %1222 = vadd.xlane.f32.xlu1 %v1221_v57  ;;  %v492_v57 = vld [vmem:[%s5445_s9 + $0x778] sm:$0xff]  ;;  %v4910_v62 = vcombine.high %v1719_v42, %v1723_v59  ;;  %v4912_v30 = vcombine.high %v1720_v4, %v1724_v26  ;;  %v4909_v9 = vcombine.low %v1719_v42, %v1723_v59  ;;  %v1732_v51 = vld [vmem:[%s7757_s1 + $0x228] sm:$0xff] }
 0x20b   : > { %v3012_v44 = vrot.slane %v2115_v2, %v6266_v46  ;;  %v3017_v48 = vrot.slane %v2116_v56, %v6269_v49  ;;  %v1619_v55 = vpack.c.bf16 %v1448_v7, %v1447_v47  ;;  %1219 = vadd.xlane.f32.xlu0 %v1218_v36  ;;  %v1163_v19 = vpop.xlane.xlu1 %1162  ;;  %v1272_v36 = vsel %vm509_vm0, %v507_v27, 0.0  ;;  %v1728_v7 = vld [vmem:[%s7757_s1 + $0x208] sm:$0xff]  ;;  %v491_v47 = vld [vmem:[%s5445_s9 + $0x770] sm:$0xff]  ;;  %s4786_s9 = sshll.u32 %s235_s30, 4  ;;  %s7716_s9 = int_to_ptr.vmem [resolvable:$true] %s4786_s9 }
 0x20c   : > { %v1496_v6 = vmul.f32 0.020408163, %v1163_v19  ;;  %v1160_v20 = vpop.xlane.xlu0 %1159  ;;  %4192 = vmatprep.subr.bf16.mxu0 %v4910_v62  ;;  %v4911_v53 = vcombine.low %v1720_v4, %v1724_v26  ;;  %v1227_v29 = vsel %vm509_vm0, %v492_v57, 0.0  ;;  %4233 = vmatprep.subr.bf16.mxu1 %v4912_v30  ;;  %v4920_v8 = vcombine.high %v1728_v7, %v1732_v51  ;;  %v1735_v26 = vld [vmem:[%s7757_s1 + $0x240] sm:$0xff]  ;;  %v1740_v30 = vld [vmem:[%s7757_s1 + $0x268] sm:$0xff]  ;;  %s5298_s11 = scalar_lea.vmem %s7716_s9, 128  ;;  %p5305_p0 = scmp.lt.s32.totalorder %s7716_s9, %s5303_s12 }
 0x20d   : > { %v3013_v31 = vsel %vm2291_vm10, %v3012_v44, %v6423_v52  ;;  %v2129_v15 = vunpack.c.l.b16 %v1619_v55  ;;  %v2130_v16 = vunpack.c.h.b16 %v1619_v55  ;;  %v1495_v41 = vmul.f32 0.020408163, %v1160_v20  ;;  %v1731_v52 = vld [vmem:[%s7757_s1 + $0x220] sm:$0xff]  ;;  %4193 = vmatpush1.bf16.msra.mxu0 %v4909_v9  ;;  %p5299_p11 = scmp.ne.s32.totalorder %s7716_s9, %s5298_s11  ;;  %p5306_p1 = scmp.lt.s32.totalorder %s5304_s13, %s5298_s11 }
 0x20e   : > { %v6705_v39 = vsel %vm2298_vm11, %v3017_v48, %v3013_v31  ;;  %1132 = vadd.xlane.f32.xlu1 %v1131_v61  ;;  %4234 = vmatpush1.bf16.msra.mxu1 %v4911_v53  ;;  %v4918_v61 = vcombine.high %v1727_v43, %v1731_v52  ;;  %v4917_v42 = vcombine.low %v1727_v43, %v1731_v52  ;;  %v2321_v19 = vadd.s32 4294967176, %v5597_v25 }
 0x20f   : > { %v3081_v34 = vrot.slane %v2129_v15, %v6071_v5  ;;  %v3086_v45 = vrot.slane %v2130_v16, %v6074_v10  ;;  %v1643_v54 = vpack.c.bf16 %v1496_v6, %v1495_v41  ;;  %1129 = vadd.xlane.f32.xlu0 %v1128_v18  ;;  %v1205_v33 = vpop.xlane.xlu1 %1204  ;;  %v6731_v55 = vsub.s32 %v2314_v22, %v5602_v35  ;;  %v1736_v6 = vld [vmem:[%s7757_s1 + $0x248] sm:$0xff]  ;;  %p5300_p12 = pnand %p5299_p11, %p5431_p5  ;;  %p5307_p2 = por %p5306_p1, %p5305_p0 }
 0x210   : > { %v1510_v2 = vmul.f32 0.020408163, %v1205_v33  ;;  %v1202_v56 = vpop.xlane.xlu0 %1201  ;;  %4194 = vmatprep.subr.bf16.mxu0 %v4918_v61  ;;  %v4919_v27 = vcombine.low %v1728_v7, %v1732_v51  ;;  %v1224_v62 = vsel %vm509_vm0, %v491_v47, 0.0  ;;  %4235 = vmatprep.subr.bf16.mxu1 %v4920_v8  ;;  %v4928_v16 = vcombine.high %v1736_v6, %v1740_v30 }
 0x211   : > { %v3082_v59 = vsel %vm2277_vm8, %v3081_v34, %v6434_v11  ;;  %v2177_v18 = vunpack.c.l.b16 %v1643_v54  ;;  %v2178_v4 = vunpack.c.h.b16 %v1643_v54  ;;  %v1509_v44 = vmul.f32 0.020408163, %v1202_v56  ;;  %v1739_v11 = vld [vmem:[%s7757_s1 + $0x260] sm:$0xff]  ;;  %4195 = vmatpush1.bf16.msra.mxu0 %v4917_v42  ;;  %v1744_v54 = vld [vmem:[%s7757_s1 + $0x288] sm:$0xff]  ;;  %p5301_p13 = pneg %p5300_p12 }
 0x212   : > { %v6728_v48 = vsel %vm2284_vm9, %v3086_v45, %v3082_v59  ;;  %1276 = vadd.xlane.f32.xlu1 %v1275_v1  ;;  %4236 = vmatpush1.bf16.msra.mxu1 %v4919_v27  ;;  %v4926_v15 = vcombine.high %v1735_v26, %v1739_v11  ;;  %v4925_v41 = vcombine.low %v1735_v26, %v1739_v11  ;;  %v1743_v45 = vld [vmem:[%s7757_s1 + $0x280] sm:$0xff]  ;;  %v1748_v56 = vld [vmem:[%s7757_s1 + $0x2a8] sm:$0xff]  ;;  %vm3513_vm0 = vcmask 1041409  }
 0x213   : > { %v3318_v1 = vrot.slane %v2177_v18, %v6071_v5  ;;  %v3323_v20 = vrot.slane %v2178_v4, %v6074_v10  ;;  %v1650_v57 = vpack.c.bf16 %v1510_v2, %v1509_v44  ;;  %1273 = vadd.xlane.f32.xlu0 %v1272_v36  ;;  %v605_v25 = vpop.xlane.xlu1 %604  ;;  %v6755_v7 = vsub.s32 %v2321_v19, %v5602_v35  ;;  %v1751_v27 = vld [vmem:[%s7757_s1 + $0x2c0] sm:$0xff]  ;;  %p5308_p3 = pnand %p5307_p2, %p5301_p13 }
 0x214   : > { %v1310_v9 = vmul.f32 0.020408163, %v605_v25  ;;  %v602_v31 = vpop.xlane.xlu0 %601  ;;  %4196 = vmatprep.subr.bf16.mxu0 %v4926_v15  ;;  %v4927_v34 = vcombine.low %v1736_v6, %v1740_v30  ;;  %4237 = vmatprep.subr.bf16.mxu1 %v4928_v16  ;;  %v4936_v42 = vcombine.high %v1744_v54, %v1748_v56  ;;  %v4935_v19 = vcombine.low %v1744_v54, %v1748_v56  ;;  %v1755_v26 = vld [vmem:[%s7757_s1 + $0x2e0] sm:$0xff]  ;;  %v1756_v25 = vld [vmem:[%s7757_s1 + $0x2e8] sm:$0xff] }
 0x215   : > { %v3319_v22 = vsel %vm2277_vm8, %v3318_v1, %v6447_v50  ;;  %v2191_v53 = vunpack.c.l.b16 %v1650_v57  ;;  %v2192_v36 = vunpack.c.h.b16 %v1650_v57  ;;  %v1309_v43 = vmul.f32 0.020408163, %v602_v31  ;;  %v1747_v50 = vld [vmem:[%s7757_s1 + $0x2a0] sm:$0xff]  ;;  %4197 = vmatpush1.bf16.msra.mxu0 %v4925_v41 }
 0x216   : > { %v6752_v52 = vsel %vm2284_vm9, %v3323_v20, %v3319_v22  ;;  %1228 = vadd.xlane.f32.xlu1 %v1227_v29  ;;  %4238 = vmatpush1.bf16.msra.mxu1 %v4927_v34  ;;  %v4934_v8 = vcombine.high %v1743_v45, %v1747_v50  ;;  %v4933_v59 = vcombine.low %v1743_v45, %v1747_v50  ;;  %v1763_v34 = vld [vmem:[%s7757_s1 + $0x320] sm:$0xff] }
 0x217   : > { %v3387_v33 = vrot.slane %v2191_v53, %v5880_v13  ;;  %v3392_v51 = vrot.slane %v2192_v36, %v5883_v14  ;;  %v1550_v2 = vpack.c.bf16 %v1310_v9, %v1309_v43  ;;  %1225 = vadd.xlane.f32.xlu0 %v1224_v62  ;;  %v701_v29 = vpop.xlane.xlu1 %700  ;;  %4239 = vmatprep.subr.bf16.mxu1 %v4936_v42  ;;  %v1759_v43 = vld [vmem:[%s7757_s1 + $0x300] sm:$0xff] }
 0x218   : > { %v1342_v47 = vmul.f32 0.020408163, %v701_v29  ;;  %v698_v61 = vpop.xlane.xlu0 %697  ;;  %4198 = vmatprep.subr.bf16.mxu0 %v4934_v8  ;;  %v4942_v57 = vcombine.high %v1751_v27, %v1755_v26  ;;  %v4941_v31 = vcombine.low %v1751_v27, %v1755_v26  ;;  %v1768_v27 = vld [vmem:[%s7757_s1 + $0x348] sm:$0xff] }
 0x219   : > { %v3388_v13 = vsel %vm2263_vm6, %v3387_v33, %v6464_v24  ;;  %v1991_v18 = vunpack.c.l.b16 %v1550_v2  ;;  %v1992_v14 = vunpack.c.h.b16 %v1550_v2  ;;  %v1341_v4 = vmul.f32 0.020408163, %v698_v61  ;;  %v1752_v24 = vld [vmem:[%s7757_s1 + $0x2c8] sm:$0xff]  ;;  %4199 = vmatpush1.bf16.msra.mxu0 %v4933_v59 }
 0x21a   : > { %v6774_v44 = vsel %vm2270_vm7, %v3392_v51, %v3388_v13  ;;  %4240 = vmatpush1.bf16.msra.mxu1 %v4935_v19  ;;  %v4944_v9 = vcombine.high %v1752_v24, %v1756_v25  ;;  %v4943_v15 = vcombine.low %v1752_v24, %v1756_v25  ;;  %4200 = vmatprep.subr.bf16.mxu0 %v4942_v57  ;;  %v1764_v2 = vld [vmem:[%s7757_s1 + $0x328] sm:$0xff]  ;;  %v1771_v19 = vld [vmem:[%s7757_s1 + $0x360] sm:$0xff]  ;;  %vm3525_vm6 = vcmask 1047559  }
 0x21b   : > { %v2400_v11 = vrot.slane %v1991_v18, %v6731_v55  ;;  %v2405_v6 = vrot.slane %v1992_v14, %v6755_v7  ;;  %v1566_v1 = vpack.c.bf16 %v1342_v47, %v1341_v4  ;;  %v743_v20 = vpop.xlane.xlu1 %742  ;;  %v4950_v51 = vcombine.high %v1759_v43, %v1763_v34  ;;  %v1767_v4 = vld [vmem:[%s7757_s1 + $0x340] sm:$0xff] }
 0x21c   : > { %v1356_v62 = vmul.f32 0.020408163, %v743_v20  ;;  %v740_v30 = vpop.xlane.xlu0 %739  ;;  %4241 = vmatprep.subr.bf16.mxu1 %v4944_v9  ;;  %v4949_v61 = vcombine.low %v1759_v43, %v1763_v34  ;;  %v4958_v25 = vcombine.high %v1767_v4, %v1771_v19  ;;  %vm4770_vm7 = vcmask 80896  }
 0x21d   : > { %v2401_v16 = vsel %vm2319_vm14, %v2400_v11, %v6475_v40  ;;  %v2023_v41 = vunpack.c.l.b16 %v1566_v1  ;;  %v2024_v22 = vunpack.c.h.b16 %v1566_v1  ;;  %v1355_v53 = vmul.f32 0.020408163, %v740_v30  ;;  %v1760_v40 = vld [vmem:[%s7757_s1 + $0x308] sm:$0xff]  ;;  %4201 = vmatpush1.bf16.msra.mxu0 %v4941_v31 }
 0x21e   : > { %v2406_v36 = vsel %vm2326_vm15, %v2405_v6, %v2401_v16  ;;  %4242 = vmatpush1.bf16.msra.mxu1 %v4943_v15  ;;  %v4952_v47 = vcombine.high %v1760_v40, %v1764_v2  ;;  %v4951_v8 = vcombine.low %v1760_v40, %v1764_v2  ;;  %4202 = vmatprep.subr.bf16.mxu0 %v4950_v51  ;;  %v1772_v1 = vld [vmem:[%s7757_s1 + $0x368] sm:$0xff] }
 0x21f   : > { %v2558_v45 = vrot.slane %v2023_v41, %v6731_v55  ;;  %v2563_v50 = vrot.slane %v2024_v22, %v6755_v7  ;;  %v1573_v54 = vpack.c.bf16 %v1356_v62, %v1355_v53  ;;  %v887_v33 = vpop.xlane.xlu1 %886  ;;  %v4960_v62 = vcombine.high %v1768_v27, %v1772_v1  ;;  %v1775_v53 = vld [vmem:[%s7757_s1 + $0x380] sm:$0xff] }
 0x220   : > { %v1404_v29 = vmul.f32 0.020408163, %v887_v33  ;;  %v884_v56 = vpop.xlane.xlu0 %883  ;;  %4243 = vmatprep.subr.bf16.mxu1 %v4952_v47  ;;  %v4957_v30 = vcombine.low %v1767_v4, %v1771_v19  ;;  %v4959_v22 = vcombine.low %v1768_v27, %v1772_v1 }
 0x221   : > { %v2559_v42 = vsel %vm2319_vm14, %v2558_v45, %v6486_v37  ;;  %v2037_v59 = vunpack.c.l.b16 %v1573_v54  ;;  %v2038_v13 = vunpack.c.h.b16 %v1573_v54  ;;  %v1403_v18 = vmul.f32 0.020408163, %v884_v56  ;;  %4203 = vmatpush1.bf16.msra.mxu0 %v4949_v61  ;;  %v1780_v54 = vld [vmem:[%s7757_s1 + $0x3a8] sm:$0xff] }
 0x222   : > { %v2564_v14 = vsel %vm2326_vm15, %v2563_v50, %v2559_v42  ;;  %4244 = vmatpush1.bf16.msra.mxu1 %v4951_v8  ;;  %4204 = vmatprep.subr.bf16.mxu0 %v4958_v25 }
 0x223   : > { %v6820_v37 = vsel %vm3513_vm0, %v2564_v14, %v2406_v36  ;;  %v2627_v26 = vrot.slane %v2037_v59, %v6450_v17  ;;  %v2632_v24 = vrot.slane %v2038_v13, %v6453_v58  ;;  %v1597_v11 = vpack.c.bf16 %v1404_v29, %v1403_v18  ;;  %v929_v6 = vpop.xlane.xlu1 %928  ;;  %4245 = vmatprep.subr.bf16.mxu1 %v4960_v62  ;;  %v1779_v36 = vld [vmem:[%s7757_s1 + $0x3a0] sm:$0xff] }
 0x224   : > { %v1418_v20 = vmul.f32 0.020408163, %v929_v6  ;;  %v926_v57 = vpop.xlane.xlu0 %925  ;;  %v4966_v50 = vcombine.high %v1775_v53, %v1779_v36  ;;  %v4965_v29 = vcombine.low %v1775_v53, %v1779_v36  ;;  %v1783_v13 = vld [vmem:[%s7757_s1 + $0x3c0] sm:$0xff] }
 0x225   : > { %v2628_v9 = vsel %vm2305_vm12, %v2627_v26, %v6497_v0  ;;  %v2085_v31 = vunpack.c.l.b16 %v1597_v11  ;;  %v2086_v15 = vunpack.c.h.b16 %v1597_v11  ;;  %v1417_v16 = vmul.f32 0.020408163, %v926_v57  ;;  %v1776_v0 = vld [vmem:[%s7757_s1 + $0x388] sm:$0xff]  ;;  %4205 = vmatpush1.bf16.msra.mxu0 %v4957_v30  ;;  %v1787_v18 = vld [vmem:[%s7757_s1 + $0x3e0] sm:$0xff] }
 0x226   : > { %v6830_v41 = vsel %vm2312_vm13, %v2632_v24, %v2628_v9  ;;  %4246 = vmatpush1.bf16.msra.mxu1 %v4959_v22  ;;  %v4968_v2 = vcombine.high %v1776_v0, %v1780_v54  ;;  %v4967_v56 = vcombine.low %v1776_v0, %v1780_v54  ;;  %4206 = vmatprep.subr.bf16.mxu0 %v4966_v50  ;;  %v1788_v24 = vld [vmem:[%s7757_s1 + $0x3e8] sm:$0xff] }
 0x227   : > { %v2864_v43 = vrot.slane %v2085_v31, %v6450_v17  ;;  %v2869_v34 = vrot.slane %v2086_v15, %v6453_v58  ;;  %v1604_v40 = vpack.c.bf16 %v1418_v20, %v1417_v16  ;;  %v1073_v45 = vpop.xlane.xlu1 %1072  ;;  %v4974_v26 = vcombine.high %v1783_v13, %v1787_v18  ;;  %v6873_v15 = vld [vmem:[%s7757_s1 + $0x10] sm:$0xff] }
 0x228   : > { %v1466_v33 = vmul.f32 0.020408163, %v1073_v45  ;;  %v1070_v51 = vpop.xlane.xlu0 %1069  ;;  %4247 = vmatprep.subr.bf16.mxu1 %v4968_v2  ;;  %v4973_v20 = vcombine.low %v1783_v13, %v1787_v18  ;;  %v6878_v16 = vld [vmem:[%s7757_s1 + $0x30] sm:$0xff] }
 0x229   : > { %v2865_v47 = vsel %vm2305_vm12, %v2864_v43, %v6508_v38  ;;  %v2099_v61 = vunpack.c.l.b16 %v1604_v40  ;;  %v2100_v8 = vunpack.c.h.b16 %v1604_v40  ;;  %v1465_v42 = vmul.f32 0.020408163, %v1070_v51  ;;  %v1784_v38 = vld [vmem:[%s7757_s1 + $0x3c8] sm:$0xff]  ;;  %4207 = vmatpush1.bf16.msra.mxu0 %v4965_v29 }
 0x22a   : > { %v6849_v59 = vsel %vm2312_vm13, %v2869_v34, %v2865_v47  ;;  %4248 = vmatpush1.bf16.msra.mxu1 %v4967_v56  ;;  %v4976_v1 = vcombine.high %v1784_v38, %v1788_v24  ;;  %v4975_v57 = vcombine.low %v1784_v38, %v1788_v24  ;;  %4208 = vmatprep.subr.bf16.mxu0 %v4974_v26  ;;  %v6892_v34 = vld [vmem:[%s7757_s1 + $0x38] sm:$0xff] }
 0x22b   : > { %v2933_v14 = vrot.slane %v2099_v61, %v6266_v46  ;;  %v2938_v4 = vrot.slane %v2100_v8, %v6269_v49  ;;  %v1628_v19 = vpack.c.bf16 %v1466_v33, %v1465_v42  ;;  %v1115_v27 = vpop.xlane.xlu1 %1114  ;;  %v4857_v43 = vcombine.low %v6873_v15, %v6878_v16 }
 0x22c   : > { %v1480_v11 = vmul.f32 0.020408163, %v1115_v27  ;;  %v1112_v6 = vpop.xlane.xlu0 %1111  ;;  %4249 = vmatprep.subr.bf16.mxu1 %v4976_v1  ;;  %v4858_v50 = vcombine.high %v6873_v15, %v6878_v16  ;;  %v1693_v15 = vld [vmem:[%s7757_s1 + $0xf0] sm:$0xff]  ;;  %v1690_v16 = vld [vmem:[%s7757_s1 + $0xd8] sm:$0xff] }
 0x22d   : > { %v2934_v25 = vsel %vm2291_vm10, %v2933_v14, %v6519_v3  ;;  %v2147_v62 = vunpack.c.l.b16 %v1628_v19  ;;  %v2148_v30 = vunpack.c.h.b16 %v1628_v19  ;;  %v1479_v9 = vmul.f32 0.020408163, %v1112_v6  ;;  %v6883_v3 = vld [vmem:[%s7757_s1 + $0x18] sm:$0xff]  ;;  %4209 = vmatpush1.bf16.msra.mxu0 %v4973_v20 }
 0x22e   : > { %v6868_v31 = vsel %vm2298_vm11, %v2938_v4, %v2934_v25  ;;  %4250 = vmatpush1.bf16.msra.mxu1 %v4975_v57  ;;  %v4859_v54 = vcombine.low %v6883_v3, %v6892_v34  ;;  %v4860_v33 = vcombine.high %v6883_v3, %v6892_v34  ;;  %4260 = vmatprep.subr.bf16.mxu0 %v4858_v50  ;;  %v1694_v3 = vld [vmem:[%s7757_s1 + $0xf8] sm:$0xff] }
 0x22f   : > { %v3170_v22 = vrot.slane %v2147_v62, %v6266_v46  ;;  %v3175_v53 = vrot.slane %v2148_v30, %v6269_v49  ;;  %v1635_v36 = vpack.c.bf16 %v1480_v11, %v1479_v9  ;;  %v1259_v0 = vpop.xlane.xlu1 %1258 }
 0x230   : > { %v1528_v40 = vmul.f32 0.020408163, %v1259_v0  ;;  %v1256_v45 = vpop.xlane.xlu0 %1255  ;;  %4301 = vmatprep.subr.bf16.mxu1 %v4860_v33 }
 0x231   : > { %v3171_v51 = vsel %vm2291_vm10, %v3170_v22, %v6542_v21  ;;  %v2161_v2 = vunpack.c.l.b16 %v1635_v36  ;;  %v2162_v29 = vunpack.c.h.b16 %v1635_v36  ;;  %v1527_v56 = vmul.f32 0.020408163, %v1256_v45 }
 0x232   : > { %v6903_v47 = vsel %vm2298_vm11, %v3175_v53, %v3171_v51 }
 0x233   : > { %v3239_v61 = vrot.slane %v2161_v2, %v6071_v5  ;;  %v3244_v8 = vrot.slane %v2162_v29, %v6074_v10  ;;  %v1659_v42 = vpack.c.bf16 %v1528_v40, %v1527_v56  ;;  %v557_v13 = vpop.xlane.xlu1 %556 }
 0x234   : > { %v1294_v18 = vmul.f32 0.020408163, %v557_v13  ;;  %v554_v38 = vpop.xlane.xlu0 %553 }
 0x235   : > { %v3240_v14 = vsel %vm2277_vm8, %v3239_v61, %v6565_v23  ;;  %v2209_v21 = vunpack.c.l.b16 %v1659_v42  ;;  %v2210_v4 = vunpack.c.h.b16 %v1659_v42  ;;  %v1293_v19 = vmul.f32 0.020408163, %v554_v38 }
 0x236   : > { %v6910_v27 = vsel %vm2284_vm9, %v3244_v8, %v3240_v14 }
 0x237   : > { %v3476_v26 = vrot.slane %v2209_v21, %v6071_v5  ;;  %v3481_v24 = vrot.slane %v2210_v4, %v6074_v10  ;;  %v1542_v11 = vpack.c.bf16 %v1294_v18, %v1293_v19  ;;  %v653_v6 = vpop.xlane.xlu1 %652 }
 0x238   : > { %v1326_v1 = vmul.f32 0.020408163, %v653_v6  ;;  %v650_v20 = vpop.xlane.xlu0 %649 }
 0x239   : > { %v3477_v57 = vsel %vm2277_vm8, %v3476_v26, %v6588_v12  ;;  %v1975_v25 = vunpack.c.l.b16 %v1542_v11  ;;  %v1976_v62 = vunpack.c.h.b16 %v1542_v11  ;;  %v1325_v23 = vmul.f32 0.020408163, %v650_v20 }
 0x23a   : > { %v6917_v30 = vsel %vm2284_vm9, %v3481_v24, %v3477_v57 }
 0x23b   : > { %v2318_v9 = vrot.slane %v1975_v25, %v6731_v55  ;;  %v2325_v22 = vrot.slane %v1976_v62, %v6755_v7  ;;  %v1558_v53 = vpack.c.bf16 %v1326_v1, %v1325_v23  ;;  %v797_v36 = vpop.xlane.xlu1 %796 }
 0x23c   : > { %v1374_v0 = vmul.f32 0.020408163, %v797_v36  ;;  %v794_v40 = vpop.xlane.xlu0 %793 }
 0x23d   : > { %v2320_v45 = vsel %vm2319_vm14, %v2318_v9, %v6611_v32  ;;  %v2007_v50 = vunpack.c.l.b16 %v1558_v53  ;;  %v2008_v33 = vunpack.c.h.b16 %v1558_v53  ;;  %v1373_v12 = vmul.f32 0.020408163, %v794_v40 }
 0x23e   : > { %v2327_v51 = vsel %vm2326_vm15, %v2325_v22, %v2320_v45 }
 0x23f   : > { %v2479_v2 = vrot.slane %v2007_v50, %v6731_v55  ;;  %v2484_v29 = vrot.slane %v2008_v33, %v6755_v7  ;;  %v1582_v56 = vpack.c.bf16 %v1374_v0, %v1373_v12  ;;  %v839_v61 = vpop.xlane.xlu1 %838 }
 0x240   : > { %v1388_v8 = vmul.f32 0.020408163, %v839_v61  ;;  %v836_v42 = vpop.xlane.xlu0 %835 }
 0x241   : > { %v2480_v13 = vsel %vm2319_vm14, %v2479_v2, %v6634_v60  ;;  %v2055_v18 = vunpack.c.l.b16 %v1582_v56  ;;  %v2056_v38 = vunpack.c.h.b16 %v1582_v56  ;;  %v1387_v14 = vmul.f32 0.020408163, %v836_v42 }
 0x242   : > { %v2485_v32 = vsel %vm2326_vm15, %v2484_v29, %v2480_v13 }
 0x243   : > { %v6930_v21 = vsel %vm3513_vm0, %v2485_v32, %v2327_v51  ;;  %v2716_v4 = vrot.slane %v2055_v18, %v6731_v55  ;;  %v2721_v19 = vrot.slane %v2056_v38, %v6755_v7  ;;  %v1589_v26 = vpack.c.bf16 %v1388_v8, %v1387_v14  ;;  %v983_v24 = vpop.xlane.xlu1 %982 }
 0x244   : > { %v1436_v11 = vmul.f32 0.020408163, %v983_v24  ;;  %v980_v6 = vpop.xlane.xlu0 %979 }
 0x245   : > { %v2717_v60 = vsel %vm2319_vm14, %v2716_v4, %v6657_v28  ;;  %v2069_v1 = vunpack.c.l.b16 %v1589_v26  ;;  %v2070_v20 = vunpack.c.h.b16 %v1589_v26  ;;  %v1435_v57 = vmul.f32 0.020408163, %v980_v6 }
 0x246   : > { %v2722_v25 = vsel %vm2326_vm15, %v2721_v19, %v2717_v60 }
 0x247   : > { %v6939_v62 = vsel %vm3515_vm1, %v2722_v25, %v6820_v37  ;;  %v2785_v23 = vrot.slane %v2069_v1, %v6450_v17  ;;  %v2790_v9 = vrot.slane %v2070_v20, %v6453_v58  ;;  %v1613_v22 = vpack.c.bf16 %v1436_v11, %v1435_v57  ;;  %v1025_v53 = vpop.xlane.xlu1 %1024 }
 0x248   : > { %v1450_v36 = vmul.f32 0.020408163, %v1025_v53  ;;  %v1022_v0 = vpop.xlane.xlu0 %1021 }
 0x249   : > { %v2786_v28 = vsel %vm2305_vm12, %v2785_v23, %v6681_v63  ;;  %v2117_v40 = vunpack.c.l.b16 %v1613_v22  ;;  %v2118_v45 = vunpack.c.h.b16 %v1613_v22  ;;  %v1449_v50 = vmul.f32 0.020408163, %v1022_v0 }
 0x24a   : > { %v6946_v33 = vsel %vm2312_vm13, %v2790_v9, %v2786_v28 }
 0x24b   : > { %v3022_v37 = vrot.slane %v2117_v40, %v6450_v17  ;;  %v3027_v12 = vrot.slane %v2118_v45, %v6453_v58  ;;  %v1620_v51 = vpack.c.bf16 %v1450_v36, %v1449_v50  ;;  %v1169_v2 = vpop.xlane.xlu1 %1168 }
 0x24c   : > { %v1498_v29 = vmul.f32 0.020408163, %v1169_v2  ;;  %v1166_v56 = vpop.xlane.xlu0 %1165 }
 0x24d   : > { %v3023_v61 = vsel %vm2305_vm12, %v3022_v37, %v6705_v39  ;;  %v2131_v8 = vunpack.c.l.b16 %v1620_v51  ;;  %v2132_v42 = vunpack.c.h.b16 %v1620_v51  ;;  %v1497_v63 = vmul.f32 0.020408163, %v1166_v56 }
 0x24e   : > { %v6953_v13 = vsel %vm2312_vm13, %v3027_v12, %v3023_v61 }
 0x24f   : > { %v3091_v18 = vrot.slane %v2131_v8, %v6266_v46  ;;  %v3096_v38 = vrot.slane %v2132_v42, %v6269_v49  ;;  %v1644_v14 = vpack.c.bf16 %v1498_v29, %v1497_v63  ;;  %v1211_v32 = vpop.xlane.xlu1 %1210 }
 0x250   : > { %v1512_v4 = vmul.f32 0.020408163, %v1211_v32  ;;  %v1208_v19 = vpop.xlane.xlu0 %1207 }
 0x251   : > { %v3092_v26 = vsel %vm2291_vm10, %v3091_v18, %v6728_v48  ;;  %v2179_v24 = vunpack.c.l.b16 %v1644_v14  ;;  %v2180_v11 = vunpack.c.h.b16 %v1644_v14  ;;  %v1511_v39 = vmul.f32 0.020408163, %v1208_v19 }
 0x252   : > { %v6960_v6 = vsel %vm2298_vm11, %v3096_v38, %v3092_v26 }
 0x253   : > { %v3328_v60 = vrot.slane %v2179_v24, %v6266_v46  ;;  %v3333_v1 = vrot.slane %v2180_v11, %v6269_v49  ;;  %v1651_v20 = vpack.c.bf16 %v1512_v4, %v1511_v39  ;;  %v749_v57 = vpop.xlane.xlu1 %748 }
 0x254   : > { %v1358_v25 = vmul.f32 0.020408163, %v749_v57  ;;  %v746_v23 = vpop.xlane.xlu0 %745 }
 0x255   : > { %v3329_v9 = vsel %vm2291_vm10, %v3328_v60, %v6752_v52  ;;  %v2193_v22 = vunpack.c.l.b16 %v1651_v20  ;;  %v2194_v53 = vunpack.c.h.b16 %v1651_v20  ;;  %v1357_v48 = vmul.f32 0.020408163, %v746_v23 }
 0x256   : > { %v6967_v36 = vsel %vm2298_vm11, %v3333_v1, %v3329_v9 }
 0x257   : > { %v3397_v0 = vrot.slane %v2193_v22, %v6071_v5  ;;  %v3402_v28 = vrot.slane %v2194_v53, %v6074_v10  ;;  %v1574_v40 = vpack.c.bf16 %v1358_v25, %v1357_v48  ;;  %v893_v45 = vpop.xlane.xlu1 %892 }
 0x258   : > { %v1406_v50 = vmul.f32 0.020408163, %v893_v45  ;;  %v890_v37 = vpop.xlane.xlu0 %889 }
 0x259   : > { %v3398_v12 = vsel %vm2277_vm8, %v3397_v0, %v6774_v44  ;;  %v2039_v51 = vunpack.c.l.b16 %v1574_v40  ;;  %v2040_v2 = vunpack.c.h.b16 %v1574_v40  ;;  %v1405_v52 = vmul.f32 0.020408163, %v890_v37 }
 0x25a   : > { %v6974_v29 = vsel %vm2284_vm9, %v3402_v28, %v3398_v12 }
 0x25b   : > { %v2637_v56 = vrot.slane %v2039_v51, %v6731_v55  ;;  %v2642_v61 = vrot.slane %v2040_v2, %v6755_v7  ;;  %v1598_v5 = vpack.c.bf16 %v1406_v50, %v1405_v52  ;;  %v935_v8 = vpop.xlane.xlu1 %934 }
 0x25c   : > { %v1420_v10 = vmul.f32 0.020408163, %v935_v8  ;;  %v932_v42 = vpop.xlane.xlu0 %931 }
 0x25d   : > { %v2638_v63 = vsel %vm2319_vm14, %v2637_v56, %v6830_v41  ;;  %v2087_v18 = vunpack.c.l.b16 %v1598_v5  ;;  %v2088_v38 = vunpack.c.h.b16 %v1598_v5  ;;  %v1419_v44 = vmul.f32 0.020408163, %v932_v42 }
 0x25e   : > { %v2643_v14 = vsel %vm2326_vm15, %v2642_v61, %v2638_v63 }
 0x25f   : > { %v3516_v32 = vsel %vm3515_vm1, %v2643_v14, %v6930_v21  ;;  %v2874_v4 = vrot.slane %v2087_v18, %v6731_v55  ;;  %v2879_v19 = vrot.slane %v2088_v38, %v6755_v7  ;;  %v1605_v26 = vpack.c.bf16 %v1420_v10, %v1419_v44  ;;  %v1079_v24 = vpop.xlane.xlu1 %1078 }
 0x260   : > { %v1076_v11 = vpop.xlane.xlu0 %1075 }
 0x261   : > { %v2875_v39 = vsel %vm2319_vm14, %v2874_v4, %v6849_v59  ;;  %v2101_v41 = vunpack.c.l.b16 %v1605_v26  ;;  %v2102_v60 = vunpack.c.h.b16 %v1605_v26  ;;  %v1467_v26 = vmul.f32 0.020408163, %v1076_v11 }
 0x262   : > { %v2880_v1 = vsel %vm2326_vm15, %v2879_v19, %v2875_v39  ;;  %v1468_v19 = vmul.f32 0.020408163, %v1079_v24 }
 0x263   : > { %v3529_v20 = vsel %vm3517_vm2, %v2880_v1, %v6939_v62  ;;  %v2943_v21 = vrot.slane %v2101_v41, %v6450_v17  ;;  %v2948_v57 = vrot.slane %v2102_v60, %v6453_v58  ;;  %v1121_v25 = vpop.xlane.xlu1 %1120 }
 0x264   : > { %v1118_v23 = vpop.xlane.xlu0 %1117 }
 0x265   : > { %v2944_v9 = vsel %vm2305_vm12, %v2943_v21, %v6868_v31 }
 0x266   : > { %v6995_v22 = vsel %vm2312_vm13, %v2948_v57, %v2944_v9 }
 0x267   : > { %v6997_v59 = vpop.xlane.xlu1 %1264 }
 0x268   : > { %v6999_v53 = vpop.xlane.xlu0 %1261 }
 0x26b   : > { %v845_v48 = vpop.xlane.xlu1 %844 }
 0x26c   : > { %v1390_v0 = vmul.f32 0.020408163, %v845_v48  ;;  %v842_v28 = vpop.xlane.xlu0 %841 }
 0x26d   : > { %v1389_v62 = vmul.f32 0.020408163, %v842_v28 }
 0x26f   : > { %v1590_v40 = vpack.c.bf16 %v1390_v0, %v1389_v62  ;;  %v989_v45 = vpop.xlane.xlu1 %988 }
 0x270   : > { %v1438_v50 = vmul.f32 0.020408163, %v989_v45  ;;  %v986_v37 = vpop.xlane.xlu0 %985  ;;  %v1481_v45 = vmul.f32 0.020408163, %v1118_v23 }
 0x271   : > { %v2071_v12 = vunpack.c.l.b16 %v1590_v40  ;;  %v2072_v51 = vunpack.c.h.b16 %v1590_v40  ;;  %v1437_v2 = vmul.f32 0.020408163, %v986_v37 }
 0x273   : > { %v2795_v31 = vrot.slane %v2071_v12, %v6731_v55  ;;  %v2800_v52 = vrot.slane %v2072_v51, %v6755_v7  ;;  %v1614_v56 = vpack.c.bf16 %v1438_v50, %v1437_v2  ;;  %v1031_v61 = vpop.xlane.xlu1 %1030 }
 0x274   : > { %v1028_v5 = vpop.xlane.xlu0 %1027  ;;  %v1452_v28 = vmul.f32 0.020408163, %v1031_v61 }
 0x275   : > { %v2796_v8 = vsel %vm2319_vm14, %v2795_v31, %v6946_v33  ;;  %v2119_v10 = vunpack.c.l.b16 %v1614_v56  ;;  %v2120_v42 = vunpack.c.h.b16 %v1614_v56  ;;  %v1451_v24 = vmul.f32 0.020408163, %v1028_v5 }
 0x276   : > { %v2801_v63 = vsel %vm2326_vm15, %v2800_v52, %v2796_v8 }
 0x277   : > { %v3518_v18 = vsel %vm3517_vm2, %v2801_v63, %v3516_v32  ;;  %v3032_v38 = vrot.slane %v2119_v10, %v6731_v55  ;;  %v3037_v44 = vrot.slane %v2120_v42, %v6755_v7  ;;  %v1175_v14 = vpop.xlane.xlu1 %1174  ;;  %v1629_v32 = vpack.c.bf16 %v1468_v19, %v1467_v26 }
 0x278   : > { %v1172_v4 = vpop.xlane.xlu0 %1171  ;;  %v1621_v31 = vpack.c.bf16 %v1452_v28, %v1451_v24  ;;  %v1500_v42 = vmul.f32 0.020408163, %v1175_v14  ;;  %v1530_v26 = vmul.f32 0.020408163, %v6997_v59 }
 0x279   : > { %v3033_v39 = vsel %vm2319_vm14, %v3032_v38, %v6953_v13  ;;  %v2149_v48 = vunpack.c.l.b16 %v1629_v32  ;;  %v2150_v40 = vunpack.c.h.b16 %v1629_v32  ;;  %v1482_v13 = vmul.f32 0.020408163, %v1121_v25 }
 0x27a   : > { %v3038_v33 = vsel %vm2326_vm15, %v3037_v44, %v3033_v39  ;;  %v1499_v25 = vmul.f32 0.020408163, %v1172_v4  ;;  %v1529_v39 = vmul.f32 0.020408163, %v6999_v53  ;;  %v2133_v32 = vunpack.c.l.b16 %v1621_v31 }
 0x27b   : > { %v3530_v41 = vsel %vm3519_vm3, %v3038_v33, %v3529_v20  ;;  %v7013_v60 = vpop.xlane.xlu1 %1216  ;;  %v3180_v20 = vrot.slane %v2149_v48, %v6450_v17  ;;  %v3185_v5 = vrot.slane %v2150_v40, %v6453_v58  ;;  %v1636_v10 = vpack.c.bf16 %v1482_v13, %v1481_v45 }
 0x27c   : > { %v7015_v1 = vpop.xlane.xlu0 %1213  ;;  %v2134_v28 = vunpack.c.h.b16 %v1621_v31  ;;  %v3101_v24 = vrot.slane %v2133_v32, %v6450_v17 }
 0x27d   : > { %v3181_v63 = vsel %vm2305_vm12, %v3180_v20, %v6903_v47  ;;  %v2163_v48 = vunpack.c.l.b16 %v1636_v10  ;;  %v2164_v59 = vunpack.c.h.b16 %v1636_v10 }
 0x27e   : > { %v3106_v31 = vrot.slane %v2134_v28, %v6453_v58 }
 0x27f   : > { %v941_v21 = vpop.xlane.xlu1 %940  ;;  %v3249_v20 = vrot.slane %v2163_v48, %v6266_v46 }
 0x280   : > { %v1422_v57 = vmul.f32 0.020408163, %v941_v21  ;;  %v938_v9 = vpop.xlane.xlu0 %937 }
 0x281   : > { %v1421_v0 = vmul.f32 0.020408163, %v938_v9 }
 0x283   : > { %v1606_v11 = vpack.c.bf16 %v1422_v57, %v1421_v0  ;;  %v1085_v62 = vpop.xlane.xlu1 %1084  ;;  %v3186_v57 = vsel %vm2312_vm13, %v3185_v5, %v3181_v63  ;;  %v7035_v0 = vpack.c.bf16 %v1530_v26, %v1529_v39 }
 0x284   : > { %v1470_v50 = vmul.f32 0.020408163, %v1085_v62  ;;  %v1082_v37 = vpop.xlane.xlu0 %1081 }
 0x285   : > { %v2103_v12 = vunpack.c.l.b16 %v1606_v11  ;;  %v2104_v51 = vunpack.c.h.b16 %v1606_v11  ;;  %v1469_v2 = vmul.f32 0.020408163, %v1082_v37  ;;  %v2212_v26 = vunpack.c.h.b16 %v7035_v0 }
 0x287   : > { %v2953_v52 = vrot.slane %v2103_v12, %v6731_v55  ;;  %v2958_v56 = vrot.slane %v2104_v51, %v6755_v7  ;;  %v1630_v8 = vpack.c.bf16 %v1470_v50, %v1469_v2  ;;  %v1127_v61 = vpop.xlane.xlu1 %1126  ;;  %v3254_v12 = vrot.slane %v2164_v59, %v6269_v49 }
 0x288   : > { %v1124_v23 = vpop.xlane.xlu0 %1123  ;;  %v1484_v11 = vmul.f32 0.020408163, %v1127_v61  ;;  %v2211_v2 = vunpack.c.l.b16 %v7035_v0 }
 0x289   : > { %v2954_v38 = vsel %vm2319_vm14, %v2953_v52, %v6995_v22  ;;  %v2151_v44 = vunpack.c.l.b16 %v1630_v8  ;;  %v2152_v19 = vunpack.c.h.b16 %v1630_v8  ;;  %v1645_v22 = vpack.c.bf16 %v1500_v42, %v1499_v25 }
 0x28a   : > { %v2959_v33 = vsel %vm2326_vm15, %v2958_v56, %v2954_v38  ;;  %v1483_v62 = vmul.f32 0.020408163, %v1124_v23  ;;  %v1514_v52 = vmul.f32 0.020408163, %v7013_v60  ;;  %v1513_v56 = vmul.f32 0.020408163, %v7015_v1 }
 0x28b   : > { %v7029_v21 = vsel %vm3519_vm3, %v2959_v33, %v3518_v18  ;;  %v3190_v14 = vrot.slane %v2151_v44, %v6731_v55  ;;  %v3195_v4 = vrot.slane %v2152_v19, %v6755_v7  ;;  %v1271_v47 = vpop.xlane.xlu1 %1270  ;;  %v2181_v45 = vunpack.c.l.b16 %v1645_v22 }
 0x28c   : > { %v1268_v9 = vpop.xlane.xlu0 %1267  ;;  %v2182_v8 = vunpack.c.h.b16 %v1645_v22  ;;  %v1637_v61 = vpack.c.bf16 %v1484_v11, %v1483_v62  ;;  %v1532_v25 = vmul.f32 0.020408163, %v1271_v47  ;;  %v3250_v44 = vsel %vm2291_vm10, %v3249_v20, %v6910_v27 }
 0x28d   : > { %v3191_v53 = vsel %vm2319_vm14, %v3190_v14, %v3186_v57  ;;  %v3338_v42 = vrot.slane %v2181_v45, %v6450_v17  ;;  %v1531_v23 = vmul.f32 0.020408163, %v1268_v9  ;;  %v1652_v33 = vpack.c.bf16 %v1514_v52, %v1513_v56 }
 0x28e   : > { %v3196_v18 = vsel %vm2326_vm15, %v3195_v4, %v3191_v53  ;;  %v2165_v32 = vunpack.c.l.b16 %v1637_v61  ;;  %v3343_v22 = vrot.slane %v2182_v8, %v6453_v58  ;;  %v2166_v62 = vunpack.c.h.b16 %v1637_v61 }
 0x28f   : > { %v1037_v40 = vpop.xlane.xlu1 %1036  ;;  %v7040_v13 = vsel %vm3521_vm4, %v3196_v18, %v3530_v41  ;;  %v3102_v41 = vsel %vm2305_vm12, %v3101_v24, %v6960_v6  ;;  %v3486_v6 = vrot.slane %v2211_v2, %v6266_v46  ;;  %v3339_v27 = vsel %vm2305_vm12, %v3338_v42, %v6967_v36 }
 0x290   : > { %v1454_v50 = vmul.f32 0.020408163, %v1037_v40  ;;  %v1034_v37 = vpop.xlane.xlu0 %1033  ;;  %v3107_v39 = vsel %vm2312_vm13, %v3106_v31, %v3102_v41  ;;  %v1661_v9 = vpack.c.bf16 %v1532_v25, %v1531_v23  ;;  %v3255_v24 = vsel %vm2298_vm11, %v3254_v12, %v3250_v44 }
 0x291   : > { %v1453_v51 = vmul.f32 0.020408163, %v1034_v37  ;;  %v2195_v11 = vunpack.c.l.b16 %v1652_v33  ;;  %v3259_v45 = vrot.slane %v2165_v32, %v6450_v17  ;;  %v3487_v56 = vsel %vm2291_vm10, %v3486_v6, %v6917_v30 }
 0x292   : > { %v2213_v2 = vunpack.c.l.b16 %v1661_v9  ;;  %v3491_v41 = vrot.slane %v2212_v26, %v6269_v49  ;;  %v3264_v42 = vrot.slane %v2166_v62, %v6453_v58  ;;  %v2214_v23 = vunpack.c.h.b16 %v1661_v9 }
 0x293   : > { %v1622_v5 = vpack.c.bf16 %v1454_v50, %v1453_v51  ;;  %v1181_v10 = vpop.xlane.xlu1 %1180  ;;  %v3344_v51 = vsel %vm2312_vm13, %v3343_v22, %v3339_v27  ;;  %v3260_v25 = vsel %vm2305_vm12, %v3259_v45, %v3255_v24 }
 0x294   : > { %v1502_v63 = vmul.f32 0.020408163, %v1181_v10  ;;  %v1178_v38 = vpop.xlane.xlu0 %1177  ;;  %v3407_v10 = vrot.slane %v2195_v11, %v6266_v46  ;;  %v3496_v44 = vrot.slane %v2213_v2, %v6450_v17 }
 0x295   : > { %v2135_v60 = vunpack.c.l.b16 %v1622_v5  ;;  %v2136_v19 = vunpack.c.h.b16 %v1622_v5  ;;  %v1501_v1 = vmul.f32 0.020408163, %v1178_v38  ;;  %v2196_v5 = vunpack.c.h.b16 %v1652_v33 }
 0x296   : > { %v3408_v33 = vsel %vm2291_vm10, %v3407_v10, %v6974_v29 }
 0x297   : > { %v3111_v14 = vrot.slane %v2135_v60, %v6731_v55  ;;  %v3116_v4 = vrot.slane %v2136_v19, %v6755_v7  ;;  %v1646_v47 = vpack.c.bf16 %v1502_v63, %v1501_v1  ;;  %v1223_v57 = vpop.xlane.xlu1 %1222  ;;  %v3412_v32 = vrot.slane %v2196_v5, %v6269_v49  ;;  %v1678_v5 = vld [vmem:[%s7757_s1 + $0x78] sm:$0xff] }
 0x298   : > { %v1516_v48 = vmul.f32 0.020408163, %v1223_v57  ;;  %v1220_v59 = vpop.xlane.xlu0 %1219 }
 0x299   : > { %v3112_v53 = vsel %vm2319_vm14, %v3111_v14, %v3107_v39  ;;  %v2183_v0 = vunpack.c.l.b16 %v1646_v47  ;;  %v2184_v28 = vunpack.c.h.b16 %v1646_v47  ;;  %v1515_v18 = vmul.f32 0.020408163, %v1220_v59 }
 0x29a   : > { %v3117_v40 = vsel %vm2326_vm15, %v3116_v4, %v3112_v53  ;;  %v3492_v39 = vsel %vm2298_vm11, %v3491_v41, %v3487_v56  ;;  %v3265_v14 = vsel %vm2312_vm13, %v3264_v42, %v3260_v25  ;;  %v3501_v4 = vrot.slane %v2214_v23, %v6453_v58 }
 0x29b   : > { %v3348_v36 = vrot.slane %v2183_v0, %v6731_v55  ;;  %v3353_v50 = vrot.slane %v2184_v28, %v6755_v7  ;;  %v1133_v37 = vpop.xlane.xlu1 %1132  ;;  %v3522_v20 = vsel %vm3521_vm4, %v3117_v40, %v7029_v21  ;;  %v1653_v31 = vpack.c.bf16 %v1516_v48, %v1515_v18 }
 0x29c   : > { %v1486_v52 = vmul.f32 0.020408163, %v1133_v37  ;;  %v1130_v12 = vpop.xlane.xlu0 %1129  ;;  %v3497_v22 = vsel %vm2305_vm12, %v3496_v44, %v3492_v39  ;;  %v3413_v45 = vsel %vm2298_vm11, %v3412_v32, %v3408_v33  ;;  %v1701_v39 = vld [vmem:[%s7757_s1 + $0x130] sm:$0xff]  ;;  %v1698_v33 = vld [vmem:[%s7757_s1 + $0x118] sm:$0xff] }
 0x29d   : > { %v3349_v8 = vsel %vm2319_vm14, %v3348_v36, %v3344_v51  ;;  %v1485_v61 = vmul.f32 0.020408163, %v1130_v12  ;;  %v2197_v60 = vunpack.c.l.b16 %v1653_v31  ;;  %v2198_v9 = vunpack.c.h.b16 %v1653_v31  ;;  %v1702_v32 = vld [vmem:[%s7757_s1 + $0x138] sm:$0xff] }
 0x29e   : > { %v3354_v21 = vsel %vm2326_vm15, %v3353_v50, %v3349_v8  ;;  %v1673_v8 = vld [vmem:[%s7757_s1 + $0x50] sm:$0xff] }
 0x29f   : > { %v1638_v63 = vpack.c.bf16 %v1486_v52, %v1485_v61  ;;  %v1277_v38 = vpop.xlane.xlu1 %1276  ;;  %v3532_v30 = vsel %vm3523_vm5, %v3354_v21, %v7040_v13  ;;  %v3417_v48 = vrot.slane %v2197_v60, %v6450_v17  ;;  %v3502_v17 = vsel %vm2312_vm13, %v3501_v4, %v3497_v22  ;;  %v1681_v21 = vld [vmem:[%s7757_s1 + $0x90] sm:$0xff]  ;;  %v1706_v22 = vld [vmem:[%s7757_s1 + $0x158] sm:$0xff] }
 0x2a0   : > { %v1534_v19 = vmul.f32 0.020408163, %v1277_v38  ;;  %v1274_v1 = vpop.xlane.xlu0 %1273  ;;  %v3422_v36 = vrot.slane %v2198_v9, %v6453_v58  ;;  %v1682_v38 = vld [vmem:[%s7757_s1 + $0x98] sm:$0xff]  ;;  %v4883_v4 = vcombine.low %v1690_v16, %v1694_v3 }
 0x2a1   : > { %v2167_v26 = vunpack.c.l.b16 %v1638_v63  ;;  %v2168_v6 = vunpack.c.h.b16 %v1638_v63  ;;  %v1533_v46 = vmul.f32 0.020408163, %v1274_v1  ;;  %v3418_v50 = vsel %vm2305_vm12, %v3417_v48, %v3413_v45  ;;  %v1685_v63 = vld [vmem:[%s7757_s1 + $0xb0] sm:$0xff]  ;;  %v1710_v9 = vld [vmem:[%s7757_s1 + $0x178] sm:$0xff] }
 0x2a2   : > { %v3423_v56 = vsel %vm2312_vm13, %v3422_v36, %v3418_v50  ;;  %v1721_v45 = vld [vmem:[%s7757_s1 + $0x1d0] sm:$0xff]  ;;  %v1722_v36 = vld [vmem:[%s7757_s1 + $0x1d8] sm:$0xff] }
 0x2a3   : > { %v3269_v13 = vrot.slane %v2167_v26, %v6731_v55  ;;  %v3274_v47 = vrot.slane %v2168_v6, %v6755_v7  ;;  %v1662_v57 = vpack.c.bf16 %v1534_v19, %v1533_v46  ;;  %v1229_v27 = vpop.xlane.xlu1 %1228  ;;  %v4874_v19 = vcombine.high %v1681_v21, %v1685_v63  ;;  %v1689_v26 = vld [vmem:[%s7757_s1 + $0xd0] sm:$0xff]  ;;  %v1726_v50 = vld [vmem:[%s7757_s1 + $0x1f8] sm:$0xff] }
 0x2a4   : > { %v1518_v59 = vmul.f32 0.020408163, %v1229_v27  ;;  %v1226_v53 = vpop.xlane.xlu0 %1225  ;;  %v4884_v6 = vcombine.high %v1690_v16, %v1694_v3  ;;  %v1697_v46 = vld [vmem:[%s7757_s1 + $0x110] sm:$0xff] }
 0x2a5   : > { %v3270_v29 = vsel %vm2319_vm14, %v3269_v13, %v3265_v14  ;;  %v2215_v49 = vunpack.c.l.b16 %v1662_v57  ;;  %v2216_v0 = vunpack.c.h.b16 %v1662_v57  ;;  %v1517_v28 = vmul.f32 0.020408163, %v1226_v53  ;;  %v1705_v57 = vld [vmem:[%s7757_s1 + $0x150] sm:$0xff] }
 0x2a6   : > { %v3275_v18 = vsel %vm2326_vm15, %v3274_v47, %v3270_v29  ;;  %v4881_v14 = vcombine.low %v1689_v26, %v1693_v15  ;;  %v4890_v13 = vcombine.high %v1697_v46, %v1701_v39  ;;  %v4892_v47 = vcombine.high %v1698_v33, %v1702_v32  ;;  %v1709_v27 = vld [vmem:[%s7757_s1 + $0x170] sm:$0xff] }
 0x2a7   : > { %v3506_v24 = vrot.slane %v2215_v49, %v6731_v55  ;;  %v3511_v11 = vrot.slane %v2216_v0, %v6755_v7  ;;  %v1654_v62 = vpack.c.bf16 %v1518_v59, %v1517_v28  ;;  %v3524_v40 = vsel %vm3523_vm5, %v3275_v18, %v3522_v20  ;;  %v1713_v49 = vld [vmem:[%s7757_s1 + $0x190] sm:$0xff]  ;;  %v1714_v28 = vld [vmem:[%s7757_s1 + $0x198] sm:$0xff] }
 0x2a8   : > { %v4889_v48 = vcombine.low %v1697_v46, %v1701_v39  ;;  %v4891_v59 = vcombine.low %v1698_v33, %v1702_v32  ;;  %v4898_v53 = vcombine.high %v1705_v57, %v1709_v27  ;;  %v4900_v29 = vcombine.high %v1706_v22, %v1710_v9  ;;  %v1717_v0 = vld [vmem:[%s7757_s1 + $0x1b0] sm:$0xff]  ;;  %v1718_v18 = vld [vmem:[%s7757_s1 + $0x1b8] sm:$0xff] }
 0x2a9   : > { %v3507_v37 = vsel %vm2319_vm14, %v3506_v24, %v3502_v17  ;;  %v2199_v51 = vunpack.c.l.b16 %v1654_v62  ;;  %v2200_v2 = vunpack.c.h.b16 %v1654_v62  ;;  %v4897_v24 = vcombine.low %v1705_v57, %v1709_v27  ;;  %v1725_v17 = vld [vmem:[%s7757_s1 + $0x1f0] sm:$0xff] }
 0x2aa   : > { %v3512_v31 = vsel %vm2326_vm15, %v3511_v11, %v3507_v37  ;;  %v4899_v11 = vcombine.low %v1706_v22, %v1710_v9  ;;  %v4906_v62 = vcombine.high %v1713_v49, %v1717_v0  ;;  %v4905_v37 = vcombine.low %v1713_v49, %v1717_v0  ;;  %v1753_v16 = vld [vmem:[%s7757_s1 + $0x2d0] sm:$0xff] }
 0x2ab   : > { %v3427_v52 = vrot.slane %v2199_v51, %v6731_v55  ;;  %v3432_v12 = vrot.slane %v2200_v2, %v6755_v7  ;;  %v3533_v20 = vsel %vm3525_vm6, %v3512_v31, %v3532_v30  ;;  %v1677_v55 = vld [vmem:[%s7757_s1 + $0x70] sm:$0xff]  ;;  %v1674_v7 = vld [vmem:[%s7757_s1 + $0x58] sm:$0xff]  ;;  %v4907_v51 = vcombine.low %v1714_v28, %v1718_v18 }
 0x2ac   : > { %v3535_v41 = vpack.c.b16 %v3533_v20, %v3533_v20  ;;  %v4866_v25 = vcombine.high %v1673_v8, %v1677_v55  ;;  %v4868_v23 = vcombine.high %v1674_v7, %v1678_v5  ;;  %v1686_v30 = vld [vmem:[%s7757_s1 + $0xb8] sm:$0xff]  ;;  %v4865_v44 = vcombine.low %v1673_v8, %v1677_v55  ;;  %v1737_v55 = vld [vmem:[%s7757_s1 + $0x250] sm:$0xff] }
 0x2ad   : > { %v3428_v58 = vsel %vm2319_vm14, %v3427_v52, %v3423_v56  ;;  %v4867_v60 = vcombine.low %v1674_v7, %v1678_v5  ;;  %v4876_v1 = vcombine.high %v1682_v38, %v1686_v30  ;;  %v4875_v34 = vcombine.low %v1682_v38, %v1686_v30  ;;  %v1729_v52 = vld [vmem:[%s7757_s1 + $0x210] sm:$0xff]  ;;  %v1730_v20 = vld [vmem:[%s7757_s1 + $0x218] sm:$0xff] }
 0x2ae   : > { %4210 = vmatprep.mubr.bf16.mxu0 %v3535_v41  ;;  %4251 = vmatprep.mubr.bf16.mxu1 %v3535_v41  ;;  %v3433_v61 = vsel %vm2326_vm15, %v3432_v12, %v3428_v58  ;;  %v4914_v2 = vcombine.high %v1721_v45, %v1725_v17  ;;  %v4916_v31 = vcombine.high %v1722_v36, %v1726_v50  ;;  %v1733_v12 = vld [vmem:[%s7757_s1 + $0x230] sm:$0xff]  ;;  %v1734_v56 = vld [vmem:[%s7757_s1 + $0x238] sm:$0xff] }
 0x2af   : > { %v3526_v10 = vsel %vm3525_vm6, %v3433_v61, %v3524_v40  ;;  %v4908_v40 = vcombine.high %v1714_v28, %v1718_v18  ;;  %v4915_v58 = vcombine.low %v1722_v36, %v1726_v50  ;;  %v4922_v8 = vcombine.high %v1729_v52, %v1733_v12  ;;  %v1741_v7 = vld [vmem:[%s7757_s1 + $0x270] sm:$0xff]  ;;  %v1738_v5 = vld [vmem:[%s7757_s1 + $0x258] sm:$0xff] }
 0x2b0   : > { %v7121_v42 = vpack.c.b16 %v3526_v10, %v3526_v10  ;;  %v4924_v61 = vcombine.high %v1730_v20, %v1734_v56  ;;  %v1742_v10 = vld [vmem:[%s7757_s1 + $0x278] sm:$0xff]  ;;  %v1745_v38 = vld [vmem:[%s7757_s1 + $0x290] sm:$0xff] }
 0x2b1   : > { %v1749_v30 = vld [vmem:[%s7757_s1 + $0x2b0] sm:$0xff] }
 0x2b2   : > { %4211 = vmatmul.mubr.bf16.vlgmr.msra.gmra.mrb[0].mxu0 %v7121_v42  ;;  %4252 = vmatmul.mubr.bf16.vlgmr.msra.gmra.mrb[0].mxu1 %v7121_v42  ;;  %v1757_v3 = vld [vmem:[%s7757_s1 + $0x2f0] sm:$0xff] }
 0x2b3   : > { %4261 = vmatpush1.bf16.msra.mxu0 %v4857_v43  ;;  %4302 = vmatpush1.bf16.msra.mxu1 %v4859_v54  ;;  %v4873_v43 = vcombine.low %v1681_v21, %v1685_v63  ;;  %v4882_v54 = vcombine.high %v1689_v26, %v1693_v15  ;;  %v4921_v21 = vcombine.low %v1729_v52, %v1733_v12  ;;  %v1761_v33 = vld [vmem:[%s7757_s1 + $0x310] sm:$0xff] }
 0x2b4   : > { %4292 = vmatprep.mubr.bf16.mxu0 %v3535_v41  ;;  %4333 = vmatprep.mubr.bf16.mxu1 %v3535_v41  ;;  %v4913_v41 = vcombine.low %v1721_v45, %v1725_v17  ;;  %v4932_v63 = vcombine.high %v1738_v5, %v1742_v10  ;;  %v4938_v26 = vcombine.high %v1745_v38, %v1749_v30  ;;  %v1765_v32 = vld [vmem:[%s7757_s1 + $0x330] sm:$0xff] }
 0x2b5   : > { %4262 = vmatprep.subr.bf16.mxu0 %v4866_v25  ;;  %4303 = vmatprep.subr.bf16.mxu1 %v4868_v23  ;;  %v4923_v25 = vcombine.low %v1730_v20, %v1734_v56  ;;  %v4930_v23 = vcombine.high %v1737_v55, %v1741_v7  ;;  %v4946_v46 = vcombine.high %v1753_v16, %v1757_v3  ;;  %v1769_v22 = vld [vmem:[%s7757_s1 + $0x350] sm:$0xff]  ;;  %v4366_v20 = vld [vmem:[%s7759_s3 + $0x80] sm:$0xff]  ;;  %v4367_v56 = vld [vmem:[%s7759_s3 + $0x88] sm:$0xff] }
 0x2b6   : > { %v4954_v57 = vcombine.high %v1761_v33, %v1765_v32  ;;  %v1773_v9 = vld [vmem:[%s7757_s1 + $0x370] sm:$0xff] }
 0x2b7   : > { %4263 = vmatpush1.bf16.msra.mxu0 %v4865_v44  ;;  %4304 = vmatpush1.bf16.msra.mxu1 %v4867_v60  ;;  %v1746_v44 = vld [vmem:[%s7757_s1 + $0x298] sm:$0xff]  ;;  %v4962_v49 = vcombine.high %v1769_v22, %v1773_v9  ;;  %v1777_v28 = vld [vmem:[%s7757_s1 + $0x390] sm:$0xff] }
 0x2b8   : > { %4264 = vmatprep.subr.bf16.mxu0 %v4874_v19  ;;  %4305 = vmatprep.subr.bf16.mxu1 %v4876_v1  ;;  %v1750_v60 = vld [vmem:[%s7757_s1 + $0x2b8] sm:$0xff]  ;;  %v4929_v19 = vcombine.low %v1737_v55, %v1741_v7  ;;  %v4931_v1 = vcombine.low %v1738_v5, %v1742_v10  ;;  %v1781_v18 = vld [vmem:[%s7757_s1 + $0x3b0] sm:$0xff]  ;;  %v4350_v55 = vld [vmem:[%s7759_s3] sm:$0xff]  ;;  %v5127_v5 = vpack.c.bf16 %v4367_v56, %v4366_v20 }
 0x2b9   : > { %v4940_v15 = vcombine.high %v1746_v44, %v1750_v60  ;;  %v4970_v45 = vcombine.high %v1777_v28, %v1781_v18  ;;  %v1785_v36 = vld [vmem:[%s7757_s1 + $0x3d0] sm:$0xff]  ;;  %v4351_v7 = vld [vmem:[%s7759_s3 + $0x8] sm:$0xff]  ;;  %v4409_v20 = vld [vmem:[%s7759_s3 + $0x1d8] sm:$0xff] }
 0x2ba   : > { %v1789_v50 = vld [vmem:[%s7757_s1 + $0x3f0] sm:$0xff] }
 0x2bb   : > { %4265 = vmatpush1.bf16.msra.mxu0 %v4873_v43  ;;  %4306 = vmatpush1.bf16.msra.mxu1 %v4875_v34  ;;  %v1754_v43 = vld [vmem:[%s7757_s1 + $0x2d8] sm:$0xff]  ;;  %v4978_v52 = vcombine.high %v1785_v36, %v1789_v50 }
 0x2bc   : > { %4266 = vmatprep.subr.bf16.mxu0 %v4882_v54  ;;  %4307 = vmatprep.subr.bf16.mxu1 %v4884_v6  ;;  %v1758_v34 = vld [vmem:[%s7757_s1 + $0x2f8] sm:$0xff]  ;;  %v4937_v54 = vcombine.low %v1745_v38, %v1749_v30  ;;  %v4939_v6 = vcombine.low %v1746_v44, %v1750_v60  ;;  %v4400_v38 = vld [vmem:[%s7759_s3 + $0x190] sm:$0xff]  ;;  %v5129_v44 = vpack.c.bf16 %v4351_v7, %v4350_v55 }
 0x2bd   : > { %v4948_v39 = vcombine.high %v1754_v43, %v1758_v34  ;;  %v4401_v30 = vld [vmem:[%s7759_s3 + $0x198] sm:$0xff]  ;;  %v4392_v7 = vld [vmem:[%s7759_s3 + $0x150] sm:$0xff] }
 0x2bf   : > { %4267 = vmatpush1.bf16.msra.mxu0 %v4881_v14  ;;  %4308 = vmatpush1.bf16.msra.mxu1 %v4883_v4  ;;  %v1762_v14 = vld [vmem:[%s7757_s1 + $0x318] sm:$0xff] }
 0x2c0   : > { %4268 = vmatprep.subr.bf16.mxu0 %v4890_v13  ;;  %4309 = vmatprep.subr.bf16.mxu1 %v4892_v47  ;;  %v1766_v4 = vld [vmem:[%s7757_s1 + $0x338] sm:$0xff]  ;;  %v4945_v13 = vcombine.low %v1753_v16, %v1757_v3  ;;  %v4947_v47 = vcombine.low %v1754_v43, %v1758_v34  ;;  %v4384_v16 = vld [vmem:[%s7759_s3 + $0x110] sm:$0xff]  ;;  %v4370_v43 = vld [vmem:[%s7759_s3 + $0xa0] sm:$0xff] }
 0x2c1   : > { %v4956_v27 = vcombine.high %v1762_v14, %v1766_v4  ;;  %v4385_v3 = vld [vmem:[%s7759_s3 + $0x118] sm:$0xff]  ;;  %v4371_v34 = vld [vmem:[%s7759_s3 + $0xa8] sm:$0xff] }
 0x2c3   : > { %4269 = vmatpush1.bf16.msra.mxu0 %v4889_v48  ;;  %4310 = vmatpush1.bf16.msra.mxu1 %v4891_v59  ;;  %v1770_v48 = vld [vmem:[%s7757_s1 + $0x358] sm:$0xff] }
 0x2c4   : > { %4270 = vmatprep.subr.bf16.mxu0 %v4898_v53  ;;  %4311 = vmatprep.subr.bf16.mxu1 %v4900_v29  ;;  %v1774_v59 = vld [vmem:[%s7757_s1 + $0x378] sm:$0xff]  ;;  %v4953_v53 = vcombine.low %v1761_v33, %v1765_v32  ;;  %v4955_v29 = vcombine.low %v1762_v14, %v1766_v4  ;;  %v4354_v33 = vld [vmem:[%s7759_s3 + $0x20] sm:$0xff]  ;;  %v4355_v32 = vld [vmem:[%s7759_s3 + $0x28] sm:$0xff]  ;;  %v5135_v14 = vpack.c.bf16 %v4371_v34, %v4370_v43 }
 0x2c5   : > { %v4964_v0 = vcombine.high %v1770_v48, %v1774_v59 }
 0x2c7   : > { %4271 = vmatpush1.bf16.msra.mxu0 %v4897_v24  ;;  %4312 = vmatpush1.bf16.msra.mxu1 %v4899_v11  ;;  %v1778_v24 = vld [vmem:[%s7757_s1 + $0x398] sm:$0xff] }
 0x2c8   : > { %4272 = vmatprep.subr.bf16.mxu0 %v4906_v62  ;;  %4313 = vmatprep.subr.bf16.mxu1 %v4908_v40  ;;  %v1782_v11 = vld [vmem:[%s7757_s1 + $0x3b8] sm:$0xff]  ;;  %v4961_v62 = vcombine.low %v1769_v22, %v1773_v9  ;;  %v4963_v40 = vcombine.low %v1770_v48, %v1774_v59  ;;  %v5137_v9 = vpack.c.bf16 %v4355_v32, %v4354_v33  ;;  %v4356_v59 = vld [vmem:[%s7759_s3 + $0x30] sm:$0xff] }
 0x2c9   : > { %v4972_v17 = vcombine.high %v1778_v24, %v1782_v11  ;;  %v4405_v22 = vld [vmem:[%s7759_s3 + $0x1b8] sm:$0xff]  ;;  %v4396_v32 = vld [vmem:[%s7759_s3 + $0x170] sm:$0xff] }
 0x2ca   : > { %v4365_v33 = vld [vmem:[%s7759_s3 + $0x78] sm:$0xff] }
 0x2cb   : > { %4273 = vmatpush1.bf16.msra.mxu0 %v4905_v37  ;;  %4314 = vmatpush1.bf16.msra.mxu1 %v4907_v51  ;;  %v1786_v37 = vld [vmem:[%s7757_s1 + $0x3d8] sm:$0xff] }
 0x2cc   : > { %4274 = vmatprep.subr.bf16.mxu0 %v4914_v2  ;;  %4315 = vmatprep.subr.bf16.mxu1 %v4916_v31  ;;  %v1790_v51 = vld [vmem:[%s7757_s1 + $0x3f8] sm:$0xff]  ;;  %v4969_v2 = vcombine.low %v1777_v28, %v1781_v18  ;;  %v4971_v31 = vcombine.low %v1778_v24, %v1782_v11  ;;  %v4374_v18 = vld [vmem:[%s7759_s3 + $0xc0] sm:$0xff]  ;;  %v4375_v24 = vld [vmem:[%s7759_s3 + $0xc8] sm:$0xff] }
 0x2cd   : > { %v4980_v12 = vcombine.high %v1786_v37, %v1790_v51  ;;  %v4389_v28 = vld [vmem:[%s7759_s3 + $0x138] sm:$0xff]  ;;  %v4406_v11 = vld [vmem:[%s7759_s3 + $0x1c0] sm:$0xff] }
 0x2cf   : > { %4275 = vmatpush1.bf16.msra.mxu0 %v4913_v41  ;;  %4316 = vmatpush1.bf16.msra.mxu1 %v4915_v58  ;;  %v4398_v41 = vld [vmem:[%s7759_s3 + $0x180] sm:$0xff]  ;;  %v4399_v58 = vld [vmem:[%s7759_s3 + $0x188] sm:$0xff] }
 0x2d0   : > { %4276 = vmatprep.subr.bf16.mxu0 %v4922_v8  ;;  %4317 = vmatprep.subr.bf16.mxu1 %v4924_v61  ;;  %v4977_v8 = vcombine.low %v1785_v36, %v1789_v50  ;;  %v4979_v61 = vcombine.low %v1786_v37, %v1790_v51  ;;  %v5159_v10 = vpack.c.bf16 %v4399_v58, %v4398_v41  ;;  %v4359_v36 = vld [vmem:[%s7759_s3 + $0x48] sm:$0xff]  ;;  %v4390_v51 = vld [vmem:[%s7759_s3 + $0x140] sm:$0xff]  ;;  %v4360_v58 = vld [vmem:[%s7759_s3 + $0x50] sm:$0xff] }
 0x2d1   : > { %v5143_v50 = vpack.c.bf16 %v4375_v24, %v4374_v18 }
 0x2d3   : > { %4277 = vmatpush1.bf16.msra.mxu0 %v4921_v21  ;;  %4318 = vmatpush1.bf16.msra.mxu1 %v4923_v25  ;;  %v4382_v21 = vld [vmem:[%s7759_s3 + $0x100] sm:$0xff]  ;;  %v4383_v25 = vld [vmem:[%s7759_s3 + $0x108] sm:$0xff] }
 0x2d4   : > { %4278 = vmatprep.subr.bf16.mxu0 %v4930_v23  ;;  %4319 = vmatprep.subr.bf16.mxu1 %v4932_v63  ;;  %v4368_v23 = vld [vmem:[%s7759_s3 + $0x90] sm:$0xff]  ;;  %v4369_v63 = vld [vmem:[%s7759_s3 + $0x98] sm:$0xff]  ;;  %v5161_v60 = vpack.c.bf16 %v4383_v25, %v4382_v21  ;;  %v4379_v21 = vld [vmem:[%s7759_s3 + $0xe8] sm:$0xff] }
 0x2d5   : > { %v4410_v25 = vld [vmem:[%s7759_s3 + $0x1e0] sm:$0xff] }
 0x2d7   : > { %4279 = vmatpush1.bf16.msra.mxu0 %v4929_v19  ;;  %4320 = vmatpush1.bf16.msra.mxu1 %v4931_v1  ;;  %v4352_v19 = vld [vmem:[%s7759_s3 + $0x10] sm:$0xff]  ;;  %v4353_v1 = vld [vmem:[%s7759_s3 + $0x18] sm:$0xff] }
 0x2d8   : > { %4280 = vmatprep.subr.bf16.mxu0 %v4938_v26  ;;  %4321 = vmatprep.subr.bf16.mxu1 %v4940_v15  ;;  %v5131_v26 = vpack.c.bf16 %v4369_v63, %v4368_v23  ;;  %v5163_v15 = vpack.c.bf16 %v4401_v30, %v4400_v38  ;;  %v4411_v23 = vld [vmem:[%s7759_s3 + $0x1e8] sm:$0xff]  ;;  %v4362_v30 = vld [vmem:[%s7759_s3 + $0x60] sm:$0xff] }
 0x2db   : > { %4281 = vmatpush1.bf16.msra.mxu0 %v4937_v54  ;;  %4322 = vmatpush1.bf16.msra.mxu1 %v4939_v6  ;;  %v4402_v54 = vld [vmem:[%s7759_s3 + $0x1a0] sm:$0xff]  ;;  %v4403_v6 = vld [vmem:[%s7759_s3 + $0x1a8] sm:$0xff] }
 0x2dc   : > { %4282 = vmatprep.subr.bf16.mxu0 %v4946_v46  ;;  %4323 = vmatprep.subr.bf16.mxu1 %v4948_v39  ;;  %v5133_v46 = vpack.c.bf16 %v4353_v1, %v4352_v19  ;;  %v5165_v39 = vpack.c.bf16 %v4385_v3, %v4384_v16  ;;  %v5167_v4 = vpack.c.bf16 %v4403_v6, %v4402_v54  ;;  %v4363_v19 = vld [vmem:[%s7759_s3 + $0x68] sm:$0xff]  ;;  %v4394_v1 = vld [vmem:[%s7759_s3 + $0x160] sm:$0xff]  ;;  %v4381_v16 = vld [vmem:[%s7759_s3 + $0xf8] sm:$0xff] }
 0x2dd   : > { %v4412_v3 = vld [vmem:[%s7759_s3 + $0x1f0] sm:$0xff]  ;;  %v5153_v43 = vpack.c.bf16 %v4363_v19, %v4362_v30  ;;  %v4413_v54 = vld [vmem:[%s7759_s3 + $0x1f8] sm:$0xff] }
 0x2de   : > { %v4364_v6 = vld [vmem:[%s7759_s3 + $0x70] sm:$0xff]  ;;  %v4449_v19 = vld [vmem:[%s7759_s3 + $0x318] sm:$0xff] }
 0x2df   : > { %4283 = vmatpush1.bf16.msra.mxu0 %v4945_v13  ;;  %4324 = vmatpush1.bf16.msra.mxu1 %v4947_v47  ;;  %v4387_v13 = vld [vmem:[%s7759_s3 + $0x128] sm:$0xff]  ;;  %v4372_v47 = vld [vmem:[%s7759_s3 + $0xb0] sm:$0xff] }
 0x2e0   : > { %4284 = vmatprep.subr.bf16.mxu0 %v4954_v57  ;;  %4325 = vmatprep.subr.bf16.mxu1 %v4956_v27  ;;  %v4373_v57 = vld [vmem:[%s7759_s3 + $0xb8] sm:$0xff]  ;;  %v4404_v27 = vld [vmem:[%s7759_s3 + $0x1b0] sm:$0xff] }
 0x2e3   : > { %4285 = vmatpush1.bf16.msra.mxu0 %v4953_v53  ;;  %4326 = vmatpush1.bf16.msra.mxu1 %v4955_v29  ;;  %v4357_v53 = vld [vmem:[%s7759_s3 + $0x38] sm:$0xff]  ;;  %v5139_v29 = vpack.c.bf16 %v4373_v57, %v4372_v47  ;;  %v4431_v47 = vld [vmem:[%s7759_s3 + $0x288] sm:$0xff]  ;;  %v4462_v57 = vld [vmem:[%s7759_s3 + $0x380] sm:$0xff] }
 0x2e4   : > { %4286 = vmatprep.subr.bf16.mxu0 %v4962_v49  ;;  %4327 = vmatprep.subr.bf16.mxu1 %v4964_v0  ;;  %v5171_v49 = vpack.c.bf16 %v4405_v22, %v4404_v27  ;;  %v4388_v0 = vld [vmem:[%s7759_s3 + $0x130] sm:$0xff]  ;;  %v4463_v22 = vld [vmem:[%s7759_s3 + $0x388] sm:$0xff] }
 0x2e7   : > { %4287 = vmatpush1.bf16.msra.mxu0 %v4961_v62  ;;  %4328 = vmatpush1.bf16.msra.mxu1 %v4963_v40  ;;  %v4407_v62 = vld [vmem:[%s7759_s3 + $0x1c8] sm:$0xff]  ;;  %v5141_v40 = vpack.c.bf16 %v4357_v53, %v4356_v59  ;;  %v1803_v59 = vsub.s32 2, %v5602_v35  ;;  %v7510_v53 = vld [vmem:[%s7758_s2] sm:$0xff] }
 0x2e8   : > { %4288 = vmatprep.subr.bf16.mxu0 %v4970_v45  ;;  %4329 = vmatprep.subr.bf16.mxu1 %v4972_v17  ;;  %v5173_v45 = vpack.c.bf16 %v4389_v28, %v4388_v0  ;;  %v4358_v17 = vld [vmem:[%s7759_s3 + $0x40] sm:$0xff]  ;;  %v5175_v37 = vpack.c.bf16 %v4407_v62, %v4406_v11 }
 0x2e9   : > { %v5145_v56 = vpack.c.bf16 %v4359_v36, %v4358_v17  ;;  %v1804_v28 = vrot.slane %v7510_v53, %v1803_v59  ;;  %v4453_v59 = vld [vmem:[%s7759_s3 + $0x338] sm:$0xff] }
 0x2eb   : > { %4289 = vmatpush1.bf16.msra.mxu0 %v4969_v2  ;;  %4330 = vmatpush1.bf16.msra.mxu1 %v4971_v31  ;;  %v4391_v2 = vld [vmem:[%s7759_s3 + $0x148] sm:$0xff]  ;;  %v4376_v31 = vld [vmem:[%s7759_s3 + $0xd0] sm:$0xff] }
 0x2ec   : > { %4290 = vmatprep.subr.bf16.mxu0 %v4978_v52  ;;  %4331 = vmatprep.subr.bf16.mxu1 %v4980_v12  ;;  %v4377_v52 = vld [vmem:[%s7759_s3 + $0xd8] sm:$0xff]  ;;  %v4408_v12 = vld [vmem:[%s7759_s3 + $0x1d0] sm:$0xff]  ;;  %v5177_v41 = vpack.c.bf16 %v4391_v2, %v4390_v51  ;;  %v4446_v51 = vld [vmem:[%s7759_s3 + $0x300] sm:$0xff] }
 0x2ed   : > { %v5179_v55 = vpack.c.bf16 %v4409_v20, %v4408_v12  ;;  %v4447_v2 = vld [vmem:[%s7759_s3 + $0x308] sm:$0xff] }
 0x2ef   : > { %4291 = vmatpush1.bf16.msra.mxu0 %v4977_v8  ;;  %4332 = vmatpush1.bf16.msra.mxu1 %v4979_v61  ;;  %v4361_v8 = vld [vmem:[%s7759_s3 + $0x58] sm:$0xff]  ;;  %v5147_v61 = vpack.c.bf16 %v4377_v52, %v4376_v31  ;;  %v4432_v31 = vld [vmem:[%s7759_s3 + $0x290] sm:$0xff] }
 0x2f0   : > { %5128 = vmatprep.subr.bf16.mxu0 %v5127_v5  ;;  %5160 = vmatprep.subr.bf16.mxu1 %v5159_v10  ;;  %v4393_v5 = vld [vmem:[%s7759_s3 + $0x158] sm:$0xff]  ;;  %v4378_v10 = vld [vmem:[%s7759_s3 + $0xe0] sm:$0xff]  ;;  %v5149_v63 = vpack.c.bf16 %v4361_v8, %v4360_v58  ;;  %v4464_v58 = vld [vmem:[%s7759_s3 + $0x390] sm:$0xff] }
 0x2f1   : > { %v5181_v38 = vpack.c.bf16 %v4393_v5, %v4392_v7  ;;  %v4465_v8 = vld [vmem:[%s7759_s3 + $0x398] sm:$0xff] }
 0x2f2   : > { %4293 = vmatmul.mubr.bf16.vlgmr.msra.gmra.mrb[4].mxu0 %v7121_v42  ;;  %4334 = vmatmul.mubr.bf16.vlgmr.msra.gmra.mrb[4].mxu1 %v7121_v42  ;;  %v4386_v42 = vld [vmem:[%s7759_s3 + $0x120] sm:$0xff] }
 0x2f3   : > { %5130 = vmatpush3.bf16.msra.mxu0 %v5129_v44  ;;  %5162 = vmatpush3.bf16.msra.mxu1 %v5161_v60  ;;  %v5169_v48 = vpack.c.bf16 %v4387_v13, %v4386_v42  ;;  %v5151_v44 = vpack.c.bf16 %v4379_v21, %v4378_v10  ;;  %v5183_v60 = vpack.c.bf16 %v4411_v23, %v4410_v25  ;;  %v4430_v13 = vld [vmem:[%s7759_s3 + $0x280] sm:$0xff]  ;;  %v4416_v25 = vld [vmem:[%s7759_s3 + $0x210] sm:$0xff]  ;;  %v4417_v23 = vld [vmem:[%s7759_s3 + $0x218] sm:$0xff] }
 0x2f4   : > { %5132 = vmatprep.subr.bf16.mxu0 %v5131_v26  ;;  %5164 = vmatprep.subr.bf16.mxu1 %v5163_v15  ;;  %v4395_v26 = vld [vmem:[%s7759_s3 + $0x168] sm:$0xff]  ;;  %v4380_v15 = vld [vmem:[%s7759_s3 + $0xf0] sm:$0xff]  ;;  %v5191_v27 = vpack.c.bf16 %v4431_v47, %v4430_v13  ;;  %v5225_v21 = vpack.c.bf16 %v4447_v2, %v4446_v51  ;;  %v4473_v2 = vld [vmem:[%s7759_s3 + $0x3d8] sm:$0xff] }
 0x2f5   : > { %v5185_v34 = vpack.c.bf16 %v4395_v26, %v4394_v1  ;;  %v4434_v1 = vld [vmem:[%s7759_s3 + $0x2a0] sm:$0xff]  ;;  %v4435_v26 = vld [vmem:[%s7759_s3 + $0x2a8] sm:$0xff]  ;;  %v4472_v51 = vld [vmem:[%s7759_s3 + $0x3d0] sm:$0xff] }
 0x2f7   : > { %5134 = vmatpush3.bf16.msra.mxu0 %v5133_v46  ;;  %5166 = vmatpush3.bf16.msra.mxu1 %v5165_v39  ;;  %v5155_v46 = vpack.c.bf16 %v4381_v16, %v4380_v15  ;;  %v5187_v39 = vpack.c.bf16 %v4413_v54, %v4412_v3  ;;  %v4466_v15 = vld [vmem:[%s7759_s3 + $0x3a0] sm:$0xff]  ;;  %v4467_v16 = vld [vmem:[%s7759_s3 + $0x3a8] sm:$0xff]  ;;  %v5197_v3 = vpack.c.bf16 %v4417_v23, %v4416_v25 }
 0x2f8   : > { %5136 = vmatprep.subr.bf16.mxu0 %v5135_v14  ;;  %5168 = vmatprep.subr.bf16.mxu1 %v5167_v4  ;;  %v4397_v14 = vld [vmem:[%s7759_s3 + $0x178] sm:$0xff]  ;;  %v5157_v4 = vpack.c.bf16 %v4365_v33, %v4364_v6  ;;  %v4419_v54 = vld [vmem:[%s7759_s3 + $0x228] sm:$0xff]  ;;  %v5199_v6 = vpack.c.bf16 %v4435_v26, %v4434_v1  ;;  %v4426_v25 = vld [vmem:[%s7759_s3 + $0x260] sm:$0xff] }
 0x2f9   : > { %v5189_v42 = vpack.c.bf16 %v4397_v14, %v4396_v32  ;;  %v4451_v33 = vld [vmem:[%s7759_s3 + $0x328] sm:$0xff]  ;;  %v4436_v32 = vld [vmem:[%s7759_s3 + $0x2b0] sm:$0xff]  ;;  %v4437_v14 = vld [vmem:[%s7759_s3 + $0x2b8] sm:$0xff] }
 0x2fa   : > { %v4427_v23 = vld [vmem:[%s7759_s3 + $0x268] sm:$0xff]  ;;  %v4476_v1 = vld [vmem:[%s7759_s3 + $0x3f0] sm:$0xff]  ;;  %v4477_v26 = vld [vmem:[%s7759_s3 + $0x3f8] sm:$0xff] }
 0x2fb   : > { %5138 = vmatpush3.bf16.msra.mxu0 %v5137_v9  ;;  %5170 = vmatpush3.bf16.msra.mxu1 %v5169_v48  ;;  %v5223_v9 = vpack.c.bf16 %v4463_v22, %v4462_v57  ;;  %v1795_v48 = vsub.s32 0, %v5602_v35  ;;  %v4420_v57 = vld [vmem:[%s7759_s3 + $0x230] sm:$0xff]  ;;  %v5203_v22 = vpack.c.bf16 %v4437_v14, %v4436_v32  ;;  %v1811_v32 = vsub.s32 4, %v5602_v35 }
 0x2fc   : > { %5140 = vmatprep.subr.bf16.mxu0 %v5139_v29  ;;  %5172 = vmatprep.subr.bf16.mxu1 %v5171_v49  ;;  %v1799_v29 = vsub.s32 1, %v5602_v35  ;;  %v1807_v49 = vsub.s32 3, %v5602_v35  ;;  %v1819_v14 = vsub.s32 6, %v5602_v35 }
 0x2fd   : > { %v1796_v0 = vrot.slane %v7510_v53, %v1795_v48  ;;  %v4452_v48 = vld [vmem:[%s7759_s3 + $0x330] sm:$0xff] }
 0x2fe   : > { %v1800_v18 = vrot.slane %v7510_v53, %v1799_v29  ;;  %v1808_v24 = vrot.slane %v7510_v53, %v1807_v49  ;;  %v4438_v29 = vld [vmem:[%s7759_s3 + $0x2c0] sm:$0xff]  ;;  %v4439_v49 = vld [vmem:[%s7759_s3 + $0x2c8] sm:$0xff] }
 0x2ff   : > { %5142 = vmatpush3.bf16.msra.mxu0 %v5141_v40  ;;  %5174 = vmatpush3.bf16.msra.mxu1 %v5173_v45  ;;  %v4414_v40 = vld [vmem:[%s7759_s3 + $0x200] sm:$0xff]  ;;  %v4415_v45 = vld [vmem:[%s7759_s3 + $0x208] sm:$0xff] }
 0x300   : > { %5144 = vmatprep.subr.bf16.mxu0 %v5143_v50  ;;  %5176 = vmatprep.subr.bf16.mxu1 %v5175_v37  ;;  %v5193_v10 = vpack.c.bf16 %v4415_v45, %v4414_v40  ;;  %v5207_v40 = vpack.c.bf16 %v4439_v49, %v4438_v29 }
 0x303   : > { %5146 = vmatpush3.bf16.msra.mxu0 %v5145_v56  ;;  %5178 = vmatpush3.bf16.msra.mxu1 %v5177_v41  ;;  %v4433_v41 = vld [vmem:[%s7759_s3 + $0x298] sm:$0xff] }
 0x304   : > { %5148 = vmatprep.subr.bf16.mxu0 %v5147_v61  ;;  %5180 = vmatprep.subr.bf16.mxu1 %v5179_v55  ;;  %v5195_v30 = vpack.c.bf16 %v4433_v41, %v4432_v31  ;;  %v5243_v41 = vpack.c.bf16 %v4473_v2, %v4472_v51 }
 0x307   : > { %5150 = vmatpush3.bf16.msra.mxu0 %v5149_v63  ;;  %5182 = vmatpush3.bf16.msra.mxu1 %v5181_v38 }
 0x308   : > { %5152 = vmatprep.subr.bf16.mxu0 %v5151_v44  ;;  %5184 = vmatprep.subr.bf16.mxu1 %v5183_v60  ;;  %v5227_v44 = vpack.c.bf16 %v4465_v8, %v4464_v58  ;;  %v4448_v60 = vld [vmem:[%s7759_s3 + $0x310] sm:$0xff]  ;;  %v4457_v8 = vld [vmem:[%s7759_s3 + $0x358] sm:$0xff] }
 0x309   : > { %v4456_v58 = vld [vmem:[%s7759_s3 + $0x350] sm:$0xff] }
 0x30b   : > { %5154 = vmatpush3.bf16.msra.mxu0 %v5153_v43  ;;  %5186 = vmatpush3.bf16.msra.mxu1 %v5185_v34  ;;  %v5229_v43 = vpack.c.bf16 %v4449_v19, %v4448_v60  ;;  %v4418_v34 = vld [vmem:[%s7759_s3 + $0x220] sm:$0xff]  ;;  %v4444_v60 = vld [vmem:[%s7759_s3 + $0x2f0] sm:$0xff]  ;;  %v4445_v19 = vld [vmem:[%s7759_s3 + $0x2f8] sm:$0xff] }
 0x30c   : > { %5156 = vmatprep.subr.bf16.mxu0 %v5155_v46  ;;  %5188 = vmatprep.subr.bf16.mxu1 %v5187_v39  ;;  %v5231_v46 = vpack.c.bf16 %v4467_v16, %v4466_v15  ;;  %v4450_v39 = vld [vmem:[%s7759_s3 + $0x320] sm:$0xff]  ;;  %v5201_v13 = vpack.c.bf16 %v4419_v54, %v4418_v34  ;;  %v5217_v15 = vpack.c.bf16 %v4427_v23, %v4426_v25  ;;  %v4429_v54 = vld [vmem:[%s7759_s3 + $0x278] sm:$0xff] }
 0x30d   : > { %v5233_v47 = vpack.c.bf16 %v4451_v33, %v4450_v39  ;;  %v5251_v34 = vpack.c.bf16 %v4477_v26, %v4476_v1 }
 0x30f   : > { %5158 = vmatpush3.bf16.msra.mxu0 %v5157_v4  ;;  %5190 = vmatpush3.bf16.msra.mxu1 %v5189_v42  ;;  %v4468_v4 = vld [vmem:[%s7759_s3 + $0x3b0] sm:$0xff]  ;;  %v4469_v42 = vld [vmem:[%s7759_s3 + $0x3b8] sm:$0xff] }
 0x310   : > { %5192 = vmatprep.subr.bf16.mxu0 %v5191_v27  ;;  %5224 = vmatprep.subr.bf16.mxu1 %v5223_v9  ;;  %v4421_v27 = vld [vmem:[%s7759_s3 + $0x238] sm:$0xff]  ;;  %v5235_v9 = vpack.c.bf16 %v4469_v42, %v4468_v4  ;;  %v1815_v4 = vsub.s32 5, %v5602_v35  ;;  %v1823_v42 = vsub.s32 7, %v5602_v35 }
 0x385   : > { %v4212_v11 = vpop.f32.mrb[0].mxu0  ;;  %v4253_v62 = vpop.f32.mrb[0].mxu1 }
 0x386   : > { %v4213_v17 = vadd.f32 %v4212_v11, %v1796_v0  ;;  %v4254_v36 = vadd.f32 %v4253_v62, %v1804_v28  ;;  %v4214_v50 = vpop.f32.mrb[1].mxu0  ;;  %v4255_v37 = vpop.f32.mrb[1].mxu1  ;;  %v4470_v0 = vld [vmem:[%s7759_s3 + $0x3c0] sm:$0xff]  ;;  %v4471_v28 = vld [vmem:[%s7759_s3 + $0x3c8] sm:$0xff] }
 0x387   : > { %v4215_v52 = vadd.f32 %v4214_v50, %v1800_v18  ;;  %v4256_v12 = vadd.f32 %v4255_v37, %v1808_v24  ;;  %v4216_v20 = vpop.f32.mrb[2].mxu0  ;;  %v4257_v56 = vpop.f32.mrb[2].mxu1  ;;  %v5205_v18 = vpack.c.bf16 %v4421_v27, %v4420_v57  ;;  %v5237_v24 = vpack.c.bf16 %v4453_v59, %v4452_v48  ;;  %v4422_v11 = vld [vmem:[%s7759_s3 + $0x240] sm:$0xff]  ;;  %v4423_v62 = vld [vmem:[%s7759_s3 + $0x248] sm:$0xff]  ;;  %v4440_v50 = vld [vmem:[%s7759_s3 + $0x2d0] sm:$0xff] }
 0x388   : > { %v4217_v61 = vpop.f32.mrb[3].mxu0  ;;  %v4258_v55 = vpop.f32.mrb[3].mxu1  ;;  %v4342_v63 = vmax.f32 %v4213_v17, 0.0  ;;  %v4344_v38 = vmax.f32 %v4254_v36, 0.0  ;;  %v5239_v45 = vpack.c.bf16 %v4471_v28, %v4470_v0  ;;  %v4454_v17 = vld [vmem:[%s7759_s3 + $0x340] sm:$0xff]  ;;  %v4455_v36 = vld [vmem:[%s7759_s3 + $0x348] sm:$0xff]  ;;  %v5209_v31 = vpack.c.bf16 %v4423_v62, %v4422_v11 }
 0x389   : > { %v4343_v7 = vmax.f32 %v4215_v52, 0.0  ;;  %v4345_v5 = vmax.f32 %v4256_v12, 0.0  ;;  %v4441_v37 = vld [vmem:[%s7759_s3 + $0x2d8] sm:$0xff]  ;;  %v5241_v52 = vpack.c.bf16 %v4455_v36, %v4454_v17  ;;  %v4424_v12 = vld [vmem:[%s7759_s3 + $0x250] sm:$0xff]  ;;  %v4442_v61 = vld [vmem:[%s7759_s3 + $0x2e0] sm:$0xff]  ;;  %v1816_v57 = vrot.slane %v7510_v53, %v1815_v4 }
 0x38a   : > { %v4425_v20 = vld [vmem:[%s7759_s3 + $0x258] sm:$0xff]  ;;  %v5211_v56 = vpack.c.bf16 %v4441_v37, %v4440_v50  ;;  %v4443_v55 = vld [vmem:[%s7759_s3 + $0x2e8] sm:$0xff]  ;;  %v1824_v27 = vrot.slane %v7510_v53, %v1823_v42  ;;  %v4981_v50 = vld [vmem:[%s7760_s4] ss:$0 sm:$0xff] }
 0x38b   : > { %4549 = vmatprep.mubr.f32.mxu0 %v4343_v7  ;;  %4619 = vmatprep.mubr.f32.mxu1 %v4345_v5  ;;  %v4474_v7 = vld [vmem:[%s7759_s3 + $0x3e0] sm:$0xff]  ;;  %v4475_v5 = vld [vmem:[%s7759_s3 + $0x3e8] sm:$0xff] }
 0x38c   : > { %4550 = vmatmul.mubr.f32.vlgmr.msra.gmra.mrb[8].mxu0 %v4342_v63  ;;  %4620 = vmatmul.mubr.f32.vlgmr.msra.gmra.mrb[8].mxu1 %v4344_v38  ;;  %v5215_v63 = vpack.c.bf16 %v4443_v55, %v4442_v61  ;;  %v5247_v38 = vpack.c.bf16 %v4475_v5, %v4474_v7 }
 0x38d   : > { %5194 = vmatpush3.bf16.msra.mxu0 %v5193_v10  ;;  %5226 = vmatpush3.bf16.msra.mxu1 %v5225_v21  ;;  %v5213_v10 = vpack.c.bf16 %v4425_v20, %v4424_v12  ;;  %v5245_v21 = vpack.c.bf16 %v4457_v8, %v4456_v58 }
 0x38e   : > { %5196 = vmatprep.subr.bf16.mxu0 %v5195_v30  ;;  %5228 = vmatprep.subr.bf16.mxu1 %v5227_v44  ;;  %v4458_v30 = vld [vmem:[%s7759_s3 + $0x360] sm:$0xff]  ;;  %v4459_v44 = vld [vmem:[%s7759_s3 + $0x368] sm:$0xff] }
 0x38f   : > { %v5249_v16 = vpack.c.bf16 %v4459_v44, %v4458_v30 }
 0x391   : > { %5198 = vmatpush3.bf16.msra.mxu0 %v5197_v3  ;;  %5230 = vmatpush3.bf16.msra.mxu1 %v5229_v43  ;;  %v4428_v3 = vld [vmem:[%s7759_s3 + $0x270] sm:$0xff]  ;;  %v5219_v43 = vpack.c.bf16 %v4445_v19, %v4444_v60 }
 0x392   : > { %5200 = vmatprep.subr.bf16.mxu0 %v5199_v6  ;;  %5232 = vmatprep.subr.bf16.mxu1 %v5231_v46  ;;  %v4460_v6 = vld [vmem:[%s7759_s3 + $0x370] sm:$0xff]  ;;  %v4461_v46 = vld [vmem:[%s7759_s3 + $0x378] sm:$0xff]  ;;  %v5221_v39 = vpack.c.bf16 %v4429_v54, %v4428_v3 }
 0x393   : > { %v5253_v33 = vpack.c.bf16 %v4461_v46, %v4460_v6 }
 0x395   : > { %5202 = vmatpush3.bf16.msra.mxu0 %v5201_v13  ;;  %5234 = vmatpush3.bf16.msra.mxu1 %v5233_v47  ;;  %v1812_v13 = vrot.slane %v7510_v53, %v1811_v32  ;;  %v1820_v47 = vrot.slane %v7510_v53, %v1819_v14 }
 0x396   : > { %5204 = vmatprep.subr.bf16.mxu0 %v5203_v22  ;;  %5236 = vmatprep.subr.bf16.mxu1 %v5235_v9 }
 0x399   : > { %5206 = vmatpush3.bf16.msra.mxu0 %v5205_v18  ;;  %5238 = vmatpush3.bf16.msra.mxu1 %v5237_v24 }
 0x39a   : > { %5208 = vmatprep.subr.bf16.mxu0 %v5207_v40  ;;  %5240 = vmatprep.subr.bf16.mxu1 %v5239_v45 }
 0x39d   : > { %5210 = vmatpush3.bf16.msra.mxu0 %v5209_v31  ;;  %5242 = vmatpush3.bf16.msra.mxu1 %v5241_v52 }
 0x39e   : > { %5212 = vmatprep.subr.bf16.mxu0 %v5211_v56  ;;  %5244 = vmatprep.subr.bf16.mxu1 %v5243_v41 }
 0x3a1   : > { %5214 = vmatpush3.bf16.msra.mxu0 %v5213_v10  ;;  %5246 = vmatpush3.bf16.msra.mxu1 %v5245_v21 }
 0x3a2   : > { %5216 = vmatprep.subr.bf16.mxu0 %v5215_v63  ;;  %5248 = vmatprep.subr.bf16.mxu1 %v5247_v38 }
 0x3a5   : > { %5218 = vmatpush3.bf16.msra.mxu0 %v5217_v15  ;;  %5250 = vmatpush3.bf16.msra.mxu1 %v5249_v16 }
 0x3a6   : > { %5220 = vmatprep.subr.bf16.mxu0 %v5219_v43  ;;  %5252 = vmatprep.subr.bf16.mxu1 %v5251_v34 }
 0x3a9   : > { %5222 = vmatpush3.bf16.msra.mxu0 %v5221_v39  ;;  %5254 = vmatpush3.bf16.msra.mxu1 %v5253_v33 }
 0x3c5   : > { %v4294_v22 = vpop.f32.mrb[4].mxu0  ;;  %v4335_v9 = vpop.f32.mrb[4].mxu1 }
 0x3c6   : > { %v4295_v48 = vadd.f32 %v4294_v22, %v1812_v13  ;;  %v4336_v59 = vadd.f32 %v4335_v9, %v1820_v47  ;;  %v4296_v29 = vpop.f32.mrb[5].mxu0  ;;  %v4337_v49 = vpop.f32.mrb[5].mxu1 }
 0x3c7   : > { %v4297_v0 = vadd.f32 %v4296_v29, %v1816_v57  ;;  %v4338_v28 = vadd.f32 %v4337_v49, %v1824_v27  ;;  %v4298_v18 = vpop.f32.mrb[6].mxu0  ;;  %v4339_v24 = vpop.f32.mrb[6].mxu1 }
 0x3c8   : > { %v4299_v11 = vpop.f32.mrb[7].mxu0  ;;  %v4340_v35 = vpop.f32.mrb[7].mxu1  ;;  %v4346_v45 = vmax.f32 %v4295_v48, 0.0  ;;  %v4348_v17 = vmax.f32 %v4336_v59, 0.0 }
 0x3c9   : > { %v4347_v62 = vmax.f32 %v4297_v0, 0.0  ;;  %v4349_v40 = vmax.f32 %v4338_v28, 0.0 }
 0x3cb   : > { %4689 = vmatprep.mubr.f32.mxu0 %v4347_v62  ;;  %4759 = vmatprep.mubr.f32.mxu1 %v4349_v40 }
 0x3cc   : > { %4690 = vmatmul.mubr.f32.vlgmr.msra.gmra.mrb[10].mxu0 %v4346_v45  ;;  %4760 = vmatmul.mubr.f32.vlgmr.msra.gmra.mrb[10].mxu1 %v4348_v17 }
 0x45f   : > { %v5019_v53 = vpop.f32.mrb[8].mxu0  ;;  %v5054_v36 = vpop.f32.mrb[8].mxu1 }
 0x460   : > { %v5020_v37 = vpop.f32.mrb[9].mxu0  ;;  %v5055_v51 = vpop.f32.mrb[9].mxu1 }
 0x461   : > { %v5021_v2 = vadd.f32 %v5020_v37, %v5019_v53  ;;  %v5056_v31 = vadd.f32 %v5055_v51, %v5054_v36 }
 0x463   : > { %v4552_v52 = vadd.f32 %v5021_v2, %v4981_v50 }
 0x465   : > { %v4622_v12 = vadd.f32 %v5056_v31, %v4552_v52 }
 0x49f   : > { %v5089_v20 = vpop.f32.mrb[10].mxu0  ;;  %v5124_v56 = vpop.f32.mrb[10].mxu1 }
 0x4a0   : > { %v5090_v41 = vpop.f32.mrb[11].mxu0  ;;  %v5125_v58 = vpop.f32.mrb[11].mxu1 }
 0x4a1   : > { %v5091_v8 = vadd.f32 %v5090_v41, %v5089_v20  ;;  %v5126_v61 = vadd.f32 %v5125_v58, %v5124_v56 }
 0x4a3   : > { %v4692_v55 = vadd.f32 %v5091_v8, %v4622_v12 }
 0x4a5   : > { %v4762_v7 = vadd.f32 %v5126_v61, %v4692_v55 }
 0x4a7   : > { %v4765_v5 = vsub.f32 0.0, %v4762_v7 }
 0x4a9   : > { %v4766_v10 = vmul.f32 1.442695, %v4765_v5 }
 0x4ab   : > { %5294 = vpow2.f32 %v4766_v10 }
 0x4b5   : > { %v5295_v21 = vpop.eup %5294 }
 0x4b6   : > { %v4768_v25 = vadd.f32 1.0, %v5295_v21 }
 0x4b8   : > { %5296 = vrcp.f32 %v4768_v25 }
 0x4c2   : > { %v5297_v23 = vpop.eup %5296 }
 0x4c3   : > { %4771 = vst.msk [vmem:[%s235_s30] sm:$0xff] %vm4770_vm7, %v5297_v23 }
 0x4c4   : > { %5311 = shalt.err (!%p5308_p3)
}
 0x4c5   : > { %s5312_s14 = scalar_lea.hbm %s7714_s8, 128  ;;  %s5316_s17 = scalar_lea.hbm %s7761_s5, 256 }
 0x4c6   : > { %p5313_p4 = scmp.ne.s32.totalorder %s7714_s8, %s5312_s14  ;;  %p5317_p9 = scmp.lt.u32.totalorder %s7714_s8, %s7761_s5 }
 0x4c7   : > { %p5318_p10 = scmp.lt.u32.totalorder %s5316_s17, %s5312_s14  ;;  %p5320_p12 = scmp.lt.u32.totalorder %s5312_s14, %s7714_s8 }
 0x4c8   : > { %p5314_p7 = pnand %p5313_p4, %p5431_p5 }
 0x4c9   : > { %p5319_p11 = por %p5318_p10, %p5317_p9 }
 0x4ca   : > { %p5315_p8 = pneg %p5314_p7 }
 0x4cb   : > { %p5321_p13 = por %p5320_p12, %p5319_p11 }
 0x4cd   : > { %p5322_p0 = pnand %p5321_p13, %p5315_p8 }
 0x4cf   : > { %5325 = shalt.err (!%p5322_p0)
}
 0x4d0   : > { %5255 = dma.vmem_to_hbm [thread:$0]  (%p5431_p5), %s7716_s9, 128, %s7714_s8, %s4773_s10  }
 0x4d1 PF: > { %p5261_p1 = scmp.ge.s32.totalorder %s5360_s21, 2  ;;  %s4798_s26 = sand.u32 1, %s5348_s18  }
 0x4d2   : > { %s4799_s30 = scalar_lea.sflag [#allocation3], %s4798_s26 }
 0x4d3   : > { %p5258_p2 = pnand %p5261_p1, %p5435_p6 }
 0x4d5   : > { %5343 = dma.done.wait (!%p5258_p2), %s4799_s30, 128  }
 0x4d6   : > { %5345 = vsyncadd (!%p5258_p2), %s4799_s30, 4294967168  ;;  %p15_p3 = scmp.ge.s32.totalorder %s5418_s24, 4   ;;  %s7764_s18 = smov %s5352_s19 }
 0x4d7   : > { %s7765_s19 = smov %s5356_s20  ;;  %s7766_s20 = smov %s5429_s27 }
 0x4d8   : > { %s7767_s21 = smov %s5418_s24  ;;  %17 = sbr.rel (!%p15_p3) target bundleno = 3 (0x3), region = 75 }
 0x4df   :  { %4804 = vsyncpa [#allocation3], 1 }
 0x4e0   :  { %4806 = vsyncpa [#allocation3 + $0x1], 1 }

// kernel: tpu_custom_call.1
= control target key start
LH: loop header
LB: loop body
LE: loop exit
PB: predicated region body
PF: predicated region fallthrough
CT: control target
= control target key end

     0   :  { %10 = vsyncpa [#allocation3], 0  ;;  %s7756_s0 = inlined_call_operand.vmem [shape: f32[12,256,49], index: 0, kind: input, shape index: {}]   ;;  %s7757_s1 = inlined_call_operand.vmem [shape: bf16[256,1024], index: 1, kind: input, shape index: {}]   ;;  %s7758_s2 = inlined_call_operand.vmem [shape: f32[1,1024], index: 2, kind: input, shape index: {}]   ;;  %s7759_s3 = inlined_call_operand.vmem [shape: f32[1024,10], index: 3, kind: input, shape index: {}]   ;;  %s7760_s4 = inlined_call_operand.vmem [shape: f32[1,10], index: 4, kind: input, shape index: {}]   ;;  %s7761_s5 = inlined_call_operand.hbm [shape: f32[12,10], index: 5, kind: output, shape index: {}]  }
   0x1   :  { %12 = vsyncpa [#allocation3 + $0x1], 0  ;;  %s5393_s18 = smov 0   ;;  %s5395_s19 = smov 0  }
   0x2   :  { %s5397_s20 = smov 0   ;;  %s5399_s21 = smov 0  }
   0x3 LB: > { %s5414_s22 = sadd.s32 4294967295, %s5360_s21   ;;  %s4845_s23 = sadd.s32 4294967294, %s5360_s21   ;;  %s5360_s21 = sphi %s5399_s21, %s7767_s21   ;;  %s5356_s20 = sphi %s5397_s20, %s7766_s20   ;;  %s5352_s19 = sphi %s5395_s19, %s7765_s19   ;;  %s5348_s18 = sphi %s5393_s18, %s7764_s18  }
   0x4   : > { %s5418_s24 = sadd.s32 1, %s5360_s21   ;;  %s135_s25 = sadd.s32 1, %s5356_s20 }
   0x5   : > { %s132_s26 = ssub.s32 %s5360_s21, %s5418_s24  ;;  %p145_p0 = scmp.ne.s32.totalorder %s5356_s20, %s5352_s19 }
   0x6   : > { %p133_p1 = scmp.eq.s32.totalorder %s132_s26, 0  ;;  %p146_p2 = scmp.eq.s32.totalorder %s5414_s22, 1 }
   0x7   : > { %p151_p3 = scmp.ne.s32.totalorder %s5352_s19, %s5348_s18  ;;  %p152_p4 = scmp.eq.s32.totalorder %s4845_s23, 1 }
   0x8   : > { %s5429_s27 = scalar_select %p133_p1, %s5356_s20, %s135_s25  }
   0x9   : > { %p5431_p5 = por %p146_p2, %p145_p0  ;;  %p5435_p6 = por %p152_p4, %p151_p3 }
   0xa   : > { %p4848_p7 = scmp.ge.s32.totalorder %s5360_s21, 1  ;;  %p202_p8 = scmp.lt.s32.totalorder %s5360_s21, 3 }
   0xc   : > { %p203_p9 = pnand %p4848_p7, %p202_p8 }
   0xd   : > { %s4850_s30 = sshll.u32 (!%p203_p9), %s5414_s22, 3  ;;  %vm509_vm0 = vcmask (!%p203_p9), 400384   ;;  %vm2228_vm1 = vcmask (!%p203_p9), 130112   ;;  %vm2235_vm2 = vcmask (!%p203_p9), 195712   ;;  %vm2242_vm3 = vcmask (!%p203_p9), 261312   ;;  %s233_s23 = sand.u32 (!%p203_p9), 1, %s5352_s19  }
   0xe   : > { %206 = sbr.rel (%p203_p9) target bundleno = 1233 (0x4d1), region = 40  ;;  %p242_p10 = scmp.lt.s32.totalorder (!%p203_p9), %s4850_s30, 11  ;;  %vm2249_vm4 = vcmask (!%p203_p9), 326912   ;;  %vm2256_vm5 = vcmask (!%p203_p9), 392512   ;;  %vm2263_vm6 = vcmask (!%p203_p9), 458112   ;;  %vm2270_vm7 = vcmask (!%p203_p9), 523712  }
   0xf   : > { %vm2277_vm8 = vcmask (!%p203_p9), 589312   ;;  %vm2284_vm9 = vcmask (!%p203_p9), 654912   ;;  %vm2291_vm10 = vcmask (!%p203_p9), 720512   ;;  %vm2298_vm11 = vcmask (!%p203_p9), 786112   ;;  %s4849_s25 = sshll.u32 (!%p203_p9), %s233_s23, 3  ;;  %s4983_s26 = sshll.u32 (!%p203_p9), %s5414_s22, 7 }
  0x10   : > { %vm2305_vm12 = vcmask (!%p203_p9), 851712   ;;  %vm2312_vm13 = vcmask (!%p203_p9), 917312   ;;  %vm2319_vm14 = vcmask (!%p203_p9), 982912   ;;  %vm2326_vm15 = vcmask (!%p203_p9), 1048512   ;;  %s7714_s8 = scalar_lea.hbm (!%p203_p9), %s7761_s5, %s4983_s26  ;;  %s4773_s10 = scalar_lea.sflag (!%p203_p9), [#allocation3], %s233_s23 }
  0x11   : > { %s5362_s22 = smov (!%p203_p9), [#allocation2]  }
  0x12   : > { %s5302_s12 = sshll.u32 (!%p203_p9), %s5362_s22, 4  ;;  %s5303_s12 = int_to_ptr.vmem [resolvable:$false] %s5302_s12 }
  0x13   : > { %s5304_s13 = scalar_lea.vmem (!%p203_p9), %s5303_s12, 256 }
  0x15   : > { %s7769_s30 = smov (!%p242_p10, %s4850_s30), 11 }
  0x16   : > { %s4986_s6 = sshll.u32 %s7769_s30, 8  ;;  %s235_s30 = scalar_lea.vmem [#allocation2], %s4849_s25 }
  0x17   : > { %s5445_s9 = scalar_lea.vmem %s7756_s0, %s4986_s6 }
  0x18   : > { %v301_v0 = vld [vmem:[%s5445_s9 + $0x180] sm:$0xff]  ;;  %v302_v2 = vld [vmem:[%s5445_s9 + $0x188] sm:$0xff]  ;;  %v272_v12 = vld [vmem:[%s5445_s9 + $0x98] sm:$0xff] }
  0x19   : > { %v269_v1 = vld [vmem:[%s5445_s9 + $0x80] sm:$0xff]  ;;  %v654_v3 = vsel %vm509_vm0, %v301_v0, 0.0  ;;  %v270_v5 = vld [vmem:[%s5445_s9 + $0x88] sm:$0xff]  ;;  %v657_v6 = vsel %vm509_vm0, %v302_v2, 0.0  ;;  %v271_v13 = vld [vmem:[%s5445_s9 + $0x90] sm:$0xff]  ;;  %v567_v14 = vsel %vm509_vm0, %v272_v12, 0.0 }
  0x1a   : > { %v558_v4 = vsel %vm509_vm0, %v269_v1, 0.0  ;;  %655 = vadd.xlane.f32.xlu1 %v654_v3  ;;  %v561_v7 = vsel %vm509_vm0, %v270_v5, 0.0  ;;  %v254_v8 = vld [vmem:[%s5445_s9 + $0x8] sm:$0xff]  ;;  %v253_v9 = vld [vmem:[%s5445_s9] sm:$0xff]  ;;  %v564_v15 = vsel %vm509_vm0, %v271_v13, 0.0  ;;  %v304_v20 = vld [vmem:[%s5445_s9 + $0x198] sm:$0xff] }
  0x1b   : > { %559 = vadd.xlane.f32.xlu0 %v558_v4  ;;  %v513_v10 = vsel %vm509_vm0, %v254_v8, 0.0  ;;  %v510_v11 = vsel %vm509_vm0, %v253_v9, 0.0  ;;  %v286_v16 = vld [vmem:[%s5445_s9 + $0x108] sm:$0xff]  ;;  %v285_v17 = vld [vmem:[%s5445_s9 + $0x100] sm:$0xff]  ;;  %v303_v21 = vld [vmem:[%s5445_s9 + $0x190] sm:$0xff]  ;;  %v663_v22 = vsel %vm509_vm0, %v304_v20, 0.0 }
  0x1c   : > { %v609_v18 = vsel %vm509_vm0, %v286_v16, 0.0  ;;  %v606_v19 = vsel %vm509_vm0, %v285_v17, 0.0  ;;  %v660_v23 = vsel %vm509_vm0, %v303_v21, 0.0  ;;  %v334_v24 = vld [vmem:[%s5445_s9 + $0x288] sm:$0xff]  ;;  %v333_v25 = vld [vmem:[%s5445_s9 + $0x280] sm:$0xff]  ;;  %v256_v28 = vld [vmem:[%s5445_s9 + $0x18] sm:$0xff] }
  0x1d   : > { %v753_v26 = vsel %vm509_vm0, %v334_v24, 0.0  ;;  %v750_v27 = vsel %vm509_vm0, %v333_v25, 0.0  ;;  %v255_v29 = vld [vmem:[%s5445_s9 + $0x10] sm:$0xff]  ;;  %v519_v30 = vsel %vm509_vm0, %v256_v28, 0.0  ;;  %v288_v32 = vld [vmem:[%s5445_s9 + $0x118] sm:$0xff]  ;;  %v318_v36 = vld [vmem:[%s5445_s9 + $0x208] sm:$0xff] }
  0x1e   : > { %658 = vadd.xlane.f32.xlu1 %v657_v6  ;;  %v516_v31 = vsel %vm509_vm0, %v255_v29, 0.0  ;;  %v287_v33 = vld [vmem:[%s5445_s9 + $0x110] sm:$0xff]  ;;  %v615_v34 = vsel %vm509_vm0, %v288_v32, 0.0  ;;  %v317_v37 = vld [vmem:[%s5445_s9 + $0x200] sm:$0xff]  ;;  %v705_v38 = vsel %vm509_vm0, %v318_v36, 0.0  ;;  %v336_v40 = vld [vmem:[%s5445_s9 + $0x298] sm:$0xff] }
  0x1f   : > { %562 = vadd.xlane.f32.xlu0 %v561_v7  ;;  %v612_v35 = vsel %vm509_vm0, %v287_v33, 0.0  ;;  %v702_v39 = vsel %vm509_vm0, %v317_v37, 0.0  ;;  %v335_v41 = vld [vmem:[%s5445_s9 + $0x290] sm:$0xff]  ;;  %v759_v42 = vsel %vm509_vm0, %v336_v40, 0.0  ;;  %v366_v44 = vld [vmem:[%s5445_s9 + $0x388] sm:$0xff]  ;;  %v365_v45 = vld [vmem:[%s5445_s9 + $0x380] sm:$0xff] }
  0x20   : > { %v756_v43 = vsel %vm509_vm0, %v335_v41, 0.0  ;;  %v849_v46 = vsel %vm509_vm0, %v366_v44, 0.0  ;;  %v846_v47 = vsel %vm509_vm0, %v365_v45, 0.0  ;;  %v274_v48 = vld [vmem:[%s5445_s9 + $0xa8] sm:$0xff]  ;;  %v273_v49 = vld [vmem:[%s5445_s9 + $0xa0] sm:$0xff]  ;;  %v320_v56 = vld [vmem:[%s5445_s9 + $0x218] sm:$0xff] }
  0x21   : > { %v573_v50 = vsel %vm509_vm0, %v274_v48, 0.0  ;;  %v570_v51 = vsel %vm509_vm0, %v273_v49, 0.0  ;;  %v306_v52 = vld [vmem:[%s5445_s9 + $0x1a8] sm:$0xff]  ;;  %v305_v53 = vld [vmem:[%s5445_s9 + $0x1a0] sm:$0xff]  ;;  %v319_v57 = vld [vmem:[%s5445_s9 + $0x210] sm:$0xff]  ;;  %v711_v58 = vsel %vm509_vm0, %v320_v56, 0.0 }
  0x22   : > { %514 = vadd.xlane.f32.xlu1 %v513_v10  ;;  %v669_v54 = vsel %vm509_vm0, %v306_v52, 0.0  ;;  %v666_v55 = vsel %vm509_vm0, %v305_v53, 0.0  ;;  %v708_v59 = vsel %vm509_vm0, %v319_v57, 0.0  ;;  %v350_v60 = vld [vmem:[%s5445_s9 + $0x308] sm:$0xff]  ;;  %v349_v61 = vld [vmem:[%s5445_s9 + $0x300] sm:$0xff]  ;;  %v368_v0 = vld [vmem:[%s5445_s9 + $0x398] sm:$0xff] }
  0x23   : > { %511 = vadd.xlane.f32.xlu0 %v510_v11  ;;  %v801_v62 = vsel %vm509_vm0, %v350_v60, 0.0  ;;  %v798_v63 = vsel %vm509_vm0, %v349_v61, 0.0  ;;  %v367_v1 = vld [vmem:[%s5445_s9 + $0x390] sm:$0xff]  ;;  %v855_v2 = vsel %vm509_vm0, %v368_v0, 0.0  ;;  %v398_v4 = vld [vmem:[%s5445_s9 + $0x488] sm:$0xff]  ;;  %v397_v5 = vld [vmem:[%s5445_s9 + $0x480] sm:$0xff] }
  0x24   : > { %v852_v3 = vsel %vm509_vm0, %v367_v1, 0.0  ;;  %v945_v6 = vsel %vm509_vm0, %v398_v4, 0.0  ;;  %v942_v7 = vsel %vm509_vm0, %v397_v5, 0.0  ;;  %v258_v8 = vld [vmem:[%s5445_s9 + $0x28] sm:$0xff]  ;;  %v257_v9 = vld [vmem:[%s5445_s9 + $0x20] sm:$0xff]  ;;  %v352_v20 = vld [vmem:[%s5445_s9 + $0x318] sm:$0xff] }
  0x25   : > { %v525_v10 = vsel %vm509_vm0, %v258_v8, 0.0  ;;  %v522_v11 = vsel %vm509_vm0, %v257_v9, 0.0  ;;  %v290_v12 = vld [vmem:[%s5445_s9 + $0x128] sm:$0xff]  ;;  %v289_v13 = vld [vmem:[%s5445_s9 + $0x120] sm:$0xff]  ;;  %v351_v21 = vld [vmem:[%s5445_s9 + $0x310] sm:$0xff] }
  0x26   : > { %568 = vadd.xlane.f32.xlu1 %v567_v14  ;;  %v621_v14 = vsel %vm509_vm0, %v290_v12, 0.0  ;;  %v338_v16 = vld [vmem:[%s5445_s9 + $0x2a8] sm:$0xff]  ;;  %v337_v17 = vld [vmem:[%s5445_s9 + $0x2a0] sm:$0xff]  ;;  %v400_v28 = vld [vmem:[%s5445_s9 + $0x498] sm:$0xff] }
  0x27   : > { %565 = vadd.xlane.f32.xlu0 %v564_v15  ;;  %v618_v15 = vsel %vm509_vm0, %v289_v13, 0.0  ;;  %v382_v24 = vld [vmem:[%s5445_s9 + $0x408] sm:$0xff]  ;;  %v381_v25 = vld [vmem:[%s5445_s9 + $0x400] sm:$0xff]  ;;  %v399_v29 = vld [vmem:[%s5445_s9 + $0x490] sm:$0xff] }
  0x28   : > { %v430_v32 = vld [vmem:[%s5445_s9 + $0x588] sm:$0xff]  ;;  %v429_v33 = vld [vmem:[%s5445_s9 + $0x580] sm:$0xff]  ;;  %v276_v36 = vld [vmem:[%s5445_s9 + $0xb8] sm:$0xff] }
  0x29   : > { %v275_v37 = vld [vmem:[%s5445_s9 + $0xb0] sm:$0xff]  ;;  %v308_v40 = vld [vmem:[%s5445_s9 + $0x1b8] sm:$0xff]  ;;  %v322_v44 = vld [vmem:[%s5445_s9 + $0x228] sm:$0xff] }
  0x2a   : > { %610 = vadd.xlane.f32.xlu1 %v609_v18  ;;  %v765_v18 = vsel %vm509_vm0, %v338_v16, 0.0  ;;  %v307_v41 = vld [vmem:[%s5445_s9 + $0x1b0] sm:$0xff]  ;;  %v321_v45 = vld [vmem:[%s5445_s9 + $0x220] sm:$0xff]  ;;  %v370_v48 = vld [vmem:[%s5445_s9 + $0x3a8] sm:$0xff] }
  0x2b   : > { %607 = vadd.xlane.f32.xlu0 %v606_v19  ;;  %v762_v19 = vsel %vm509_vm0, %v337_v17, 0.0  ;;  %v369_v49 = vld [vmem:[%s5445_s9 + $0x3a0] sm:$0xff]  ;;  %v384_v52 = vld [vmem:[%s5445_s9 + $0x418] sm:$0xff]  ;;  %v383_v53 = vld [vmem:[%s5445_s9 + $0x410] sm:$0xff] }
  0x2c   : > { %v414_v56 = vld [vmem:[%s5445_s9 + $0x508] sm:$0xff]  ;;  %v413_v57 = vld [vmem:[%s5445_s9 + $0x500] sm:$0xff]  ;;  %v432_v60 = vld [vmem:[%s5445_s9 + $0x598] sm:$0xff] }
  0x2d   : > { %v431_v61 = vld [vmem:[%s5445_s9 + $0x590] sm:$0xff]  ;;  %v462_v0 = vld [vmem:[%s5445_s9 + $0x688] sm:$0xff]  ;;  %v461_v1 = vld [vmem:[%s5445_s9 + $0x680] sm:$0xff] }
  0x2e   : > { %664 = vadd.xlane.f32.xlu1 %v663_v22  ;;  %v807_v22 = vsel %vm509_vm0, %v352_v20, 0.0  ;;  %v260_v4 = vld [vmem:[%s5445_s9 + $0x38] sm:$0xff]  ;;  %v259_v5 = vld [vmem:[%s5445_s9 + $0x30] sm:$0xff]  ;;  %v354_v16 = vld [vmem:[%s5445_s9 + $0x328] sm:$0xff] }
  0x2f   : > { %661 = vadd.xlane.f32.xlu0 %v660_v23  ;;  %v804_v23 = vsel %vm509_vm0, %v351_v21, 0.0  ;;  %v292_v8 = vld [vmem:[%s5445_s9 + $0x138] sm:$0xff]  ;;  %v291_v9 = vld [vmem:[%s5445_s9 + $0x130] sm:$0xff]  ;;  %v353_v17 = vld [vmem:[%s5445_s9 + $0x320] sm:$0xff]  ;;  %v813_v21 = vsel %vm509_vm0, %v354_v16, 0.0 }
  0x30   : > { %v340_v12 = vld [vmem:[%s5445_s9 + $0x2b8] sm:$0xff]  ;;  %v339_v13 = vld [vmem:[%s5445_s9 + $0x2b0] sm:$0xff] }
  0x32   : > { %754 = vadd.xlane.f32.xlu1 %v753_v26  ;;  %v897_v26 = vsel %vm509_vm0, %v382_v24, 0.0  ;;  %v401_v24 = vld [vmem:[%s5445_s9 + $0x4a0] sm:$0xff] }
  0x33   : > { %751 = vadd.xlane.f32.xlu0 %v750_v27  ;;  %v894_v27 = vsel %vm509_vm0, %v381_v25, 0.0 }
  0x36   : > { %520 = vadd.xlane.f32.xlu1 %v519_v30  ;;  %v951_v30 = vsel %vm509_vm0, %v400_v28, 0.0 }
  0x37   : > { %517 = vadd.xlane.f32.xlu0 %v516_v31  ;;  %v948_v31 = vsel %vm509_vm0, %v399_v29, 0.0 }
  0x3a   : > { %616 = vadd.xlane.f32.xlu1 %v615_v34  ;;  %v1041_v34 = vsel %vm509_vm0, %v430_v32, 0.0 }
  0x3b   : > { %613 = vadd.xlane.f32.xlu0 %v612_v35  ;;  %v1038_v35 = vsel %vm509_vm0, %v429_v33, 0.0 }
  0x3e   : > { %706 = vadd.xlane.f32.xlu1 %v705_v38  ;;  %v579_v38 = vsel %vm509_vm0, %v276_v36, 0.0  ;;  %v415_v36 = vld [vmem:[%s5445_s9 + $0x510] sm:$0xff] }
  0x3f   : > { %703 = vadd.xlane.f32.xlu0 %v702_v39  ;;  %v576_v39 = vsel %vm509_vm0, %v275_v37, 0.0 }
  0x42   : > { %760 = vadd.xlane.f32.xlu1 %v759_v42  ;;  %v675_v42 = vsel %vm509_vm0, %v308_v40, 0.0 }
  0x43   : > { %757 = vadd.xlane.f32.xlu0 %v756_v43  ;;  %v672_v43 = vsel %vm509_vm0, %v307_v41, 0.0 }
  0x46   : > { %850 = vadd.xlane.f32.xlu1 %v849_v46  ;;  %v717_v46 = vsel %vm509_vm0, %v322_v44, 0.0  ;;  %v996_v44 = vsel %vm509_vm0, %v415_v36, 0.0 }
  0x47   : > { %847 = vadd.xlane.f32.xlu0 %v846_v47  ;;  %v714_v47 = vsel %vm509_vm0, %v321_v45, 0.0  ;;  %v445_v45 = vld [vmem:[%s5445_s9 + $0x600] sm:$0xff] }
  0x4a   : > { %574 = vadd.xlane.f32.xlu1 %v573_v50  ;;  %v861_v50 = vsel %vm509_vm0, %v370_v48, 0.0 }
  0x4b   : > { %571 = vadd.xlane.f32.xlu0 %v570_v51  ;;  %v858_v51 = vsel %vm509_vm0, %v369_v49, 0.0 }
  0x4e   : > { %670 = vadd.xlane.f32.xlu1 %v669_v54  ;;  %v903_v54 = vsel %vm509_vm0, %v384_v52, 0.0 }
  0x4f   : > { %667 = vadd.xlane.f32.xlu0 %v666_v55  ;;  %v900_v55 = vsel %vm509_vm0, %v383_v53, 0.0 }
  0x52   : > { %712 = vadd.xlane.f32.xlu1 %v711_v58  ;;  %v993_v58 = vsel %vm509_vm0, %v414_v56, 0.0 }
  0x53   : > { %709 = vadd.xlane.f32.xlu0 %v708_v59  ;;  %v990_v59 = vsel %vm509_vm0, %v413_v57, 0.0 }
  0x56   : > { %802 = vadd.xlane.f32.xlu1 %v801_v62  ;;  %v1047_v62 = vsel %vm509_vm0, %v432_v60, 0.0 }
  0x57   : > { %799 = vadd.xlane.f32.xlu0 %v798_v63  ;;  %v1044_v63 = vsel %vm509_vm0, %v431_v61, 0.0  ;;  %v464_v61 = vld [vmem:[%s5445_s9 + $0x698] sm:$0xff] }
  0x5a   : > { %856 = vadd.xlane.f32.xlu1 %v855_v2  ;;  %v1137_v2 = vsel %vm509_vm0, %v462_v0, 0.0 }
  0x5b   : > { %853 = vadd.xlane.f32.xlu0 %v852_v3  ;;  %v1134_v3 = vsel %vm509_vm0, %v461_v1, 0.0 }
  0x5e   : > { %946 = vadd.xlane.f32.xlu1 %v945_v6  ;;  %v531_v6 = vsel %vm509_vm0, %v260_v4, 0.0 }
  0x5f   : > { %943 = vadd.xlane.f32.xlu0 %v942_v7  ;;  %v528_v7 = vsel %vm509_vm0, %v259_v5, 0.0 }
  0x62   : > { %526 = vadd.xlane.f32.xlu1 %v525_v10  ;;  %v627_v10 = vsel %vm509_vm0, %v292_v8, 0.0 }
  0x63   : > { %523 = vadd.xlane.f32.xlu0 %v522_v11  ;;  %v624_v11 = vsel %vm509_vm0, %v291_v9, 0.0 }
  0x66   : > { %622 = vadd.xlane.f32.xlu1 %v621_v14  ;;  %v771_v14 = vsel %vm509_vm0, %v340_v12, 0.0  ;;  %v494_v12 = vld [vmem:[%s5445_s9 + $0x788] sm:$0xff] }
  0x67   : > { %619 = vadd.xlane.f32.xlu0 %v618_v15  ;;  %v768_v15 = vsel %vm509_vm0, %v339_v13, 0.0  ;;  %v493_v13 = vld [vmem:[%s5445_s9 + $0x780] sm:$0xff] }
  0x6a   : > { %766 = vadd.xlane.f32.xlu1 %v765_v18  ;;  %v1793_v18 = vlaneseq }
  0x6b   : > { %763 = vadd.xlane.f32.xlu0 %v762_v19 }
  0x6c   : > { %v5597_v25 = vand.u32 127, %v1793_v18 }
  0x6e   : > { %808 = vadd.xlane.f32.xlu1 %v807_v22  ;;  %v810_v22 = vsel %vm509_vm0, %v353_v17, 0.0  ;;  %v2223_v37 = vadd.s32 4294967288, %v5597_v25 }
  0x6f   : > { %805 = vadd.xlane.f32.xlu0 %v804_v23  ;;  %v402_v23 = vld [vmem:[%s5445_s9 + $0x4a8] sm:$0xff] }
  0x70   : > { %v957_v29 = vsel %vm509_vm0, %v402_v23, 0.0 }
  0x72   : > { %898 = vadd.xlane.f32.xlu1 %v897_v26 }
  0x73   : > { %895 = vadd.xlane.f32.xlu0 %v894_v27 }
  0x76   : > { %952 = vadd.xlane.f32.xlu1 %v951_v30  ;;  %v954_v30 = vsel %vm509_vm0, %v401_v24, 0.0 }
  0x77   : > { %949 = vadd.xlane.f32.xlu0 %v948_v31  ;;  %v416_v31 = vld [vmem:[%s5445_s9 + $0x518] sm:$0xff] }
  0x7a   : > { %1042 = vadd.xlane.f32.xlu1 %v1041_v34 }
  0x7b   : > { %1039 = vadd.xlane.f32.xlu0 %v1038_v35  ;;  %v5602_v35 = vshrl.u32 %v1793_v18, 7 }
  0x7d   : > { %v5617_v49 = vsub.s32 %v2223_v37, %v5602_v35  ;;  %v310_v37 = vld [vmem:[%s5445_s9 + $0x1c8] sm:$0xff] }
  0x7e   : > { %580 = vadd.xlane.f32.xlu1 %v579_v38 }
  0x7f   : > { %577 = vadd.xlane.f32.xlu0 %v576_v39 }
  0x82   : > { %676 = vadd.xlane.f32.xlu1 %v675_v42  ;;  %v999_v42 = vsel %vm509_vm0, %v416_v31, 0.0 }
  0x83   : > { %673 = vadd.xlane.f32.xlu0 %v672_v43  ;;  %v446_v43 = vld [vmem:[%s5445_s9 + $0x608] sm:$0xff] }
  0x84   : > { %v1089_v52 = vsel %vm509_vm0, %v446_v43, 0.0 }
  0x86   : > { %718 = vadd.xlane.f32.xlu1 %v717_v46  ;;  %v5614_v46 = vsub.s32 %v5597_v25, %v5602_v35 }
  0x87   : > { %715 = vadd.xlane.f32.xlu0 %v714_v47 }
  0x8a   : > { %862 = vadd.xlane.f32.xlu1 %v861_v50  ;;  %v2230_v50 = vadd.s32 4294967280, %v5597_v25 }
  0x8b   : > { %859 = vadd.xlane.f32.xlu0 %v858_v51  ;;  %v2237_v51 = vadd.s32 4294967272, %v5597_v25 }
  0x8d   : > { %v5631_v0 = vsub.s32 %v2237_v51, %v5602_v35 }
  0x8e   : > { %904 = vadd.xlane.f32.xlu1 %v903_v54 }
  0x8f   : > { %901 = vadd.xlane.f32.xlu0 %v900_v55 }
  0x92   : > { %994 = vadd.xlane.f32.xlu1 %v993_v58  ;;  %v1086_v58 = vsel %vm509_vm0, %v445_v45, 0.0 }
  0x93   : > { %991 = vadd.xlane.f32.xlu0 %v990_v59 }
  0x96   : > { %1048 = vadd.xlane.f32.xlu1 %v1047_v62  ;;  %v463_v62 = vld [vmem:[%s5445_s9 + $0x690] sm:$0xff] }
  0x97   : > { %1045 = vadd.xlane.f32.xlu0 %v1044_v63  ;;  %v5628_v63 = vsub.s32 %v2230_v50, %v5602_v35 }
  0x9a   : > { %1138 = vadd.xlane.f32.xlu1 %v1137_v2 }
  0x9b   : > { %1135 = vadd.xlane.f32.xlu0 %v1134_v3 }
  0x9e   : > { %532 = vadd.xlane.f32.xlu1 %v531_v6  ;;  %v1143_v6 = vsel %vm509_vm0, %v464_v61, 0.0  ;;  %v323_v61 = vld [vmem:[%s5445_s9 + $0x230] sm:$0xff] }
  0x9f   : > { %529 = vadd.xlane.f32.xlu0 %v528_v7  ;;  %v1140_v7 = vsel %vm509_vm0, %v463_v62, 0.0 }
  0xa2   : > { %628 = vadd.xlane.f32.xlu1 %v627_v10 }
  0xa3   : > { %625 = vadd.xlane.f32.xlu0 %v624_v11 }
  0xa6   : > { %772 = vadd.xlane.f32.xlu1 %v771_v14 }
  0xa7   : > { %769 = vadd.xlane.f32.xlu0 %v768_v15  ;;  %v656_v19 = vpop.xlane.xlu1 %655 }
  0xa8   : > { %v560_v20 = vpop.xlane.xlu0 %559  ;;  %v1327_v26 = vmul.f32 0.020408163, %v656_v19 }
  0xa9   : > { %v1295_v32 = vmul.f32 0.020408163, %v560_v20  ;;  %v1233_v20 = vsel %vm509_vm0, %v494_v12, 0.0 }
  0xaa   : > { %814 = vadd.xlane.f32.xlu1 %v813_v21  ;;  %v1230_v21 = vsel %vm509_vm0, %v493_v13, 0.0 }
  0xab   : > { %811 = vadd.xlane.f32.xlu0 %v810_v22  ;;  %v659_v27 = vpop.xlane.xlu1 %658 }
  0xac   : > { %v563_v28 = vpop.xlane.xlu0 %562  ;;  %v1328_v33 = vmul.f32 0.020408163, %v659_v27  ;;  %v278_v27 = vld [vmem:[%s5445_s9 + $0xc8] sm:$0xff] }
  0xad   : > { %v1296_v34 = vmul.f32 0.020408163, %v563_v28  ;;  %v277_v28 = vld [vmem:[%s5445_s9 + $0xc0] sm:$0xff] }
  0xae   : > { %v5606_v38 = vpack.c.bf16 %v1328_v33, %v1327_v26  ;;  %958 = vadd.xlane.f32.xlu1 %v957_v29  ;;  %v582_v36 = vsel %vm509_vm0, %v277_v28, 0.0 }
  0xaf   : > { %v1543_v39 = vpack.c.bf16 %v1296_v34, %v1295_v32  ;;  %955 = vadd.xlane.f32.xlu0 %v954_v30  ;;  %v515_v40 = vpop.xlane.xlu1 %514  ;;  %v585_v34 = vsel %vm509_vm0, %v278_v27, 0.0 }
  0xb0   : > { %v512_v41 = vpop.xlane.xlu0 %511  ;;  %v1280_v47 = vmul.f32 0.020408163, %v515_v40  ;;  %v2009_v22 = vunpack.c.l.b16 %v5606_v38  ;;  %v2010_v23 = vunpack.c.h.b16 %v5606_v38 }
  0xb1   : > { %v1279_v48 = vmul.f32 0.020408163, %v512_v41  ;;  %v1977_v53 = vunpack.c.l.b16 %v1543_v39  ;;  %v1978_v54 = vunpack.c.h.b16 %v1543_v39 }
  0xb2   : > { %1000 = vadd.xlane.f32.xlu1 %v999_v42  ;;  %v2489_v38 = vrot.slane %v2009_v22, %v5614_v46  ;;  %v2493_v39 = vrot.slane %v2010_v23, %v5617_v49 }
  0xb3   : > { %v5622_v55 = vpack.c.bf16 %v1280_v47, %v1279_v48  ;;  %997 = vadd.xlane.f32.xlu0 %v996_v44  ;;  %v569_v56 = vpop.xlane.xlu1 %568  ;;  %v2331_v2 = vrot.slane %v1977_v53, %v5614_v46  ;;  %v2335_v3 = vrot.slane %v1978_v54, %v5617_v49  ;;  %v309_v44 = vld [vmem:[%s5445_s9 + $0x1c0] sm:$0xff]  ;;  %v681_v47 = vsel %vm509_vm0, %v310_v37, 0.0 }
  0xb4   : > { %v566_v57 = vpop.xlane.xlu0 %565  ;;  %v1298_v59 = vmul.f32 0.020408163, %v569_v56  ;;  %v324_v56 = vld [vmem:[%s5445_s9 + $0x238] sm:$0xff] }
  0xb5   : > { %v1297_v60 = vmul.f32 0.020408163, %v566_v57  ;;  %v2336_v17 = vsel %vm2228_vm1, %v2335_v3, %v2331_v2  ;;  %v1961_v48 = vunpack.c.l.b16 %v5622_v55  ;;  %v1962_v50 = vunpack.c.h.b16 %v5622_v55 }
  0xb6   : > { %1090 = vadd.xlane.f32.xlu1 %v1089_v52  ;;  %v2494_v57 = vsel %vm2228_vm1, %v2493_v39, %v2489_v38  ;;  %v723_v2 = vsel %vm509_vm0, %v324_v56, 0.0 }
  0xb7   : > { %v1544_v1 = vpack.c.bf16 %v1298_v59, %v1297_v60  ;;  %1087 = vadd.xlane.f32.xlu0 %v1086_v58  ;;  %v611_v4 = vpop.xlane.xlu1 %610  ;;  %v678_v60 = vsel %vm509_vm0, %v309_v44, 0.0  ;;  %v2222_v3 = vrot.slane %v1961_v48, %v5614_v46 }
  0xb8   : > { %v608_v5 = vpop.xlane.xlu0 %607  ;;  %v1312_v10 = vmul.f32 0.020408163, %v611_v4  ;;  %v2227_v4 = vrot.slane %v1962_v50, %v5617_v49 }
  0xb9   : > { %v1979_v8 = vunpack.c.l.b16 %v1544_v1  ;;  %v1980_v9 = vunpack.c.h.b16 %v1544_v1  ;;  %v1311_v11 = vmul.f32 0.020408163, %v608_v5 }
  0xba   : > { %1144 = vadd.xlane.f32.xlu1 %v1143_v6 }
  0xbb   : > { %v2340_v14 = vrot.slane %v1979_v8, %v5628_v63  ;;  %v2345_v15 = vrot.slane %v1980_v9, %v5631_v0  ;;  %v5641_v16 = vpack.c.bf16 %v1312_v10, %v1311_v11  ;;  %1141 = vadd.xlane.f32.xlu0 %v1140_v7  ;;  %v665_v18 = vpop.xlane.xlu1 %664  ;;  %v720_v8 = vsel %vm509_vm0, %v323_v61, 0.0  ;;  %v372_v9 = vld [vmem:[%s5445_s9 + $0x3b8] sm:$0xff] }
  0xbc   : > { %v662_v19 = vpop.xlane.xlu0 %661  ;;  %v1330_v26 = vmul.f32 0.020408163, %v665_v18 }
  0xbd   : > { %v2341_v24 = vsel %vm2235_vm2, %v2340_v14, %v2336_v17  ;;  %v1329_v30 = vmul.f32 0.020408163, %v662_v19  ;;  %v1993_v5 = vunpack.c.l.b16 %v5641_v16  ;;  %v1994_v10 = vunpack.c.h.b16 %v5641_v16  ;;  %v371_v14 = vld [vmem:[%s5445_s9 + $0x3b0] sm:$0xff] }
  0xbe   : > { %v5652_v29 = vsel %vm2242_vm3, %v2345_v15, %v2341_v24  ;;  %1234 = vadd.xlane.f32.xlu1 %v1233_v20  ;;  %v867_v19 = vsel %vm509_vm0, %v372_v9, 0.0  ;;  %v2229_v20 = vsel %vm2228_vm1, %v2227_v4, %v2222_v3  ;;  %v864_v24 = vsel %vm509_vm0, %v371_v14, 0.0  ;;  %v448_v4 = vld [vmem:[%s5445_s9 + $0x618] sm:$0xff] }
  0xbf   : > { %v1560_v31 = vpack.c.bf16 %v1330_v26, %v1329_v30  ;;  %1231 = vadd.xlane.f32.xlu0 %v1230_v21  ;;  %v755_v32 = vpop.xlane.xlu1 %754  ;;  %v2410_v21 = vrot.slane %v1993_v5, %v5614_v46  ;;  %v386_v26 = vld [vmem:[%s5445_s9 + $0x428] sm:$0xff]  ;;  %v2414_v27 = vrot.slane %v1994_v10, %v5617_v49  ;;  %v447_v5 = vld [vmem:[%s5445_s9 + $0x610] sm:$0xff]  ;;  %v2244_v9 = vadd.s32 4294967264, %v5597_v25 }
  0xc0   : > { %v752_v33 = vpop.xlane.xlu0 %751  ;;  %v1360_v40 = vmul.f32 0.020408163, %v755_v32  ;;  %v909_v38 = vsel %vm509_vm0, %v386_v26, 0.0  ;;  %v2251_v10 = vadd.s32 4294967256, %v5597_v25 }
  0xc1   : > { %v1359_v41 = vmul.f32 0.020408163, %v752_v33  ;;  %v2011_v42 = vunpack.c.l.b16 %v1560_v31  ;;  %v2012_v43 = vunpack.c.h.b16 %v1560_v31 }
  0xc2   : > { %586 = vadd.xlane.f32.xlu1 %v585_v34 }
  0xc3   : > { %v5660_v45 = vpack.c.bf16 %v1360_v40, %v1359_v41  ;;  %v2498_v51 = vrot.slane %v2011_v42, %v5628_v63  ;;  %v2503_v52 = vrot.slane %v2012_v43, %v5631_v0  ;;  %583 = vadd.xlane.f32.xlu0 %v582_v36  ;;  %v521_v53 = vpop.xlane.xlu1 %520  ;;  %v385_v36 = vld [vmem:[%s5445_s9 + $0x420] sm:$0xff] }
  0xc4   : > { %v518_v54 = vpop.xlane.xlu0 %517  ;;  %v1282_v58 = vmul.f32 0.020408163, %v521_v53 }
  0xc5   : > { %v1281_v59 = vmul.f32 0.020408163, %v518_v54  ;;  %v2499_v62 = vsel %vm2235_vm2, %v2498_v51, %v2494_v57  ;;  %v2041_v39 = vunpack.c.l.b16 %v5660_v45  ;;  %v2042_v40 = vunpack.c.h.b16 %v5660_v45  ;;  %v433_v54 = vld [vmem:[%s5445_s9 + $0x5a0] sm:$0xff] }
  0xc6   : > { %v5673_v55 = vsel %vm2242_vm3, %v2503_v52, %v2499_v62  ;;  %682 = vadd.xlane.f32.xlu1 %v681_v47  ;;  %v2415_v47 = vsel %vm2228_vm1, %v2414_v27, %v2410_v21  ;;  %v906_v51 = vsel %vm509_vm0, %v385_v36, 0.0  ;;  %v434_v52 = vld [vmem:[%s5445_s9 + $0x5a8] sm:$0xff]  ;;  %v1050_v3 = vsel %vm509_vm0, %v433_v54, 0.0 }
  0xc7   : > { %v1536_v1 = vpack.c.bf16 %v1282_v58, %v1281_v59  ;;  %679 = vadd.xlane.f32.xlu0 %v678_v60  ;;  %v617_v6 = vpop.xlane.xlu1 %616  ;;  %v2647_v57 = vrot.slane %v2041_v39, %v5614_v46  ;;  %v2651_v58 = vrot.slane %v2042_v40, %v5617_v49  ;;  %v1053_v61 = vsel %vm509_vm0, %v434_v52, 0.0  ;;  %v478_v21 = vld [vmem:[%s5445_s9 + $0x708] sm:$0xff]  ;;  %v496_v39 = vld [vmem:[%s5445_s9 + $0x798] sm:$0xff]  ;;  %v495_v40 = vld [vmem:[%s5445_s9 + $0x790] sm:$0xff] }
  0xc8   : > { %v614_v7 = vpop.xlane.xlu0 %613  ;;  %v1314_v13 = vmul.f32 0.020408163, %v617_v6  ;;  %v1236_v52 = vsel %vm509_vm0, %v495_v40, 0.0 }
  0xc9   : > { %v1963_v11 = vunpack.c.l.b16 %v1536_v1  ;;  %v1964_v12 = vunpack.c.h.b16 %v1536_v1  ;;  %v1313_v15 = vmul.f32 0.020408163, %v614_v7 }
  0xca   : > { %724 = vadd.xlane.f32.xlu1 %v723_v2 }
  0xcb   : > { %v2234_v17 = vrot.slane %v1963_v11, %v5628_v63  ;;  %v2241_v18 = vrot.slane %v1964_v12, %v5631_v0  ;;  %v1552_v22 = vpack.c.bf16 %v1314_v13, %v1313_v15  ;;  %721 = vadd.xlane.f32.xlu0 %v720_v8  ;;  %v707_v16 = vpop.xlane.xlu1 %706  ;;  %v2652_v11 = vsel %vm2228_vm1, %v2651_v58, %v2647_v57  ;;  %v262_v58 = vld [vmem:[%s5445_s9 + $0x48] sm:$0xff] }
  0xcc   : > { %v704_v23 = vpop.xlane.xlu0 %703  ;;  %v1344_v30 = vmul.f32 0.020408163, %v707_v16  ;;  %v1095_v15 = vsel %vm509_vm0, %v448_v4, 0.0  ;;  %v537_v4 = vsel %vm509_vm0, %v262_v58, 0.0 }
  0xcd   : > { %v2236_v28 = vsel %vm2235_vm2, %v2234_v17, %v2229_v20  ;;  %v1343_v31 = vmul.f32 0.020408163, %v704_v23  ;;  %v1995_v33 = vunpack.c.l.b16 %v1552_v22  ;;  %v1996_v34 = vunpack.c.h.b16 %v1552_v22  ;;  %v477_v22 = vld [vmem:[%s5445_s9 + $0x700] sm:$0xff] }
  0xce   : > { %v5693_v32 = vsel %vm2242_vm3, %v2241_v18, %v2236_v28  ;;  %868 = vadd.xlane.f32.xlu1 %v867_v19  ;;  %v1092_v17 = vsel %vm509_vm0, %v447_v5, 0.0  ;;  %v5733_v23 = vsub.s32 %v2244_v9, %v5602_v35 }
  0xcf   : > { %v5696_v37 = vpack.c.bf16 %v1344_v30, %v1343_v31  ;;  %v2419_v41 = vrot.slane %v1995_v33, %v5628_v63  ;;  %v2424_v42 = vrot.slane %v1996_v34, %v5631_v0  ;;  %865 = vadd.xlane.f32.xlu0 %v864_v24  ;;  %v761_v43 = vpop.xlane.xlu1 %760  ;;  %v5736_v24 = vsub.s32 %v2251_v10, %v5602_v35 }
  0xd0   : > { %v758_v44 = vpop.xlane.xlu0 %757  ;;  %v1362_v48 = vmul.f32 0.020408163, %v761_v43  ;;  %v1185_v30 = vsel %vm509_vm0, %v478_v21, 0.0  ;;  %v1182_v31 = vsel %vm509_vm0, %v477_v22, 0.0 }
  0xd1   : > { %v1361_v50 = vmul.f32 0.020408163, %v758_v44  ;;  %v2420_v53 = vsel %vm2235_vm2, %v2419_v41, %v2415_v47  ;;  %v2025_v44 = vunpack.c.l.b16 %v5696_v37  ;;  %v2026_v47 = vunpack.c.h.b16 %v5696_v37 }
  0xd2   : > { %v5709_v45 = vsel %vm2242_vm3, %v2424_v42, %v2420_v53  ;;  %910 = vadd.xlane.f32.xlu1 %v909_v38 }
  0xd3   : > { %v1576_v56 = vpack.c.bf16 %v1362_v48, %v1361_v50  ;;  %907 = vadd.xlane.f32.xlu0 %v906_v51  ;;  %v851_v59 = vpop.xlane.xlu1 %850  ;;  %v1239_v51 = vsel %vm509_vm0, %v496_v39, 0.0 }
  0xd4   : > { %v848_v60 = vpop.xlane.xlu0 %847  ;;  %v1392_v2 = vmul.f32 0.020408163, %v851_v59  ;;  %v261_v59 = vld [vmem:[%s5445_s9 + $0x40] sm:$0xff] }
  0xd5   : > { %v2043_v62 = vunpack.c.l.b16 %v1576_v56  ;;  %v2044_v1 = vunpack.c.h.b16 %v1576_v56  ;;  %v1391_v6 = vmul.f32 0.020408163, %v848_v60  ;;  %v534_v5 = vsel %vm509_vm0, %v261_v59, 0.0 }
  0xd6   : > { %1054 = vadd.xlane.f32.xlu1 %v1053_v61 }
  0xd7   : > { %v2656_v7 = vrot.slane %v2043_v62, %v5628_v63  ;;  %v2661_v8 = vrot.slane %v2044_v1, %v5631_v0  ;;  %v5722_v12 = vpack.c.bf16 %v1392_v2, %v1391_v6  ;;  %1051 = vadd.xlane.f32.xlu0 %v1050_v3  ;;  %v575_v13 = vpop.xlane.xlu1 %574  ;;  %v2568_v1 = vrot.slane %v2025_v44, %v5614_v46  ;;  %v294_v6 = vld [vmem:[%s5445_s9 + $0x148] sm:$0xff] }
  0xd8   : > { %v572_v14 = vpop.xlane.xlu0 %571  ;;  %v1300_v19 = vmul.f32 0.020408163, %v575_v13 }
  0xd9   : > { %v2657_v18 = vsel %vm2235_vm2, %v2656_v7, %v2652_v11  ;;  %v1299_v20 = vmul.f32 0.020408163, %v572_v14  ;;  %v2572_v7 = vrot.slane %v2026_v47, %v5617_v49 }
  0xda   : > { %v5730_v16 = vsel %vm2242_vm3, %v2661_v8, %v2657_v18  ;;  %1096 = vadd.xlane.f32.xlu1 %v1095_v15  ;;  %v293_v15 = vld [vmem:[%s5445_s9 + $0x140] sm:$0xff]  ;;  %v633_v18 = vsel %vm509_vm0, %v294_v6, 0.0 }
  0xdb   : > { %v1545_v26 = vpack.c.bf16 %v1300_v19, %v1299_v20  ;;  %1093 = vadd.xlane.f32.xlu0 %v1092_v17  ;;  %v671_v27 = vpop.xlane.xlu1 %670  ;;  %v2073_v19 = vunpack.c.l.b16 %v5722_v12  ;;  %v2074_v20 = vunpack.c.h.b16 %v5722_v12 }
  0xdc   : > { %v668_v28 = vpop.xlane.xlu0 %667  ;;  %v1332_v36 = vmul.f32 0.020408163, %v671_v27  ;;  %v2573_v27 = vsel %vm2228_vm1, %v2572_v7, %v2568_v1 }
  0xdd   : > { %v1981_v33 = vunpack.c.l.b16 %v1545_v26  ;;  %v1982_v34 = vunpack.c.h.b16 %v1545_v26  ;;  %v1331_v38 = vmul.f32 0.020408163, %v668_v28  ;;  %v2805_v39 = vrot.slane %v2073_v19, %v5614_v46  ;;  %v418_v19 = vld [vmem:[%s5445_s9 + $0x528] sm:$0xff] }
  0xde   : > { %1186 = vadd.xlane.f32.xlu1 %v1185_v30  ;;  %v2809_v40 = vrot.slane %v2074_v20, %v5617_v49  ;;  %v417_v20 = vld [vmem:[%s5445_s9 + $0x520] sm:$0xff] }
  0xdf   : > { %v2350_v41 = vrot.slane %v1981_v33, %v5733_v23  ;;  %v2355_v42 = vrot.slane %v1982_v34, %v5736_v24  ;;  %v1561_v43 = vpack.c.bf16 %v1332_v36, %v1331_v38  ;;  %1183 = vadd.xlane.f32.xlu0 %v1182_v31  ;;  %v713_v48 = vpop.xlane.xlu1 %712  ;;  %v630_v31 = vsel %vm509_vm0, %v293_v15, 0.0  ;;  %v342_v33 = vld [vmem:[%s5445_s9 + $0x2c8] sm:$0xff]  ;;  %v341_v36 = vld [vmem:[%s5445_s9 + $0x2c0] sm:$0xff] }
  0xe0   : > { %v710_v50 = vpop.xlane.xlu0 %709  ;;  %v1346_v57 = vmul.f32 0.020408163, %v713_v48 }
  0xe1   : > { %v2351_v53 = vsel %vm2249_vm4, %v2350_v41, %v5652_v29  ;;  %v2013_v54 = vunpack.c.l.b16 %v1561_v43  ;;  %v2014_v56 = vunpack.c.h.b16 %v1561_v43  ;;  %v1345_v37 = vmul.f32 0.020408163, %v710_v50 }
  0xe2   : > { %v5753_v60 = vsel %vm2256_vm5, %v2355_v42, %v2351_v53  ;;  %1240 = vadd.xlane.f32.xlu1 %v1239_v51  ;;  %v777_v43 = vsel %vm509_vm0, %v342_v33, 0.0  ;;  %v774_v50 = vsel %vm509_vm0, %v341_v36, 0.0  ;;  %v356_v51 = vld [vmem:[%s5445_s9 + $0x338] sm:$0xff] }
  0xe3   : > { %v2508_v61 = vrot.slane %v2013_v54, %v5733_v23  ;;  %v2513_v62 = vrot.slane %v2014_v56, %v5736_v24  ;;  %v1568_v2 = vpack.c.bf16 %v1346_v57, %v1345_v37  ;;  %1237 = vadd.xlane.f32.xlu0 %v1236_v52  ;;  %v803_v29 = vpop.xlane.xlu1 %802  ;;  %v355_v52 = vld [vmem:[%s5445_s9 + $0x330] sm:$0xff]  ;;  %v2810_v57 = vsel %vm2228_vm1, %v2809_v40, %v2805_v39 }
  0xe4   : > { %v800_v3 = vpop.xlane.xlu0 %799  ;;  %v1376_v9 = vmul.f32 0.020408163, %v803_v29 }
  0xe5   : > { %v2509_v8 = vsel %vm2249_vm4, %v2508_v61, %v5673_v55  ;;  %v1375_v10 = vmul.f32 0.020408163, %v800_v3  ;;  %v2027_v13 = vunpack.c.l.b16 %v1568_v2  ;;  %v2028_v14 = vunpack.c.h.b16 %v1568_v2  ;;  %v404_v3 = vld [vmem:[%s5445_s9 + $0x4b8] sm:$0xff] }
  0xe6   : > { %v5765_v11 = vsel %vm2256_vm5, %v2513_v62, %v2509_v8  ;;  %538 = vadd.xlane.f32.xlu1 %v537_v4  ;;  %v819_v61 = vsel %vm509_vm0, %v356_v51, 0.0  ;;  %v816_v62 = vsel %vm509_vm0, %v355_v52, 0.0  ;;  %v403_v4 = vld [vmem:[%s5445_s9 + $0x4b0] sm:$0xff]  ;;  %v480_v52 = vld [vmem:[%s5445_s9 + $0x718] sm:$0xff] }
  0xe7   : > { %v5768_v17 = vpack.c.bf16 %v1376_v9, %v1375_v10  ;;  %v2577_v55 = vrot.slane %v2027_v13, %v5628_v63  ;;  %v2582_v21 = vrot.slane %v2028_v14, %v5631_v0  ;;  %535 = vadd.xlane.f32.xlu0 %v534_v5  ;;  %v857_v22 = vpop.xlane.xlu1 %856  ;;  %v963_v9 = vsel %vm509_vm0, %v404_v3, 0.0 }
  0xe8   : > { %v854_v26 = vpop.xlane.xlu0 %853  ;;  %v1394_v28 = vmul.f32 0.020408163, %v857_v22  ;;  %v960_v10 = vsel %vm509_vm0, %v403_v4, 0.0 }
  0xe9   : > { %v1393_v30 = vmul.f32 0.020408163, %v854_v26  ;;  %v2578_v34 = vsel %vm2235_vm2, %v2577_v55, %v2573_v27 }
  0xea   : > { %v5781_v12 = vsel %vm2242_vm3, %v2582_v21, %v2578_v34  ;;  %634 = vadd.xlane.f32.xlu1 %v633_v18 }
  0xeb   : > { %v1592_v38 = vpack.c.bf16 %v1394_v28, %v1393_v30  ;;  %631 = vadd.xlane.f32.xlu0 %v630_v31  ;;  %v947_v41 = vpop.xlane.xlu1 %946  ;;  %v1005_v28 = vsel %vm509_vm0, %v418_v19, 0.0  ;;  %v1002_v30 = vsel %vm509_vm0, %v417_v20, 0.0 }
  0xec   : > { %v944_v42 = vpop.xlane.xlu0 %943  ;;  %v1424_v48 = vmul.f32 0.020408163, %v947_v41  ;;  %v465_v41 = vld [vmem:[%s5445_s9 + $0x6a0] sm:$0xff] }
  0xed   : > { %v2075_v44 = vunpack.c.l.b16 %v1592_v38  ;;  %v2076_v47 = vunpack.c.h.b16 %v1592_v38  ;;  %v1423_v53 = vmul.f32 0.020408163, %v944_v42  ;;  %v466_v38 = vld [vmem:[%s5445_s9 + $0x6a8] sm:$0xff] }
  0xee   : > { %778 = vadd.xlane.f32.xlu1 %v777_v43  ;;  %v1149_v51 = vsel %vm509_vm0, %v466_v38, 0.0  ;;  %v311_v38 = vld [vmem:[%s5445_s9 + $0x1d0] sm:$0xff] }
  0xef   : > { %v2814_v54 = vrot.slane %v2075_v44, %v5628_v63  ;;  %v2819_v56 = vrot.slane %v2076_v47, %v5631_v0  ;;  %v5792_v58 = vpack.c.bf16 %v1424_v48, %v1423_v53  ;;  %775 = vadd.xlane.f32.xlu0 %v774_v50  ;;  %v527_v59 = vpop.xlane.xlu1 %526  ;;  %v2057_v44 = vunpack.c.l.b16 %v5768_v17  ;;  %v479_v53 = vld [vmem:[%s5445_s9 + $0x710] sm:$0xff] }
  0xf0   : > { %v524_v37 = vpop.xlane.xlu0 %523  ;;  %v1284_v2 = vmul.f32 0.020408163, %v527_v59  ;;  %v1146_v59 = vsel %vm509_vm0, %v465_v41, 0.0 }
  0xf1   : > { %v2815_v1 = vsel %vm2235_vm2, %v2814_v54, %v2810_v57  ;;  %v1283_v29 = vmul.f32 0.020408163, %v524_v37 }
  0xf2   : > { %v5800_v5 = vsel %vm2242_vm3, %v2819_v56, %v2815_v1  ;;  %820 = vadd.xlane.f32.xlu1 %v819_v61  ;;  %v1191_v1 = vsel %vm509_vm0, %v480_v52, 0.0  ;;  %v326_v52 = vld [vmem:[%s5445_s9 + $0x248] sm:$0xff] }
  0xf3   : > { %v1537_v6 = vpack.c.bf16 %v1284_v2, %v1283_v29  ;;  %817 = vadd.xlane.f32.xlu0 %v816_v62  ;;  %v623_v7 = vpop.xlane.xlu1 %622  ;;  %v1188_v2 = vsel %vm509_vm0, %v479_v53, 0.0  ;;  %v2726_v29 = vrot.slane %v2057_v44, %v5614_v46 }
  0xf4   : > { %v620_v8 = vpop.xlane.xlu0 %619  ;;  %v1316_v15 = vmul.f32 0.020408163, %v623_v7 }
  0xf5   : > { %v1965_v13 = vunpack.c.l.b16 %v1537_v6  ;;  %v1966_v14 = vunpack.c.h.b16 %v1537_v6  ;;  %v1315_v18 = vmul.f32 0.020408163, %v620_v8 }
  0xf6   : > { %964 = vadd.xlane.f32.xlu1 %v963_v9 }
  0xf7   : > { %v2248_v55 = vrot.slane %v1965_v13, %v5733_v23  ;;  %v2255_v21 = vrot.slane %v1966_v14, %v5736_v24  ;;  %v1553_v22 = vpack.c.bf16 %v1316_v15, %v1315_v18  ;;  %961 = vadd.xlane.f32.xlu0 %v960_v10  ;;  %v767_v26 = vpop.xlane.xlu1 %766  ;;  %v280_v14 = vld [vmem:[%s5445_s9 + $0xd8] sm:$0xff]  ;;  %v279_v15 = vld [vmem:[%s5445_s9 + $0xd0] sm:$0xff] }
  0xf8   : > { %v764_v27 = vpop.xlane.xlu0 %763  ;;  %v1364_v36 = vmul.f32 0.020408163, %v767_v26 }
  0xf9   : > { %v2250_v31 = vsel %vm2249_vm4, %v2248_v55, %v5693_v32  ;;  %v1997_v33 = vunpack.c.l.b16 %v1553_v22  ;;  %v1998_v34 = vunpack.c.h.b16 %v1553_v22  ;;  %v1363_v40 = vmul.f32 0.020408163, %v764_v27 }
  0xfa   : > { %v5814_v39 = vsel %vm2256_vm5, %v2255_v21, %v2250_v31  ;;  %1006 = vadd.xlane.f32.xlu1 %v1005_v28  ;;  %v2058_v32 = vunpack.c.h.b16 %v5768_v17  ;;  %v591_v28 = vsel %vm509_vm0, %v280_v14, 0.0  ;;  %v2106_v31 = vunpack.c.h.b16 %v5792_v58 }
  0xfb   : > { %v2429_v42 = vrot.slane %v1997_v33, %v5733_v23  ;;  %v2434_v43 = vrot.slane %v1998_v34, %v5736_v24  ;;  %v1577_v47 = vpack.c.bf16 %v1364_v36, %v1363_v40  ;;  %1003 = vadd.xlane.f32.xlu0 %v1002_v30  ;;  %v809_v48 = vpop.xlane.xlu1 %808  ;;  %v2105_v30 = vunpack.c.l.b16 %v5792_v58  ;;  %v312_v36 = vld [vmem:[%s5445_s9 + $0x1d8] sm:$0xff] }
  0xfc   : > { %v806_v50 = vpop.xlane.xlu0 %805  ;;  %v1378_v56 = vmul.f32 0.020408163, %v809_v48  ;;  %v684_v58 = vsel %vm509_vm0, %v311_v38, 0.0  ;;  %v2967_v48 = vrot.slane %v2106_v31, %v5617_v49 }
  0xfd   : > { %v2430_v54 = vsel %vm2249_vm4, %v2429_v42, %v5709_v45  ;;  %v1377_v57 = vmul.f32 0.020408163, %v806_v50  ;;  %v2045_v61 = vunpack.c.l.b16 %v1577_v47  ;;  %v2046_v17 = vunpack.c.h.b16 %v1577_v47 }
  0xfe   : > { %v5828_v37 = vsel %vm2256_vm5, %v2434_v43, %v2430_v54  ;;  %1150 = vadd.xlane.f32.xlu1 %v1149_v51  ;;  %v2730_v45 = vrot.slane %v2058_v32, %v5617_v49  ;;  %v687_v32 = vsel %vm509_vm0, %v312_v36, 0.0  ;;  %v2963_v47 = vrot.slane %v2105_v30, %v5614_v46  ;;  %v387_v30 = vld [vmem:[%s5445_s9 + $0x430] sm:$0xff] }
  0xff   : > { %v1584_v62 = vpack.c.bf16 %v1378_v56, %v1377_v57  ;;  %v2666_v3 = vrot.slane %v2045_v61, %v5733_v23  ;;  %v2671_v4 = vrot.slane %v2046_v17, %v5736_v24  ;;  %1147 = vadd.xlane.f32.xlu0 %v1146_v59  ;;  %v899_v6 = vpop.xlane.xlu1 %898  ;;  %v325_v56 = vld [vmem:[%s5445_s9 + $0x240] sm:$0xff]  ;;  %v2258_v59 = vadd.s32 4294967248, %v5597_v25 }
 0x100   : > { %v896_v7 = vpop.xlane.xlu0 %895  ;;  %v1408_v10 = vmul.f32 0.020408163, %v899_v6  ;;  %v2731_v22 = vsel %vm2228_vm1, %v2730_v45, %v2726_v29  ;;  %v2265_v61 = vadd.s32 4294967240, %v5597_v25  ;;  %v729_v29 = vsel %vm509_vm0, %v326_v52, 0.0 }
 0x101   : > { %v2059_v8 = vunpack.c.l.b16 %v1584_v62  ;;  %v2060_v9 = vunpack.c.h.b16 %v1584_v62  ;;  %v1407_v13 = vmul.f32 0.020408163, %v896_v7  ;;  %v2667_v18 = vsel %vm2249_vm4, %v2666_v3, %v5730_v16  ;;  %v374_v7 = vld [vmem:[%s5445_s9 + $0x3c8] sm:$0xff] }
 0x102   : > { %v5841_v19 = vsel %vm2256_vm5, %v2671_v4, %v2667_v18  ;;  %1192 = vadd.xlane.f32.xlu1 %v1191_v1  ;;  %v588_v16 = vsel %vm509_vm0, %v279_v15, 0.0  ;;  %v2968_v45 = vsel %vm2228_vm1, %v2967_v48, %v2963_v47  ;;  %v726_v6 = vsel %vm509_vm0, %v325_v56, 0.0  ;;  %v436_v47 = vld [vmem:[%s5445_s9 + $0x5b8] sm:$0xff]  ;;  %v435_v48 = vld [vmem:[%s5445_s9 + $0x5b0] sm:$0xff] }
 0x103   : > { %v2735_v20 = vrot.slane %v2059_v8, %v5628_v63  ;;  %v2740_v55 = vrot.slane %v2060_v9, %v5631_v0  ;;  %v5845_v21 = vpack.c.bf16 %v1408_v10, %v1407_v13  ;;  %1189 = vadd.xlane.f32.xlu0 %v1188_v2  ;;  %v953_v26 = vpop.xlane.xlu1 %952  ;;  %v373_v9 = vld [vmem:[%s5445_s9 + $0x3c0] sm:$0xff]  ;;  %v5880_v13 = vsub.s32 %v2258_v59, %v5602_v35 }
 0x104   : > { %v950_v27 = vpop.xlane.xlu0 %949  ;;  %v1426_v34 = vmul.f32 0.020408163, %v953_v26  ;;  %v5883_v14 = vsub.s32 %v2265_v61, %v5602_v35  ;;  %v1059_v61 = vsel %vm509_vm0, %v436_v47, 0.0 }
 0x105   : > { %v2736_v33 = vsel %vm2235_vm2, %v2735_v20, %v2731_v22  ;;  %v1425_v41 = vmul.f32 0.020408163, %v950_v27 }
 0x106   : > { %v5856_v40 = vsel %vm2242_vm3, %v2740_v55, %v2736_v33  ;;  %592 = vadd.xlane.f32.xlu1 %v591_v28  ;;  %v873_v55 = vsel %vm509_vm0, %v374_v7, 0.0  ;;  %v870_v28 = vsel %vm509_vm0, %v373_v9, 0.0 }
 0x107   : > { %v1608_v42 = vpack.c.bf16 %v1426_v34, %v1425_v41  ;;  %589 = vadd.xlane.f32.xlu0 %v588_v16  ;;  %v1043_v43 = vpop.xlane.xlu1 %1042  ;;  %v388_v16 = vld [vmem:[%s5445_s9 + $0x438] sm:$0xff] }
 0x108   : > { %v1040_v44 = vpop.xlane.xlu0 %1039  ;;  %v1456_v50 = vmul.f32 0.020408163, %v1043_v43  ;;  %v912_v43 = vsel %vm509_vm0, %v387_v30, 0.0  ;;  %v498_v30 = vld [vmem:[%s5445_s9 + $0x7a8] sm:$0xff] }
 0x109   : > { %v1455_v51 = vmul.f32 0.020408163, %v1040_v44  ;;  %v2107_v53 = vunpack.c.l.b16 %v1608_v42  ;;  %v2108_v54 = vunpack.c.h.b16 %v1608_v42  ;;  %v915_v42 = vsel %vm509_vm0, %v388_v16, 0.0 }
 0x10a   : > { %688 = vadd.xlane.f32.xlu1 %v687_v32 }
 0x10b   : > { %v5864_v57 = vpack.c.bf16 %v1456_v50, %v1455_v51  ;;  %v2972_v17 = vrot.slane %v2107_v53, %v5628_v63  ;;  %v2977_v62 = vrot.slane %v2108_v54, %v5631_v0  ;;  %685 = vadd.xlane.f32.xlu0 %v684_v58  ;;  %v581_v1 = vpop.xlane.xlu1 %580 }
 0x10c   : > { %v578_v2 = vpop.xlane.xlu0 %577  ;;  %v1302_v3 = vmul.f32 0.020408163, %v581_v1 }
 0x10d   : > { %v1301_v4 = vmul.f32 0.020408163, %v578_v2  ;;  %v2973_v8 = vsel %vm2235_vm2, %v2972_v17, %v2968_v45  ;;  %v1056_v17 = vsel %vm509_vm0, %v435_v48, 0.0  ;;  %v450_v45 = vld [vmem:[%s5445_s9 + $0x628] sm:$0xff] }
 0x10e   : > { %v5877_v10 = vsel %vm2242_vm3, %v2977_v62, %v2973_v8  ;;  %730 = vadd.xlane.f32.xlu1 %v729_v29 }
 0x10f   : > { %v1546_v15 = vpack.c.bf16 %v1302_v3, %v1301_v4  ;;  %727 = vadd.xlane.f32.xlu0 %v726_v6  ;;  %v677_v18 = vpop.xlane.xlu1 %676  ;;  %v449_v3 = vld [vmem:[%s5445_s9 + $0x620] sm:$0xff] }
 0x110   : > { %v674_v20 = vpop.xlane.xlu0 %673  ;;  %v1334_v27 = vmul.f32 0.020408163, %v677_v18  ;;  %v2090_v18 = vunpack.c.h.b16 %v5845_v21 }
 0x111   : > { %v1983_v22 = vunpack.c.l.b16 %v1546_v15  ;;  %v1984_v26 = vunpack.c.h.b16 %v1546_v15  ;;  %v1333_v31 = vmul.f32 0.020408163, %v674_v20  ;;  %v2089_v15 = vunpack.c.l.b16 %v5845_v21 }
 0x112   : > { %874 = vadd.xlane.f32.xlu1 %v873_v55 }
 0x113   : > { %v2360_v33 = vrot.slane %v1983_v22, %v5880_v13  ;;  %v2365_v34 = vrot.slane %v1984_v26, %v5883_v14  ;;  %v1562_v36 = vpack.c.bf16 %v1334_v27, %v1333_v31  ;;  %871 = vadd.xlane.f32.xlu0 %v870_v28  ;;  %v719_v38 = vpop.xlane.xlu1 %718  ;;  %v1098_v22 = vsel %vm509_vm0, %v449_v3, 0.0  ;;  %v497_v31 = vld [vmem:[%s5445_s9 + $0x7a0] sm:$0xff] }
 0x114   : > { %v716_v41 = vpop.xlane.xlu0 %715  ;;  %v1348_v32 = vmul.f32 0.020408163, %v719_v38  ;;  %v2884_v38 = vrot.slane %v2089_v15, %v5614_v46 }
 0x115   : > { %v2361_v44 = vsel %vm2263_vm6, %v2360_v33, %v5753_v60  ;;  %v1347_v58 = vmul.f32 0.020408163, %v716_v41  ;;  %v2015_v51 = vunpack.c.l.b16 %v1562_v36  ;;  %v2016_v52 = vunpack.c.h.b16 %v1562_v36 }
 0x116   : > { %v5898_v50 = vsel %vm2270_vm7, %v2365_v34, %v2361_v44  ;;  %916 = vadd.xlane.f32.xlu1 %v915_v42  ;;  %v1242_v44 = vsel %vm509_vm0, %v497_v31, 0.0  ;;  %v343_v31 = vld [vmem:[%s5445_s9 + $0x2d0] sm:$0xff] }
 0x117   : > { %v1569_v53 = vpack.c.bf16 %v1348_v32, %v1347_v58  ;;  %v2518_v54 = vrot.slane %v2015_v51, %v5880_v13  ;;  %v2523_v56 = vrot.slane %v2016_v52, %v5883_v14  ;;  %913 = vadd.xlane.f32.xlu0 %v912_v43  ;;  %v863_v59 = vpop.xlane.xlu1 %862  ;;  %v1245_v43 = vsel %vm509_vm0, %v498_v30, 0.0  ;;  %v264_v32 = vld [vmem:[%s5445_s9 + $0x58] sm:$0xff] }
 0x118   : > { %v860_v60 = vpop.xlane.xlu0 %859  ;;  %v1396_v2 = vmul.f32 0.020408163, %v863_v59  ;;  %v2888_v58 = vrot.slane %v2090_v18, %v5617_v49  ;;  %v344_v30 = vld [vmem:[%s5445_s9 + $0x2d8] sm:$0xff] }
 0x119   : > { %v2029_v62 = vunpack.c.l.b16 %v1569_v53  ;;  %v2030_v1 = vunpack.c.h.b16 %v1569_v53  ;;  %v1395_v29 = vmul.f32 0.020408163, %v860_v60  ;;  %v2519_v4 = vsel %vm2263_vm6, %v2518_v54, %v5765_v11 }
 0x11a   : > { %v5909_v6 = vsel %vm2270_vm7, %v2523_v56, %v2519_v4  ;;  %1060 = vadd.xlane.f32.xlu1 %v1059_v61  ;;  %v1101_v11 = vsel %vm509_vm0, %v450_v45, 0.0  ;;  %v263_v56 = vld [vmem:[%s5445_s9 + $0x50] sm:$0xff]  ;;  %v543_v60 = vsel %vm509_vm0, %v264_v32, 0.0  ;;  %v2137_v61 = vunpack.c.l.b16 %v5864_v57 }
 0x11b   : > { %v2587_v7 = vrot.slane %v2029_v62, %v5733_v23  ;;  %v2592_v8 = vrot.slane %v2030_v1, %v5736_v24  ;;  %v1593_v9 = vpack.c.bf16 %v1396_v2, %v1395_v29  ;;  %1057 = vadd.xlane.f32.xlu0 %v1056_v17  ;;  %v905_v20 = vpop.xlane.xlu1 %904  ;;  %v2138_v17 = vunpack.c.h.b16 %v5864_v57 }
 0x11c   : > { %v902_v55 = vpop.xlane.xlu0 %901  ;;  %v1410_v16 = vmul.f32 0.020408163, %v905_v20  ;;  %v2889_v29 = vsel %vm2228_vm1, %v2888_v58, %v2884_v38  ;;  %v540_v4 = vsel %vm509_vm0, %v263_v56, 0.0  ;;  %v3121_v18 = vrot.slane %v2137_v61, %v5614_v46 }
 0x11d   : > { %v2588_v26 = vsel %vm2249_vm4, %v2587_v7, %v5781_v12  ;;  %v2077_v27 = vunpack.c.l.b16 %v1593_v9  ;;  %v2078_v28 = vunpack.c.h.b16 %v1593_v9  ;;  %v1409_v21 = vmul.f32 0.020408163, %v902_v55  ;;  %v296_v7 = vld [vmem:[%s5445_s9 + $0x158] sm:$0xff]  ;;  %v295_v9 = vld [vmem:[%s5445_s9 + $0x150] sm:$0xff] }
 0x11e   : > { %v5922_v33 = vsel %vm2256_vm5, %v2592_v8, %v2588_v26  ;;  %1102 = vadd.xlane.f32.xlu1 %v1101_v11  ;;  %v3125_v20 = vrot.slane %v2138_v17, %v5617_v49 }
 0x11f   : > { %v2824_v34 = vrot.slane %v2077_v27, %v5733_v23  ;;  %v2829_v36 = vrot.slane %v2078_v28, %v5736_v24  ;;  %v1600_v41 = vpack.c.bf16 %v1410_v16, %v1409_v21  ;;  %1099 = vadd.xlane.f32.xlu0 %v1098_v22  ;;  %v995_v12 = vpop.xlane.xlu1 %994  ;;  %v639_v22 = vsel %vm509_vm0, %v296_v7, 0.0 }
 0x120   : > { %v992_v42 = vpop.xlane.xlu0 %991  ;;  %v1440_v48 = vmul.f32 0.020408163, %v995_v12  ;;  %v636_v16 = vsel %vm509_vm0, %v295_v9, 0.0  ;;  %v3126_v38 = vsel %vm2228_vm1, %v3125_v20, %v3121_v18 }
 0x121   : > { %v2825_v47 = vsel %vm2249_vm4, %v2824_v34, %v5800_v5  ;;  %v1439_v51 = vmul.f32 0.020408163, %v992_v42  ;;  %v2091_v53 = vunpack.c.l.b16 %v1600_v41  ;;  %v2092_v54 = vunpack.c.h.b16 %v1600_v41 }
 0x122   : > { %v5934_v52 = vsel %vm2256_vm5, %v2829_v36, %v2825_v47  ;;  %1246 = vadd.xlane.f32.xlu1 %v1245_v43  ;;  %v783_v43 = vsel %vm509_vm0, %v344_v30, 0.0 }
 0x123   : > { %v5937_v59 = vpack.c.bf16 %v1440_v48, %v1439_v51  ;;  %v2893_v5 = vrot.slane %v2091_v53, %v5628_v63  ;;  %v2898_v62 = vrot.slane %v2092_v54, %v5631_v0  ;;  %1243 = vadd.xlane.f32.xlu0 %v1242_v44  ;;  %v1049_v1 = vpop.xlane.xlu1 %1048  ;;  %v780_v44 = vsel %vm509_vm0, %v343_v31, 0.0  ;;  %v358_v48 = vld [vmem:[%s5445_s9 + $0x348] sm:$0xff]  ;;  %v357_v51 = vld [vmem:[%s5445_s9 + $0x340] sm:$0xff] }
 0x124   : > { %v1046_v2 = vpop.xlane.xlu0 %1045  ;;  %v1458_v45 = vmul.f32 0.020408163, %v1049_v1  ;;  %v825_v61 = vsel %vm509_vm0, %v358_v48, 0.0  ;;  %v822_v17 = vsel %vm509_vm0, %v357_v51, 0.0 }
 0x125   : > { %v1457_v3 = vmul.f32 0.020408163, %v1046_v2  ;;  %v2894_v8 = vsel %vm2235_vm2, %v2893_v5, %v2889_v29  ;;  %v406_v29 = vld [vmem:[%s5445_s9 + $0x4c8] sm:$0xff] }
 0x126   : > { %v5950_v57 = vsel %vm2242_vm3, %v2898_v62, %v2894_v8  ;;  %544 = vadd.xlane.f32.xlu1 %v543_v60 }
 0x127   : > { %v1624_v15 = vpack.c.bf16 %v1458_v45, %v1457_v3  ;;  %541 = vadd.xlane.f32.xlu0 %v540_v4  ;;  %v1139_v55 = vpop.xlane.xlu1 %1138  ;;  %v405_v45 = vld [vmem:[%s5445_s9 + $0x4c0] sm:$0xff] }
 0x128   : > { %v1136_v11 = vpop.xlane.xlu0 %1135  ;;  %v1488_v28 = vmul.f32 0.020408163, %v1139_v55  ;;  %v966_v18 = vsel %vm509_vm0, %v405_v45, 0.0  ;;  %v481_v45 = vld [vmem:[%s5445_s9 + $0x720] sm:$0xff] }
 0x129   : > { %v2139_v26 = vunpack.c.l.b16 %v1624_v15  ;;  %v2140_v27 = vunpack.c.h.b16 %v1624_v15  ;;  %v1487_v21 = vmul.f32 0.020408163, %v1136_v11  ;;  %v969_v15 = vsel %vm509_vm0, %v406_v29, 0.0  ;;  %v482_v29 = vld [vmem:[%s5445_s9 + $0x728] sm:$0xff] }
 0x12a   : > { %640 = vadd.xlane.f32.xlu1 %v639_v22 }
 0x12b   : > { %v3130_v34 = vrot.slane %v2139_v26, %v5628_v63  ;;  %v3135_v36 = vrot.slane %v2140_v27, %v5631_v0  ;;  %v5961_v41 = vpack.c.bf16 %v1488_v28, %v1487_v21  ;;  %637 = vadd.xlane.f32.xlu0 %v636_v16  ;;  %v533_v12 = vpop.xlane.xlu1 %532  ;;  %v420_v26 = vld [vmem:[%s5445_s9 + $0x538] sm:$0xff]  ;;  %v419_v27 = vld [vmem:[%s5445_s9 + $0x530] sm:$0xff] }
 0x12c   : > { %v530_v42 = vpop.xlane.xlu0 %529  ;;  %v1286_v58 = vmul.f32 0.020408163, %v533_v12 }
 0x12d   : > { %v3131_v32 = vsel %vm2235_vm2, %v3130_v34, %v3126_v38  ;;  %v1285_v47 = vmul.f32 0.020408163, %v530_v42  ;;  %v1008_v38 = vsel %vm509_vm0, %v419_v27, 0.0 }
 0x12e   : > { %v5969_v53 = vsel %vm2242_vm3, %v3135_v36, %v3131_v32  ;;  %784 = vadd.xlane.f32.xlu1 %v783_v43  ;;  %v1011_v36 = vsel %vm509_vm0, %v420_v26, 0.0  ;;  %v467_v32 = vld [vmem:[%s5445_s9 + $0x6b0] sm:$0xff] }
 0x12f   : > { %v1538_v54 = vpack.c.bf16 %v1286_v58, %v1285_v47  ;;  %781 = vadd.xlane.f32.xlu0 %v780_v44  ;;  %v629_v56 = vpop.xlane.xlu1 %628  ;;  %v468_v44 = vld [vmem:[%s5445_s9 + $0x6b8] sm:$0xff] }
 0x130   : > { %v626_v60 = vpop.xlane.xlu0 %625  ;;  %v1318_v1 = vmul.f32 0.020408163, %v629_v56 }
 0x131   : > { %v1967_v5 = vunpack.c.l.b16 %v1538_v54  ;;  %v1968_v62 = vunpack.c.h.b16 %v1538_v54  ;;  %v1317_v2 = vmul.f32 0.020408163, %v626_v60 }
 0x132   : > { %826 = vadd.xlane.f32.xlu1 %v825_v61  ;;  %v1155_v61 = vsel %vm509_vm0, %v468_v44, 0.0 }
 0x133   : > { %v2262_v3 = vrot.slane %v1967_v5, %v5880_v13  ;;  %v2269_v4 = vrot.slane %v1968_v62, %v5883_v14  ;;  %v1554_v7 = vpack.c.bf16 %v1318_v1, %v1317_v2  ;;  %823 = vadd.xlane.f32.xlu0 %v822_v17  ;;  %v773_v8 = vpop.xlane.xlu1 %772  ;;  %v1152_v17 = vsel %vm509_vm0, %v467_v32, 0.0 }
 0x134   : > { %v770_v9 = vpop.xlane.xlu0 %769  ;;  %v1366_v22 = vmul.f32 0.020408163, %v773_v8 }
 0x135   : > { %v2264_v20 = vsel %vm2263_vm6, %v2262_v3, %v5814_v39  ;;  %v1999_v55 = vunpack.c.l.b16 %v1554_v7  ;;  %v2000_v11 = vunpack.c.h.b16 %v1554_v7  ;;  %v1365_v16 = vmul.f32 0.020408163, %v770_v9 }
 0x136   : > { %v5984_v28 = vsel %vm2270_vm7, %v2269_v4, %v2264_v20  ;;  %970 = vadd.xlane.f32.xlu1 %v969_v15  ;;  %v2121_v15 = vunpack.c.l.b16 %v5937_v59 }
 0x137   : > { %v2439_v30 = vrot.slane %v1999_v55, %v5880_v13  ;;  %v2444_v31 = vrot.slane %v2000_v11, %v5883_v14  ;;  %v1578_v21 = vpack.c.bf16 %v1366_v22, %v1365_v16  ;;  %967 = vadd.xlane.f32.xlu0 %v966_v18  ;;  %v815_v34 = vpop.xlane.xlu1 %814  ;;  %v2122_v18 = vunpack.c.h.b16 %v5937_v59 }
 0x138   : > { %v812_v39 = vpop.xlane.xlu0 %811  ;;  %v1380_v42 = vmul.f32 0.020408163, %v815_v34  ;;  %v1197_v55 = vsel %vm509_vm0, %v482_v29, 0.0  ;;  %v2169_v29 = vunpack.c.l.b16 %v5961_v41 }
 0x139   : > { %v2440_v12 = vsel %vm2263_vm6, %v2439_v30, %v5828_v37  ;;  %v1379_v43 = vmul.f32 0.020408163, %v812_v39  ;;  %v2047_v47 = vunpack.c.l.b16 %v1578_v21  ;;  %v2048_v48 = vunpack.c.h.b16 %v1578_v21  ;;  %v282_v30 = vld [vmem:[%s5445_s9 + $0xe8] sm:$0xff] }
 0x13a   : > { %v5995_v58 = vsel %vm2270_vm7, %v2444_v31, %v2440_v12  ;;  %1012 = vadd.xlane.f32.xlu1 %v1011_v36  ;;  %v281_v31 = vld [vmem:[%s5445_s9 + $0xe0] sm:$0xff]  ;;  %v3046_v44 = vrot.slane %v2122_v18, %v5617_v49  ;;  %v327_v18 = vld [vmem:[%s5445_s9 + $0x250] sm:$0xff] }
 0x13b   : > { %v1585_v51 = vpack.c.bf16 %v1380_v42, %v1379_v43  ;;  %v2676_v54 = vrot.slane %v2047_v47, %v5880_v13  ;;  %v2681_v56 = vrot.slane %v2048_v48, %v5883_v14  ;;  %1009 = vadd.xlane.f32.xlu0 %v1008_v38  ;;  %v959_v60 = vpop.xlane.xlu1 %958  ;;  %v597_v38 = vsel %vm509_vm0, %v282_v30, 0.0  ;;  %v314_v42 = vld [vmem:[%s5445_s9 + $0x1e8] sm:$0xff]  ;;  %v376_v30 = vld [vmem:[%s5445_s9 + $0x3d8] sm:$0xff] }
 0x13c   : > { %v956_v37 = vpop.xlane.xlu0 %955  ;;  %v1428_v1 = vmul.f32 0.020408163, %v959_v60  ;;  %v594_v12 = vsel %vm509_vm0, %v281_v31, 0.0  ;;  %v3042_v43 = vrot.slane %v2121_v15, %v5614_v46 }
 0x13d   : > { %v2061_v5 = vunpack.c.l.b16 %v1585_v51  ;;  %v2062_v62 = vunpack.c.h.b16 %v1585_v51  ;;  %v1427_v2 = vmul.f32 0.020408163, %v956_v37  ;;  %v2677_v3 = vsel %vm2263_vm6, %v2676_v54, %v5841_v19  ;;  %v313_v51 = vld [vmem:[%s5445_s9 + $0x1e0] sm:$0xff] }
 0x13e   : > { %v6006_v4 = vsel %vm2270_vm7, %v2681_v56, %v2677_v3  ;;  %1156 = vadd.xlane.f32.xlu1 %v1155_v61  ;;  %v1194_v19 = vsel %vm509_vm0, %v481_v45, 0.0  ;;  %v693_v61 = vsel %vm509_vm0, %v314_v42, 0.0  ;;  %v2170_v45 = vunpack.c.h.b16 %v5961_v41 }
 0x13f   : > { %v2745_v7 = vrot.slane %v2061_v5, %v5733_v23  ;;  %v2750_v8 = vrot.slane %v2062_v62, %v5736_v24  ;;  %v1609_v9 = vpack.c.bf16 %v1428_v1, %v1427_v2  ;;  %1153 = vadd.xlane.f32.xlu0 %v1152_v17  ;;  %v1001_v20 = vpop.xlane.xlu1 %1000  ;;  %v690_v1 = vsel %vm509_vm0, %v313_v51, 0.0 }
 0x140   : > { %v1442_v27 = vmul.f32 0.020408163, %v1001_v20  ;;  %v998_v16 = vpop.xlane.xlu0 %997  ;;  %v3047_v2 = vsel %vm2228_vm1, %v3046_v44, %v3042_v43  ;;  %v3279_v41 = vrot.slane %v2169_v29, %v5614_v46  ;;  %v879_v44 = vsel %vm509_vm0, %v376_v30, 0.0 }
 0x141   : > { %v2746_v11 = vsel %vm2249_vm4, %v2745_v7, %v5856_v40  ;;  %v2109_v22 = vunpack.c.l.b16 %v1609_v9  ;;  %v2110_v26 = vunpack.c.h.b16 %v1609_v9  ;;  %v1441_v59 = vmul.f32 0.020408163, %v998_v16 }
 0x142   : > { %v6019_v21 = vsel %vm2256_vm5, %v2750_v8, %v2746_v11  ;;  %1198 = vadd.xlane.f32.xlu1 %v1197_v55  ;;  %v328_v8 = vld [vmem:[%s5445_s9 + $0x258] sm:$0xff]  ;;  %v732_v16 = vsel %vm509_vm0, %v327_v18, 0.0 }
 0x143   : > { %v2982_v34 = vrot.slane %v2109_v22, %v5733_v23  ;;  %v2987_v39 = vrot.slane %v2110_v26, %v5736_v24  ;;  %v1616_v36 = vpack.c.bf16 %v1442_v27, %v1441_v59  ;;  %1195 = vadd.xlane.f32.xlu0 %v1194_v19  ;;  %v1091_v40 = vpop.xlane.xlu1 %1090  ;;  %v735_v11 = vsel %vm509_vm0, %v328_v8, 0.0  ;;  %v438_v8 = vld [vmem:[%s5445_s9 + $0x5c8] sm:$0xff] }
 0x144   : > { %v1472_v47 = vmul.f32 0.020408163, %v1091_v40  ;;  %v1088_v48 = vpop.xlane.xlu0 %1087  ;;  %v3283_v22 = vrot.slane %v2170_v45, %v5617_v49  ;;  %v2279_v40 = vadd.s32 4294967224, %v5597_v25 }
 0x145   : > { %v2983_v32 = vsel %vm2249_vm4, %v2982_v34, %v5877_v10  ;;  %v2123_v56 = vunpack.c.l.b16 %v1616_v36  ;;  %v2124_v60 = vunpack.c.h.b16 %v1616_v36  ;;  %v1471_v37 = vmul.f32 0.020408163, %v1088_v48 }
 0x146   : > { %v6032_v54 = vsel %vm2256_vm5, %v2987_v39, %v2983_v32  ;;  %598 = vadd.xlane.f32.xlu1 %v597_v38  ;;  %v375_v39 = vld [vmem:[%s5445_s9 + $0x3d0] sm:$0xff]  ;;  %v2272_v36 = vadd.s32 4294967232, %v5597_v25  ;;  %v3284_v32 = vsel %vm2228_vm1, %v3283_v22, %v3279_v41 }
 0x147   : > { %v3051_v17 = vrot.slane %v2123_v56, %v5628_v63  ;;  %v3056_v5 = vrot.slane %v2124_v60, %v5631_v0  ;;  %v6037_v62 = vpack.c.bf16 %v1472_v47, %v1471_v37  ;;  %595 = vadd.xlane.f32.xlu0 %v594_v12  ;;  %v1145_v10 = vpop.xlane.xlu1 %1144  ;;  %v876_v51 = vsel %vm509_vm0, %v375_v39, 0.0  ;;  %v390_v56 = vld [vmem:[%s5445_s9 + $0x448] sm:$0xff] }
 0x148   : > { %v1490_v3 = vmul.f32 0.020408163, %v1145_v10  ;;  %v1142_v7 = vpop.xlane.xlu0 %1141  ;;  %v6074_v10 = vsub.s32 %v2279_v40, %v5602_v35  ;;  %v921_v29 = vsel %vm509_vm0, %v390_v56, 0.0  ;;  %v451_v40 = vld [vmem:[%s5445_s9 + $0x630] sm:$0xff]  ;;  %v500_v56 = vld [vmem:[%s5445_s9 + $0x7b8] sm:$0xff] }
 0x149   : > { %v3052_v9 = vsel %vm2235_vm2, %v3051_v17, %v3047_v2  ;;  %v1489_v15 = vmul.f32 0.020408163, %v1142_v7 }
 0x14a   : > { %v6047_v20 = vsel %vm2242_vm3, %v3056_v5, %v3052_v9  ;;  %694 = vadd.xlane.f32.xlu1 %v693_v61  ;;  %v389_v61 = vld [vmem:[%s5445_s9 + $0x440] sm:$0xff]  ;;  %v6071_v5 = vsub.s32 %v2272_v36, %v5602_v35 }
 0x14b   : > { %v1640_v55 = vpack.c.bf16 %v1490_v3, %v1489_v15  ;;  %691 = vadd.xlane.f32.xlu0 %v690_v1  ;;  %v1235_v19 = vpop.xlane.xlu1 %1234  ;;  %v918_v7 = vsel %vm509_vm0, %v389_v61, 0.0 }
 0x14c   : > { %v1520_v26 = vmul.f32 0.020408163, %v1235_v19  ;;  %v1232_v27 = vpop.xlane.xlu0 %1231 }
 0x14d   : > { %v2171_v31 = vunpack.c.l.b16 %v1640_v55  ;;  %v2172_v59 = vunpack.c.h.b16 %v1640_v55  ;;  %v1519_v34 = vmul.f32 0.020408163, %v1232_v27  ;;  %v437_v55 = vld [vmem:[%s5445_s9 + $0x5c0] sm:$0xff] }
 0x14e   : > { %736 = vadd.xlane.f32.xlu1 %v735_v11  ;;  %v1062_v30 = vsel %vm509_vm0, %v437_v55, 0.0  ;;  %v266_v55 = vld [vmem:[%s5445_s9 + $0x68] sm:$0xff] }
 0x14f   : > { %v3288_v38 = vrot.slane %v2171_v31, %v5628_v63  ;;  %v3293_v12 = vrot.slane %v2172_v59, %v5631_v0  ;;  %v6059_v42 = vpack.c.bf16 %v1520_v26, %v1519_v34  ;;  %733 = vadd.xlane.f32.xlu0 %v732_v16  ;;  %v587_v43 = vpop.xlane.xlu1 %586  ;;  %v1065_v26 = vsel %vm509_vm0, %v438_v8, 0.0  ;;  %v452_v31 = vld [vmem:[%s5445_s9 + $0x638] sm:$0xff] }
 0x150   : > { %v1304_v47 = vmul.f32 0.020408163, %v587_v43  ;;  %v584_v48 = vpop.xlane.xlu0 %583 }
 0x151   : > { %v3289_v60 = vsel %vm2235_vm2, %v3288_v38, %v3284_v32  ;;  %v1303_v37 = vmul.f32 0.020408163, %v584_v48 }
 0x152   : > { %v6068_v17 = vsel %vm2242_vm3, %v3293_v12, %v3289_v60  ;;  %880 = vadd.xlane.f32.xlu1 %v879_v44 }
 0x153   : > { %v1547_v1 = vpack.c.bf16 %v1304_v47, %v1303_v37  ;;  %877 = vadd.xlane.f32.xlu0 %v876_v51  ;;  %v683_v2 = vpop.xlane.xlu1 %682  ;;  %v1107_v47 = vsel %vm509_vm0, %v452_v31, 0.0  ;;  %v1104_v51 = vsel %vm509_vm0, %v451_v40, 0.0  ;;  %v298_v40 = vld [vmem:[%s5445_s9 + $0x168] sm:$0xff] }
 0x154   : > { %v1336_v45 = vmul.f32 0.020408163, %v683_v2  ;;  %v680_v3 = vpop.xlane.xlu0 %679  ;;  %v499_v2 = vld [vmem:[%s5445_s9 + $0x7b0] sm:$0xff] }
 0x155   : > { %v1985_v9 = vunpack.c.l.b16 %v1547_v1  ;;  %v1986_v15 = vunpack.c.h.b16 %v1547_v1  ;;  %v1335_v18 = vmul.f32 0.020408163, %v680_v3 }
 0x156   : > { %922 = vadd.xlane.f32.xlu1 %v921_v29 }
 0x157   : > { %v2370_v19 = vrot.slane %v1985_v9, %v6071_v5  ;;  %v2375_v11 = vrot.slane %v1986_v15, %v6074_v10  ;;  %v1563_v41 = vpack.c.bf16 %v1336_v45, %v1335_v18  ;;  %919 = vadd.xlane.f32.xlu0 %v918_v7  ;;  %v725_v22 = vpop.xlane.xlu1 %724  ;;  %v1251_v9 = vsel %vm509_vm0, %v500_v56, 0.0 }
 0x158   : > { %v1350_v27 = vmul.f32 0.020408163, %v725_v22  ;;  %v722_v16 = vpop.xlane.xlu0 %721  ;;  %v1248_v18 = vsel %vm509_vm0, %v499_v2, 0.0 }
 0x159   : > { %v2371_v59 = vsel %vm2277_vm8, %v2370_v19, %v5898_v50  ;;  %v2017_v34 = vunpack.c.l.b16 %v1563_v41  ;;  %v2018_v39 = vunpack.c.h.b16 %v1563_v41  ;;  %v1349_v36 = vmul.f32 0.020408163, %v722_v16 }
 0x15a   : > { %v6089_v38 = vsel %vm2284_vm9, %v2375_v11, %v2371_v59  ;;  %1066 = vadd.xlane.f32.xlu1 %v1065_v26  ;;  %v265_v26 = vld [vmem:[%s5445_s9 + $0x60] sm:$0xff] }
 0x15b   : > { %v2528_v12 = vrot.slane %v2017_v34, %v6071_v5  ;;  %v2533_v43 = vrot.slane %v2018_v39, %v6074_v10  ;;  %v1570_v44 = vpack.c.bf16 %v1350_v27, %v1349_v36  ;;  %1063 = vadd.xlane.f32.xlu0 %v1062_v30  ;;  %v869_v32 = vpop.xlane.xlu1 %868  ;;  %v549_v34 = vsel %vm509_vm0, %v266_v55, 0.0 }
 0x15c   : > { %v1398_v50 = vmul.f32 0.020408163, %v869_v32  ;;  %v866_v48 = vpop.xlane.xlu0 %865  ;;  %v546_v36 = vsel %vm509_vm0, %v265_v26, 0.0 }
 0x15d   : > { %v2529_v60 = vsel %vm2277_vm8, %v2528_v12, %v5909_v6  ;;  %v2031_v37 = vunpack.c.l.b16 %v1570_v44  ;;  %v2032_v61 = vunpack.c.h.b16 %v1570_v44  ;;  %v1397_v1 = vmul.f32 0.020408163, %v866_v48 }
 0x15e   : > { %v6100_v29 = vsel %vm2284_vm9, %v2533_v43, %v2529_v60  ;;  %1108 = vadd.xlane.f32.xlu1 %v1107_v47  ;;  %v297_v47 = vld [vmem:[%s5445_s9 + $0x160] sm:$0xff] }
 0x15f   : > { %v2597_v45 = vrot.slane %v2031_v37, %v5880_v13  ;;  %v2602_v3 = vrot.slane %v2032_v61, %v5883_v14  ;;  %v1594_v7 = vpack.c.bf16 %v1398_v50, %v1397_v1  ;;  %1105 = vadd.xlane.f32.xlu0 %v1104_v51  ;;  %v911_v8 = vpop.xlane.xlu1 %910  ;;  %v645_v37 = vsel %vm509_vm0, %v298_v40, 0.0 }
 0x160   : > { %v1412_v6 = vmul.f32 0.020408163, %v911_v8  ;;  %v908_v15 = vpop.xlane.xlu0 %907  ;;  %v2154_v61 = vunpack.c.h.b16 %v6037_v62 }
 0x161   : > { %v2598_v19 = vsel %vm2263_vm6, %v2597_v45, %v5922_v33  ;;  %v2079_v11 = vunpack.c.l.b16 %v1594_v7  ;;  %v2080_v41 = vunpack.c.h.b16 %v1594_v7  ;;  %v1411_v22 = vmul.f32 0.020408163, %v908_v15  ;;  %v345_v15 = vld [vmem:[%s5445_s9 + $0x2e0] sm:$0xff] }
 0x162   : > { %v6111_v27 = vsel %vm2270_vm7, %v2602_v3, %v2598_v19  ;;  %1252 = vadd.xlane.f32.xlu1 %v1251_v9  ;;  %v642_v45 = vsel %vm509_vm0, %v297_v47, 0.0  ;;  %v346_v3 = vld [vmem:[%s5445_s9 + $0x2e8] sm:$0xff]  ;;  %v3204_v26 = vrot.slane %v2154_v61, %v5617_v49 }
 0x163   : > { %v2834_v16 = vrot.slane %v2079_v11, %v5880_v13  ;;  %v2839_v30 = vrot.slane %v2080_v41, %v5883_v14  ;;  %v1601_v31 = vpack.c.bf16 %v1412_v6, %v1411_v22  ;;  %1249 = vadd.xlane.f32.xlu0 %v1248_v18  ;;  %v1055_v59 = vpop.xlane.xlu1 %1054  ;;  %v789_v41 = vsel %vm509_vm0, %v346_v3, 0.0  ;;  %v360_v22 = vld [vmem:[%s5445_s9 + $0x358] sm:$0xff] }
 0x164   : > { %v1460_v33 = vmul.f32 0.020408163, %v1055_v59  ;;  %v1052_v39 = vpop.xlane.xlu0 %1051  ;;  %v359_v59 = vld [vmem:[%s5445_s9 + $0x350] sm:$0xff] }
 0x165   : > { %v2835_v12 = vsel %vm2263_vm6, %v2834_v16, %v5934_v52  ;;  %v2093_v43 = vunpack.c.l.b16 %v1601_v31  ;;  %v2094_v44 = vunpack.c.h.b16 %v1601_v31  ;;  %v1459_v32 = vmul.f32 0.020408163, %v1052_v39 }
 0x166   : > { %v6122_v50 = vsel %vm2270_vm7, %v2839_v30, %v2835_v12  ;;  %550 = vadd.xlane.f32.xlu1 %v549_v34  ;;  %v2153_v52 = vunpack.c.l.b16 %v6037_v62  ;;  %v786_v31 = vsel %vm509_vm0, %v345_v15, 0.0  ;;  %v831_v12 = vsel %vm509_vm0, %v360_v22, 0.0  ;;  %v421_v22 = vld [vmem:[%s5445_s9 + $0x540] sm:$0xff] }
 0x167   : > { %v2903_v48 = vrot.slane %v2093_v43, %v5733_v23  ;;  %v2908_v51 = vrot.slane %v2094_v44, %v5736_v24  ;;  %v1625_v56 = vpack.c.bf16 %v1460_v33, %v1459_v32  ;;  %547 = vadd.xlane.f32.xlu0 %v546_v36  ;;  %v1097_v60 = vpop.xlane.xlu1 %1096 }
 0x168   : > { %v1474_v1 = vmul.f32 0.020408163, %v1097_v60  ;;  %v1094_v2 = vpop.xlane.xlu0 %1093 }
 0x169   : > { %v2904_v7 = vsel %vm2249_vm4, %v2903_v48, %v5950_v57  ;;  %v2141_v8 = vunpack.c.l.b16 %v1625_v56  ;;  %v2142_v9 = vunpack.c.h.b16 %v1625_v56  ;;  %v1473_v6 = vmul.f32 0.020408163, %v1094_v2  ;;  %v407_v2 = vld [vmem:[%s5445_s9 + $0x4d0] sm:$0xff] }
 0x16a   : > { %v6135_v18 = vsel %vm2256_vm5, %v2908_v51, %v2904_v7  ;;  %646 = vadd.xlane.f32.xlu1 %v645_v37  ;;  %v3200_v57 = vrot.slane %v2153_v52, %v5614_v46  ;;  %v2201_v51 = vunpack.c.l.b16 %v6059_v42  ;;  %v2202_v56 = vunpack.c.h.b16 %v6059_v42  ;;  %v408_v52 = vld [vmem:[%s5445_s9 + $0x4d8] sm:$0xff] }
 0x16b   : > { %v3140_v62 = vrot.slane %v2141_v8, %v5733_v23  ;;  %v3145_v55 = vrot.slane %v2142_v9, %v5736_v24  ;;  %v1632_v19 = vpack.c.bf16 %v1474_v1, %v1473_v6  ;;  %643 = vadd.xlane.f32.xlu0 %v642_v45  ;;  %v1187_v11 = vpop.xlane.xlu1 %1186  ;;  %v975_v8 = vsel %vm509_vm0, %v408_v52, 0.0 }
 0x16c   : > { %v1504_v16 = vmul.f32 0.020408163, %v1187_v11  ;;  %v1184_v30 = vpop.xlane.xlu0 %1183  ;;  %v3205_v48 = vsel %vm2228_vm1, %v3204_v26, %v3200_v57  ;;  %v3437_v42 = vrot.slane %v2201_v51, %v5614_v46  ;;  %v3441_v9 = vrot.slane %v2202_v56, %v5617_v49 }
 0x16d   : > { %v3141_v34 = vsel %vm2249_vm4, %v3140_v62, %v5969_v53  ;;  %v2155_v33 = vunpack.c.l.b16 %v1632_v19  ;;  %v2156_v39 = vunpack.c.h.b16 %v1632_v19  ;;  %v1503_v36 = vmul.f32 0.020408163, %v1184_v30 }
 0x16e   : > { %v6148_v40 = vsel %vm2256_vm5, %v3145_v55, %v3141_v34  ;;  %790 = vadd.xlane.f32.xlu1 %v789_v41  ;;  %v828_v53 = vsel %vm509_vm0, %v359_v59, 0.0  ;;  %v972_v62 = vsel %vm509_vm0, %v407_v2, 0.0  ;;  %v422_v55 = vld [vmem:[%s5445_s9 + $0x548] sm:$0xff]  ;;  %v3442_v59 = vsel %vm2228_vm1, %v3441_v9, %v3437_v42 }
 0x16f   : > { %v3209_v43 = vrot.slane %v2155_v33, %v5628_v63  ;;  %v3214_v44 = vrot.slane %v2156_v39, %v5631_v0  ;;  %v6153_v32 = vpack.c.bf16 %v1504_v16, %v1503_v36  ;;  %787 = vadd.xlane.f32.xlu0 %v786_v31  ;;  %v1241_v47 = vpop.xlane.xlu1 %1240  ;;  %v1017_v31 = vsel %vm509_vm0, %v422_v55, 0.0  ;;  %v470_v36 = vld [vmem:[%s5445_s9 + $0x6c8] sm:$0xff] }
 0x170   : > { %v1522_v60 = vmul.f32 0.020408163, %v1241_v47  ;;  %v1238_v37 = vpop.xlane.xlu0 %1237  ;;  %v1014_v39 = vsel %vm509_vm0, %v421_v22, 0.0  ;;  %v1161_v52 = vsel %vm509_vm0, %v470_v36, 0.0 }
 0x171   : > { %v3210_v61 = vsel %vm2235_vm2, %v3209_v43, %v3205_v48  ;;  %v1521_v1 = vmul.f32 0.020408163, %v1238_v37 }
 0x172   : > { %v6163_v45 = vsel %vm2242_vm3, %v3214_v44, %v3210_v61  ;;  %832 = vadd.xlane.f32.xlu1 %v831_v12 }
 0x173   : > { %v1656_v3 = vpack.c.bf16 %v1522_v60, %v1521_v1  ;;  %829 = vadd.xlane.f32.xlu0 %v828_v53  ;;  %v539_v7 = vpop.xlane.xlu1 %538  ;;  %v469_v53 = vld [vmem:[%s5445_s9 + $0x6c0] sm:$0xff] }
 0x174   : > { %v1288_v6 = vmul.f32 0.020408163, %v539_v7  ;;  %v536_v15 = vpop.xlane.xlu0 %535  ;;  %v1158_v2 = vsel %vm509_vm0, %v469_v53, 0.0 }
 0x175   : > { %v2203_v19 = vunpack.c.l.b16 %v1656_v3  ;;  %v2204_v11 = vunpack.c.h.b16 %v1656_v3  ;;  %v1287_v41 = vmul.f32 0.020408163, %v536_v15  ;;  %v484_v3 = vld [vmem:[%s5445_s9 + $0x738] sm:$0xff] }
 0x176   : > { %976 = vadd.xlane.f32.xlu1 %v975_v8 }
 0x177   : > { %v3446_v57 = vrot.slane %v2203_v19, %v5628_v63  ;;  %v3451_v26 = vrot.slane %v2204_v11, %v5631_v0  ;;  %v1539_v16 = vpack.c.bf16 %v1288_v6, %v1287_v41  ;;  %973 = vadd.xlane.f32.xlu0 %v972_v62  ;;  %v635_v30 = vpop.xlane.xlu1 %634  ;;  %v483_v6 = vld [vmem:[%s5445_s9 + $0x730] sm:$0xff]  ;;  %v1203_v41 = vsel %vm509_vm0, %v484_v3, 0.0 }
 0x178   : > { %v1320_v34 = vmul.f32 0.020408163, %v635_v30  ;;  %v632_v33 = vpop.xlane.xlu0 %631 }
 0x179   : > { %v3447_v12 = vsel %vm2235_vm2, %v3446_v57, %v3442_v59  ;;  %v1969_v43 = vunpack.c.l.b16 %v1539_v16  ;;  %v1970_v44 = vunpack.c.h.b16 %v1539_v16  ;;  %v1319_v47 = vmul.f32 0.020408163, %v632_v33 }
 0x17a   : > { %v6180_v48 = vsel %vm2242_vm3, %v3451_v26, %v3447_v12  ;;  %1018 = vadd.xlane.f32.xlu1 %v1017_v31  ;;  %v1200_v57 = vsel %vm509_vm0, %v483_v6, 0.0  ;;  %v284_v26 = vld [vmem:[%s5445_s9 + $0xf8] sm:$0xff] }
 0x17b   : > { %v2276_v51 = vrot.slane %v1969_v43, %v6071_v5  ;;  %v2283_v56 = vrot.slane %v1970_v44, %v6074_v10  ;;  %v1555_v60 = vpack.c.bf16 %v1320_v34, %v1319_v47  ;;  %1015 = vadd.xlane.f32.xlu0 %v1014_v39  ;;  %v779_v37 = vpop.xlane.xlu1 %778  ;;  %v283_v34 = vld [vmem:[%s5445_s9 + $0xf0] sm:$0xff]  ;;  %v603_v44 = vsel %vm509_vm0, %v284_v26, 0.0 }
 0x17c   : > { %v1368_v61 = vmul.f32 0.020408163, %v779_v37  ;;  %v776_v1 = vpop.xlane.xlu0 %775  ;;  %v600_v53 = vsel %vm509_vm0, %v283_v34, 0.0 }
 0x17d   : > { %v2278_v7 = vsel %vm2277_vm8, %v2276_v51, %v5984_v28  ;;  %v2001_v8 = vunpack.c.l.b16 %v1555_v60  ;;  %v2002_v42 = vunpack.c.h.b16 %v1555_v60  ;;  %v1367_v9 = vmul.f32 0.020408163, %v776_v1  ;;  %v316_v51 = vld [vmem:[%s5445_s9 + $0x1f8] sm:$0xff] }
 0x17e   : > { %v6191_v15 = vsel %vm2284_vm9, %v2283_v56, %v2278_v7  ;;  %1162 = vadd.xlane.f32.xlu1 %v1161_v52 }
 0x17f   : > { %v2449_v62 = vrot.slane %v2001_v8, %v6071_v5  ;;  %v2454_v55 = vrot.slane %v2002_v42, %v6074_v10  ;;  %v1579_v19 = vpack.c.bf16 %v1368_v61, %v1367_v9  ;;  %1159 = vadd.xlane.f32.xlu0 %v1158_v2  ;;  %v821_v11 = vpop.xlane.xlu1 %820  ;;  %v315_v61 = vld [vmem:[%s5445_s9 + $0x1f0] sm:$0xff]  ;;  %v699_v42 = vsel %vm509_vm0, %v316_v51, 0.0 }
 0x180   : > { %v1382_v28 = vmul.f32 0.020408163, %v821_v11  ;;  %v818_v22 = vpop.xlane.xlu0 %817  ;;  %v696_v6 = vsel %vm509_vm0, %v315_v61, 0.0 }
 0x181   : > { %v2450_v16 = vsel %vm2277_vm8, %v2449_v62, %v5995_v58  ;;  %v2049_v30 = vunpack.c.l.b16 %v1579_v19  ;;  %v2050_v31 = vunpack.c.h.b16 %v1579_v19  ;;  %v1381_v59 = vmul.f32 0.020408163, %v818_v22  ;;  %v330_v62 = vld [vmem:[%s5445_s9 + $0x268] sm:$0xff] }
 0x182   : > { %v6202_v33 = vsel %vm2284_vm9, %v2454_v55, %v2450_v16  ;;  %1204 = vadd.xlane.f32.xlu1 %v1203_v41 }
 0x183   : > { %v2686_v39 = vrot.slane %v2049_v30, %v6071_v5  ;;  %v2691_v36 = vrot.slane %v2050_v31, %v6074_v10  ;;  %v1586_v12 = vpack.c.bf16 %v1382_v28, %v1381_v59  ;;  %1201 = vadd.xlane.f32.xlu0 %v1200_v57  ;;  %v965_v43 = vpop.xlane.xlu1 %964  ;;  %v329_v28 = vld [vmem:[%s5445_s9 + $0x260] sm:$0xff]  ;;  %v741_v31 = vsel %vm509_vm0, %v330_v62, 0.0 }
 0x184   : > { %v1430_v58 = vmul.f32 0.020408163, %v965_v43  ;;  %v962_v47 = vpop.xlane.xlu0 %961  ;;  %v738_v34 = vsel %vm509_vm0, %v329_v28, 0.0 }
 0x185   : > { %v2687_v56 = vsel %vm2277_vm8, %v2686_v39, %v6006_v4  ;;  %v2063_v60 = vunpack.c.l.b16 %v1586_v12  ;;  %v2064_v37 = vunpack.c.h.b16 %v1586_v12  ;;  %v1429_v52 = vmul.f32 0.020408163, %v962_v47  ;;  %v378_v39 = vld [vmem:[%s5445_s9 + $0x3e8] sm:$0xff] }
 0x186   : > { %v6213_v1 = vsel %vm2284_vm9, %v2691_v36, %v2687_v56  ;;  %604 = vadd.xlane.f32.xlu1 %v603_v44 }
 0x187   : > { %v2755_v2 = vrot.slane %v2063_v60, %v5880_v13  ;;  %v2760_v3 = vrot.slane %v2064_v37, %v5883_v14  ;;  %v1610_v7 = vpack.c.bf16 %v1430_v58, %v1429_v52  ;;  %601 = vadd.xlane.f32.xlu0 %v600_v53  ;;  %v1007_v8 = vpop.xlane.xlu1 %1006  ;;  %v377_v58 = vld [vmem:[%s5445_s9 + $0x3e0] sm:$0xff]  ;;  %v885_v37 = vsel %vm509_vm0, %v378_v39, 0.0 }
 0x188   : > { %v1444_v4 = vmul.f32 0.020408163, %v1007_v8  ;;  %v1004_v9 = vpop.xlane.xlu0 %1003  ;;  %v2186_v52 = vunpack.c.h.b16 %v6153_v32 }
 0x189   : > { %v2756_v55 = vsel %vm2263_vm6, %v2755_v2, %v6019_v21  ;;  %v2111_v19 = vunpack.c.l.b16 %v1610_v7  ;;  %v2112_v11 = vunpack.c.h.b16 %v1610_v7  ;;  %v1443_v41 = vmul.f32 0.020408163, %v1004_v9  ;;  %v392_v7 = vld [vmem:[%s5445_s9 + $0x458] sm:$0xff] }
 0x18a   : > { %v6224_v22 = vsel %vm2270_vm7, %v2760_v3, %v2756_v55  ;;  %700 = vadd.xlane.f32.xlu1 %v699_v42  ;;  %v882_v3 = vsel %vm509_vm0, %v377_v58, 0.0  ;;  %v2286_v55 = vadd.s32 4294967216, %v5597_v25  ;;  %v927_v28 = vsel %vm509_vm0, %v392_v7, 0.0  ;;  %v453_v7 = vld [vmem:[%s5445_s9 + $0x640] sm:$0xff] }
 0x18b   : > { %v2992_v57 = vrot.slane %v2111_v19, %v5880_v13  ;;  %v2997_v26 = vrot.slane %v2112_v11, %v5883_v14  ;;  %v1617_v16 = vpack.c.bf16 %v1444_v4, %v1443_v41  ;;  %697 = vadd.xlane.f32.xlu0 %v696_v6  ;;  %v1151_v30 = vpop.xlane.xlu1 %1150  ;;  %v391_v6 = vld [vmem:[%s5445_s9 + $0x450] sm:$0xff] }
 0x18c   : > { %v1492_v21 = vmul.f32 0.020408163, %v1151_v30  ;;  %v1148_v59 = vpop.xlane.xlu0 %1147 }
 0x18d   : > { %v2993_v36 = vsel %vm2263_vm6, %v2992_v57, %v6032_v54  ;;  %v2125_v12 = vunpack.c.l.b16 %v1617_v16  ;;  %v2126_v43 = vunpack.c.h.b16 %v1617_v16  ;;  %v1491_v44 = vmul.f32 0.020408163, %v1148_v59 }
 0x18e   : > { %v6235_v47 = vsel %vm2270_vm7, %v2997_v26, %v2993_v36  ;;  %742 = vadd.xlane.f32.xlu1 %v741_v31  ;;  %v2185_v54 = vunpack.c.l.b16 %v6153_v32  ;;  %v2293_v32 = vadd.s32 4294967208, %v5597_v25  ;;  %v3362_v26 = vrot.slane %v2186_v52, %v5617_v49  ;;  %v454_v52 = vld [vmem:[%s5445_s9 + $0x648] sm:$0xff] }
 0x18f   : > { %v3061_v53 = vrot.slane %v2125_v12, %v5733_v23  ;;  %v3066_v51 = vrot.slane %v2126_v43, %v5736_v24  ;;  %v1641_v56 = vpack.c.bf16 %v1492_v21, %v1491_v44  ;;  %739 = vadd.xlane.f32.xlu0 %v738_v34  ;;  %v1193_v60 = vpop.xlane.xlu1 %1192  ;;  %v924_v31 = vsel %vm509_vm0, %v391_v6, 0.0  ;;  %v440_v21 = vld [vmem:[%s5445_s9 + $0x5d8] sm:$0xff]  ;;  %v439_v12 = vld [vmem:[%s5445_s9 + $0x5d0] sm:$0xff] }
 0x190   : > { %v1506_v61 = vmul.f32 0.020408163, %v1193_v60  ;;  %v1190_v2 = vpop.xlane.xlu0 %1189  ;;  %v3358_v57 = vrot.slane %v2185_v54, %v5614_v46  ;;  %v6266_v46 = vsub.s32 %v2286_v55, %v5602_v35  ;;  %v6269_v49 = vsub.s32 %v2293_v32, %v5602_v35 }
 0x191   : > { %v3062_v8 = vsel %vm2249_vm4, %v3061_v53, %v6047_v20  ;;  %v2173_v42 = vunpack.c.l.b16 %v1641_v56  ;;  %v2174_v4 = vunpack.c.h.b16 %v1641_v56  ;;  %v1505_v9 = vmul.f32 0.020408163, %v1190_v2 }
 0x192   : > { %v6248_v62 = vsel %vm2256_vm5, %v3066_v51, %v3062_v8  ;;  %886 = vadd.xlane.f32.xlu1 %v885_v37  ;;  %v1071_v51 = vsel %vm509_vm0, %v440_v21, 0.0  ;;  %v3363_v56 = vsel %vm2228_vm1, %v3362_v26, %v3358_v57  ;;  %v1068_v54 = vsel %vm509_vm0, %v439_v12, 0.0  ;;  %v501_v26 = vld [vmem:[%s5445_s9 + $0x7c0] sm:$0xff]  ;;  %v268_v12 = vld [vmem:[%s5445_s9 + $0x78] sm:$0xff] }
 0x193   : > { %v3298_v19 = vrot.slane %v2173_v42, %v5733_v23  ;;  %v3303_v11 = vrot.slane %v2174_v4, %v5736_v24  ;;  %v1648_v41 = vpack.c.bf16 %v1506_v61, %v1505_v9  ;;  %883 = vadd.xlane.f32.xlu0 %v882_v3  ;;  %v593_v20 = vpop.xlane.xlu1 %592  ;;  %v1113_v6 = vsel %vm509_vm0, %v454_v52, 0.0 }
 0x194   : > { %v1306_v16 = vmul.f32 0.020408163, %v593_v20  ;;  %v590_v30 = vpop.xlane.xlu0 %589  ;;  %vm3515_vm1 = vcmask 1042434  }
 0x195   : > { %v3299_v59 = vsel %vm2249_vm4, %v3298_v19, %v6068_v17  ;;  %v2187_v34 = vunpack.c.l.b16 %v1648_v41  ;;  %v2188_v39 = vunpack.c.h.b16 %v1648_v41  ;;  %v1305_v36 = vmul.f32 0.020408163, %v590_v30 }
 0x196   : > { %v6263_v43 = vsel %vm2256_vm5, %v3303_v11, %v3299_v59  ;;  %928 = vadd.xlane.f32.xlu1 %v927_v28  ;;  %v1110_v19 = vsel %vm509_vm0, %v453_v7, 0.0  ;;  %v502_v11 = vld [vmem:[%s5445_s9 + $0x7c8] sm:$0xff] }
 0x197   : > { %v3367_v44 = vrot.slane %v2187_v34, %v5628_v63  ;;  %v3372_v17 = vrot.slane %v2188_v39, %v5631_v0  ;;  %v1548_v58 = vpack.c.bf16 %v1306_v16, %v1305_v36  ;;  %925 = vadd.xlane.f32.xlu0 %v924_v31  ;;  %v689_v53 = vpop.xlane.xlu1 %688  ;;  %v1257_v34 = vsel %vm509_vm0, %v502_v11, 0.0 }
 0x198   : > { %v1338_v60 = vmul.f32 0.020408163, %v689_v53  ;;  %v686_v37 = vpop.xlane.xlu0 %685  ;;  %v1254_v36 = vsel %vm509_vm0, %v501_v26, 0.0 }
 0x199   : > { %v3368_v61 = vsel %vm2235_vm2, %v3367_v44, %v3363_v56  ;;  %v1987_v2 = vunpack.c.l.b16 %v1548_v58  ;;  %v1988_v3 = vunpack.c.h.b16 %v1548_v58  ;;  %v1337_v63 = vmul.f32 0.020408163, %v686_v37 }
 0x19a   : > { %v6280_v0 = vsel %vm2242_vm3, %v3372_v17, %v3368_v61  ;;  %1072 = vadd.xlane.f32.xlu1 %v1071_v51  ;;  %v267_v51 = vld [vmem:[%s5445_s9 + $0x70] sm:$0xff]  ;;  %v555_v61 = vsel %vm509_vm0, %v268_v12, 0.0  ;;  %vm3517_vm2 = vcmask 1043459   ;;  %vm3519_vm3 = vcmask 1044484  }
 0x19b   : > { %v2380_v8 = vrot.slane %v1987_v2, %v6266_v46  ;;  %v2385_v42 = vrot.slane %v1988_v3, %v6269_v49  ;;  %v1564_v4 = vpack.c.bf16 %v1338_v60, %v1337_v63  ;;  %1069 = vadd.xlane.f32.xlu0 %v1068_v54  ;;  %v731_v9 = vpop.xlane.xlu1 %730  ;;  %v552_v3 = vsel %vm509_vm0, %v267_v51, 0.0  ;;  %v300_v63 = vld [vmem:[%s5445_s9 + $0x178] sm:$0xff] }
 0x19c   : > { %v1352_v55 = vmul.f32 0.020408163, %v731_v9  ;;  %v728_v32 = vpop.xlane.xlu0 %727  ;;  %v299_v9 = vld [vmem:[%s5445_s9 + $0x170] sm:$0xff] }
 0x19d   : > { %v2381_v41 = vsel %vm2291_vm10, %v2380_v8, %v6089_v38  ;;  %v2019_v20 = vunpack.c.l.b16 %v1564_v4  ;;  %v2020_v28 = vunpack.c.h.b16 %v1564_v4  ;;  %v1351_v57 = vmul.f32 0.020408163, %v728_v32 }
 0x19e   : > { %v6291_v16 = vsel %vm2298_vm11, %v2385_v42, %v2381_v41  ;;  %1114 = vadd.xlane.f32.xlu1 %v1113_v6  ;;  %v651_v41 = vsel %vm509_vm0, %v300_v63, 0.0 }
 0x19f   : > { %v2538_v30 = vrot.slane %v2019_v20, %v6266_v46  ;;  %v2543_v31 = vrot.slane %v2020_v28, %v6269_v49  ;;  %v1571_v21 = vpack.c.bf16 %v1352_v55, %v1351_v57  ;;  %1111 = vadd.xlane.f32.xlu0 %v1110_v19  ;;  %v875_v59 = vpop.xlane.xlu1 %874  ;;  %v648_v28 = vsel %vm509_vm0, %v299_v9, 0.0  ;;  %v348_v57 = vld [vmem:[%s5445_s9 + $0x2f8] sm:$0xff] }
 0x1a0   : > { %v1400_v38 = vmul.f32 0.020408163, %v875_v59  ;;  %v872_v39 = vpop.xlane.xlu0 %871  ;;  %v347_v59 = vld [vmem:[%s5445_s9 + $0x2f0] sm:$0xff] }
 0x1a1   : > { %v2539_v44 = vsel %vm2291_vm10, %v2538_v30, %v6100_v29  ;;  %v2033_v17 = vunpack.c.l.b16 %v1571_v21  ;;  %v2034_v58 = vunpack.c.h.b16 %v1571_v21  ;;  %v1399_v53 = vmul.f32 0.020408163, %v872_v39 }
 0x1a2   : > { %v6302_v56 = vsel %vm2298_vm11, %v2543_v31, %v2539_v44  ;;  %1258 = vadd.xlane.f32.xlu1 %v1257_v34  ;;  %v795_v44 = vsel %vm509_vm0, %v348_v57, 0.0 }
 0x1a3   : > { %v2607_v60 = vrot.slane %v2033_v17, %v6071_v5  ;;  %v2612_v37 = vrot.slane %v2034_v58, %v6074_v10  ;;  %v1595_v54 = vpack.c.bf16 %v1400_v38, %v1399_v53  ;;  %1255 = vadd.xlane.f32.xlu0 %v1254_v36  ;;  %v917_v52 = vpop.xlane.xlu1 %916  ;;  %v792_v58 = vsel %vm509_vm0, %v347_v59, 0.0  ;;  %v362_v53 = vld [vmem:[%s5445_s9 + $0x368] sm:$0xff] }
 0x1a4   : > { %v1414_v29 = vmul.f32 0.020408163, %v917_v52  ;;  %v914_v2 = vpop.xlane.xlu0 %913  ;;  %v361_v52 = vld [vmem:[%s5445_s9 + $0x360] sm:$0xff] }
 0x1a5   : > { %v2608_v7 = vsel %vm2277_vm8, %v2607_v60, %v6111_v27  ;;  %v2081_v8 = vunpack.c.l.b16 %v1595_v54  ;;  %v2082_v42 = vunpack.c.h.b16 %v1595_v54  ;;  %v1413_v4 = vmul.f32 0.020408163, %v914_v2 }
 0x1a6   : > { %v6313_v6 = vsel %vm2284_vm9, %v2612_v37, %v2608_v7  ;;  %556 = vadd.xlane.f32.xlu1 %v555_v61  ;;  %v837_v7 = vsel %vm509_vm0, %v362_v53, 0.0 }
 0x1a7   : > { %v2844_v55 = vrot.slane %v2081_v8, %v6071_v5  ;;  %v2849_v32 = vrot.slane %v2082_v42, %v6074_v10  ;;  %v1602_v19 = vpack.c.bf16 %v1414_v29, %v1413_v4  ;;  %553 = vadd.xlane.f32.xlu0 %v552_v3  ;;  %v1061_v11 = vpop.xlane.xlu1 %1060  ;;  %v834_v42 = vsel %vm509_vm0, %v361_v52, 0.0  ;;  %v410_v4 = vld [vmem:[%s5445_s9 + $0x4e8] sm:$0xff] }
 0x1a8   : > { %v1462_v27 = vmul.f32 0.020408163, %v1061_v11  ;;  %v1058_v20 = vpop.xlane.xlu0 %1057  ;;  %v409_v11 = vld [vmem:[%s5445_s9 + $0x4e0] sm:$0xff] }
 0x1a9   : > { %v2845_v26 = vsel %vm2277_vm8, %v2844_v55, %v6122_v50  ;;  %v2095_v30 = vunpack.c.l.b16 %v1602_v19  ;;  %v2096_v31 = vunpack.c.h.b16 %v1602_v19  ;;  %v1461_v21 = vmul.f32 0.020408163, %v1058_v20 }
 0x1aa   : > { %v6324_v34 = vsel %vm2284_vm9, %v2849_v32, %v2845_v26  ;;  %652 = vadd.xlane.f32.xlu1 %v651_v41  ;;  %v981_v26 = vsel %vm509_vm0, %v410_v4, 0.0 }
 0x1ab   : > { %v2913_v38 = vrot.slane %v2095_v30, %v5880_v13  ;;  %v2918_v39 = vrot.slane %v2096_v31, %v5883_v14  ;;  %v1626_v36 = vpack.c.bf16 %v1462_v27, %v1461_v21  ;;  %649 = vadd.xlane.f32.xlu0 %v648_v28  ;;  %v1103_v12 = vpop.xlane.xlu1 %1102  ;;  %v978_v31 = vsel %vm509_vm0, %v409_v11, 0.0  ;;  %v424_v21 = vld [vmem:[%s5445_s9 + $0x558] sm:$0xff] }
 0x1ac   : > { %v1476_v50 = vmul.f32 0.020408163, %v1103_v12  ;;  %v1100_v17 = vpop.xlane.xlu0 %1099  ;;  %v423_v12 = vld [vmem:[%s5445_s9 + $0x550] sm:$0xff] }
 0x1ad   : > { %v2914_v51 = vsel %vm2263_vm6, %v2913_v38, %v6135_v18  ;;  %v2143_v60 = vunpack.c.l.b16 %v1626_v36  ;;  %v2144_v37 = vunpack.c.h.b16 %v1626_v36  ;;  %v1475_v54 = vmul.f32 0.020408163, %v1100_v17 }
 0x1ae   : > { %v6335_v61 = vsel %vm2270_vm7, %v2918_v39, %v2914_v51  ;;  %796 = vadd.xlane.f32.xlu1 %v795_v44  ;;  %v1023_v51 = vsel %vm509_vm0, %v424_v21, 0.0 }
 0x1af   : > { %v3150_v29 = vrot.slane %v2143_v60, %v5880_v13  ;;  %v3155_v2 = vrot.slane %v2144_v37, %v5883_v14  ;;  %v1633_v3 = vpack.c.bf16 %v1476_v50, %v1475_v54  ;;  %793 = vadd.xlane.f32.xlu0 %v792_v58  ;;  %v1247_v63 = vpop.xlane.xlu1 %1246  ;;  %v1020_v37 = vsel %vm509_vm0, %v423_v12, 0.0  ;;  %v472_v54 = vld [vmem:[%s5445_s9 + $0x6d8] sm:$0xff] }
 0x1b0   : > { %v1524_v18 = vmul.f32 0.020408163, %v1247_v63  ;;  %v1244_v8 = vpop.xlane.xlu0 %1243  ;;  %v471_v63 = vld [vmem:[%s5445_s9 + $0x6d0] sm:$0xff] }
 0x1b1   : > { %v3151_v9 = vsel %vm2263_vm6, %v3150_v29, %v6148_v40  ;;  %v2157_v55 = vunpack.c.l.b16 %v1633_v3  ;;  %v2158_v32 = vunpack.c.h.b16 %v1633_v3  ;;  %v1523_v19 = vmul.f32 0.020408163, %v1244_v8 }
 0x1b2   : > { %v6346_v41 = vsel %vm2270_vm7, %v3155_v2, %v3151_v9  ;;  %838 = vadd.xlane.f32.xlu1 %v837_v7  ;;  %v1167_v9 = vsel %vm509_vm0, %v472_v54, 0.0 }
 0x1b3   : > { %v3219_v27 = vrot.slane %v2157_v55, %v5733_v23  ;;  %v3224_v20 = vrot.slane %v2158_v32, %v5736_v24  ;;  %v1657_v28 = vpack.c.bf16 %v1524_v18, %v1523_v19  ;;  %835 = vadd.xlane.f32.xlu0 %v834_v42  ;;  %v545_v57 = vpop.xlane.xlu1 %544  ;;  %v1164_v32 = vsel %vm509_vm0, %v471_v63, 0.0  ;;  %v486_v19 = vld [vmem:[%s5445_s9 + $0x748] sm:$0xff] }
 0x1b4   : > { %v1290_v40 = vmul.f32 0.020408163, %v545_v57  ;;  %v542_v30 = vpop.xlane.xlu0 %541  ;;  %v485_v57 = vld [vmem:[%s5445_s9 + $0x740] sm:$0xff] }
 0x1b5   : > { %v3220_v59 = vsel %vm2249_vm4, %v3219_v27, %v6163_v45  ;;  %v2205_v38 = vunpack.c.l.b16 %v1657_v28  ;;  %v2206_v39 = vunpack.c.h.b16 %v1657_v28  ;;  %v1289_v36 = vmul.f32 0.020408163, %v542_v30 }
 0x1b6   : > { %v6357_v44 = vsel %vm2256_vm5, %v3224_v20, %v3220_v59  ;;  %982 = vadd.xlane.f32.xlu1 %v981_v26  ;;  %v1209_v59 = vsel %vm509_vm0, %v486_v19, 0.0 }
 0x1b7   : > { %v3456_v50 = vrot.slane %v2205_v38, %v5733_v23  ;;  %v3461_v17 = vrot.slane %v2206_v39, %v5736_v24  ;;  %v1540_v58 = vpack.c.bf16 %v1290_v40, %v1289_v36  ;;  %979 = vadd.xlane.f32.xlu0 %v978_v31  ;;  %v641_v53 = vpop.xlane.xlu1 %640  ;;  %v1206_v39 = vsel %vm509_vm0, %v485_v57, 0.0  ;;  %v332_v36 = vld [vmem:[%s5445_s9 + $0x278] sm:$0xff] }
 0x1b8   : > { %v1322_v45 = vmul.f32 0.020408163, %v641_v53  ;;  %v638_v60 = vpop.xlane.xlu0 %637  ;;  %v331_v53 = vld [vmem:[%s5445_s9 + $0x270] sm:$0xff] }
 0x1b9   : > { %v3457_v52 = vsel %vm2249_vm4, %v3456_v50, %v6180_v48  ;;  %v1971_v29 = vunpack.c.l.b16 %v1540_v58  ;;  %v1972_v2 = vunpack.c.h.b16 %v1540_v58  ;;  %v1321_v3 = vmul.f32 0.020408163, %v638_v60 }
 0x1ba   : > { %v6368_v7 = vsel %vm2256_vm5, %v3461_v17, %v3457_v52  ;;  %1024 = vadd.xlane.f32.xlu1 %v1023_v51  ;;  %v747_v52 = vsel %vm509_vm0, %v332_v36, 0.0 }
 0x1bb   : > { %v2290_v18 = vrot.slane %v1971_v29, %v6266_v46  ;;  %v2297_v8 = vrot.slane %v1972_v2, %v6269_v49  ;;  %v1556_v42 = vpack.c.bf16 %v1322_v45, %v1321_v3  ;;  %1021 = vadd.xlane.f32.xlu0 %v1020_v37  ;;  %v785_v4 = vpop.xlane.xlu1 %784  ;;  %v744_v2 = vsel %vm509_vm0, %v331_v53, 0.0  ;;  %v380_v3 = vld [vmem:[%s5445_s9 + $0x3f8] sm:$0xff] }
 0x1bc   : > { %v1370_v48 = vmul.f32 0.020408163, %v785_v4  ;;  %v782_v55 = vpop.xlane.xlu0 %781  ;;  %v379_v4 = vld [vmem:[%s5445_s9 + $0x3f0] sm:$0xff] }
 0x1bd   : > { %v2292_v11 = vsel %vm2291_vm10, %v2290_v18, %v6191_v15  ;;  %v2003_v27 = vunpack.c.l.b16 %v1556_v42  ;;  %v2004_v20 = vunpack.c.h.b16 %v1556_v42  ;;  %v1369_v28 = vmul.f32 0.020408163, %v782_v55 }
 0x1be   : > { %v6379_v26 = vsel %vm2298_vm11, %v2297_v8, %v2292_v11  ;;  %1168 = vadd.xlane.f32.xlu1 %v1167_v9  ;;  %v891_v11 = vsel %vm509_vm0, %v380_v3, 0.0 }
 0x1bf   : > { %v2459_v40 = vrot.slane %v2003_v27, %v6266_v46  ;;  %v2464_v30 = vrot.slane %v2004_v20, %v6269_v49  ;;  %v1580_v31 = vpack.c.bf16 %v1370_v48, %v1369_v28  ;;  %1165 = vadd.xlane.f32.xlu0 %v1164_v32  ;;  %v827_v21 = vpop.xlane.xlu1 %826  ;;  %v888_v20 = vsel %vm509_vm0, %v379_v4, 0.0  ;;  %v394_v28 = vld [vmem:[%s5445_s9 + $0x468] sm:$0xff] }
 0x1c0   : > { %v1384_v15 = vmul.f32 0.020408163, %v827_v21  ;;  %v824_v38 = vpop.xlane.xlu0 %823  ;;  %v393_v21 = vld [vmem:[%s5445_s9 + $0x460] sm:$0xff] }
 0x1c1   : > { %v2460_v12 = vsel %vm2291_vm10, %v2459_v40, %v6202_v33  ;;  %v2051_v50 = vunpack.c.l.b16 %v1580_v31  ;;  %v2052_v17 = vunpack.c.h.b16 %v1580_v31  ;;  %v1383_v58 = vmul.f32 0.020408163, %v824_v38 }
 0x1c2   : > { %v6390_v51 = vsel %vm2298_vm11, %v2464_v30, %v2460_v12  ;;  %1210 = vadd.xlane.f32.xlu1 %v1209_v59  ;;  %v933_v12 = vsel %vm509_vm0, %v394_v28, 0.0 }
 0x1c3   : > { %v2696_v45 = vrot.slane %v2051_v50, %v6266_v46  ;;  %v2701_v60 = vrot.slane %v2052_v17, %v6269_v49  ;;  %v1587_v37 = vpack.c.bf16 %v1384_v15, %v1383_v58  ;;  %1207 = vadd.xlane.f32.xlu0 %v1206_v39  ;;  %v971_v54 = vpop.xlane.xlu1 %970  ;;  %v930_v17 = vsel %vm509_vm0, %v393_v21, 0.0  ;;  %v442_v58 = vld [vmem:[%s5445_s9 + $0x5e8] sm:$0xff] }
 0x1c4   : > { %v1432_v33 = vmul.f32 0.020408163, %v971_v54  ;;  %v968_v29 = vpop.xlane.xlu0 %967  ;;  %v441_v54 = vld [vmem:[%s5445_s9 + $0x5e0] sm:$0xff] }
 0x1c5   : > { %v2697_v63 = vsel %vm2291_vm10, %v2696_v45, %v6213_v1  ;;  %v2065_v18 = vunpack.c.l.b16 %v1587_v37  ;;  %v2066_v8 = vunpack.c.h.b16 %v1587_v37  ;;  %v1431_v42 = vmul.f32 0.020408163, %v968_v29 }
 0x1c6   : > { %v6401_v9 = vsel %vm2298_vm11, %v2701_v60, %v2697_v63  ;;  %748 = vadd.xlane.f32.xlu1 %v747_v52  ;;  %v1077_v63 = vsel %vm509_vm0, %v442_v58, 0.0 }
 0x1c7   : > { %v2765_v48 = vrot.slane %v2065_v18, %v6071_v5  ;;  %v2770_v55 = vrot.slane %v2066_v8, %v6074_v10  ;;  %v1611_v32 = vpack.c.bf16 %v1432_v33, %v1431_v42  ;;  %745 = vadd.xlane.f32.xlu0 %v744_v2  ;;  %v1013_v19 = vpop.xlane.xlu1 %1012  ;;  %v1074_v8 = vsel %vm509_vm0, %v441_v54, 0.0  ;;  %v456_v42 = vld [vmem:[%s5445_s9 + $0x658] sm:$0xff] }
 0x1c8   : > { %v1446_v1 = vmul.f32 0.020408163, %v1013_v19  ;;  %v1010_v27 = vpop.xlane.xlu0 %1009  ;;  %v455_v19 = vld [vmem:[%s5445_s9 + $0x650] sm:$0xff] }
 0x1c9   : > { %v2766_v57 = vsel %vm2277_vm8, %v2765_v48, %v6224_v22  ;;  %v2113_v40 = vunpack.c.l.b16 %v1611_v32  ;;  %v2114_v30 = vunpack.c.h.b16 %v1611_v32  ;;  %v1445_v31 = vmul.f32 0.020408163, %v1010_v27 }
 0x1ca   : > { %v6412_v59 = vsel %vm2284_vm9, %v2770_v55, %v2766_v57  ;;  %892 = vadd.xlane.f32.xlu1 %v891_v11  ;;  %v2307_v27 = vadd.s32 4294967192, %v5597_v25  ;;  %v1116_v21 = vsel %vm509_vm0, %v455_v19, 0.0 }
 0x1cb   : > { %v3002_v15 = vrot.slane %v2113_v40, %v6071_v5  ;;  %v3007_v38 = vrot.slane %v2114_v30, %v6074_v10  ;;  %v1618_v39 = vpack.c.bf16 %v1446_v1, %v1445_v31  ;;  %889 = vadd.xlane.f32.xlu0 %v888_v20  ;;  %v1157_v36 = vpop.xlane.xlu1 %1156  ;;  %v2300_v1 = vadd.s32 4294967200, %v5597_v25 }
 0x1cc   : > { %v1494_v22 = vmul.f32 0.020408163, %v1157_v36  ;;  %v1154_v50 = vpop.xlane.xlu0 %1153  ;;  %v1119_v40 = vsel %vm509_vm0, %v456_v42, 0.0  ;;  %v6453_v58 = vsub.s32 %v2307_v27, %v5602_v35 }
 0x1cd   : > { %v3003_v53 = vsel %vm2277_vm8, %v3002_v15, %v6235_v47  ;;  %v2127_v45 = vunpack.c.l.b16 %v1618_v39  ;;  %v2128_v60 = vunpack.c.h.b16 %v1618_v39  ;;  %v1493_v37 = vmul.f32 0.020408163, %v1154_v50  ;;  %v504_v15 = vld [vmem:[%s5445_s9 + $0x7d8] sm:$0xff] }
 0x1ce   : > { %v6423_v52 = vsel %vm2284_vm9, %v3007_v38, %v3003_v53  ;;  %934 = vadd.xlane.f32.xlu1 %v933_v12 }
 0x1cf   : > { %v3071_v33 = vrot.slane %v2127_v45, %v5880_v13  ;;  %v3076_v29 = vrot.slane %v2128_v60, %v5883_v14  ;;  %v1642_v2 = vpack.c.bf16 %v1494_v22, %v1493_v37  ;;  %931 = vadd.xlane.f32.xlu0 %v930_v17  ;;  %v1199_v3 = vpop.xlane.xlu1 %1198  ;;  %v503_v22 = vld [vmem:[%s5445_s9 + $0x7d0] sm:$0xff]  ;;  %v6450_v17 = vsub.s32 %v2300_v1, %v5602_v35  ;;  %v412_v1 = vld [vmem:[%s5445_s9 + $0x4f8] sm:$0xff] }
 0x1d0   : > { %v1508_v47 = vmul.f32 0.020408163, %v1199_v3  ;;  %v1196_v18 = vpop.xlane.xlu0 %1195  ;;  %v1263_v37 = vsel %vm509_vm0, %v504_v15, 0.0 }
 0x1d1   : > { %v3072_v4 = vsel %vm2263_vm6, %v3071_v33, %v6248_v62  ;;  %v2175_v48 = vunpack.c.l.b16 %v1642_v2  ;;  %v2176_v55 = vunpack.c.h.b16 %v1642_v2  ;;  %v1507_v32 = vmul.f32 0.020408163, %v1196_v18  ;;  %v364_v2 = vld [vmem:[%s5445_s9 + $0x378] sm:$0xff] }
 0x1d2   : > { %v6434_v11 = vsel %vm2270_vm7, %v3076_v29, %v3072_v4  ;;  %1078 = vadd.xlane.f32.xlu1 %v1077_v63  ;;  %v1260_v29 = vsel %vm509_vm0, %v503_v22, 0.0 }
 0x1d3   : > { %v3308_v20 = vrot.slane %v2175_v48, %v5880_v13  ;;  %v3313_v28 = vrot.slane %v2176_v55, %v5883_v14  ;;  %v1649_v57 = vpack.c.bf16 %v1508_v47, %v1507_v32  ;;  %1075 = vadd.xlane.f32.xlu0 %v1074_v8  ;;  %v599_v62 = vpop.xlane.xlu1 %598 }
 0x1d4   : > { %v1308_v30 = vmul.f32 0.020408163, %v599_v62  ;;  %v596_v31 = vpop.xlane.xlu0 %595  ;;  %v411_v62 = vld [vmem:[%s5445_s9 + $0x4f0] sm:$0xff] }
 0x1d5   : > { %v3309_v38 = vsel %vm2263_vm6, %v3308_v20, %v6263_v43  ;;  %v2189_v39 = vunpack.c.l.b16 %v1649_v57  ;;  %v2190_v36 = vunpack.c.h.b16 %v1649_v57  ;;  %v1307_v12 = vmul.f32 0.020408163, %v596_v31 }
 0x1d6   : > { %v6447_v50 = vsel %vm2270_vm7, %v3313_v28, %v3309_v38  ;;  %1120 = vadd.xlane.f32.xlu1 %v1119_v40  ;;  %v987_v38 = vsel %vm509_vm0, %v412_v1, 0.0 }
 0x1d7   : > { %v3377_v53 = vrot.slane %v2189_v39, %v5733_v23  ;;  %v3382_v43 = vrot.slane %v2190_v36, %v5736_v24  ;;  %v1549_v45 = vpack.c.bf16 %v1308_v30, %v1307_v12  ;;  %1117 = vadd.xlane.f32.xlu0 %v1116_v21  ;;  %v695_v60 = vpop.xlane.xlu1 %694  ;;  %v363_v23 = vld [vmem:[%s5445_s9 + $0x370] sm:$0xff]  ;;  %v984_v36 = vsel %vm509_vm0, %v411_v62, 0.0  ;;  %v426_v12 = vld [vmem:[%s5445_s9 + $0x568] sm:$0xff] }
 0x1d8   : > { %v1340_v54 = vmul.f32 0.020408163, %v695_v60  ;;  %v692_v33 = vpop.xlane.xlu0 %691  ;;  %v840_v19 = vsel %vm509_vm0, %v363_v23, 0.0  ;;  %v425_v60 = vld [vmem:[%s5445_s9 + $0x560] sm:$0xff] }
 0x1d9   : > { %v3378_v3 = vsel %vm2249_vm4, %v3377_v53, %v6280_v0  ;;  %v1989_v63 = vunpack.c.l.b16 %v1549_v45  ;;  %v1990_v47 = vunpack.c.h.b16 %v1549_v45  ;;  %v1339_v18 = vmul.f32 0.020408163, %v692_v33 }
 0x1da   : > { %v6464_v24 = vsel %vm2256_vm5, %v3382_v43, %v3378_v3  ;;  %1264 = vadd.xlane.f32.xlu1 %v1263_v37  ;;  %v843_v0 = vsel %vm509_vm0, %v364_v2, 0.0  ;;  %v1029_v3 = vsel %vm509_vm0, %v426_v12, 0.0  ;;  %vm3521_vm4 = vcmask 1045509  }
 0x1db   : > { %v2390_v8 = vrot.slane %v1989_v63, %v6450_v17  ;;  %v2395_v42 = vrot.slane %v1990_v47, %v6453_v58  ;;  %v1565_v4 = vpack.c.bf16 %v1340_v54, %v1339_v18  ;;  %1261 = vadd.xlane.f32.xlu0 %v1260_v29  ;;  %v737_v48 = vpop.xlane.xlu1 %736  ;;  %v1026_v47 = vsel %vm509_vm0, %v425_v60, 0.0  ;;  %v474_v18 = vld [vmem:[%s5445_s9 + $0x6e8] sm:$0xff] }
 0x1dc   : > { %v1354_v55 = vmul.f32 0.020408163, %v737_v48  ;;  %v734_v32 = vpop.xlane.xlu0 %733  ;;  %v473_v48 = vld [vmem:[%s5445_s9 + $0x6e0] sm:$0xff]  ;;  %vm3523_vm5 = vcmask 1046534  }
 0x1dd   : > { %v2391_v27 = vsel %vm2305_vm12, %v2390_v8, %v6291_v16  ;;  %v2021_v20 = vunpack.c.l.b16 %v1565_v4  ;;  %v2022_v28 = vunpack.c.h.b16 %v1565_v4  ;;  %v1353_v57 = vmul.f32 0.020408163, %v734_v32 }
 0x1de   : > { %v6475_v40 = vsel %vm2312_vm13, %v2395_v42, %v2391_v27  ;;  %844 = vadd.xlane.f32.xlu1 %v843_v0  ;;  %v1173_v27 = vsel %vm509_vm0, %v474_v18, 0.0  ;;  %v1664_v18 = vld [vmem:[%s7757_s1 + $0x8] sm:$0xff] }
 0x1df   : > { %v2548_v30 = vrot.slane %v2021_v20, %v6450_v17  ;;  %v2553_v31 = vrot.slane %v2022_v28, %v6453_v58  ;;  %v1572_v21 = vpack.c.bf16 %v1354_v55, %v1353_v57  ;;  %841 = vadd.xlane.f32.xlu0 %v840_v19  ;;  %v881_v15 = vpop.xlane.xlu1 %880  ;;  %v1170_v28 = vsel %vm509_vm0, %v473_v48, 0.0  ;;  %v488_v57 = vld [vmem:[%s5445_s9 + $0x758] sm:$0xff] }
 0x1e0   : > { %v1402_v16 = vmul.f32 0.020408163, %v881_v15  ;;  %v878_v39 = vpop.xlane.xlu0 %877  ;;  %v487_v15 = vld [vmem:[%s5445_s9 + $0x750] sm:$0xff]  ;;  %v444_v48 = vld [vmem:[%s5445_s9 + $0x5f8] sm:$0xff] }
 0x1e1   : > { %v2549_v22 = vsel %vm2305_vm12, %v2548_v30, %v6302_v56  ;;  %v2035_v53 = vunpack.c.l.b16 %v1572_v21  ;;  %v2036_v43 = vunpack.c.h.b16 %v1572_v21  ;;  %v1401_v45 = vmul.f32 0.020408163, %v878_v39 }
 0x1e2   : > { %v6486_v37 = vsel %vm2312_vm13, %v2553_v31, %v2549_v22  ;;  %988 = vadd.xlane.f32.xlu1 %v987_v38  ;;  %v1215_v22 = vsel %vm509_vm0, %v488_v57, 0.0  ;;  %v1212_v60 = vsel %vm509_vm0, %v487_v15, 0.0  ;;  %v1083_v15 = vsel %vm509_vm0, %v444_v48, 0.0  ;;  %v1680_v48 = vld [vmem:[%s7757_s1 + $0x88] sm:$0xff] }
 0x1e3   : > { %v2617_v54 = vrot.slane %v2035_v53, %v6266_v46  ;;  %v2622_v33 = vrot.slane %v2036_v43, %v6269_v49  ;;  %v1596_v29 = vpack.c.bf16 %v1402_v16, %v1401_v45  ;;  %985 = vadd.xlane.f32.xlu0 %v984_v36  ;;  %v923_v2 = vpop.xlane.xlu1 %922  ;;  %v396_v53 = vld [vmem:[%s5445_s9 + $0x478] sm:$0xff]  ;;  %v395_v43 = vld [vmem:[%s5445_s9 + $0x470] sm:$0xff] }
 0x1e4   : > { %v1416_v56 = vmul.f32 0.020408163, %v923_v2  ;;  %v920_v63 = vpop.xlane.xlu0 %919 }
 0x1e5   : > { %v2618_v23 = vsel %vm2291_vm10, %v2617_v54, %v6313_v6  ;;  %v2083_v8 = vunpack.c.l.b16 %v1596_v29  ;;  %v2084_v42 = vunpack.c.h.b16 %v1596_v29  ;;  %v1415_v4 = vmul.f32 0.020408163, %v920_v63 }
 0x1e6   : > { %v6497_v0 = vsel %vm2298_vm11, %v2622_v33, %v2618_v23  ;;  %1030 = vadd.xlane.f32.xlu1 %v1029_v3  ;;  %v936_v63 = vsel %vm509_vm0, %v395_v43, 0.0 }
 0x1e7   : > { %v2854_v55 = vrot.slane %v2083_v8, %v6266_v46  ;;  %v2859_v32 = vrot.slane %v2084_v42, %v6269_v49  ;;  %v1603_v19 = vpack.c.bf16 %v1416_v56, %v1415_v4  ;;  %1027 = vadd.xlane.f32.xlu0 %v1026_v47  ;;  %v1067_v1 = vpop.xlane.xlu1 %1066  ;;  %v939_v56 = vsel %vm509_vm0, %v396_v53, 0.0  ;;  %v1663_v47 = vld [vmem:[%s7757_s1] sm:$0xff] }
 0x1e8   : > { %v1464_v6 = vmul.f32 0.020408163, %v1067_v1  ;;  %v1064_v20 = vpop.xlane.xlu0 %1063 }
 0x1e9   : > { %v2855_v62 = vsel %vm2291_vm10, %v2854_v55, %v6324_v34  ;;  %v2097_v30 = vunpack.c.l.b16 %v1603_v19  ;;  %v2098_v31 = vunpack.c.h.b16 %v1603_v19  ;;  %v1463_v21 = vmul.f32 0.020408163, %v1064_v20 }
 0x1ea   : > { %v6508_v38 = vsel %vm2298_vm11, %v2859_v32, %v2855_v62  ;;  %1174 = vadd.xlane.f32.xlu1 %v1173_v27  ;;  %v1668_v32 = vld [vmem:[%s7757_s1 + $0x28] sm:$0xff]  ;;  %v443_v27 = vld [vmem:[%s5445_s9 + $0x5f0] sm:$0xff] }
 0x1eb   : > { %v2923_v16 = vrot.slane %v2097_v30, %v6071_v5  ;;  %v2928_v39 = vrot.slane %v2098_v31, %v6074_v10  ;;  %v1627_v36 = vpack.c.bf16 %v1464_v6, %v1463_v21  ;;  %1171 = vadd.xlane.f32.xlu0 %v1170_v28  ;;  %v1109_v12 = vpop.xlane.xlu1 %1108  ;;  %v4856_v6 = vcombine.high %v1664_v18, %v1668_v32 }
 0x1ec   : > { %v1478_v34 = vmul.f32 0.020408163, %v1109_v12  ;;  %v1106_v45 = vpop.xlane.xlu0 %1105  ;;  %v4855_v28 = vcombine.low %v1664_v18, %v1668_v32  ;;  %v1080_v43 = vsel %vm509_vm0, %v443_v27, 0.0 }
 0x1ed   : > { %v2924_v54 = vsel %vm2277_vm8, %v2923_v16, %v6335_v61  ;;  %v2145_v33 = vunpack.c.l.b16 %v1627_v36  ;;  %v2146_v29 = vunpack.c.h.b16 %v1627_v36  ;;  %v1477_v2 = vmul.f32 0.020408163, %v1106_v45  ;;  %v1667_v61 = vld [vmem:[%s7757_s1 + $0x20] sm:$0xff]  ;;  %4219 = vmatprep.subr.bf16.mxu1 %v4856_v6  ;;  %v1676_v45 = vld [vmem:[%s7757_s1 + $0x68] sm:$0xff] }
 0x1ee   : > { %v6519_v3 = vsel %vm2284_vm9, %v2928_v39, %v2924_v54  ;;  %1216 = vadd.xlane.f32.xlu1 %v1215_v22  ;;  %v4854_v55 = vcombine.high %v1663_v47, %v1667_v61  ;;  %v4853_v20 = vcombine.low %v1663_v47, %v1667_v61  ;;  %v1671_v16 = vld [vmem:[%s7757_s1 + $0x40] sm:$0xff]  ;;  %v1672_v39 = vld [vmem:[%s7757_s1 + $0x48] sm:$0xff]  ;;  %4220 = vmatpush1.bf16.msra.mxu1 %v4855_v28 }
 0x1ef   : > { %v3160_v23 = vrot.slane %v2145_v33, %v6071_v5  ;;  %v3165_v8 = vrot.slane %v2146_v29, %v6074_v10  ;;  %v1634_v42 = vpack.c.bf16 %v1478_v34, %v1477_v2  ;;  %1213 = vadd.xlane.f32.xlu0 %v1212_v60  ;;  %v1253_v4 = vpop.xlane.xlu1 %1252  ;;  %v458_v34 = vld [vmem:[%s5445_s9 + $0x668] sm:$0xff]  ;;  %v457_v33 = vld [vmem:[%s5445_s9 + $0x660] sm:$0xff]  ;;  %v4864_v2 = vcombine.high %v1672_v39, %v1676_v45 }
 0x1f0   : > { %v1526_v19 = vmul.f32 0.020408163, %v1253_v4  ;;  %v1250_v1 = vpop.xlane.xlu0 %1249  ;;  %4178 = vmatprep.subr.bf16.mxu0 %v4854_v55  ;;  %v1679_v4 = vld [vmem:[%s7757_s1 + $0x80] sm:$0xff]  ;;  %v1122_v27 = vsel %vm509_vm0, %v457_v33, 0.0  ;;  %v506_v6 = vld [vmem:[%s5445_s9 + $0x7e8] sm:$0xff] }
 0x1f1   : > { %v3161_v57 = vsel %vm2277_vm8, %v3160_v23, %v6346_v41  ;;  %v2159_v62 = vunpack.c.l.b16 %v1634_v42  ;;  %v2160_v30 = vunpack.c.h.b16 %v1634_v42  ;;  %v1525_v31 = vmul.f32 0.020408163, %v1250_v1  ;;  %v1675_v41 = vld [vmem:[%s7757_s1 + $0x60] sm:$0xff]  ;;  %4179 = vmatpush1.bf16.msra.mxu0 %v4853_v20  ;;  %4221 = vmatprep.subr.bf16.mxu1 %v4864_v2  ;;  %v1684_v20 = vld [vmem:[%s7757_s1 + $0xa8] sm:$0xff]  ;;  %v428_v2 = vld [vmem:[%s5445_s9 + $0x578] sm:$0xff] }
 0x1f2   : > { %v6542_v21 = vsel %vm2284_vm9, %v3165_v8, %v3161_v57  ;;  %940 = vadd.xlane.f32.xlu1 %v939_v56  ;;  %v4862_v29 = vcombine.high %v1671_v16, %v1675_v41  ;;  %v4861_v56 = vcombine.low %v1671_v16, %v1675_v41  ;;  %v1125_v8 = vsel %vm509_vm0, %v458_v34, 0.0  ;;  %v1688_v34 = vld [vmem:[%s7757_s1 + $0xc8] sm:$0xff] }
 0x1f3   : > { %v3229_v36 = vrot.slane %v2159_v62, %v5880_v13  ;;  %v3234_v12 = vrot.slane %v2160_v30, %v5883_v14  ;;  %v1658_v22 = vpack.c.bf16 %v1526_v19, %v1525_v31  ;;  %937 = vadd.xlane.f32.xlu0 %v936_v63  ;;  %v551_v53 = vpop.xlane.xlu1 %550  ;;  %v4863_v42 = vcombine.low %v1672_v39, %v1676_v45  ;;  %v505_v62 = vld [vmem:[%s5445_s9 + $0x7e0] sm:$0xff] }
 0x1f4   : > { %v1292_v60 = vmul.f32 0.020408163, %v551_v53  ;;  %v548_v54 = vpop.xlane.xlu0 %547  ;;  %4180 = vmatprep.subr.bf16.mxu0 %v4862_v29  ;;  %v4872_v31 = vcombine.high %v1680_v48, %v1684_v20  ;;  %v4871_v53 = vcombine.low %v1680_v48, %v1684_v20  ;;  %v1266_v29 = vsel %vm509_vm0, %v505_v62, 0.0 }
 0x1f5   : > { %v3230_v47 = vsel %vm2263_vm6, %v3229_v36, %v6357_v44  ;;  %v2207_v63 = vunpack.c.l.b16 %v1658_v22  ;;  %v2208_v61 = vunpack.c.h.b16 %v1658_v22  ;;  %v1291_v18 = vmul.f32 0.020408163, %v548_v54  ;;  %v1683_v44 = vld [vmem:[%s7757_s1 + $0xa0] sm:$0xff]  ;;  %4181 = vmatpush1.bf16.msra.mxu0 %v4861_v56  ;;  %4222 = vmatpush1.bf16.msra.mxu1 %v4863_v42  ;;  %v1692_v56 = vld [vmem:[%s7757_s1 + $0xe8] sm:$0xff] }
 0x1f6   : > { %v6565_v23 = vsel %vm2270_vm7, %v3234_v12, %v3230_v47  ;;  %1084 = vadd.xlane.f32.xlu1 %v1083_v15  ;;  %v4870_v30 = vcombine.high %v1679_v4, %v1683_v44  ;;  %v4869_v15 = vcombine.low %v1679_v4, %v1683_v44  ;;  %v1269_v22 = vsel %vm509_vm0, %v506_v6, 0.0  ;;  %4223 = vmatprep.subr.bf16.mxu1 %v4872_v31  ;;  %v1696_v6 = vld [vmem:[%s7757_s1 + $0x108] sm:$0xff]  ;;  %v476_v31 = vld [vmem:[%s5445_s9 + $0x6f8] sm:$0xff] }
 0x1f7   : > { %v3466_v55 = vrot.slane %v2207_v63, %v5880_v13  ;;  %v3471_v32 = vrot.slane %v2208_v61, %v5883_v14  ;;  %v1541_v19 = vpack.c.bf16 %v1292_v60, %v1291_v18  ;;  %1081 = vadd.xlane.f32.xlu0 %v1080_v43  ;;  %v647_v1 = vpop.xlane.xlu1 %646  ;;  %v1687_v43 = vld [vmem:[%s7757_s1 + $0xc0] sm:$0xff]  ;;  %v427_v61 = vld [vmem:[%s5445_s9 + $0x570] sm:$0xff] }
 0x1f8   : > { %v1324_v28 = vmul.f32 0.020408163, %v647_v1  ;;  %v644_v57 = vpop.xlane.xlu0 %643  ;;  %4182 = vmatprep.subr.bf16.mxu0 %v4870_v30  ;;  %v4879_v1 = vcombine.low %v1688_v34, %v1692_v56  ;;  %v1032_v30 = vsel %vm509_vm0, %v427_v61, 0.0 }
 0x1f9   : > { %v3467_v16 = vsel %vm2263_vm6, %v3466_v55, %v6368_v7  ;;  %v1973_v41 = vunpack.c.l.b16 %v1541_v19  ;;  %v1974_v39 = vunpack.c.h.b16 %v1541_v19  ;;  %v1323_v36 = vmul.f32 0.020408163, %v644_v57  ;;  %v1691_v7 = vld [vmem:[%s7757_s1 + $0xe0] sm:$0xff]  ;;  %4183 = vmatpush1.bf16.msra.mxu0 %v4869_v15  ;;  %4224 = vmatpush1.bf16.msra.mxu1 %v4871_v53  ;;  %v1700_v15 = vld [vmem:[%s7757_s1 + $0x128] sm:$0xff] }
 0x1fa   : > { %v6588_v12 = vsel %vm2270_vm7, %v3471_v32, %v3467_v16  ;;  %1126 = vadd.xlane.f32.xlu1 %v1125_v8  ;;  %v4878_v18 = vcombine.high %v1687_v43, %v1691_v7  ;;  %v4880_v8 = vcombine.high %v1688_v34, %v1692_v56  ;;  %v4877_v42 = vcombine.low %v1687_v43, %v1691_v7 }
 0x1fb   : > { %v2304_v45 = vrot.slane %v1973_v41, %v6450_v17  ;;  %v2311_v60 = vrot.slane %v1974_v39, %v6453_v58  ;;  %v1557_v54 = vpack.c.bf16 %v1324_v28, %v1323_v36  ;;  %1123 = vadd.xlane.f32.xlu0 %v1122_v27  ;;  %v791_v33 = vpop.xlane.xlu1 %790  ;;  %v1035_v19 = vsel %vm509_vm0, %v428_v2, 0.0  ;;  %v1695_v27 = vld [vmem:[%s7757_s1 + $0x100] sm:$0xff]  ;;  %v475_v39 = vld [vmem:[%s5445_s9 + $0x6f0] sm:$0xff]  ;;  %v1704_v2 = vld [vmem:[%s7757_s1 + $0x148] sm:$0xff] }
 0x1fc   : > { %v1372_v47 = vmul.f32 0.020408163, %v791_v33  ;;  %v788_v63 = vpop.xlane.xlu0 %787  ;;  %4184 = vmatprep.subr.bf16.mxu0 %v4878_v18  ;;  %4225 = vmatprep.subr.bf16.mxu1 %v4880_v8  ;;  %v4887_v33 = vcombine.low %v1696_v6, %v1700_v15  ;;  %v1176_v18 = vsel %vm509_vm0, %v475_v39, 0.0  ;;  %v490_v8 = vld [vmem:[%s5445_s9 + $0x768] sm:$0xff] }
 0x1fd   : > { %v2306_v4 = vsel %vm2305_vm12, %v2304_v45, %v6379_v26  ;;  %v2005_v44 = vunpack.c.l.b16 %v1557_v54  ;;  %v2006_v48 = vunpack.c.h.b16 %v1557_v54  ;;  %v1371_v55 = vmul.f32 0.020408163, %v788_v63  ;;  %v1699_v26 = vld [vmem:[%s7757_s1 + $0x120] sm:$0xff]  ;;  %4185 = vmatpush1.bf16.msra.mxu0 %v4877_v42  ;;  %4226 = vmatpush1.bf16.msra.mxu1 %v4879_v1  ;;  %v1708_v42 = vld [vmem:[%s7757_s1 + $0x168] sm:$0xff] }
 0x1fe   : > { %v6611_v32 = vsel %vm2312_vm13, %v2311_v60, %v2306_v4  ;;  %1270 = vadd.xlane.f32.xlu1 %v1269_v22  ;;  %v4886_v36 = vcombine.high %v1695_v27, %v1699_v26  ;;  %v4888_v22 = vcombine.high %v1696_v6, %v1700_v15  ;;  %v4885_v53 = vcombine.low %v1695_v27, %v1699_v26 }
 0x1ff   : > { %v2469_v20 = vrot.slane %v2005_v44, %v6450_v17  ;;  %v2474_v28 = vrot.slane %v2006_v48, %v6453_v58  ;;  %v1581_v57 = vpack.c.bf16 %v1372_v47, %v1371_v55  ;;  %1267 = vadd.xlane.f32.xlu0 %v1266_v29  ;;  %v833_v62 = vpop.xlane.xlu1 %832  ;;  %v1179_v54 = vsel %vm509_vm0, %v476_v31, 0.0  ;;  %v1703_v29 = vld [vmem:[%s7757_s1 + $0x140] sm:$0xff]  ;;  %v1712_v31 = vld [vmem:[%s7757_s1 + $0x188] sm:$0xff] }
 0x200   : > { %v1386_v16 = vmul.f32 0.020408163, %v833_v62  ;;  %v830_v41 = vpop.xlane.xlu0 %829  ;;  %4186 = vmatprep.subr.bf16.mxu0 %v4886_v36  ;;  %4227 = vmatprep.subr.bf16.mxu1 %v4888_v22  ;;  %v489_v48 = vld [vmem:[%s5445_s9 + $0x760] sm:$0xff]  ;;  %v4895_v62 = vcombine.low %v1704_v2, %v1708_v42  ;;  %v460_v22 = vld [vmem:[%s5445_s9 + $0x678] sm:$0xff] }
 0x201   : > { %v2470_v43 = vsel %vm2305_vm12, %v2469_v20, %v6390_v51  ;;  %v2053_v7 = vunpack.c.l.b16 %v1581_v57  ;;  %v2054_v34 = vunpack.c.h.b16 %v1581_v57  ;;  %v1385_v45 = vmul.f32 0.020408163, %v830_v41  ;;  %v1707_v51 = vld [vmem:[%s7757_s1 + $0x160] sm:$0xff]  ;;  %4187 = vmatpush1.bf16.msra.mxu0 %v4885_v53  ;;  %4228 = vmatpush1.bf16.msra.mxu1 %v4887_v33  ;;  %v459_v53 = vld [vmem:[%s5445_s9 + $0x670] sm:$0xff] }
 0x202   : > { %v6634_v60 = vsel %vm2312_vm13, %v2474_v28, %v2470_v43  ;;  %1036 = vadd.xlane.f32.xlu1 %v1035_v19  ;;  %v4894_v55 = vcombine.high %v1703_v29, %v1707_v51  ;;  %v4896_v19 = vcombine.high %v1704_v2, %v1708_v42  ;;  %v4893_v1 = vcombine.low %v1703_v29, %v1707_v51  ;;  %v1716_v43 = vld [vmem:[%s7757_s1 + $0x1a8] sm:$0xff]  ;;  %v1719_v42 = vld [vmem:[%s7757_s1 + $0x1c0] sm:$0xff] }
 0x203   : > { %v2706_v56 = vrot.slane %v2053_v7, %v6450_v17  ;;  %v2711_v47 = vrot.slane %v2054_v34, %v6453_v58  ;;  %v1588_v63 = vpack.c.bf16 %v1386_v16, %v1385_v45  ;;  %1033 = vadd.xlane.f32.xlu0 %v1032_v30  ;;  %v977_v61 = vpop.xlane.xlu1 %976  ;;  %v1221_v57 = vsel %vm509_vm0, %v490_v8, 0.0  ;;  %v1711_v30 = vld [vmem:[%s7757_s1 + $0x180] sm:$0xff]  ;;  %v508_v45 = vld [vmem:[%s5445_s9 + $0x7f8] sm:$0xff] }
 0x204   : > { %v1434_v4 = vmul.f32 0.020408163, %v977_v61  ;;  %v974_v44 = vpop.xlane.xlu0 %973  ;;  %4188 = vmatprep.subr.bf16.mxu0 %v4894_v55  ;;  %v1218_v36 = vsel %vm509_vm0, %v489_v48, 0.0  ;;  %4229 = vmatprep.subr.bf16.mxu1 %v4896_v19  ;;  %v4904_v33 = vcombine.high %v1712_v31, %v1716_v43  ;;  %v1131_v61 = vsel %vm509_vm0, %v460_v22, 0.0 }
 0x205   : > { %v2707_v27 = vsel %vm2305_vm12, %v2706_v56, %v6401_v9  ;;  %v2067_v26 = vunpack.c.l.b16 %v1588_v63  ;;  %v2068_v6 = vunpack.c.h.b16 %v1588_v63  ;;  %v1433_v20 = vmul.f32 0.020408163, %v974_v44  ;;  %v1715_v9 = vld [vmem:[%s7757_s1 + $0x1a0] sm:$0xff]  ;;  %4189 = vmatpush1.bf16.msra.mxu0 %v4893_v1  ;;  %4230 = vmatpush1.bf16.msra.mxu1 %v4895_v62 }
 0x206   : > { %v6657_v28 = vsel %vm2312_vm13, %v2711_v47, %v2707_v27  ;;  %1180 = vadd.xlane.f32.xlu1 %v1179_v54  ;;  %v4902_v54 = vcombine.high %v1711_v30, %v1715_v9  ;;  %v4901_v29 = vcombine.low %v1711_v30, %v1715_v9  ;;  %v4903_v8 = vcombine.low %v1712_v31, %v1716_v43  ;;  %v507_v27 = vld [vmem:[%s5445_s9 + $0x7f0] sm:$0xff]  ;;  %v1727_v43 = vld [vmem:[%s7757_s1 + $0x200] sm:$0xff] }
 0x207   : > { %v2775_v15 = vrot.slane %v2067_v26, %v6266_v46  ;;  %v2780_v16 = vrot.slane %v2068_v6, %v6269_v49  ;;  %v1612_v41 = vpack.c.bf16 %v1434_v4, %v1433_v20  ;;  %1177 = vadd.xlane.f32.xlu0 %v1176_v18  ;;  %v1019_v39 = vpop.xlane.xlu1 %1018  ;;  %v1128_v18 = vsel %vm509_vm0, %v459_v53, 0.0  ;;  %v1720_v4 = vld [vmem:[%s7757_s1 + $0x1c8] sm:$0xff]  ;;  %4231 = vmatprep.subr.bf16.mxu1 %v4904_v33 }
 0x208   : > { %v1448_v7 = vmul.f32 0.020408163, %v1019_v39  ;;  %v1016_v34 = vpop.xlane.xlu0 %1015  ;;  %4190 = vmatprep.subr.bf16.mxu0 %v4902_v54  ;;  %v1275_v1 = vsel %vm509_vm0, %v508_v45, 0.0  ;;  %v1724_v26 = vld [vmem:[%s7757_s1 + $0x1e8] sm:$0xff]  ;;  %v2314_v22 = vadd.s32 4294967184, %v5597_v25 }
 0x209   : > { %v2776_v51 = vsel %vm2291_vm10, %v2775_v15, %v6412_v59  ;;  %v2115_v2 = vunpack.c.l.b16 %v1612_v41  ;;  %v2116_v56 = vunpack.c.h.b16 %v1612_v41  ;;  %v1447_v47 = vmul.f32 0.020408163, %v1016_v34  ;;  %v1723_v59 = vld [vmem:[%s7757_s1 + $0x1e0] sm:$0xff]  ;;  %4191 = vmatpush1.bf16.msra.mxu0 %v4901_v29  ;;  %4232 = vmatpush1.bf16.msra.mxu1 %v4903_v8 }
 0x20a   : > { %v6681_v63 = vsel %vm2298_vm11, %v2780_v16, %v2776_v51  ;;  %1222 = vadd.xlane.f32.xlu1 %v1221_v57  ;;  %v492_v57 = vld [vmem:[%s5445_s9 + $0x778] sm:$0xff]  ;;  %v4910_v62 = vcombine.high %v1719_v42, %v1723_v59  ;;  %v4912_v30 = vcombine.high %v1720_v4, %v1724_v26  ;;  %v4909_v9 = vcombine.low %v1719_v42, %v1723_v59  ;;  %v1732_v51 = vld [vmem:[%s7757_s1 + $0x228] sm:$0xff] }
 0x20b   : > { %v3012_v44 = vrot.slane %v2115_v2, %v6266_v46  ;;  %v3017_v48 = vrot.slane %v2116_v56, %v6269_v49  ;;  %v1619_v55 = vpack.c.bf16 %v1448_v7, %v1447_v47  ;;  %1219 = vadd.xlane.f32.xlu0 %v1218_v36  ;;  %v1163_v19 = vpop.xlane.xlu1 %1162  ;;  %v1272_v36 = vsel %vm509_vm0, %v507_v27, 0.0  ;;  %v1728_v7 = vld [vmem:[%s7757_s1 + $0x208] sm:$0xff]  ;;  %v491_v47 = vld [vmem:[%s5445_s9 + $0x770] sm:$0xff]  ;;  %s4786_s9 = sshll.u32 %s235_s30, 4  ;;  %s7716_s9 = int_to_ptr.vmem [resolvable:$true] %s4786_s9 }
 0x20c   : > { %v1496_v6 = vmul.f32 0.020408163, %v1163_v19  ;;  %v1160_v20 = vpop.xlane.xlu0 %1159  ;;  %4192 = vmatprep.subr.bf16.mxu0 %v4910_v62  ;;  %v4911_v53 = vcombine.low %v1720_v4, %v1724_v26  ;;  %v1227_v29 = vsel %vm509_vm0, %v492_v57, 0.0  ;;  %4233 = vmatprep.subr.bf16.mxu1 %v4912_v30  ;;  %v4920_v8 = vcombine.high %v1728_v7, %v1732_v51  ;;  %v1735_v26 = vld [vmem:[%s7757_s1 + $0x240] sm:$0xff]  ;;  %v1740_v30 = vld [vmem:[%s7757_s1 + $0x268] sm:$0xff]  ;;  %s5298_s11 = scalar_lea.vmem %s7716_s9, 128  ;;  %p5305_p0 = scmp.lt.s32.totalorder %s7716_s9, %s5303_s12 }
 0x20d   : > { %v3013_v31 = vsel %vm2291_vm10, %v3012_v44, %v6423_v52  ;;  %v2129_v15 = vunpack.c.l.b16 %v1619_v55  ;;  %v2130_v16 = vunpack.c.h.b16 %v1619_v55  ;;  %v1495_v41 = vmul.f32 0.020408163, %v1160_v20  ;;  %v1731_v52 = vld [vmem:[%s7757_s1 + $0x220] sm:$0xff]  ;;  %4193 = vmatpush1.bf16.msra.mxu0 %v4909_v9  ;;  %p5299_p11 = scmp.ne.s32.totalorder %s7716_s9, %s5298_s11  ;;  %p5306_p1 = scmp.lt.s32.totalorder %s5304_s13, %s5298_s11 }
 0x20e   : > { %v6705_v39 = vsel %vm2298_vm11, %v3017_v48, %v3013_v31  ;;  %1132 = vadd.xlane.f32.xlu1 %v1131_v61  ;;  %4234 = vmatpush1.bf16.msra.mxu1 %v4911_v53  ;;  %v4918_v61 = vcombine.high %v1727_v43, %v1731_v52  ;;  %v4917_v42 = vcombine.low %v1727_v43, %v1731_v52  ;;  %v2321_v19 = vadd.s32 4294967176, %v5597_v25 }
 0x20f   : > { %v3081_v34 = vrot.slane %v2129_v15, %v6071_v5  ;;  %v3086_v45 = vrot.slane %v2130_v16, %v6074_v10  ;;  %v1643_v54 = vpack.c.bf16 %v1496_v6, %v1495_v41  ;;  %1129 = vadd.xlane.f32.xlu0 %v1128_v18  ;;  %v1205_v33 = vpop.xlane.xlu1 %1204  ;;  %v6731_v55 = vsub.s32 %v2314_v22, %v5602_v35  ;;  %v1736_v6 = vld [vmem:[%s7757_s1 + $0x248] sm:$0xff]  ;;  %p5300_p12 = pnand %p5299_p11, %p5431_p5  ;;  %p5307_p2 = por %p5306_p1, %p5305_p0 }
 0x210   : > { %v1510_v2 = vmul.f32 0.020408163, %v1205_v33  ;;  %v1202_v56 = vpop.xlane.xlu0 %1201  ;;  %4194 = vmatprep.subr.bf16.mxu0 %v4918_v61  ;;  %v4919_v27 = vcombine.low %v1728_v7, %v1732_v51  ;;  %v1224_v62 = vsel %vm509_vm0, %v491_v47, 0.0  ;;  %4235 = vmatprep.subr.bf16.mxu1 %v4920_v8  ;;  %v4928_v16 = vcombine.high %v1736_v6, %v1740_v30 }
 0x211   : > { %v3082_v59 = vsel %vm2277_vm8, %v3081_v34, %v6434_v11  ;;  %v2177_v18 = vunpack.c.l.b16 %v1643_v54  ;;  %v2178_v4 = vunpack.c.h.b16 %v1643_v54  ;;  %v1509_v44 = vmul.f32 0.020408163, %v1202_v56  ;;  %v1739_v11 = vld [vmem:[%s7757_s1 + $0x260] sm:$0xff]  ;;  %4195 = vmatpush1.bf16.msra.mxu0 %v4917_v42  ;;  %v1744_v54 = vld [vmem:[%s7757_s1 + $0x288] sm:$0xff]  ;;  %p5301_p13 = pneg %p5300_p12 }
 0x212   : > { %v6728_v48 = vsel %vm2284_vm9, %v3086_v45, %v3082_v59  ;;  %1276 = vadd.xlane.f32.xlu1 %v1275_v1  ;;  %4236 = vmatpush1.bf16.msra.mxu1 %v4919_v27  ;;  %v4926_v15 = vcombine.high %v1735_v26, %v1739_v11  ;;  %v4925_v41 = vcombine.low %v1735_v26, %v1739_v11  ;;  %v1743_v45 = vld [vmem:[%s7757_s1 + $0x280] sm:$0xff]  ;;  %v1748_v56 = vld [vmem:[%s7757_s1 + $0x2a8] sm:$0xff]  ;;  %vm3513_vm0 = vcmask 1041409  }
 0x213   : > { %v3318_v1 = vrot.slane %v2177_v18, %v6071_v5  ;;  %v3323_v20 = vrot.slane %v2178_v4, %v6074_v10  ;;  %v1650_v57 = vpack.c.bf16 %v1510_v2, %v1509_v44  ;;  %1273 = vadd.xlane.f32.xlu0 %v1272_v36  ;;  %v605_v25 = vpop.xlane.xlu1 %604  ;;  %v6755_v7 = vsub.s32 %v2321_v19, %v5602_v35  ;;  %v1751_v27 = vld [vmem:[%s7757_s1 + $0x2c0] sm:$0xff]  ;;  %p5308_p3 = pnand %p5307_p2, %p5301_p13 }
 0x214   : > { %v1310_v9 = vmul.f32 0.020408163, %v605_v25  ;;  %v602_v31 = vpop.xlane.xlu0 %601  ;;  %4196 = vmatprep.subr.bf16.mxu0 %v4926_v15  ;;  %v4927_v34 = vcombine.low %v1736_v6, %v1740_v30  ;;  %4237 = vmatprep.subr.bf16.mxu1 %v4928_v16  ;;  %v4936_v42 = vcombine.high %v1744_v54, %v1748_v56  ;;  %v4935_v19 = vcombine.low %v1744_v54, %v1748_v56  ;;  %v1755_v26 = vld [vmem:[%s7757_s1 + $0x2e0] sm:$0xff]  ;;  %v1756_v25 = vld [vmem:[%s7757_s1 + $0x2e8] sm:$0xff] }
 0x215   : > { %v3319_v22 = vsel %vm2277_vm8, %v3318_v1, %v6447_v50  ;;  %v2191_v53 = vunpack.c.l.b16 %v1650_v57  ;;  %v2192_v36 = vunpack.c.h.b16 %v1650_v57  ;;  %v1309_v43 = vmul.f32 0.020408163, %v602_v31  ;;  %v1747_v50 = vld [vmem:[%s7757_s1 + $0x2a0] sm:$0xff]  ;;  %4197 = vmatpush1.bf16.msra.mxu0 %v4925_v41 }
 0x216   : > { %v6752_v52 = vsel %vm2284_vm9, %v3323_v20, %v3319_v22  ;;  %1228 = vadd.xlane.f32.xlu1 %v1227_v29  ;;  %4238 = vmatpush1.bf16.msra.mxu1 %v4927_v34  ;;  %v4934_v8 = vcombine.high %v1743_v45, %v1747_v50  ;;  %v4933_v59 = vcombine.low %v1743_v45, %v1747_v50  ;;  %v1763_v34 = vld [vmem:[%s7757_s1 + $0x320] sm:$0xff] }
 0x217   : > { %v3387_v33 = vrot.slane %v2191_v53, %v5880_v13  ;;  %v3392_v51 = vrot.slane %v2192_v36, %v5883_v14  ;;  %v1550_v2 = vpack.c.bf16 %v1310_v9, %v1309_v43  ;;  %1225 = vadd.xlane.f32.xlu0 %v1224_v62  ;;  %v701_v29 = vpop.xlane.xlu1 %700  ;;  %4239 = vmatprep.subr.bf16.mxu1 %v4936_v42  ;;  %v1759_v43 = vld [vmem:[%s7757_s1 + $0x300] sm:$0xff] }
 0x218   : > { %v1342_v47 = vmul.f32 0.020408163, %v701_v29  ;;  %v698_v61 = vpop.xlane.xlu0 %697  ;;  %4198 = vmatprep.subr.bf16.mxu0 %v4934_v8  ;;  %v4942_v57 = vcombine.high %v1751_v27, %v1755_v26  ;;  %v4941_v31 = vcombine.low %v1751_v27, %v1755_v26  ;;  %v1768_v27 = vld [vmem:[%s7757_s1 + $0x348] sm:$0xff] }
 0x219   : > { %v3388_v13 = vsel %vm2263_vm6, %v3387_v33, %v6464_v24  ;;  %v1991_v18 = vunpack.c.l.b16 %v1550_v2  ;;  %v1992_v14 = vunpack.c.h.b16 %v1550_v2  ;;  %v1341_v4 = vmul.f32 0.020408163, %v698_v61  ;;  %v1752_v24 = vld [vmem:[%s7757_s1 + $0x2c8] sm:$0xff]  ;;  %4199 = vmatpush1.bf16.msra.mxu0 %v4933_v59 }
 0x21a   : > { %v6774_v44 = vsel %vm2270_vm7, %v3392_v51, %v3388_v13  ;;  %4240 = vmatpush1.bf16.msra.mxu1 %v4935_v19  ;;  %v4944_v9 = vcombine.high %v1752_v24, %v1756_v25  ;;  %v4943_v15 = vcombine.low %v1752_v24, %v1756_v25  ;;  %4200 = vmatprep.subr.bf16.mxu0 %v4942_v57  ;;  %v1764_v2 = vld [vmem:[%s7757_s1 + $0x328] sm:$0xff]  ;;  %v1771_v19 = vld [vmem:[%s7757_s1 + $0x360] sm:$0xff]  ;;  %vm3525_vm6 = vcmask 1047559  }
 0x21b   : > { %v2400_v11 = vrot.slane %v1991_v18, %v6731_v55  ;;  %v2405_v6 = vrot.slane %v1992_v14, %v6755_v7  ;;  %v1566_v1 = vpack.c.bf16 %v1342_v47, %v1341_v4  ;;  %v743_v20 = vpop.xlane.xlu1 %742  ;;  %v4950_v51 = vcombine.high %v1759_v43, %v1763_v34  ;;  %v1767_v4 = vld [vmem:[%s7757_s1 + $0x340] sm:$0xff] }
 0x21c   : > { %v1356_v62 = vmul.f32 0.020408163, %v743_v20  ;;  %v740_v30 = vpop.xlane.xlu0 %739  ;;  %4241 = vmatprep.subr.bf16.mxu1 %v4944_v9  ;;  %v4949_v61 = vcombine.low %v1759_v43, %v1763_v34  ;;  %v4958_v25 = vcombine.high %v1767_v4, %v1771_v19  ;;  %vm4770_vm7 = vcmask 80896  }
 0x21d   : > { %v2401_v16 = vsel %vm2319_vm14, %v2400_v11, %v6475_v40  ;;  %v2023_v41 = vunpack.c.l.b16 %v1566_v1  ;;  %v2024_v22 = vunpack.c.h.b16 %v1566_v1  ;;  %v1355_v53 = vmul.f32 0.020408163, %v740_v30  ;;  %v1760_v40 = vld [vmem:[%s7757_s1 + $0x308] sm:$0xff]  ;;  %4201 = vmatpush1.bf16.msra.mxu0 %v4941_v31 }
 0x21e   : > { %v2406_v36 = vsel %vm2326_vm15, %v2405_v6, %v2401_v16  ;;  %4242 = vmatpush1.bf16.msra.mxu1 %v4943_v15  ;;  %v4952_v47 = vcombine.high %v1760_v40, %v1764_v2  ;;  %v4951_v8 = vcombine.low %v1760_v40, %v1764_v2  ;;  %4202 = vmatprep.subr.bf16.mxu0 %v4950_v51  ;;  %v1772_v1 = vld [vmem:[%s7757_s1 + $0x368] sm:$0xff] }
 0x21f   : > { %v2558_v45 = vrot.slane %v2023_v41, %v6731_v55  ;;  %v2563_v50 = vrot.slane %v2024_v22, %v6755_v7  ;;  %v1573_v54 = vpack.c.bf16 %v1356_v62, %v1355_v53  ;;  %v887_v33 = vpop.xlane.xlu1 %886  ;;  %v4960_v62 = vcombine.high %v1768_v27, %v1772_v1  ;;  %v1775_v53 = vld [vmem:[%s7757_s1 + $0x380] sm:$0xff] }
 0x220   : > { %v1404_v29 = vmul.f32 0.020408163, %v887_v33  ;;  %v884_v56 = vpop.xlane.xlu0 %883  ;;  %4243 = vmatprep.subr.bf16.mxu1 %v4952_v47  ;;  %v4957_v30 = vcombine.low %v1767_v4, %v1771_v19  ;;  %v4959_v22 = vcombine.low %v1768_v27, %v1772_v1 }
 0x221   : > { %v2559_v42 = vsel %vm2319_vm14, %v2558_v45, %v6486_v37  ;;  %v2037_v59 = vunpack.c.l.b16 %v1573_v54  ;;  %v2038_v13 = vunpack.c.h.b16 %v1573_v54  ;;  %v1403_v18 = vmul.f32 0.020408163, %v884_v56  ;;  %4203 = vmatpush1.bf16.msra.mxu0 %v4949_v61  ;;  %v1780_v54 = vld [vmem:[%s7757_s1 + $0x3a8] sm:$0xff] }
 0x222   : > { %v2564_v14 = vsel %vm2326_vm15, %v2563_v50, %v2559_v42  ;;  %4244 = vmatpush1.bf16.msra.mxu1 %v4951_v8  ;;  %4204 = vmatprep.subr.bf16.mxu0 %v4958_v25 }
 0x223   : > { %v6820_v37 = vsel %vm3513_vm0, %v2564_v14, %v2406_v36  ;;  %v2627_v26 = vrot.slane %v2037_v59, %v6450_v17  ;;  %v2632_v24 = vrot.slane %v2038_v13, %v6453_v58  ;;  %v1597_v11 = vpack.c.bf16 %v1404_v29, %v1403_v18  ;;  %v929_v6 = vpop.xlane.xlu1 %928  ;;  %4245 = vmatprep.subr.bf16.mxu1 %v4960_v62  ;;  %v1779_v36 = vld [vmem:[%s7757_s1 + $0x3a0] sm:$0xff] }
 0x224   : > { %v1418_v20 = vmul.f32 0.020408163, %v929_v6  ;;  %v926_v57 = vpop.xlane.xlu0 %925  ;;  %v4966_v50 = vcombine.high %v1775_v53, %v1779_v36  ;;  %v4965_v29 = vcombine.low %v1775_v53, %v1779_v36  ;;  %v1783_v13 = vld [vmem:[%s7757_s1 + $0x3c0] sm:$0xff] }
 0x225   : > { %v2628_v9 = vsel %vm2305_vm12, %v2627_v26, %v6497_v0  ;;  %v2085_v31 = vunpack.c.l.b16 %v1597_v11  ;;  %v2086_v15 = vunpack.c.h.b16 %v1597_v11  ;;  %v1417_v16 = vmul.f32 0.020408163, %v926_v57  ;;  %v1776_v0 = vld [vmem:[%s7757_s1 + $0x388] sm:$0xff]  ;;  %4205 = vmatpush1.bf16.msra.mxu0 %v4957_v30  ;;  %v1787_v18 = vld [vmem:[%s7757_s1 + $0x3e0] sm:$0xff] }
 0x226   : > { %v6830_v41 = vsel %vm2312_vm13, %v2632_v24, %v2628_v9  ;;  %4246 = vmatpush1.bf16.msra.mxu1 %v4959_v22  ;;  %v4968_v2 = vcombine.high %v1776_v0, %v1780_v54  ;;  %v4967_v56 = vcombine.low %v1776_v0, %v1780_v54  ;;  %4206 = vmatprep.subr.bf16.mxu0 %v4966_v50  ;;  %v1788_v24 = vld [vmem:[%s7757_s1 + $0x3e8] sm:$0xff] }
 0x227   : > { %v2864_v43 = vrot.slane %v2085_v31, %v6450_v17  ;;  %v2869_v34 = vrot.slane %v2086_v15, %v6453_v58  ;;  %v1604_v40 = vpack.c.bf16 %v1418_v20, %v1417_v16  ;;  %v1073_v45 = vpop.xlane.xlu1 %1072  ;;  %v4974_v26 = vcombine.high %v1783_v13, %v1787_v18  ;;  %v6873_v15 = vld [vmem:[%s7757_s1 + $0x10] sm:$0xff] }
 0x228   : > { %v1466_v33 = vmul.f32 0.020408163, %v1073_v45  ;;  %v1070_v51 = vpop.xlane.xlu0 %1069  ;;  %4247 = vmatprep.subr.bf16.mxu1 %v4968_v2  ;;  %v4973_v20 = vcombine.low %v1783_v13, %v1787_v18  ;;  %v6878_v16 = vld [vmem:[%s7757_s1 + $0x30] sm:$0xff] }
 0x229   : > { %v2865_v47 = vsel %vm2305_vm12, %v2864_v43, %v6508_v38  ;;  %v2099_v61 = vunpack.c.l.b16 %v1604_v40  ;;  %v2100_v8 = vunpack.c.h.b16 %v1604_v40  ;;  %v1465_v42 = vmul.f32 0.020408163, %v1070_v51  ;;  %v1784_v38 = vld [vmem:[%s7757_s1 + $0x3c8] sm:$0xff]  ;;  %4207 = vmatpush1.bf16.msra.mxu0 %v4965_v29 }
 0x22a   : > { %v6849_v59 = vsel %vm2312_vm13, %v2869_v34, %v2865_v47  ;;  %4248 = vmatpush1.bf16.msra.mxu1 %v4967_v56  ;;  %v4976_v1 = vcombine.high %v1784_v38, %v1788_v24  ;;  %v4975_v57 = vcombine.low %v1784_v38, %v1788_v24  ;;  %4208 = vmatprep.subr.bf16.mxu0 %v4974_v26  ;;  %v6892_v34 = vld [vmem:[%s7757_s1 + $0x38] sm:$0xff] }
 0x22b   : > { %v2933_v14 = vrot.slane %v2099_v61, %v6266_v46  ;;  %v2938_v4 = vrot.slane %v2100_v8, %v6269_v49  ;;  %v1628_v19 = vpack.c.bf16 %v1466_v33, %v1465_v42  ;;  %v1115_v27 = vpop.xlane.xlu1 %1114  ;;  %v4857_v43 = vcombine.low %v6873_v15, %v6878_v16 }
 0x22c   : > { %v1480_v11 = vmul.f32 0.020408163, %v1115_v27  ;;  %v1112_v6 = vpop.xlane.xlu0 %1111  ;;  %4249 = vmatprep.subr.bf16.mxu1 %v4976_v1  ;;  %v4858_v50 = vcombine.high %v6873_v15, %v6878_v16  ;;  %v1693_v15 = vld [vmem:[%s7757_s1 + $0xf0] sm:$0xff]  ;;  %v1690_v16 = vld [vmem:[%s7757_s1 + $0xd8] sm:$0xff] }
 0x22d   : > { %v2934_v25 = vsel %vm2291_vm10, %v2933_v14, %v6519_v3  ;;  %v2147_v62 = vunpack.c.l.b16 %v1628_v19  ;;  %v2148_v30 = vunpack.c.h.b16 %v1628_v19  ;;  %v1479_v9 = vmul.f32 0.020408163, %v1112_v6  ;;  %v6883_v3 = vld [vmem:[%s7757_s1 + $0x18] sm:$0xff]  ;;  %4209 = vmatpush1.bf16.msra.mxu0 %v4973_v20 }
 0x22e   : > { %v6868_v31 = vsel %vm2298_vm11, %v2938_v4, %v2934_v25  ;;  %4250 = vmatpush1.bf16.msra.mxu1 %v4975_v57  ;;  %v4859_v54 = vcombine.low %v6883_v3, %v6892_v34  ;;  %v4860_v33 = vcombine.high %v6883_v3, %v6892_v34  ;;  %4260 = vmatprep.subr.bf16.mxu0 %v4858_v50  ;;  %v1694_v3 = vld [vmem:[%s7757_s1 + $0xf8] sm:$0xff] }
 0x22f   : > { %v3170_v22 = vrot.slane %v2147_v62, %v6266_v46  ;;  %v3175_v53 = vrot.slane %v2148_v30, %v6269_v49  ;;  %v1635_v36 = vpack.c.bf16 %v1480_v11, %v1479_v9  ;;  %v1259_v0 = vpop.xlane.xlu1 %1258 }
 0x230   : > { %v1528_v40 = vmul.f32 0.020408163, %v1259_v0  ;;  %v1256_v45 = vpop.xlane.xlu0 %1255  ;;  %4301 = vmatprep.subr.bf16.mxu1 %v4860_v33 }
 0x231   : > { %v3171_v51 = vsel %vm2291_vm10, %v3170_v22, %v6542_v21  ;;  %v2161_v2 = vunpack.c.l.b16 %v1635_v36  ;;  %v2162_v29 = vunpack.c.h.b16 %v1635_v36  ;;  %v1527_v56 = vmul.f32 0.020408163, %v1256_v45 }
 0x232   : > { %v6903_v47 = vsel %vm2298_vm11, %v3175_v53, %v3171_v51 }
 0x233   : > { %v3239_v61 = vrot.slane %v2161_v2, %v6071_v5  ;;  %v3244_v8 = vrot.slane %v2162_v29, %v6074_v10  ;;  %v1659_v42 = vpack.c.bf16 %v1528_v40, %v1527_v56  ;;  %v557_v13 = vpop.xlane.xlu1 %556 }
 0x234   : > { %v1294_v18 = vmul.f32 0.020408163, %v557_v13  ;;  %v554_v38 = vpop.xlane.xlu0 %553 }
 0x235   : > { %v3240_v14 = vsel %vm2277_vm8, %v3239_v61, %v6565_v23  ;;  %v2209_v21 = vunpack.c.l.b16 %v1659_v42  ;;  %v2210_v4 = vunpack.c.h.b16 %v1659_v42  ;;  %v1293_v19 = vmul.f32 0.020408163, %v554_v38 }
 0x236   : > { %v6910_v27 = vsel %vm2284_vm9, %v3244_v8, %v3240_v14 }
 0x237   : > { %v3476_v26 = vrot.slane %v2209_v21, %v6071_v5  ;;  %v3481_v24 = vrot.slane %v2210_v4, %v6074_v10  ;;  %v1542_v11 = vpack.c.bf16 %v1294_v18, %v1293_v19  ;;  %v653_v6 = vpop.xlane.xlu1 %652 }
 0x238   : > { %v1326_v1 = vmul.f32 0.020408163, %v653_v6  ;;  %v650_v20 = vpop.xlane.xlu0 %649 }
 0x239   : > { %v3477_v57 = vsel %vm2277_vm8, %v3476_v26, %v6588_v12  ;;  %v1975_v25 = vunpack.c.l.b16 %v1542_v11  ;;  %v1976_v62 = vunpack.c.h.b16 %v1542_v11  ;;  %v1325_v23 = vmul.f32 0.020408163, %v650_v20 }
 0x23a   : > { %v6917_v30 = vsel %vm2284_vm9, %v3481_v24, %v3477_v57 }
 0x23b   : > { %v2318_v9 = vrot.slane %v1975_v25, %v6731_v55  ;;  %v2325_v22 = vrot.slane %v1976_v62, %v6755_v7  ;;  %v1558_v53 = vpack.c.bf16 %v1326_v1, %v1325_v23  ;;  %v797_v36 = vpop.xlane.xlu1 %796 }
 0x23c   : > { %v1374_v0 = vmul.f32 0.020408163, %v797_v36  ;;  %v794_v40 = vpop.xlane.xlu0 %793 }
 0x23d   : > { %v2320_v45 = vsel %vm2319_vm14, %v2318_v9, %v6611_v32  ;;  %v2007_v50 = vunpack.c.l.b16 %v1558_v53  ;;  %v2008_v33 = vunpack.c.h.b16 %v1558_v53  ;;  %v1373_v12 = vmul.f32 0.020408163, %v794_v40 }
 0x23e   : > { %v2327_v51 = vsel %vm2326_vm15, %v2325_v22, %v2320_v45 }
 0x23f   : > { %v2479_v2 = vrot.slane %v2007_v50, %v6731_v55  ;;  %v2484_v29 = vrot.slane %v2008_v33, %v6755_v7  ;;  %v1582_v56 = vpack.c.bf16 %v1374_v0, %v1373_v12  ;;  %v839_v61 = vpop.xlane.xlu1 %838 }
 0x240   : > { %v1388_v8 = vmul.f32 0.020408163, %v839_v61  ;;  %v836_v42 = vpop.xlane.xlu0 %835 }
 0x241   : > { %v2480_v13 = vsel %vm2319_vm14, %v2479_v2, %v6634_v60  ;;  %v2055_v18 = vunpack.c.l.b16 %v1582_v56  ;;  %v2056_v38 = vunpack.c.h.b16 %v1582_v56  ;;  %v1387_v14 = vmul.f32 0.020408163, %v836_v42 }
 0x242   : > { %v2485_v32 = vsel %vm2326_vm15, %v2484_v29, %v2480_v13 }
 0x243   : > { %v6930_v21 = vsel %vm3513_vm0, %v2485_v32, %v2327_v51  ;;  %v2716_v4 = vrot.slane %v2055_v18, %v6731_v55  ;;  %v2721_v19 = vrot.slane %v2056_v38, %v6755_v7  ;;  %v1589_v26 = vpack.c.bf16 %v1388_v8, %v1387_v14  ;;  %v983_v24 = vpop.xlane.xlu1 %982 }
 0x244   : > { %v1436_v11 = vmul.f32 0.020408163, %v983_v24  ;;  %v980_v6 = vpop.xlane.xlu0 %979 }
 0x245   : > { %v2717_v60 = vsel %vm2319_vm14, %v2716_v4, %v6657_v28  ;;  %v2069_v1 = vunpack.c.l.b16 %v1589_v26  ;;  %v2070_v20 = vunpack.c.h.b16 %v1589_v26  ;;  %v1435_v57 = vmul.f32 0.020408163, %v980_v6 }
 0x246   : > { %v2722_v25 = vsel %vm2326_vm15, %v2721_v19, %v2717_v60 }
 0x247   : > { %v6939_v62 = vsel %vm3515_vm1, %v2722_v25, %v6820_v37  ;;  %v2785_v23 = vrot.slane %v2069_v1, %v6450_v17  ;;  %v2790_v9 = vrot.slane %v2070_v20, %v6453_v58  ;;  %v1613_v22 = vpack.c.bf16 %v1436_v11, %v1435_v57  ;;  %v1025_v53 = vpop.xlane.xlu1 %1024 }
 0x248   : > { %v1450_v36 = vmul.f32 0.020408163, %v1025_v53  ;;  %v1022_v0 = vpop.xlane.xlu0 %1021 }
 0x249   : > { %v2786_v28 = vsel %vm2305_vm12, %v2785_v23, %v6681_v63  ;;  %v2117_v40 = vunpack.c.l.b16 %v1613_v22  ;;  %v2118_v45 = vunpack.c.h.b16 %v1613_v22  ;;  %v1449_v50 = vmul.f32 0.020408163, %v1022_v0 }
 0x24a   : > { %v6946_v33 = vsel %vm2312_vm13, %v2790_v9, %v2786_v28 }
 0x24b   : > { %v3022_v37 = vrot.slane %v2117_v40, %v6450_v17  ;;  %v3027_v12 = vrot.slane %v2118_v45, %v6453_v58  ;;  %v1620_v51 = vpack.c.bf16 %v1450_v36, %v1449_v50  ;;  %v1169_v2 = vpop.xlane.xlu1 %1168 }
 0x24c   : > { %v1498_v29 = vmul.f32 0.020408163, %v1169_v2  ;;  %v1166_v56 = vpop.xlane.xlu0 %1165 }
 0x24d   : > { %v3023_v61 = vsel %vm2305_vm12, %v3022_v37, %v6705_v39  ;;  %v2131_v8 = vunpack.c.l.b16 %v1620_v51  ;;  %v2132_v42 = vunpack.c.h.b16 %v1620_v51  ;;  %v1497_v63 = vmul.f32 0.020408163, %v1166_v56 }
 0x24e   : > { %v6953_v13 = vsel %vm2312_vm13, %v3027_v12, %v3023_v61 }
 0x24f   : > { %v3091_v18 = vrot.slane %v2131_v8, %v6266_v46  ;;  %v3096_v38 = vrot.slane %v2132_v42, %v6269_v49  ;;  %v1644_v14 = vpack.c.bf16 %v1498_v29, %v1497_v63  ;;  %v1211_v32 = vpop.xlane.xlu1 %1210 }
 0x250   : > { %v1512_v4 = vmul.f32 0.020408163, %v1211_v32  ;;  %v1208_v19 = vpop.xlane.xlu0 %1207 }
 0x251   : > { %v3092_v26 = vsel %vm2291_vm10, %v3091_v18, %v6728_v48  ;;  %v2179_v24 = vunpack.c.l.b16 %v1644_v14  ;;  %v2180_v11 = vunpack.c.h.b16 %v1644_v14  ;;  %v1511_v39 = vmul.f32 0.020408163, %v1208_v19 }
 0x252   : > { %v6960_v6 = vsel %vm2298_vm11, %v3096_v38, %v3092_v26 }
 0x253   : > { %v3328_v60 = vrot.slane %v2179_v24, %v6266_v46  ;;  %v3333_v1 = vrot.slane %v2180_v11, %v6269_v49  ;;  %v1651_v20 = vpack.c.bf16 %v1512_v4, %v1511_v39  ;;  %v749_v57 = vpop.xlane.xlu1 %748 }
 0x254   : > { %v1358_v25 = vmul.f32 0.020408163, %v749_v57  ;;  %v746_v23 = vpop.xlane.xlu0 %745 }
 0x255   : > { %v3329_v9 = vsel %vm2291_vm10, %v3328_v60, %v6752_v52  ;;  %v2193_v22 = vunpack.c.l.b16 %v1651_v20  ;;  %v2194_v53 = vunpack.c.h.b16 %v1651_v20  ;;  %v1357_v48 = vmul.f32 0.020408163, %v746_v23 }
 0x256   : > { %v6967_v36 = vsel %vm2298_vm11, %v3333_v1, %v3329_v9 }
 0x257   : > { %v3397_v0 = vrot.slane %v2193_v22, %v6071_v5  ;;  %v3402_v28 = vrot.slane %v2194_v53, %v6074_v10  ;;  %v1574_v40 = vpack.c.bf16 %v1358_v25, %v1357_v48  ;;  %v893_v45 = vpop.xlane.xlu1 %892 }
 0x258   : > { %v1406_v50 = vmul.f32 0.020408163, %v893_v45  ;;  %v890_v37 = vpop.xlane.xlu0 %889 }
 0x259   : > { %v3398_v12 = vsel %vm2277_vm8, %v3397_v0, %v6774_v44  ;;  %v2039_v51 = vunpack.c.l.b16 %v1574_v40  ;;  %v2040_v2 = vunpack.c.h.b16 %v1574_v40  ;;  %v1405_v52 = vmul.f32 0.020408163, %v890_v37 }
 0x25a   : > { %v6974_v29 = vsel %vm2284_vm9, %v3402_v28, %v3398_v12 }
 0x25b   : > { %v2637_v56 = vrot.slane %v2039_v51, %v6731_v55  ;;  %v2642_v61 = vrot.slane %v2040_v2, %v6755_v7  ;;  %v1598_v5 = vpack.c.bf16 %v1406_v50, %v1405_v52  ;;  %v935_v8 = vpop.xlane.xlu1 %934 }
 0x25c   : > { %v1420_v10 = vmul.f32 0.020408163, %v935_v8  ;;  %v932_v42 = vpop.xlane.xlu0 %931 }
 0x25d   : > { %v2638_v63 = vsel %vm2319_vm14, %v2637_v56, %v6830_v41  ;;  %v2087_v18 = vunpack.c.l.b16 %v1598_v5  ;;  %v2088_v38 = vunpack.c.h.b16 %v1598_v5  ;;  %v1419_v44 = vmul.f32 0.020408163, %v932_v42 }
 0x25e   : > { %v2643_v14 = vsel %vm2326_vm15, %v2642_v61, %v2638_v63 }
 0x25f   : > { %v3516_v32 = vsel %vm3515_vm1, %v2643_v14, %v6930_v21  ;;  %v2874_v4 = vrot.slane %v2087_v18, %v6731_v55  ;;  %v2879_v19 = vrot.slane %v2088_v38, %v6755_v7  ;;  %v1605_v26 = vpack.c.bf16 %v1420_v10, %v1419_v44  ;;  %v1079_v24 = vpop.xlane.xlu1 %1078 }
 0x260   : > { %v1076_v11 = vpop.xlane.xlu0 %1075 }
 0x261   : > { %v2875_v39 = vsel %vm2319_vm14, %v2874_v4, %v6849_v59  ;;  %v2101_v41 = vunpack.c.l.b16 %v1605_v26  ;;  %v2102_v60 = vunpack.c.h.b16 %v1605_v26  ;;  %v1467_v26 = vmul.f32 0.020408163, %v1076_v11 }
 0x262   : > { %v2880_v1 = vsel %vm2326_vm15, %v2879_v19, %v2875_v39  ;;  %v1468_v19 = vmul.f32 0.020408163, %v1079_v24 }
 0x263   : > { %v3529_v20 = vsel %vm3517_vm2, %v2880_v1, %v6939_v62  ;;  %v2943_v21 = vrot.slane %v2101_v41, %v6450_v17  ;;  %v2948_v57 = vrot.slane %v2102_v60, %v6453_v58  ;;  %v1121_v25 = vpop.xlane.xlu1 %1120 }
 0x264   : > { %v1118_v23 = vpop.xlane.xlu0 %1117 }
 0x265   : > { %v2944_v9 = vsel %vm2305_vm12, %v2943_v21, %v6868_v31 }
 0x266   : > { %v6995_v22 = vsel %vm2312_vm13, %v2948_v57, %v2944_v9 }
 0x267   : > { %v6997_v59 = vpop.xlane.xlu1 %1264 }
 0x268   : > { %v6999_v53 = vpop.xlane.xlu0 %1261 }
 0x26b   : > { %v845_v48 = vpop.xlane.xlu1 %844 }
 0x26c   : > { %v1390_v0 = vmul.f32 0.020408163, %v845_v48  ;;  %v842_v28 = vpop.xlane.xlu0 %841 }
 0x26d   : > { %v1389_v62 = vmul.f32 0.020408163, %v842_v28 }
 0x26f   : > { %v1590_v40 = vpack.c.bf16 %v1390_v0, %v1389_v62  ;;  %v989_v45 = vpop.xlane.xlu1 %988 }
 0x270   : > { %v1438_v50 = vmul.f32 0.020408163, %v989_v45  ;;  %v986_v37 = vpop.xlane.xlu0 %985  ;;  %v1481_v45 = vmul.f32 0.020408163, %v1118_v23 }
 0x271   : > { %v2071_v12 = vunpack.c.l.b16 %v1590_v40  ;;  %v2072_v51 = vunpack.c.h.b16 %v1590_v40  ;;  %v1437_v2 = vmul.f32 0.020408163, %v986_v37 }
 0x273   : > { %v2795_v31 = vrot.slane %v2071_v12, %v6731_v55  ;;  %v2800_v52 = vrot.slane %v2072_v51, %v6755_v7  ;;  %v1614_v56 = vpack.c.bf16 %v1438_v50, %v1437_v2  ;;  %v1031_v61 = vpop.xlane.xlu1 %1030 }
 0x274   : > { %v1028_v5 = vpop.xlane.xlu0 %1027  ;;  %v1452_v28 = vmul.f32 0.020408163, %v1031_v61 }
 0x275   : > { %v2796_v8 = vsel %vm2319_vm14, %v2795_v31, %v6946_v33  ;;  %v2119_v10 = vunpack.c.l.b16 %v1614_v56  ;;  %v2120_v42 = vunpack.c.h.b16 %v1614_v56  ;;  %v1451_v24 = vmul.f32 0.020408163, %v1028_v5 }
 0x276   : > { %v2801_v63 = vsel %vm2326_vm15, %v2800_v52, %v2796_v8 }
 0x277   : > { %v3518_v18 = vsel %vm3517_vm2, %v2801_v63, %v3516_v32  ;;  %v3032_v38 = vrot.slane %v2119_v10, %v6731_v55  ;;  %v3037_v44 = vrot.slane %v2120_v42, %v6755_v7  ;;  %v1175_v14 = vpop.xlane.xlu1 %1174  ;;  %v1629_v32 = vpack.c.bf16 %v1468_v19, %v1467_v26 }
 0x278   : > { %v1172_v4 = vpop.xlane.xlu0 %1171  ;;  %v1621_v31 = vpack.c.bf16 %v1452_v28, %v1451_v24  ;;  %v1500_v42 = vmul.f32 0.020408163, %v1175_v14  ;;  %v1530_v26 = vmul.f32 0.020408163, %v6997_v59 }
 0x279   : > { %v3033_v39 = vsel %vm2319_vm14, %v3032_v38, %v6953_v13  ;;  %v2149_v48 = vunpack.c.l.b16 %v1629_v32  ;;  %v2150_v40 = vunpack.c.h.b16 %v1629_v32  ;;  %v1482_v13 = vmul.f32 0.020408163, %v1121_v25 }
 0x27a   : > { %v3038_v33 = vsel %vm2326_vm15, %v3037_v44, %v3033_v39  ;;  %v1499_v25 = vmul.f32 0.020408163, %v1172_v4  ;;  %v1529_v39 = vmul.f32 0.020408163, %v6999_v53  ;;  %v2133_v32 = vunpack.c.l.b16 %v1621_v31 }
 0x27b   : > { %v3530_v41 = vsel %vm3519_vm3, %v3038_v33, %v3529_v20  ;;  %v7013_v60 = vpop.xlane.xlu1 %1216  ;;  %v3180_v20 = vrot.slane %v2149_v48, %v6450_v17  ;;  %v3185_v5 = vrot.slane %v2150_v40, %v6453_v58  ;;  %v1636_v10 = vpack.c.bf16 %v1482_v13, %v1481_v45 }
 0x27c   : > { %v7015_v1 = vpop.xlane.xlu0 %1213  ;;  %v2134_v28 = vunpack.c.h.b16 %v1621_v31  ;;  %v3101_v24 = vrot.slane %v2133_v32, %v6450_v17 }
 0x27d   : > { %v3181_v63 = vsel %vm2305_vm12, %v3180_v20, %v6903_v47  ;;  %v2163_v48 = vunpack.c.l.b16 %v1636_v10  ;;  %v2164_v59 = vunpack.c.h.b16 %v1636_v10 }
 0x27e   : > { %v3106_v31 = vrot.slane %v2134_v28, %v6453_v58 }
 0x27f   : > { %v941_v21 = vpop.xlane.xlu1 %940  ;;  %v3249_v20 = vrot.slane %v2163_v48, %v6266_v46 }
 0x280   : > { %v1422_v57 = vmul.f32 0.020408163, %v941_v21  ;;  %v938_v9 = vpop.xlane.xlu0 %937 }
 0x281   : > { %v1421_v0 = vmul.f32 0.020408163, %v938_v9 }
 0x283   : > { %v1606_v11 = vpack.c.bf16 %v1422_v57, %v1421_v0  ;;  %v1085_v62 = vpop.xlane.xlu1 %1084  ;;  %v3186_v57 = vsel %vm2312_vm13, %v3185_v5, %v3181_v63  ;;  %v7035_v0 = vpack.c.bf16 %v1530_v26, %v1529_v39 }
 0x284   : > { %v1470_v50 = vmul.f32 0.020408163, %v1085_v62  ;;  %v1082_v37 = vpop.xlane.xlu0 %1081 }
 0x285   : > { %v2103_v12 = vunpack.c.l.b16 %v1606_v11  ;;  %v2104_v51 = vunpack.c.h.b16 %v1606_v11  ;;  %v1469_v2 = vmul.f32 0.020408163, %v1082_v37  ;;  %v2212_v26 = vunpack.c.h.b16 %v7035_v0 }
 0x287   : > { %v2953_v52 = vrot.slane %v2103_v12, %v6731_v55  ;;  %v2958_v56 = vrot.slane %v2104_v51, %v6755_v7  ;;  %v1630_v8 = vpack.c.bf16 %v1470_v50, %v1469_v2  ;;  %v1127_v61 = vpop.xlane.xlu1 %1126  ;;  %v3254_v12 = vrot.slane %v2164_v59, %v6269_v49 }
 0x288   : > { %v1124_v23 = vpop.xlane.xlu0 %1123  ;;  %v1484_v11 = vmul.f32 0.020408163, %v1127_v61  ;;  %v2211_v2 = vunpack.c.l.b16 %v7035_v0 }
 0x289   : > { %v2954_v38 = vsel %vm2319_vm14, %v2953_v52, %v6995_v22  ;;  %v2151_v44 = vunpack.c.l.b16 %v1630_v8  ;;  %v2152_v19 = vunpack.c.h.b16 %v1630_v8  ;;  %v1645_v22 = vpack.c.bf16 %v1500_v42, %v1499_v25 }
 0x28a   : > { %v2959_v33 = vsel %vm2326_vm15, %v2958_v56, %v2954_v38  ;;  %v1483_v62 = vmul.f32 0.020408163, %v1124_v23  ;;  %v1514_v52 = vmul.f32 0.020408163, %v7013_v60  ;;  %v1513_v56 = vmul.f32 0.020408163, %v7015_v1 }
 0x28b   : > { %v7029_v21 = vsel %vm3519_vm3, %v2959_v33, %v3518_v18  ;;  %v3190_v14 = vrot.slane %v2151_v44, %v6731_v55  ;;  %v3195_v4 = vrot.slane %v2152_v19, %v6755_v7  ;;  %v1271_v47 = vpop.xlane.xlu1 %1270  ;;  %v2181_v45 = vunpack.c.l.b16 %v1645_v22 }
 0x28c   : > { %v1268_v9 = vpop.xlane.xlu0 %1267  ;;  %v2182_v8 = vunpack.c.h.b16 %v1645_v22  ;;  %v1637_v61 = vpack.c.bf16 %v1484_v11, %v1483_v62  ;;  %v1532_v25 = vmul.f32 0.020408163, %v1271_v47  ;;  %v3250_v44 = vsel %vm2291_vm10, %v3249_v20, %v6910_v27 }
 0x28d   : > { %v3191_v53 = vsel %vm2319_vm14, %v3190_v14, %v3186_v57  ;;  %v3338_v42 = vrot.slane %v2181_v45, %v6450_v17  ;;  %v1531_v23 = vmul.f32 0.020408163, %v1268_v9  ;;  %v1652_v33 = vpack.c.bf16 %v1514_v52, %v1513_v56 }
 0x28e   : > { %v3196_v18 = vsel %vm2326_vm15, %v3195_v4, %v3191_v53  ;;  %v2165_v32 = vunpack.c.l.b16 %v1637_v61  ;;  %v3343_v22 = vrot.slane %v2182_v8, %v6453_v58  ;;  %v2166_v62 = vunpack.c.h.b16 %v1637_v61 }
 0x28f   : > { %v1037_v40 = vpop.xlane.xlu1 %1036  ;;  %v7040_v13 = vsel %vm3521_vm4, %v3196_v18, %v3530_v41  ;;  %v3102_v41 = vsel %vm2305_vm12, %v3101_v24, %v6960_v6  ;;  %v3486_v6 = vrot.slane %v2211_v2, %v6266_v46  ;;  %v3339_v27 = vsel %vm2305_vm12, %v3338_v42, %v6967_v36 }
 0x290   : > { %v1454_v50 = vmul.f32 0.020408163, %v1037_v40  ;;  %v1034_v37 = vpop.xlane.xlu0 %1033  ;;  %v3107_v39 = vsel %vm2312_vm13, %v3106_v31, %v3102_v41  ;;  %v1661_v9 = vpack.c.bf16 %v1532_v25, %v1531_v23  ;;  %v3255_v24 = vsel %vm2298_vm11, %v3254_v12, %v3250_v44 }
 0x291   : > { %v1453_v51 = vmul.f32 0.020408163, %v1034_v37  ;;  %v2195_v11 = vunpack.c.l.b16 %v1652_v33  ;;  %v3259_v45 = vrot.slane %v2165_v32, %v6450_v17  ;;  %v3487_v56 = vsel %vm2291_vm10, %v3486_v6, %v6917_v30 }
 0x292   : > { %v2213_v2 = vunpack.c.l.b16 %v1661_v9  ;;  %v3491_v41 = vrot.slane %v2212_v26, %v6269_v49  ;;  %v3264_v42 = vrot.slane %v2166_v62, %v6453_v58  ;;  %v2214_v23 = vunpack.c.h.b16 %v1661_v9 }
 0x293   : > { %v1622_v5 = vpack.c.bf16 %v1454_v50, %v1453_v51  ;;  %v1181_v10 = vpop.xlane.xlu1 %1180  ;;  %v3344_v51 = vsel %vm2312_vm13, %v3343_v22, %v3339_v27  ;;  %v3260_v25 = vsel %vm2305_vm12, %v3259_v45, %v3255_v24 }
 0x294   : > { %v1502_v63 = vmul.f32 0.020408163, %v1181_v10  ;;  %v1178_v38 = vpop.xlane.xlu0 %1177  ;;  %v3407_v10 = vrot.slane %v2195_v11, %v6266_v46  ;;  %v3496_v44 = vrot.slane %v2213_v2, %v6450_v17 }
 0x295   : > { %v2135_v60 = vunpack.c.l.b16 %v1622_v5  ;;  %v2136_v19 = vunpack.c.h.b16 %v1622_v5  ;;  %v1501_v1 = vmul.f32 0.020408163, %v1178_v38  ;;  %v2196_v5 = vunpack.c.h.b16 %v1652_v33 }
 0x296   : > { %v3408_v33 = vsel %vm2291_vm10, %v3407_v10, %v6974_v29 }
 0x297   : > { %v3111_v14 = vrot.slane %v2135_v60, %v6731_v55  ;;  %v3116_v4 = vrot.slane %v2136_v19, %v6755_v7  ;;  %v1646_v47 = vpack.c.bf16 %v1502_v63, %v1501_v1  ;;  %v1223_v57 = vpop.xlane.xlu1 %1222  ;;  %v3412_v32 = vrot.slane %v2196_v5, %v6269_v49  ;;  %v1678_v5 = vld [vmem:[%s7757_s1 + $0x78] sm:$0xff] }
 0x298   : > { %v1516_v48 = vmul.f32 0.020408163, %v1223_v57  ;;  %v1220_v59 = vpop.xlane.xlu0 %1219 }
 0x299   : > { %v3112_v53 = vsel %vm2319_vm14, %v3111_v14, %v3107_v39  ;;  %v2183_v0 = vunpack.c.l.b16 %v1646_v47  ;;  %v2184_v28 = vunpack.c.h.b16 %v1646_v47  ;;  %v1515_v18 = vmul.f32 0.020408163, %v1220_v59 }
 0x29a   : > { %v3117_v40 = vsel %vm2326_vm15, %v3116_v4, %v3112_v53  ;;  %v3492_v39 = vsel %vm2298_vm11, %v3491_v41, %v3487_v56  ;;  %v3265_v14 = vsel %vm2312_vm13, %v3264_v42, %v3260_v25  ;;  %v3501_v4 = vrot.slane %v2214_v23, %v6453_v58 }
 0x29b   : > { %v3348_v36 = vrot.slane %v2183_v0, %v6731_v55  ;;  %v3353_v50 = vrot.slane %v2184_v28, %v6755_v7  ;;  %v1133_v37 = vpop.xlane.xlu1 %1132  ;;  %v3522_v20 = vsel %vm3521_vm4, %v3117_v40, %v7029_v21  ;;  %v1653_v31 = vpack.c.bf16 %v1516_v48, %v1515_v18 }
 0x29c   : > { %v1486_v52 = vmul.f32 0.020408163, %v1133_v37  ;;  %v1130_v12 = vpop.xlane.xlu0 %1129  ;;  %v3497_v22 = vsel %vm2305_vm12, %v3496_v44, %v3492_v39  ;;  %v3413_v45 = vsel %vm2298_vm11, %v3412_v32, %v3408_v33  ;;  %v1701_v39 = vld [vmem:[%s7757_s1 + $0x130] sm:$0xff]  ;;  %v1698_v33 = vld [vmem:[%s7757_s1 + $0x118] sm:$0xff] }
 0x29d   : > { %v3349_v8 = vsel %vm2319_vm14, %v3348_v36, %v3344_v51  ;;  %v1485_v61 = vmul.f32 0.020408163, %v1130_v12  ;;  %v2197_v60 = vunpack.c.l.b16 %v1653_v31  ;;  %v2198_v9 = vunpack.c.h.b16 %v1653_v31  ;;  %v1702_v32 = vld [vmem:[%s7757_s1 + $0x138] sm:$0xff] }
 0x29e   : > { %v3354_v21 = vsel %vm2326_vm15, %v3353_v50, %v3349_v8  ;;  %v1673_v8 = vld [vmem:[%s7757_s1 + $0x50] sm:$0xff] }
 0x29f   : > { %v1638_v63 = vpack.c.bf16 %v1486_v52, %v1485_v61  ;;  %v1277_v38 = vpop.xlane.xlu1 %1276  ;;  %v3532_v30 = vsel %vm3523_vm5, %v3354_v21, %v7040_v13  ;;  %v3417_v48 = vrot.slane %v2197_v60, %v6450_v17  ;;  %v3502_v17 = vsel %vm2312_vm13, %v3501_v4, %v3497_v22  ;;  %v1681_v21 = vld [vmem:[%s7757_s1 + $0x90] sm:$0xff]  ;;  %v1706_v22 = vld [vmem:[%s7757_s1 + $0x158] sm:$0xff] }
 0x2a0   : > { %v1534_v19 = vmul.f32 0.020408163, %v1277_v38  ;;  %v1274_v1 = vpop.xlane.xlu0 %1273  ;;  %v3422_v36 = vrot.slane %v2198_v9, %v6453_v58  ;;  %v1682_v38 = vld [vmem:[%s7757_s1 + $0x98] sm:$0xff]  ;;  %v4883_v4 = vcombine.low %v1690_v16, %v1694_v3 }
 0x2a1   : > { %v2167_v26 = vunpack.c.l.b16 %v1638_v63  ;;  %v2168_v6 = vunpack.c.h.b16 %v1638_v63  ;;  %v1533_v46 = vmul.f32 0.020408163, %v1274_v1  ;;  %v3418_v50 = vsel %vm2305_vm12, %v3417_v48, %v3413_v45  ;;  %v1685_v63 = vld [vmem:[%s7757_s1 + $0xb0] sm:$0xff]  ;;  %v1710_v9 = vld [vmem:[%s7757_s1 + $0x178] sm:$0xff] }
 0x2a2   : > { %v3423_v56 = vsel %vm2312_vm13, %v3422_v36, %v3418_v50  ;;  %v1721_v45 = vld [vmem:[%s7757_s1 + $0x1d0] sm:$0xff]  ;;  %v1722_v36 = vld [vmem:[%s7757_s1 + $0x1d8] sm:$0xff] }
 0x2a3   : > { %v3269_v13 = vrot.slane %v2167_v26, %v6731_v55  ;;  %v3274_v47 = vrot.slane %v2168_v6, %v6755_v7  ;;  %v1662_v57 = vpack.c.bf16 %v1534_v19, %v1533_v46  ;;  %v1229_v27 = vpop.xlane.xlu1 %1228  ;;  %v4874_v19 = vcombine.high %v1681_v21, %v1685_v63  ;;  %v1689_v26 = vld [vmem:[%s7757_s1 + $0xd0] sm:$0xff]  ;;  %v1726_v50 = vld [vmem:[%s7757_s1 + $0x1f8] sm:$0xff] }
 0x2a4   : > { %v1518_v59 = vmul.f32 0.020408163, %v1229_v27  ;;  %v1226_v53 = vpop.xlane.xlu0 %1225  ;;  %v4884_v6 = vcombine.high %v1690_v16, %v1694_v3  ;;  %v1697_v46 = vld [vmem:[%s7757_s1 + $0x110] sm:$0xff] }
 0x2a5   : > { %v3270_v29 = vsel %vm2319_vm14, %v3269_v13, %v3265_v14  ;;  %v2215_v49 = vunpack.c.l.b16 %v1662_v57  ;;  %v2216_v0 = vunpack.c.h.b16 %v1662_v57  ;;  %v1517_v28 = vmul.f32 0.020408163, %v1226_v53  ;;  %v1705_v57 = vld [vmem:[%s7757_s1 + $0x150] sm:$0xff] }
 0x2a6   : > { %v3275_v18 = vsel %vm2326_vm15, %v3274_v47, %v3270_v29  ;;  %v4881_v14 = vcombine.low %v1689_v26, %v1693_v15  ;;  %v4890_v13 = vcombine.high %v1697_v46, %v1701_v39  ;;  %v4892_v47 = vcombine.high %v1698_v33, %v1702_v32  ;;  %v1709_v27 = vld [vmem:[%s7757_s1 + $0x170] sm:$0xff] }
 0x2a7   : > { %v3506_v24 = vrot.slane %v2215_v49, %v6731_v55  ;;  %v3511_v11 = vrot.slane %v2216_v0, %v6755_v7  ;;  %v1654_v62 = vpack.c.bf16 %v1518_v59, %v1517_v28  ;;  %v3524_v40 = vsel %vm3523_vm5, %v3275_v18, %v3522_v20  ;;  %v1713_v49 = vld [vmem:[%s7757_s1 + $0x190] sm:$0xff]  ;;  %v1714_v28 = vld [vmem:[%s7757_s1 + $0x198] sm:$0xff] }
 0x2a8   : > { %v4889_v48 = vcombine.low %v1697_v46, %v1701_v39  ;;  %v4891_v59 = vcombine.low %v1698_v33, %v1702_v32  ;;  %v4898_v53 = vcombine.high %v1705_v57, %v1709_v27  ;;  %v4900_v29 = vcombine.high %v1706_v22, %v1710_v9  ;;  %v1717_v0 = vld [vmem:[%s7757_s1 + $0x1b0] sm:$0xff]  ;;  %v1718_v18 = vld [vmem:[%s7757_s1 + $0x1b8] sm:$0xff] }
 0x2a9   : > { %v3507_v37 = vsel %vm2319_vm14, %v3506_v24, %v3502_v17  ;;  %v2199_v51 = vunpack.c.l.b16 %v1654_v62  ;;  %v2200_v2 = vunpack.c.h.b16 %v1654_v62  ;;  %v4897_v24 = vcombine.low %v1705_v57, %v1709_v27  ;;  %v1725_v17 = vld [vmem:[%s7757_s1 + $0x1f0] sm:$0xff] }
 0x2aa   : > { %v3512_v31 = vsel %vm2326_vm15, %v3511_v11, %v3507_v37  ;;  %v4899_v11 = vcombine.low %v1706_v22, %v1710_v9  ;;  %v4906_v62 = vcombine.high %v1713_v49, %v1717_v0  ;;  %v4905_v37 = vcombine.low %v1713_v49, %v1717_v0  ;;  %v1753_v16 = vld [vmem:[%s7757_s1 + $0x2d0] sm:$0xff] }
 0x2ab   : > { %v3427_v52 = vrot.slane %v2199_v51, %v6731_v55  ;;  %v3432_v12 = vrot.slane %v2200_v2, %v6755_v7  ;;  %v3533_v20 = vsel %vm3525_vm6, %v3512_v31, %v3532_v30  ;;  %v1677_v55 = vld [vmem:[%s7757_s1 + $0x70] sm:$0xff]  ;;  %v1674_v7 = vld [vmem:[%s7757_s1 + $0x58] sm:$0xff]  ;;  %v4907_v51 = vcombine.low %v1714_v28, %v1718_v18 }
 0x2ac   : > { %v3535_v41 = vpack.c.b16 %v3533_v20, %v3533_v20  ;;  %v4866_v25 = vcombine.high %v1673_v8, %v1677_v55  ;;  %v4868_v23 = vcombine.high %v1674_v7, %v1678_v5  ;;  %v1686_v30 = vld [vmem:[%s7757_s1 + $0xb8] sm:$0xff]  ;;  %v4865_v44 = vcombine.low %v1673_v8, %v1677_v55  ;;  %v1737_v55 = vld [vmem:[%s7757_s1 + $0x250] sm:$0xff] }
 0x2ad   : > { %v3428_v58 = vsel %vm2319_vm14, %v3427_v52, %v3423_v56  ;;  %v4867_v60 = vcombine.low %v1674_v7, %v1678_v5  ;;  %v4876_v1 = vcombine.high %v1682_v38, %v1686_v30  ;;  %v4875_v34 = vcombine.low %v1682_v38, %v1686_v30  ;;  %v1729_v52 = vld [vmem:[%s7757_s1 + $0x210] sm:$0xff]  ;;  %v1730_v20 = vld [vmem:[%s7757_s1 + $0x218] sm:$0xff] }
 0x2ae   : > { %4210 = vmatprep.mubr.bf16.mxu0 %v3535_v41  ;;  %4251 = vmatprep.mubr.bf16.mxu1 %v3535_v41  ;;  %v3433_v61 = vsel %vm2326_vm15, %v3432_v12, %v3428_v58  ;;  %v4914_v2 = vcombine.high %v1721_v45, %v1725_v17  ;;  %v4916_v31 = vcombine.high %v1722_v36, %v1726_v50  ;;  %v1733_v12 = vld [vmem:[%s7757_s1 + $0x230] sm:$0xff]  ;;  %v1734_v56 = vld [vmem:[%s7757_s1 + $0x238] sm:$0xff] }
 0x2af   : > { %v3526_v10 = vsel %vm3525_vm6, %v3433_v61, %v3524_v40  ;;  %v4908_v40 = vcombine.high %v1714_v28, %v1718_v18  ;;  %v4915_v58 = vcombine.low %v1722_v36, %v1726_v50  ;;  %v4922_v8 = vcombine.high %v1729_v52, %v1733_v12  ;;  %v1741_v7 = vld [vmem:[%s7757_s1 + $0x270] sm:$0xff]  ;;  %v1738_v5 = vld [vmem:[%s7757_s1 + $0x258] sm:$0xff] }
 0x2b0   : > { %v7121_v42 = vpack.c.b16 %v3526_v10, %v3526_v10  ;;  %v4924_v61 = vcombine.high %v1730_v20, %v1734_v56  ;;  %v1742_v10 = vld [vmem:[%s7757_s1 + $0x278] sm:$0xff]  ;;  %v1745_v38 = vld [vmem:[%s7757_s1 + $0x290] sm:$0xff] }
 0x2b1   : > { %v1749_v30 = vld [vmem:[%s7757_s1 + $0x2b0] sm:$0xff] }
 0x2b2   : > { %4211 = vmatmul.mubr.bf16.vlgmr.msra.gmra.mrb[0].mxu0 %v7121_v42  ;;  %4252 = vmatmul.mubr.bf16.vlgmr.msra.gmra.mrb[0].mxu1 %v7121_v42  ;;  %v1757_v3 = vld [vmem:[%s7757_s1 + $0x2f0] sm:$0xff] }
 0x2b3   : > { %4261 = vmatpush1.bf16.msra.mxu0 %v4857_v43  ;;  %4302 = vmatpush1.bf16.msra.mxu1 %v4859_v54  ;;  %v4873_v43 = vcombine.low %v1681_v21, %v1685_v63  ;;  %v4882_v54 = vcombine.high %v1689_v26, %v1693_v15  ;;  %v4921_v21 = vcombine.low %v1729_v52, %v1733_v12  ;;  %v1761_v33 = vld [vmem:[%s7757_s1 + $0x310] sm:$0xff] }
 0x2b4   : > { %4292 = vmatprep.mubr.bf16.mxu0 %v3535_v41  ;;  %4333 = vmatprep.mubr.bf16.mxu1 %v3535_v41  ;;  %v4913_v41 = vcombine.low %v1721_v45, %v1725_v17  ;;  %v4932_v63 = vcombine.high %v1738_v5, %v1742_v10  ;;  %v4938_v26 = vcombine.high %v1745_v38, %v1749_v30  ;;  %v1765_v32 = vld [vmem:[%s7757_s1 + $0x330] sm:$0xff] }
 0x2b5   : > { %4262 = vmatprep.subr.bf16.mxu0 %v4866_v25  ;;  %4303 = vmatprep.subr.bf16.mxu1 %v4868_v23  ;;  %v4923_v25 = vcombine.low %v1730_v20, %v1734_v56  ;;  %v4930_v23 = vcombine.high %v1737_v55, %v1741_v7  ;;  %v4946_v46 = vcombine.high %v1753_v16, %v1757_v3  ;;  %v1769_v22 = vld [vmem:[%s7757_s1 + $0x350] sm:$0xff]  ;;  %v4366_v20 = vld [vmem:[%s7759_s3 + $0x80] sm:$0xff]  ;;  %v4367_v56 = vld [vmem:[%s7759_s3 + $0x88] sm:$0xff] }
 0x2b6   : > { %v4954_v57 = vcombine.high %v1761_v33, %v1765_v32  ;;  %v1773_v9 = vld [vmem:[%s7757_s1 + $0x370] sm:$0xff] }
 0x2b7   : > { %4263 = vmatpush1.bf16.msra.mxu0 %v4865_v44  ;;  %4304 = vmatpush1.bf16.msra.mxu1 %v4867_v60  ;;  %v1746_v44 = vld [vmem:[%s7757_s1 + $0x298] sm:$0xff]  ;;  %v4962_v49 = vcombine.high %v1769_v22, %v1773_v9  ;;  %v1777_v28 = vld [vmem:[%s7757_s1 + $0x390] sm:$0xff] }
 0x2b8   : > { %4264 = vmatprep.subr.bf16.mxu0 %v4874_v19  ;;  %4305 = vmatprep.subr.bf16.mxu1 %v4876_v1  ;;  %v1750_v60 = vld [vmem:[%s7757_s1 + $0x2b8] sm:$0xff]  ;;  %v4929_v19 = vcombine.low %v1737_v55, %v1741_v7  ;;  %v4931_v1 = vcombine.low %v1738_v5, %v1742_v10  ;;  %v1781_v18 = vld [vmem:[%s7757_s1 + $0x3b0] sm:$0xff]  ;;  %v4350_v55 = vld [vmem:[%s7759_s3] sm:$0xff]  ;;  %v5127_v5 = vpack.c.bf16 %v4367_v56, %v4366_v20 }
 0x2b9   : > { %v4940_v15 = vcombine.high %v1746_v44, %v1750_v60  ;;  %v4970_v45 = vcombine.high %v1777_v28, %v1781_v18  ;;  %v1785_v36 = vld [vmem:[%s7757_s1 + $0x3d0] sm:$0xff]  ;;  %v4351_v7 = vld [vmem:[%s7759_s3 + $0x8] sm:$0xff]  ;;  %v4409_v20 = vld [vmem:[%s7759_s3 + $0x1d8] sm:$0xff] }
 0x2ba   : > { %v1789_v50 = vld [vmem:[%s7757_s1 + $0x3f0] sm:$0xff] }
 0x2bb   : > { %4265 = vmatpush1.bf16.msra.mxu0 %v4873_v43  ;;  %4306 = vmatpush1.bf16.msra.mxu1 %v4875_v34  ;;  %v1754_v43 = vld [vmem:[%s7757_s1 + $0x2d8] sm:$0xff]  ;;  %v4978_v52 = vcombine.high %v1785_v36, %v1789_v50 }
 0x2bc   : > { %4266 = vmatprep.subr.bf16.mxu0 %v4882_v54  ;;  %4307 = vmatprep.subr.bf16.mxu1 %v4884_v6  ;;  %v1758_v34 = vld [vmem:[%s7757_s1 + $0x2f8] sm:$0xff]  ;;  %v4937_v54 = vcombine.low %v1745_v38, %v1749_v30  ;;  %v4939_v6 = vcombine.low %v1746_v44, %v1750_v60  ;;  %v4400_v38 = vld [vmem:[%s7759_s3 + $0x190] sm:$0xff]  ;;  %v5129_v44 = vpack.c.bf16 %v4351_v7, %v4350_v55 }
 0x2bd   : > { %v4948_v39 = vcombine.high %v1754_v43, %v1758_v34  ;;  %v4401_v30 = vld [vmem:[%s7759_s3 + $0x198] sm:$0xff]  ;;  %v4392_v7 = vld [vmem:[%s7759_s3 + $0x150] sm:$0xff] }
 0x2bf   : > { %4267 = vmatpush1.bf16.msra.mxu0 %v4881_v14  ;;  %4308 = vmatpush1.bf16.msra.mxu1 %v4883_v4  ;;  %v1762_v14 = vld [vmem:[%s7757_s1 + $0x318] sm:$0xff] }
 0x2c0   : > { %4268 = vmatprep.subr.bf16.mxu0 %v4890_v13  ;;  %4309 = vmatprep.subr.bf16.mxu1 %v4892_v47  ;;  %v1766_v4 = vld [vmem:[%s7757_s1 + $0x338] sm:$0xff]  ;;  %v4945_v13 = vcombine.low %v1753_v16, %v1757_v3  ;;  %v4947_v47 = vcombine.low %v1754_v43, %v1758_v34  ;;  %v4384_v16 = vld [vmem:[%s7759_s3 + $0x110] sm:$0xff]  ;;  %v4370_v43 = vld [vmem:[%s7759_s3 + $0xa0] sm:$0xff] }
 0x2c1   : > { %v4956_v27 = vcombine.high %v1762_v14, %v1766_v4  ;;  %v4385_v3 = vld [vmem:[%s7759_s3 + $0x118] sm:$0xff]  ;;  %v4371_v34 = vld [vmem:[%s7759_s3 + $0xa8] sm:$0xff] }
 0x2c3   : > { %4269 = vmatpush1.bf16.msra.mxu0 %v4889_v48  ;;  %4310 = vmatpush1.bf16.msra.mxu1 %v4891_v59  ;;  %v1770_v48 = vld [vmem:[%s7757_s1 + $0x358] sm:$0xff] }
 0x2c4   : > { %4270 = vmatprep.subr.bf16.mxu0 %v4898_v53  ;;  %4311 = vmatprep.subr.bf16.mxu1 %v4900_v29  ;;  %v1774_v59 = vld [vmem:[%s7757_s1 + $0x378] sm:$0xff]  ;;  %v4953_v53 = vcombine.low %v1761_v33, %v1765_v32  ;;  %v4955_v29 = vcombine.low %v1762_v14, %v1766_v4  ;;  %v4354_v33 = vld [vmem:[%s7759_s3 + $0x20] sm:$0xff]  ;;  %v4355_v32 = vld [vmem:[%s7759_s3 + $0x28] sm:$0xff]  ;;  %v5135_v14 = vpack.c.bf16 %v4371_v34, %v4370_v43 }
 0x2c5   : > { %v4964_v0 = vcombine.high %v1770_v48, %v1774_v59 }
 0x2c7   : > { %4271 = vmatpush1.bf16.msra.mxu0 %v4897_v24  ;;  %4312 = vmatpush1.bf16.msra.mxu1 %v4899_v11  ;;  %v1778_v24 = vld [vmem:[%s7757_s1 + $0x398] sm:$0xff] }
 0x2c8   : > { %4272 = vmatprep.subr.bf16.mxu0 %v4906_v62  ;;  %4313 = vmatprep.subr.bf16.mxu1 %v4908_v40  ;;  %v1782_v11 = vld [vmem:[%s7757_s1 + $0x3b8] sm:$0xff]  ;;  %v4961_v62 = vcombine.low %v1769_v22, %v1773_v9  ;;  %v4963_v40 = vcombine.low %v1770_v48, %v1774_v59  ;;  %v5137_v9 = vpack.c.bf16 %v4355_v32, %v4354_v33  ;;  %v4356_v59 = vld [vmem:[%s7759_s3 + $0x30] sm:$0xff] }
 0x2c9   : > { %v4972_v17 = vcombine.high %v1778_v24, %v1782_v11  ;;  %v4405_v22 = vld [vmem:[%s7759_s3 + $0x1b8] sm:$0xff]  ;;  %v4396_v32 = vld [vmem:[%s7759_s3 + $0x170] sm:$0xff] }
 0x2ca   : > { %v4365_v33 = vld [vmem:[%s7759_s3 + $0x78] sm:$0xff] }
 0x2cb   : > { %4273 = vmatpush1.bf16.msra.mxu0 %v4905_v37  ;;  %4314 = vmatpush1.bf16.msra.mxu1 %v4907_v51  ;;  %v1786_v37 = vld [vmem:[%s7757_s1 + $0x3d8] sm:$0xff] }
 0x2cc   : > { %4274 = vmatprep.subr.bf16.mxu0 %v4914_v2  ;;  %4315 = vmatprep.subr.bf16.mxu1 %v4916_v31  ;;  %v1790_v51 = vld [vmem:[%s7757_s1 + $0x3f8] sm:$0xff]  ;;  %v4969_v2 = vcombine.low %v1777_v28, %v1781_v18  ;;  %v4971_v31 = vcombine.low %v1778_v24, %v1782_v11  ;;  %v4374_v18 = vld [vmem:[%s7759_s3 + $0xc0] sm:$0xff]  ;;  %v4375_v24 = vld [vmem:[%s7759_s3 + $0xc8] sm:$0xff] }
 0x2cd   : > { %v4980_v12 = vcombine.high %v1786_v37, %v1790_v51  ;;  %v4389_v28 = vld [vmem:[%s7759_s3 + $0x138] sm:$0xff]  ;;  %v4406_v11 = vld [vmem:[%s7759_s3 + $0x1c0] sm:$0xff] }
 0x2cf   : > { %4275 = vmatpush1.bf16.msra.mxu0 %v4913_v41  ;;  %4316 = vmatpush1.bf16.msra.mxu1 %v4915_v58  ;;  %v4398_v41 = vld [vmem:[%s7759_s3 + $0x180] sm:$0xff]  ;;  %v4399_v58 = vld [vmem:[%s7759_s3 + $0x188] sm:$0xff] }
 0x2d0   : > { %4276 = vmatprep.subr.bf16.mxu0 %v4922_v8  ;;  %4317 = vmatprep.subr.bf16.mxu1 %v4924_v61  ;;  %v4977_v8 = vcombine.low %v1785_v36, %v1789_v50  ;;  %v4979_v61 = vcombine.low %v1786_v37, %v1790_v51  ;;  %v5159_v10 = vpack.c.bf16 %v4399_v58, %v4398_v41  ;;  %v4359_v36 = vld [vmem:[%s7759_s3 + $0x48] sm:$0xff]  ;;  %v4390_v51 = vld [vmem:[%s7759_s3 + $0x140] sm:$0xff]  ;;  %v4360_v58 = vld [vmem:[%s7759_s3 + $0x50] sm:$0xff] }
 0x2d1   : > { %v5143_v50 = vpack.c.bf16 %v4375_v24, %v4374_v18 }
 0x2d3   : > { %4277 = vmatpush1.bf16.msra.mxu0 %v4921_v21  ;;  %4318 = vmatpush1.bf16.msra.mxu1 %v4923_v25  ;;  %v4382_v21 = vld [vmem:[%s7759_s3 + $0x100] sm:$0xff]  ;;  %v4383_v25 = vld [vmem:[%s7759_s3 + $0x108] sm:$0xff] }
 0x2d4   : > { %4278 = vmatprep.subr.bf16.mxu0 %v4930_v23  ;;  %4319 = vmatprep.subr.bf16.mxu1 %v4932_v63  ;;  %v4368_v23 = vld [vmem:[%s7759_s3 + $0x90] sm:$0xff]  ;;  %v4369_v63 = vld [vmem:[%s7759_s3 + $0x98] sm:$0xff]  ;;  %v5161_v60 = vpack.c.bf16 %v4383_v25, %v4382_v21  ;;  %v4379_v21 = vld [vmem:[%s7759_s3 + $0xe8] sm:$0xff] }
 0x2d5   : > { %v4410_v25 = vld [vmem:[%s7759_s3 + $0x1e0] sm:$0xff] }
 0x2d7   : > { %4279 = vmatpush1.bf16.msra.mxu0 %v4929_v19  ;;  %4320 = vmatpush1.bf16.msra.mxu1 %v4931_v1  ;;  %v4352_v19 = vld [vmem:[%s7759_s3 + $0x10] sm:$0xff]  ;;  %v4353_v1 = vld [vmem:[%s7759_s3 + $0x18] sm:$0xff] }
 0x2d8   : > { %4280 = vmatprep.subr.bf16.mxu0 %v4938_v26  ;;  %4321 = vmatprep.subr.bf16.mxu1 %v4940_v15  ;;  %v5131_v26 = vpack.c.bf16 %v4369_v63, %v4368_v23  ;;  %v5163_v15 = vpack.c.bf16 %v4401_v30, %v4400_v38  ;;  %v4411_v23 = vld [vmem:[%s7759_s3 + $0x1e8] sm:$0xff]  ;;  %v4362_v30 = vld [vmem:[%s7759_s3 + $0x60] sm:$0xff] }
 0x2db   : > { %4281 = vmatpush1.bf16.msra.mxu0 %v4937_v54  ;;  %4322 = vmatpush1.bf16.msra.mxu1 %v4939_v6  ;;  %v4402_v54 = vld [vmem:[%s7759_s3 + $0x1a0] sm:$0xff]  ;;  %v4403_v6 = vld [vmem:[%s7759_s3 + $0x1a8] sm:$0xff] }
 0x2dc   : > { %4282 = vmatprep.subr.bf16.mxu0 %v4946_v46  ;;  %4323 = vmatprep.subr.bf16.mxu1 %v4948_v39  ;;  %v5133_v46 = vpack.c.bf16 %v4353_v1, %v4352_v19  ;;  %v5165_v39 = vpack.c.bf16 %v4385_v3, %v4384_v16  ;;  %v5167_v4 = vpack.c.bf16 %v4403_v6, %v4402_v54  ;;  %v4363_v19 = vld [vmem:[%s7759_s3 + $0x68] sm:$0xff]  ;;  %v4394_v1 = vld [vmem:[%s7759_s3 + $0x160] sm:$0xff]  ;;  %v4381_v16 = vld [vmem:[%s7759_s3 + $0xf8] sm:$0xff] }
 0x2dd   : > { %v4412_v3 = vld [vmem:[%s7759_s3 + $0x1f0] sm:$0xff]  ;;  %v5153_v43 = vpack.c.bf16 %v4363_v19, %v4362_v30  ;;  %v4413_v54 = vld [vmem:[%s7759_s3 + $0x1f8] sm:$0xff] }
 0x2de   : > { %v4364_v6 = vld [vmem:[%s7759_s3 + $0x70] sm:$0xff]  ;;  %v4449_v19 = vld [vmem:[%s7759_s3 + $0x318] sm:$0xff] }
 0x2df   : > { %4283 = vmatpush1.bf16.msra.mxu0 %v4945_v13  ;;  %4324 = vmatpush1.bf16.msra.mxu1 %v4947_v47  ;;  %v4387_v13 = vld [vmem:[%s7759_s3 + $0x128] sm:$0xff]  ;;  %v4372_v47 = vld [vmem:[%s7759_s3 + $0xb0] sm:$0xff] }
 0x2e0   : > { %4284 = vmatprep.subr.bf16.mxu0 %v4954_v57  ;;  %4325 = vmatprep.subr.bf16.mxu1 %v4956_v27  ;;  %v4373_v57 = vld [vmem:[%s7759_s3 + $0xb8] sm:$0xff]  ;;  %v4404_v27 = vld [vmem:[%s7759_s3 + $0x1b0] sm:$0xff] }
 0x2e3   : > { %4285 = vmatpush1.bf16.msra.mxu0 %v4953_v53  ;;  %4326 = vmatpush1.bf16.msra.mxu1 %v4955_v29  ;;  %v4357_v53 = vld [vmem:[%s7759_s3 + $0x38] sm:$0xff]  ;;  %v5139_v29 = vpack.c.bf16 %v4373_v57, %v4372_v47  ;;  %v4431_v47 = vld [vmem:[%s7759_s3 + $0x288] sm:$0xff]  ;;  %v4462_v57 = vld [vmem:[%s7759_s3 + $0x380] sm:$0xff] }
 0x2e4   : > { %4286 = vmatprep.subr.bf16.mxu0 %v4962_v49  ;;  %4327 = vmatprep.subr.bf16.mxu1 %v4964_v0  ;;  %v5171_v49 = vpack.c.bf16 %v4405_v22, %v4404_v27  ;;  %v4388_v0 = vld [vmem:[%s7759_s3 + $0x130] sm:$0xff]  ;;  %v4463_v22 = vld [vmem:[%s7759_s3 + $0x388] sm:$0xff] }
 0x2e7   : > { %4287 = vmatpush1.bf16.msra.mxu0 %v4961_v62  ;;  %4328 = vmatpush1.bf16.msra.mxu1 %v4963_v40  ;;  %v4407_v62 = vld [vmem:[%s7759_s3 + $0x1c8] sm:$0xff]  ;;  %v5141_v40 = vpack.c.bf16 %v4357_v53, %v4356_v59  ;;  %v1803_v59 = vsub.s32 2, %v5602_v35  ;;  %v7510_v53 = vld [vmem:[%s7758_s2] sm:$0xff] }
 0x2e8   : > { %4288 = vmatprep.subr.bf16.mxu0 %v4970_v45  ;;  %4329 = vmatprep.subr.bf16.mxu1 %v4972_v17  ;;  %v5173_v45 = vpack.c.bf16 %v4389_v28, %v4388_v0  ;;  %v4358_v17 = vld [vmem:[%s7759_s3 + $0x40] sm:$0xff]  ;;  %v5175_v37 = vpack.c.bf16 %v4407_v62, %v4406_v11 }
 0x2e9   : > { %v5145_v56 = vpack.c.bf16 %v4359_v36, %v4358_v17  ;;  %v1804_v28 = vrot.slane %v7510_v53, %v1803_v59  ;;  %v4453_v59 = vld [vmem:[%s7759_s3 + $0x338] sm:$0xff] }
 0x2eb   : > { %4289 = vmatpush1.bf16.msra.mxu0 %v4969_v2  ;;  %4330 = vmatpush1.bf16.msra.mxu1 %v4971_v31  ;;  %v4391_v2 = vld [vmem:[%s7759_s3 + $0x148] sm:$0xff]  ;;  %v4376_v31 = vld [vmem:[%s7759_s3 + $0xd0] sm:$0xff] }
 0x2ec   : > { %4290 = vmatprep.subr.bf16.mxu0 %v4978_v52  ;;  %4331 = vmatprep.subr.bf16.mxu1 %v4980_v12  ;;  %v4377_v52 = vld [vmem:[%s7759_s3 + $0xd8] sm:$0xff]  ;;  %v4408_v12 = vld [vmem:[%s7759_s3 + $0x1d0] sm:$0xff]  ;;  %v5177_v41 = vpack.c.bf16 %v4391_v2, %v4390_v51  ;;  %v4446_v51 = vld [vmem:[%s7759_s3 + $0x300] sm:$0xff] }
 0x2ed   : > { %v5179_v55 = vpack.c.bf16 %v4409_v20, %v4408_v12  ;;  %v4447_v2 = vld [vmem:[%s7759_s3 + $0x308] sm:$0xff] }
 0x2ef   : > { %4291 = vmatpush1.bf16.msra.mxu0 %v4977_v8  ;;  %4332 = vmatpush1.bf16.msra.mxu1 %v4979_v61  ;;  %v4361_v8 = vld [vmem:[%s7759_s3 + $0x58] sm:$0xff]  ;;  %v5147_v61 = vpack.c.bf16 %v4377_v52, %v4376_v31  ;;  %v4432_v31 = vld [vmem:[%s7759_s3 + $0x290] sm:$0xff] }
 0x2f0   : > { %5128 = vmatprep.subr.bf16.mxu0 %v5127_v5  ;;  %5160 = vmatprep.subr.bf16.mxu1 %v5159_v10  ;;  %v4393_v5 = vld [vmem:[%s7759_s3 + $0x158] sm:$0xff]  ;;  %v4378_v10 = vld [vmem:[%s7759_s3 + $0xe0] sm:$0xff]  ;;  %v5149_v63 = vpack.c.bf16 %v4361_v8, %v4360_v58  ;;  %v4464_v58 = vld [vmem:[%s7759_s3 + $0x390] sm:$0xff] }
 0x2f1   : > { %v5181_v38 = vpack.c.bf16 %v4393_v5, %v4392_v7  ;;  %v4465_v8 = vld [vmem:[%s7759_s3 + $0x398] sm:$0xff] }
 0x2f2   : > { %4293 = vmatmul.mubr.bf16.vlgmr.msra.gmra.mrb[4].mxu0 %v7121_v42  ;;  %4334 = vmatmul.mubr.bf16.vlgmr.msra.gmra.mrb[4].mxu1 %v7121_v42  ;;  %v4386_v42 = vld [vmem:[%s7759_s3 + $0x120] sm:$0xff] }
 0x2f3   : > { %5130 = vmatpush3.bf16.msra.mxu0 %v5129_v44  ;;  %5162 = vmatpush3.bf16.msra.mxu1 %v5161_v60  ;;  %v5169_v48 = vpack.c.bf16 %v4387_v13, %v4386_v42  ;;  %v5151_v44 = vpack.c.bf16 %v4379_v21, %v4378_v10  ;;  %v5183_v60 = vpack.c.bf16 %v4411_v23, %v4410_v25  ;;  %v4430_v13 = vld [vmem:[%s7759_s3 + $0x280] sm:$0xff]  ;;  %v4416_v25 = vld [vmem:[%s7759_s3 + $0x210] sm:$0xff]  ;;  %v4417_v23 = vld [vmem:[%s7759_s3 + $0x218] sm:$0xff] }
 0x2f4   : > { %5132 = vmatprep.subr.bf16.mxu0 %v5131_v26  ;;  %5164 = vmatprep.subr.bf16.mxu1 %v5163_v15  ;;  %v4395_v26 = vld [vmem:[%s7759_s3 + $0x168] sm:$0xff]  ;;  %v4380_v15 = vld [vmem:[%s7759_s3 + $0xf0] sm:$0xff]  ;;  %v5191_v27 = vpack.c.bf16 %v4431_v47, %v4430_v13  ;;  %v5225_v21 = vpack.c.bf16 %v4447_v2, %v4446_v51  ;;  %v4473_v2 = vld [vmem:[%s7759_s3 + $0x3d8] sm:$0xff] }
 0x2f5   : > { %v5185_v34 = vpack.c.bf16 %v4395_v26, %v4394_v1  ;;  %v4434_v1 = vld [vmem:[%s7759_s3 + $0x2a0] sm:$0xff]  ;;  %v4435_v26 = vld [vmem:[%s7759_s3 + $0x2a8] sm:$0xff]  ;;  %v4472_v51 = vld [vmem:[%s7759_s3 + $0x3d0] sm:$0xff] }
 0x2f7   : > { %5134 = vmatpush3.bf16.msra.mxu0 %v5133_v46  ;;  %5166 = vmatpush3.bf16.msra.mxu1 %v5165_v39  ;;  %v5155_v46 = vpack.c.bf16 %v4381_v16, %v4380_v15  ;;  %v5187_v39 = vpack.c.bf16 %v4413_v54, %v4412_v3  ;;  %v4466_v15 = vld [vmem:[%s7759_s3 + $0x3a0] sm:$0xff]  ;;  %v4467_v16 = vld [vmem:[%s7759_s3 + $0x3a8] sm:$0xff]  ;;  %v5197_v3 = vpack.c.bf16 %v4417_v23, %v4416_v25 }
 0x2f8   : > { %5136 = vmatprep.subr.bf16.mxu0 %v5135_v14  ;;  %5168 = vmatprep.subr.bf16.mxu1 %v5167_v4  ;;  %v4397_v14 = vld [vmem:[%s7759_s3 + $0x178] sm:$0xff]  ;;  %v5157_v4 = vpack.c.bf16 %v4365_v33, %v4364_v6  ;;  %v4419_v54 = vld [vmem:[%s7759_s3 + $0x228] sm:$0xff]  ;;  %v5199_v6 = vpack.c.bf16 %v4435_v26, %v4434_v1  ;;  %v4426_v25 = vld [vmem:[%s7759_s3 + $0x260] sm:$0xff] }
 0x2f9   : > { %v5189_v42 = vpack.c.bf16 %v4397_v14, %v4396_v32  ;;  %v4451_v33 = vld [vmem:[%s7759_s3 + $0x328] sm:$0xff]  ;;  %v4436_v32 = vld [vmem:[%s7759_s3 + $0x2b0] sm:$0xff]  ;;  %v4437_v14 = vld [vmem:[%s7759_s3 + $0x2b8] sm:$0xff] }
 0x2fa   : > { %v4427_v23 = vld [vmem:[%s7759_s3 + $0x268] sm:$0xff]  ;;  %v4476_v1 = vld [vmem:[%s7759_s3 + $0x3f0] sm:$0xff]  ;;  %v4477_v26 = vld [vmem:[%s7759_s3 + $0x3f8] sm:$0xff] }
 0x2fb   : > { %5138 = vmatpush3.bf16.msra.mxu0 %v5137_v9  ;;  %5170 = vmatpush3.bf16.msra.mxu1 %v5169_v48  ;;  %v5223_v9 = vpack.c.bf16 %v4463_v22, %v4462_v57  ;;  %v1795_v48 = vsub.s32 0, %v5602_v35  ;;  %v4420_v57 = vld [vmem:[%s7759_s3 + $0x230] sm:$0xff]  ;;  %v5203_v22 = vpack.c.bf16 %v4437_v14, %v4436_v32  ;;  %v1811_v32 = vsub.s32 4, %v5602_v35 }
 0x2fc   : > { %5140 = vmatprep.subr.bf16.mxu0 %v5139_v29  ;;  %5172 = vmatprep.subr.bf16.mxu1 %v5171_v49  ;;  %v1799_v29 = vsub.s32 1, %v5602_v35  ;;  %v1807_v49 = vsub.s32 3, %v5602_v35  ;;  %v1819_v14 = vsub.s32 6, %v5602_v35 }
 0x2fd   : > { %v1796_v0 = vrot.slane %v7510_v53, %v1795_v48  ;;  %v4452_v48 = vld [vmem:[%s7759_s3 + $0x330] sm:$0xff] }
 0x2fe   : > { %v1800_v18 = vrot.slane %v7510_v53, %v1799_v29  ;;  %v1808_v24 = vrot.slane %v7510_v53, %v1807_v49  ;;  %v4438_v29 = vld [vmem:[%s7759_s3 + $0x2c0] sm:$0xff]  ;;  %v4439_v49 = vld [vmem:[%s7759_s3 + $0x2c8] sm:$0xff] }
 0x2ff   : > { %5142 = vmatpush3.bf16.msra.mxu0 %v5141_v40  ;;  %5174 = vmatpush3.bf16.msra.mxu1 %v5173_v45  ;;  %v4414_v40 = vld [vmem:[%s7759_s3 + $0x200] sm:$0xff]  ;;  %v4415_v45 = vld [vmem:[%s7759_s3 + $0x208] sm:$0xff] }
 0x300   : > { %5144 = vmatprep.subr.bf16.mxu0 %v5143_v50  ;;  %5176 = vmatprep.subr.bf16.mxu1 %v5175_v37  ;;  %v5193_v10 = vpack.c.bf16 %v4415_v45, %v4414_v40  ;;  %v5207_v40 = vpack.c.bf16 %v4439_v49, %v4438_v29 }
 0x303   : > { %5146 = vmatpush3.bf16.msra.mxu0 %v5145_v56  ;;  %5178 = vmatpush3.bf16.msra.mxu1 %v5177_v41  ;;  %v4433_v41 = vld [vmem:[%s7759_s3 + $0x298] sm:$0xff] }
 0x304   : > { %5148 = vmatprep.subr.bf16.mxu0 %v5147_v61  ;;  %5180 = vmatprep.subr.bf16.mxu1 %v5179_v55  ;;  %v5195_v30 = vpack.c.bf16 %v4433_v41, %v4432_v31  ;;  %v5243_v41 = vpack.c.bf16 %v4473_v2, %v4472_v51 }
 0x307   : > { %5150 = vmatpush3.bf16.msra.mxu0 %v5149_v63  ;;  %5182 = vmatpush3.bf16.msra.mxu1 %v5181_v38 }
 0x308   : > { %5152 = vmatprep.subr.bf16.mxu0 %v5151_v44  ;;  %5184 = vmatprep.subr.bf16.mxu1 %v5183_v60  ;;  %v5227_v44 = vpack.c.bf16 %v4465_v8, %v4464_v58  ;;  %v4448_v60 = vld [vmem:[%s7759_s3 + $0x310] sm:$0xff]  ;;  %v4457_v8 = vld [vmem:[%s7759_s3 + $0x358] sm:$0xff] }
 0x309   : > { %v4456_v58 = vld [vmem:[%s7759_s3 + $0x350] sm:$0xff] }
 0x30b   : > { %5154 = vmatpush3.bf16.msra.mxu0 %v5153_v43  ;;  %5186 = vmatpush3.bf16.msra.mxu1 %v5185_v34  ;;  %v5229_v43 = vpack.c.bf16 %v4449_v19, %v4448_v60  ;;  %v4418_v34 = vld [vmem:[%s7759_s3 + $0x220] sm:$0xff]  ;;  %v4444_v60 = vld [vmem:[%s7759_s3 + $0x2f0] sm:$0xff]  ;;  %v4445_v19 = vld [vmem:[%s7759_s3 + $0x2f8] sm:$0xff] }
 0x30c   : > { %5156 = vmatprep.subr.bf16.mxu0 %v5155_v46  ;;  %5188 = vmatprep.subr.bf16.mxu1 %v5187_v39  ;;  %v5231_v46 = vpack.c.bf16 %v4467_v16, %v4466_v15  ;;  %v4450_v39 = vld [vmem:[%s7759_s3 + $0x320] sm:$0xff]  ;;  %v5201_v13 = vpack.c.bf16 %v4419_v54, %v4418_v34  ;;  %v5217_v15 = vpack.c.bf16 %v4427_v23, %v4426_v25  ;;  %v4429_v54 = vld [vmem:[%s7759_s3 + $0x278] sm:$0xff] }
 0x30d   : > { %v5233_v47 = vpack.c.bf16 %v4451_v33, %v4450_v39  ;;  %v5251_v34 = vpack.c.bf16 %v4477_v26, %v4476_v1 }
 0x30f   : > { %5158 = vmatpush3.bf16.msra.mxu0 %v5157_v4  ;;  %5190 = vmatpush3.bf16.msra.mxu1 %v5189_v42  ;;  %v4468_v4 = vld [vmem:[%s7759_s3 + $0x3b0] sm:$0xff]  ;;  %v4469_v42 = vld [vmem:[%s7759_s3 + $0x3b8] sm:$0xff] }
 0x310   : > { %5192 = vmatprep.subr.bf16.mxu0 %v5191_v27  ;;  %5224 = vmatprep.subr.bf16.mxu1 %v5223_v9  ;;  %v4421_v27 = vld [vmem:[%s7759_s3 + $0x238] sm:$0xff]  ;;  %v5235_v9 = vpack.c.bf16 %v4469_v42, %v4468_v4  ;;  %v1815_v4 = vsub.s32 5, %v5602_v35  ;;  %v1823_v42 = vsub.s32 7, %v5602_v35 }
 0x385   : > { %v4212_v11 = vpop.f32.mrb[0].mxu0  ;;  %v4253_v62 = vpop.f32.mrb[0].mxu1 }
 0x386   : > { %v4213_v17 = vadd.f32 %v4212_v11, %v1796_v0  ;;  %v4254_v36 = vadd.f32 %v4253_v62, %v1804_v28  ;;  %v4214_v50 = vpop.f32.mrb[1].mxu0  ;;  %v4255_v37 = vpop.f32.mrb[1].mxu1  ;;  %v4470_v0 = vld [vmem:[%s7759_s3 + $0x3c0] sm:$0xff]  ;;  %v4471_v28 = vld [vmem:[%s7759_s3 + $0x3c8] sm:$0xff] }
 0x387   : > { %v4215_v52 = vadd.f32 %v4214_v50, %v1800_v18  ;;  %v4256_v12 = vadd.f32 %v4255_v37, %v1808_v24  ;;  %v4216_v20 = vpop.f32.mrb[2].mxu0  ;;  %v4257_v56 = vpop.f32.mrb[2].mxu1  ;;  %v5205_v18 = vpack.c.bf16 %v4421_v27, %v4420_v57  ;;  %v5237_v24 = vpack.c.bf16 %v4453_v59, %v4452_v48  ;;  %v4422_v11 = vld [vmem:[%s7759_s3 + $0x240] sm:$0xff]  ;;  %v4423_v62 = vld [vmem:[%s7759_s3 + $0x248] sm:$0xff]  ;;  %v4440_v50 = vld [vmem:[%s7759_s3 + $0x2d0] sm:$0xff] }
 0x388   : > { %v4217_v61 = vpop.f32.mrb[3].mxu0  ;;  %v4258_v55 = vpop.f32.mrb[3].mxu1  ;;  %v4342_v63 = vmax.f32 %v4213_v17, 0.0  ;;  %v4344_v38 = vmax.f32 %v4254_v36, 0.0  ;;  %v5239_v45 = vpack.c.bf16 %v4471_v28, %v4470_v0  ;;  %v4454_v17 = vld [vmem:[%s7759_s3 + $0x340] sm:$0xff]  ;;  %v4455_v36 = vld [vmem:[%s7759_s3 + $0x348] sm:$0xff]  ;;  %v5209_v31 = vpack.c.bf16 %v4423_v62, %v4422_v11 }
 0x389   : > { %v4343_v7 = vmax.f32 %v4215_v52, 0.0  ;;  %v4345_v5 = vmax.f32 %v4256_v12, 0.0  ;;  %v4441_v37 = vld [vmem:[%s7759_s3 + $0x2d8] sm:$0xff]  ;;  %v5241_v52 = vpack.c.bf16 %v4455_v36, %v4454_v17  ;;  %v4424_v12 = vld [vmem:[%s7759_s3 + $0x250] sm:$0xff]  ;;  %v4442_v61 = vld [vmem:[%s7759_s3 + $0x2e0] sm:$0xff]  ;;  %v1816_v57 = vrot.slane %v7510_v53, %v1815_v4 }
 0x38a   : > { %v4425_v20 = vld [vmem:[%s7759_s3 + $0x258] sm:$0xff]  ;;  %v5211_v56 = vpack.c.bf16 %v4441_v37, %v4440_v50  ;;  %v4443_v55 = vld [vmem:[%s7759_s3 + $0x2e8] sm:$0xff]  ;;  %v1824_v27 = vrot.slane %v7510_v53, %v1823_v42  ;;  %v4981_v50 = vld [vmem:[%s7760_s4] ss:$0 sm:$0xff] }
 0x38b   : > { %4549 = vmatprep.mubr.f32.mxu0 %v4343_v7  ;;  %4619 = vmatprep.mubr.f32.mxu1 %v4345_v5  ;;  %v4474_v7 = vld [vmem:[%s7759_s3 + $0x3e0] sm:$0xff]  ;;  %v4475_v5 = vld [vmem:[%s7759_s3 + $0x3e8] sm:$0xff] }
 0x38c   : > { %4550 = vmatmul.mubr.f32.vlgmr.msra.gmra.mrb[8].mxu0 %v4342_v63  ;;  %4620 = vmatmul.mubr.f32.vlgmr.msra.gmra.mrb[8].mxu1 %v4344_v38  ;;  %v5215_v63 = vpack.c.bf16 %v4443_v55, %v4442_v61  ;;  %v5247_v38 = vpack.c.bf16 %v4475_v5, %v4474_v7 }
 0x38d   : > { %5194 = vmatpush3.bf16.msra.mxu0 %v5193_v10  ;;  %5226 = vmatpush3.bf16.msra.mxu1 %v5225_v21  ;;  %v5213_v10 = vpack.c.bf16 %v4425_v20, %v4424_v12  ;;  %v5245_v21 = vpack.c.bf16 %v4457_v8, %v4456_v58 }
 0x38e   : > { %5196 = vmatprep.subr.bf16.mxu0 %v5195_v30  ;;  %5228 = vmatprep.subr.bf16.mxu1 %v5227_v44  ;;  %v4458_v30 = vld [vmem:[%s7759_s3 + $0x360] sm:$0xff]  ;;  %v4459_v44 = vld [vmem:[%s7759_s3 + $0x368] sm:$0xff] }
 0x38f   : > { %v5249_v16 = vpack.c.bf16 %v4459_v44, %v4458_v30 }
 0x391   : > { %5198 = vmatpush3.bf16.msra.mxu0 %v5197_v3  ;;  %5230 = vmatpush3.bf16.msra.mxu1 %v5229_v43  ;;  %v4428_v3 = vld [vmem:[%s7759_s3 + $0x270] sm:$0xff]  ;;  %v5219_v43 = vpack.c.bf16 %v4445_v19, %v4444_v60 }
 0x392   : > { %5200 = vmatprep.subr.bf16.mxu0 %v5199_v6  ;;  %5232 = vmatprep.subr.bf16.mxu1 %v5231_v46  ;;  %v4460_v6 = vld [vmem:[%s7759_s3 + $0x370] sm:$0xff]  ;;  %v4461_v46 = vld [vmem:[%s7759_s3 + $0x378] sm:$0xff]  ;;  %v5221_v39 = vpack.c.bf16 %v4429_v54, %v4428_v3 }
 0x393   : > { %v5253_v33 = vpack.c.bf16 %v4461_v46, %v4460_v6 }
 0x395   : > { %5202 = vmatpush3.bf16.msra.mxu0 %v5201_v13  ;;  %5234 = vmatpush3.bf16.msra.mxu1 %v5233_v47  ;;  %v1812_v13 = vrot.slane %v7510_v53, %v1811_v32  ;;  %v1820_v47 = vrot.slane %v7510_v53, %v1819_v14 }
 0x396   : > { %5204 = vmatprep.subr.bf16.mxu0 %v5203_v22  ;;  %5236 = vmatprep.subr.bf16.mxu1 %v5235_v9 }
 0x399   : > { %5206 = vmatpush3.bf16.msra.mxu0 %v5205_v18  ;;  %5238 = vmatpush3.bf16.msra.mxu1 %v5237_v24 }
 0x39a   : > { %5208 = vmatprep.subr.bf16.mxu0 %v5207_v40  ;;  %5240 = vmatprep.subr.bf16.mxu1 %v5239_v45 }
 0x39d   : > { %5210 = vmatpush3.bf16.msra.mxu0 %v5209_v31  ;;  %5242 = vmatpush3.bf16.msra.mxu1 %v5241_v52 }
 0x39e   : > { %5212 = vmatprep.subr.bf16.mxu0 %v5211_v56  ;;  %5244 = vmatprep.subr.bf16.mxu1 %v5243_v41 }
 0x3a1   : > { %5214 = vmatpush3.bf16.msra.mxu0 %v5213_v10  ;;  %5246 = vmatpush3.bf16.msra.mxu1 %v5245_v21 }
 0x3a2   : > { %5216 = vmatprep.subr.bf16.mxu0 %v5215_v63  ;;  %5248 = vmatprep.subr.bf16.mxu1 %v5247_v38 }
 0x3a5   : > { %5218 = vmatpush3.bf16.msra.mxu0 %v5217_v15  ;;  %5250 = vmatpush3.bf16.msra.mxu1 %v5249_v16 }
 0x3a6   : > { %5220 = vmatprep.subr.bf16.mxu0 %v5219_v43  ;;  %5252 = vmatprep.subr.bf16.mxu1 %v5251_v34 }
 0x3a9   : > { %5222 = vmatpush3.bf16.msra.mxu0 %v5221_v39  ;;  %5254 = vmatpush3.bf16.msra.mxu1 %v5253_v33 }
 0x3c5   : > { %v4294_v22 = vpop.f32.mrb[4].mxu0  ;;  %v4335_v9 = vpop.f32.mrb[4].mxu1 }
 0x3c6   : > { %v4295_v48 = vadd.f32 %v4294_v22, %v1812_v13  ;;  %v4336_v59 = vadd.f32 %v4335_v9, %v1820_v47  ;;  %v4296_v29 = vpop.f32.mrb[5].mxu0  ;;  %v4337_v49 = vpop.f32.mrb[5].mxu1 }
 0x3c7   : > { %v4297_v0 = vadd.f32 %v4296_v29, %v1816_v57  ;;  %v4338_v28 = vadd.f32 %v4337_v49, %v1824_v27  ;;  %v4298_v18 = vpop.f32.mrb[6].mxu0  ;;  %v4339_v24 = vpop.f32.mrb[6].mxu1 }
 0x3c8   : > { %v4299_v11 = vpop.f32.mrb[7].mxu0  ;;  %v4340_v35 = vpop.f32.mrb[7].mxu1  ;;  %v4346_v45 = vmax.f32 %v4295_v48, 0.0  ;;  %v4348_v17 = vmax.f32 %v4336_v59, 0.0 }
 0x3c9   : > { %v4347_v62 = vmax.f32 %v4297_v0, 0.0  ;;  %v4349_v40 = vmax.f32 %v4338_v28, 0.0 }
 0x3cb   : > { %4689 = vmatprep.mubr.f32.mxu0 %v4347_v62  ;;  %4759 = vmatprep.mubr.f32.mxu1 %v4349_v40 }
 0x3cc   : > { %4690 = vmatmul.mubr.f32.vlgmr.msra.gmra.mrb[10].mxu0 %v4346_v45  ;;  %4760 = vmatmul.mubr.f32.vlgmr.msra.gmra.mrb[10].mxu1 %v4348_v17 }
 0x45f   : > { %v5019_v53 = vpop.f32.mrb[8].mxu0  ;;  %v5054_v36 = vpop.f32.mrb[8].mxu1 }
 0x460   : > { %v5020_v37 = vpop.f32.mrb[9].mxu0  ;;  %v5055_v51 = vpop.f32.mrb[9].mxu1 }
 0x461   : > { %v5021_v2 = vadd.f32 %v5020_v37, %v5019_v53  ;;  %v5056_v31 = vadd.f32 %v5055_v51, %v5054_v36 }
 0x463   : > { %v4552_v52 = vadd.f32 %v5021_v2, %v4981_v50 }
 0x465   : > { %v4622_v12 = vadd.f32 %v5056_v31, %v4552_v52 }
 0x49f   : > { %v5089_v20 = vpop.f32.mrb[10].mxu0  ;;  %v5124_v56 = vpop.f32.mrb[10].mxu1 }
 0x4a0   : > { %v5090_v41 = vpop.f32.mrb[11].mxu0  ;;  %v5125_v58 = vpop.f32.mrb[11].mxu1 }
 0x4a1   : > { %v5091_v8 = vadd.f32 %v5090_v41, %v5089_v20  ;;  %v5126_v61 = vadd.f32 %v5125_v58, %v5124_v56 }
 0x4a3   : > { %v4692_v55 = vadd.f32 %v5091_v8, %v4622_v12 }
 0x4a5   : > { %v4762_v7 = vadd.f32 %v5126_v61, %v4692_v55 }
 0x4a7   : > { %v4765_v5 = vsub.f32 0.0, %v4762_v7 }
 0x4a9   : > { %v4766_v10 = vmul.f32 1.442695, %v4765_v5 }
 0x4ab   : > { %5294 = vpow2.f32 %v4766_v10 }
 0x4b5   : > { %v5295_v21 = vpop.eup %5294 }
 0x4b6   : > { %v4768_v25 = vadd.f32 1.0, %v5295_v21 }
 0x4b8   : > { %5296 = vrcp.f32 %v4768_v25 }
 0x4c2   : > { %v5297_v23 = vpop.eup %5296 }
 0x4c3   : > { %4771 = vst.msk [vmem:[%s235_s30] sm:$0xff] %vm4770_vm7, %v5297_v23 }
 0x4c4   : > { %5311 = shalt.err (!%p5308_p3)
}
 0x4c5   : > { %s5312_s14 = scalar_lea.hbm %s7714_s8, 128  ;;  %s5316_s17 = scalar_lea.hbm %s7761_s5, 256 }
 0x4c6   : > { %p5313_p4 = scmp.ne.s32.totalorder %s7714_s8, %s5312_s14  ;;  %p5317_p9 = scmp.lt.u32.totalorder %s7714_s8, %s7761_s5 }
 0x4c7   : > { %p5318_p10 = scmp.lt.u32.totalorder %s5316_s17, %s5312_s14  ;;  %p5320_p12 = scmp.lt.u32.totalorder %s5312_s14, %s7714_s8 }
 0x4c8   : > { %p5314_p7 = pnand %p5313_p4, %p5431_p5 }
 0x4c9   : > { %p5319_p11 = por %p5318_p10, %p5317_p9 }
 0x4ca   : > { %p5315_p8 = pneg %p5314_p7 }
 0x4cb   : > { %p5321_p13 = por %p5320_p12, %p5319_p11 }
 0x4cd   : > { %p5322_p0 = pnand %p5321_p13, %p5315_p8 }
 0x4cf   : > { %5325 = shalt.err (!%p5322_p0)
}
 0x4d0   : > { %5255 = dma.vmem_to_hbm [thread:$0]  (%p5431_p5), %s7716_s9, 128, %s7714_s8, %s4773_s10  }
 0x4d1 PF: > { %p5261_p1 = scmp.ge.s32.totalorder %s5360_s21, 2  ;;  %s4798_s26 = sand.u32 1, %s5348_s18  }
 0x4d2   : > { %s4799_s30 = scalar_lea.sflag [#allocation3], %s4798_s26 }
 0x4d3   : > { %p5258_p2 = pnand %p5261_p1, %p5435_p6 }
 0x4d5   : > { %5343 = dma.done.wait (!%p5258_p2), %s4799_s30, 128  }
 0x4d6   : > { %5345 = vsyncadd (!%p5258_p2), %s4799_s30, 4294967168  ;;  %p15_p3 = scmp.ge.s32.totalorder %s5418_s24, 4   ;;  %s7764_s18 = smov %s5352_s19 }
 0x4d7   : > { %s7765_s19 = smov %s5356_s20  ;;  %s7766_s20 = smov %s5429_s27 }
 0x4d8   : > { %s7767_s21 = smov %s5418_s24  ;;  %17 = sbr.rel (!%p15_p3) target bundleno = 3 (0x3), region = 75 }
 0x4df   :  { %4804 = vsyncpa [#allocation3], 1 }
 0x4e0   :  { %4806 = vsyncpa [#allocation3 + $0x1], 1 }

</bundles_post_ra>
